<compile_context>
chip_gen: v5e
topology: v5e:2x2
jax: 0.10.0
libtpu: 0.0.40
codegen_flags: <defaults>
</compile_context>

<pallas_src>
import functools

import jax
import jax.numpy as jnp
from jax.experimental import pallas as pl
from jax.experimental.pallas import tpu as pltpu


# ----------------------------------------------------------------------------
# Helpers
# ----------------------------------------------------------------------------
def _round_up(x, m):
    return (x + m - 1) // m * m


def _pick_tile(padded_dim, candidates):
    """Largest candidate tile that evenly divides the padded dimension."""
    for c in candidates:
        if padded_dim % c == 0:
            return c
    return padded_dim


# ----------------------------------------------------------------------------
# Tiled matmul kernel with fused BN-affine / ReLU / residual epilogue
# ----------------------------------------------------------------------------
def _matmul_affine_kernel(a_ref, b_ref, s_ref, c_ref, *rest, relu, has_residual):
    if has_residual:
        r_ref, o_ref, acc_ref = rest
    else:
        o_ref, acc_ref = rest
    k = pl.program_id(2)

    @pl.when(k == 0)
    def _():
        acc_ref[...] = jnp.zeros_like(acc_ref)

    acc_ref[...] += jnp.dot(a_ref[...], b_ref[...],
                            preferred_element_type=jnp.float32)

    @pl.when(k == pl.num_programs(2) - 1)
    def _():
        out = acc_ref[...] * s_ref[...] + c_ref[...]   # f32 epilogue (v5e-safe)
        if has_residual:
            out = out + r_ref[...]
        if relu:
            out = jnp.maximum(out, 0.0)
        o_ref[...] = out


def prepare_matmul_weights(w_kn, scale, bias):
    """w_kn: (K, N) f32.  Pre-pad to (8,128) multiples, cast weight to bf16 once."""
    K, N = w_kn.shape
    Kp, Np = _round_up(K, 128), _round_up(N, 128)
    wp = jnp.pad(w_kn.astype(jnp.bfloat16), ((0, Kp - K), (0, Np - N)))
    sp = jnp.pad(scale.astype(jnp.float32), (0, Np - N)).reshape(1, Np)
    cp = jnp.pad(bias.astype(jnp.float32), (0, Np - N)).reshape(1, Np)
    return {"w": wp, "scale": sp, "bias": cp, "K": K, "N": N}


def matmul_affine(a, pw, relu=False, residual=None):
    """a: (M, K); pw: prepared weight dict.  Returns (M, N) f32 of
    relu_opt((a @ w) * scale + bias [+ residual])."""
    M, K = a.shape
    assert K == pw["K"], (K, pw["K"])
    N = pw["N"]
    Kp, Np = pw["w"].shape
    Mp = _round_up(M, 8)

    tm = _pick_tile(Mp, (256, 128, 64, 32, 16, 8))
    tk = _pick_tile(Kp, (512, 256, 128))
    tn = _pick_tile(Np, (512, 256, 128))

    a_b = a.astype(jnp.bfloat16)
    if Mp != M or Kp != K:
        a_b = jnp.pad(a_b, ((0, Mp - M), (0, Kp - K)))

    in_specs = [
        pl.BlockSpec((tm, tk), lambda i, j, k: (i, k)),
        pl.BlockSpec((tk, tn), lambda i, j, k: (k, j)),
        pl.BlockSpec((1, tn), lambda i, j, k: (0, j)),
        pl.BlockSpec((1, tn), lambda i, j, k: (0, j)),
    ]
    args = [a_b, pw["w"], pw["scale"], pw["bias"]]

    has_residual = residual is not None
    if has_residual:
        r = residual.astype(jnp.float32)
        if (Mp, Np) != r.shape:
            r = jnp.pad(r, ((0, Mp - r.shape[0]), (0, Np - r.shape[1])))
        in_specs.append(pl.BlockSpec((tm, tn), lambda i, j, k: (i, j)))
        args.append(r)

    out = pl.pallas_call(
        functools.partial(_matmul_affine_kernel, relu=relu,
                          has_residual=has_residual),
        out_shape=jax.ShapeDtypeStruct((Mp, Np), jnp.float32),
        grid=(Mp // tm, Np // tn, Kp // tk),
        in_specs=in_specs,
        out_specs=pl.BlockSpec((tm, tn), lambda i, j, k: (i, j)),
        scratch_shapes=[pltpu.VMEM((tm, tn), jnp.float32)],
        compiler_params=pltpu.CompilerParams(
            dimension_semantics=("parallel", "parallel", "arbitrary")),
    )(*args)

    if (Mp, Np) != (M, N):
        out = out[:M, :N]
    return out


# ----------------------------------------------------------------------------
# MaxPool(3x3, stride 2, pad 1) — parity-plane kernel (no 9x HBM stack)
# ----------------------------------------------------------------------------
def _maxpool_kernel(p00, p01, p10, p11, o_ref):
    OH, OW = o_ref.shape[1], o_ref.shape[2]
    planes = ((p00, p01), (p10, p11))
    acc = None
    for ki in range(3):
        for kj in range(3):
            pr = planes[ki % 2][kj % 2]
            di, dj = ki // 2, kj // 2
            v = pr[:, di:di + OH, dj:dj + OW, :]
            acc = v if acc is None else jnp.maximum(acc, v)
    o_ref[...] = acc


def maxpool_3x3_s2(x):
    """x: NHWC f32, even H/W.  Returns (N, H//2, W//2, C)."""
    N, H, W, C = x.shape
    assert H % 2 == 0 and W % 2 == 0
    OH, OW = H // 2, W // 2
    xp = jnp.pad(x, ((0, 0), (1, 1), (1, 1), (0, 0)),
                 constant_values=-jnp.inf)
    p00 = xp[:, 0::2, 0::2, :]
    p01 = xp[:, 0::2, 1::2, :]
    p10 = xp[:, 1::2, 0::2, :]
    p11 = xp[:, 1::2, 1::2, :]
    blk_in = pl.BlockSpec((1, OH + 1, OW + 1, C), lambda n: (n, 0, 0, 0))
    return pl.pallas_call(
        _maxpool_kernel,
        out_shape=jax.ShapeDtypeStruct((N, OH, OW, C), jnp.float32),
        grid=(N,),
        in_specs=[blk_in] * 4,
        out_specs=pl.BlockSpec((1, OH, OW, C), lambda n: (n, 0, 0, 0)),
        compiler_params=pltpu.CompilerParams(dimension_semantics=("parallel",)),
    )(p00, p01, p10, p11)


# ----------------------------------------------------------------------------
# Global average pool — lane-dense VPU reduction
# ----------------------------------------------------------------------------
def _avgpool_kernel(x_ref, o_ref, *, inv):
    o_ref[...] = jnp.sum(x_ref[...], axis=1) * inv


def global_avgpool(x):
    """x: (N, H, W, C) f32 -> (N, C) f32 mean over spatial."""
    N, H, W, C = x.shape
    x2 = x.reshape(N, H * W, C)
    return pl.pallas_call(
        functools.partial(_avgpool_kernel, inv=1.0 / (H * W)),
        out_shape=jax.ShapeDtypeStruct((N, C), jnp.float32),
        grid=(1,),
        in_specs=[pl.BlockSpec((N, H * W, C), lambda i: (0, 0, 0))],
        out_specs=pl.BlockSpec((N, C), lambda i: (0, 0)),
    )(x2)


# ----------------------------------------------------------------------------
# Conv layers (NHWC): im2col glue in plain JAX (bf16), matmul+BN+ReLU in Pallas
# ----------------------------------------------------------------------------
def conv2d_bn(x, pw, KH, KW, stride, padding, relu=False, residual=None):
    """x: (N, H, W, Cin) NHWC.  pw: prepared (K = KH*KW*Cin) weight.  Returns NHWC."""
    N, H, W, C = x.shape
    OH = (H + 2 * padding - KH) // stride + 1
    OW = (W + 2 * padding - KW) // stride + 1
    xb = x.astype(jnp.bfloat16)
    if KH == 1 and KW == 1 and padding == 0:
        patches = xb[:, ::stride, ::stride, :].reshape(N * OH * OW, C)
    else:
        xp = jnp.pad(xb, ((0, 0), (padding, padding), (padding, padding), (0, 0)))
        taps = []
        for ki in range(KH):
            for kj in range(KW):
                taps.append(xp[:, ki:ki + stride * (OH - 1) + 1:stride,
                               kj:kj + stride * (OW - 1) + 1:stride, :])
        patches = jnp.concatenate(taps, axis=-1).reshape(N * OH * OW, KH * KW * C)
    res2 = residual.reshape(N * OH * OW, -1) if residual is not None else None
    out = matmul_affine(patches, pw, relu=relu, residual=res2)
    return out.reshape(N, OH, OW, pw["N"])


def prepare_conv(w, bn_scale, bn_bias):
    """w: (Cout, Cin, KH, KW) -> prepared (KH*KW*Cin, Cout) bf16 matmul weight."""
    Cout, Cin, KH, KW = w.shape
    w_kn = w.transpose(2, 3, 1, 0).reshape(KH * KW * Cin, Cout)
    return prepare_matmul_weights(w_kn.astype(jnp.float32), bn_scale, bn_bias)


# ----------------------------------------------------------------------------
# Deterministic parameter construction (resnet18 shapes)
# ----------------------------------------------------------------------------
def _make_conv(key, cout, cin, k):
    return (0.05 * jax.random.normal(key, (cout, cin, k, k))).astype(jnp.float32)


def _make_bn(key, c, eps=1e-5):
    k1, k2, k3, k4 = jax.random.split(key, 4)
    gamma = 1.0 + 0.1 * jax.random.normal(k1, (c,))
    beta = 0.1 * jax.random.normal(k2, (c,))
    mean = 0.1 * jax.random.normal(k3, (c,))
    var = jax.random.uniform(k4, (c,), minval=0.5, maxval=1.5)
    scale = gamma / jnp.sqrt(var + eps)
    bias = beta - mean * scale
    return scale.astype(jnp.float32), bias.astype(jnp.float32)


def _make_linear(key, out_f, in_f):
    k1, k2 = jax.random.split(key)
    w = (0.05 * jax.random.normal(k1, (out_f, in_f))).astype(jnp.float32)
    b = (0.05 * jax.random.normal(k2, (out_f,))).astype(jnp.float32)
    return w, b


def init_params(key, num_classes):
    keys = iter(jax.random.split(key, 256))
    nk = lambda: next(keys)
    params = {}
    params["conv1"] = _make_conv(nk(), 64, 3, 7)
    params["bn1"] = _make_bn(nk(), 64)

    layer_cfg = [(64, 64, 1), (64, 128, 2), (128, 256, 2), (256, 512, 2)]
    layers = []
    for cin, cout, first_stride in layer_cfg:
        blocks = []
        for bi in range(2):
            stride = first_stride if bi == 0 else 1
            ci = cin if bi == 0 else cout
            blk = {
                "stride": stride,  # python int (static)
                "conv1": _make_conv(nk(), cout, ci, 3),
                "bn1": _make_bn(nk(), cout),
                "conv2": _make_conv(nk(), cout, cout, 3),
                "bn2": _make_bn(nk(), cout),
            }
            if stride != 1 or ci != cout:
                blk["down_conv"] = _make_conv(nk(), cout, ci, 1)
                blk["down_bn"] = _make_bn(nk(), cout)
            blocks.append(blk)
        layers.append(blocks)
    params["layers"] = layers

    params["res_fc"] = _make_linear(nk(), 1000, 512)           # resnet18's own fc
    params["head_fc1"] = _make_linear(nk(), 512, 1000)         # nn.Linear(1000, 512)
    params["head_fc2"] = _make_linear(nk(), num_classes, 512)  # nn.Linear(512, nc)
    return params


def prepare_params(raw, num_classes):
    """One-time prep: fold BN, transpose/pad/cast weights, fold the linear tail."""
    prep = {"stem": prepare_conv(raw["conv1"], *raw["bn1"])}
    layers = []
    for blocks in raw["layers"]:
        pblocks = []
        for blk in blocks:
            pb = {
                "stride": blk["stride"],
                "conv1": prepare_conv(blk["conv1"], *blk["bn1"]),
                "conv2": prepare_conv(blk["conv2"], *blk["bn2"]),
            }
            if "down_conv" in blk:
                pb["down"] = prepare_conv(blk["down_conv"], *blk["down_bn"])
            pblocks.append(pb)
        layers.append(pblocks)
    prep["layers"] = layers

    # resnet.fc (512->1000) -> Linear(1000,512) -> Linear(512,nc): purely linear,
    # fold into one 512->nc matmul: y = W2 W1 W0 x + (W2 (W1 b0 + b1) + b2).
    w0, b0 = raw["res_fc"]
    w1, b1 = raw["head_fc1"]
    w2, b2 = raw["head_fc2"]
    Wc = w2 @ w1 @ w0
    bc = w2 @ (w1 @ b0 + b1) + b2
    prep["head"] = prepare_matmul_weights(
        Wc.T, jnp.ones((num_classes,), jnp.float32), bc)
    return prep


# ----------------------------------------------------------------------------
# Forward pass (resnet18 eval-mode + FC head), NHWC internally
# ----------------------------------------------------------------------------
def basic_block(p, x):
    s = p["stride"]
    out = conv2d_bn(x, p["conv1"], 3, 3, stride=s, padding=1, relu=True)
    if "down" in p:
        identity = conv2d_bn(x, p["down"], 1, 1, stride=s, padding=0, relu=False)
    else:
        identity = x
    # conv2 with the residual add + ReLU fused into the matmul epilogue.
    return conv2d_bn(out, p["conv2"], 3, 3, stride=1, padding=1,
                     relu=True, residual=identity)


def resnet_forward(prep, x_nchw):
    x = jnp.transpose(x_nchw, (0, 2, 3, 1))  # NCHW -> NHWC once at entry
    x = conv2d_bn(x, prep["stem"], 7, 7, stride=2, padding=3, relu=True)
    x = maxpool_3x3_s2(x)
    for blocks in prep["layers"]:
        for blk in blocks:
            x = basic_block(blk, x)
    feat = global_avgpool(x)                       # (N, 512)
    return matmul_affine(feat, prep["head"])       # folded fc tail -> (N, nc)


# ----------------------------------------------------------------------------
# Main
# ----------------------------------------------------------------------------
if __name__ == "__main__":
    num_classes = 20
    key = jax.random.PRNGKey(0)
    pkey, xkey = jax.random.split(key)
    raw_params = init_params(pkey, num_classes)
    prep = prepare_params(raw_params, num_classes)

    # small input consistent with the module's forward (3-channel image, NCHW)
    x = jax.random.normal(xkey, (2, 3, 32, 32), dtype=jnp.float32)

    fwd = jax.jit(lambda inp: resnet_forward(prep, inp))
    out = jax.block_until_ready(fwd(x))

    assert out.shape == (2, num_classes), out.shape
    assert bool(jnp.all(jnp.isfinite(out)))
    print("KERNEL_OK")
</pallas_src>

<mosaic_0001>
module attributes {stable_mosaic.version = 11 : i64} {
  func.func @_matmul_affine_kernel(%arg0: i32, %arg1: i32, %arg2: i32, %arg3: memref<256x256xbf16, #tpu.memory_space<vmem>>, %arg4: memref<256x128xbf16, #tpu.memory_space<vmem>>, %arg5: memref<1x128xf32, #tpu.memory_space<vmem>>, %arg6: memref<1x128xf32, #tpu.memory_space<vmem>>, %arg7: memref<256x128xf32, #tpu.memory_space<vmem>>, %arg8: memref<256x128xf32, #tpu.memory_space<vmem>>) attributes {dimension_semantics = [#tpu.dimension_semantics<parallel>, #tpu.dimension_semantics<parallel>, #tpu.dimension_semantics<arbitrary>], iteration_bounds = array<i64: 2, 1, 1>, scalar_prefetch = 0 : i64, scratch_operands = 1 : i64, tpu.core_type = #tpu.core_type<tc>, window_params = [{transform_indices = @transform_0, window_bounds = array<i64: 256, 256>}, {transform_indices = @transform_1, window_bounds = array<i64: 256, 128>}, {transform_indices = @transform_2, window_bounds = array<i64: 1, 128>}, {transform_indices = @transform_3, window_bounds = array<i64: 1, 128>}, {transform_indices = @transform_4, window_bounds = array<i64: 256, 128>}]} {
    %c0_i32 = arith.constant 0 : i32
    %0 = arith.cmpi eq, %arg2, %c0_i32 : i32
    %1 = arith.extui %0 : i1 to i32
    %c0_i32_0 = arith.constant 0 : i32
    %2 = arith.cmpi ne, %1, %c0_i32_0 : i32
    scf.if %2 {
      %cst_10 = arith.constant 0.000000e+00 : f32
      %12 = vector.broadcast %cst_10 : f32 to vector<256x128xf32>
      %c0_11 = arith.constant 0 : index
      %c0_12 = arith.constant 0 : index
      %13 = vector.load %arg8[%c0_11, %c0_12] : memref<256x128xf32, #tpu.memory_space<vmem>>, vector<256x128xf32>
      tpu.vector_store %arg8[%c0_11, %c0_12], %12 {strides = array<i32>} : memref<256x128xf32, #tpu.memory_space<vmem>>, vector<256x128xf32>,
    } else {
    }
    %c0 = arith.constant 0 : index
    %c0_1 = arith.constant 0 : index
    %3 = vector.load %arg8[%c0, %c0_1] : memref<256x128xf32, #tpu.memory_space<vmem>>, vector<256x128xf32>
    %c0_2 = arith.constant 0 : index
    %c0_3 = arith.constant 0 : index
    %4 = vector.load %arg3[%c0_2, %c0_3] : memref<256x256xbf16, #tpu.memory_space<vmem>>, vector<256x256xbf16>
    %c0_4 = arith.constant 0 : index
    %c0_5 = arith.constant 0 : index
    %5 = vector.load %arg4[%c0_4, %c0_5] : memref<256x128xbf16, #tpu.memory_space<vmem>>, vector<256x128xbf16>
    %cst = arith.constant dense<0.000000e+00> : vector<256x128xf32>
    %6 = tpu.matmul %4, %5, %cst {dimension_numbers = #tpu.dot_dimension_numbers<[1], [0], [0], [1], [0, 0, 1, 1], [], []>} : vector<256x256xbf16>, vector<256x128xbf16>, vector<256x128xf32> -> vector<256x128xf32>
    %7 = arith.addf %3, %6 : vector<256x128xf32>
    %c0_6 = arith.constant 0 : index
    %c0_7 = arith.constant 0 : index
    %8 = vector.load %arg8[%c0_6, %c0_7] : memref<256x128xf32, #tpu.memory_space<vmem>>, vector<256x128xf32>
    tpu.vector_store %arg8[%c0_6, %c0_7], %7 {strides = array<i32>} : memref<256x128xf32, #tpu.memory_space<vmem>>, vector<256x128xf32>,
    %c0_i32_8 = arith.constant 0 : i32
    %9 = arith.cmpi eq, %arg2, %c0_i32_8 : i32
    %10 = arith.extui %9 : i1 to i32
    %c0_i32_9 = arith.constant 0 : i32
    %11 = arith.cmpi ne, %10, %c0_i32_9 : i32
    scf.if %11 {
      %c0_10 = arith.constant 0 : index
      %c0_11 = arith.constant 0 : index
      %12 = vector.load %arg8[%c0_10, %c0_11] : memref<256x128xf32, #tpu.memory_space<vmem>>, vector<256x128xf32>
      %c0_12 = arith.constant 0 : index
      %c0_13 = arith.constant 0 : index
      %13 = vector.load %arg5[%c0_12, %c0_13] : memref<1x128xf32, #tpu.memory_space<vmem>>, vector<1x128xf32>
      %14 = vector.broadcast %13 : vector<1x128xf32> to vector<256x128xf32>
      %15 = arith.mulf %12, %14 : vector<256x128xf32>
      %c0_14 = arith.constant 0 : index
      %c0_15 = arith.constant 0 : index
      %16 = vector.load %arg6[%c0_14, %c0_15] : memref<1x128xf32, #tpu.memory_space<vmem>>, vector<1x128xf32>
      %17 = vector.broadcast %16 : vector<1x128xf32> to vector<256x128xf32>
      %18 = arith.addf %15, %17 : vector<256x128xf32>
      %cst_16 = arith.constant 0.000000e+00 : f32
      %19 = vector.broadcast %cst_16 : f32 to vector<256x128xf32>
      %20 = arith.maximumf %18, %19 : vector<256x128xf32>
      %c0_17 = arith.constant 0 : index
      %c0_18 = arith.constant 0 : index
      %21 = vector.load %arg7[%c0_17, %c0_18] : memref<256x128xf32, #tpu.memory_space<vmem>>, vector<256x128xf32>
      tpu.vector_store %arg7[%c0_17, %c0_18], %20 {strides = array<i32>} : memref<256x128xf32, #tpu.memory_space<vmem>>, vector<256x128xf32>,
    } else {
    }
    return
  }
  func.func @transform_0(%arg0: i32, %arg1: i32, %arg2: i32) -> (i32, i32) {
    %c0_i32 = arith.constant 0 : i32
    return %arg0, %arg2 : i32, i32
  }
  func.func @transform_1(%arg0: i32, %arg1: i32, %arg2: i32) -> (i32, i32) {
    %c0_i32 = arith.constant 0 : i32
    return %arg2, %arg1 : i32, i32
  }
  func.func @transform_2(%arg0: i32, %arg1: i32, %arg2: i32) -> (i32, i32) {
    %c0_i32 = arith.constant 0 : i32
    %c0_i32_0 = arith.constant 0 : i32
    return %c0_i32, %arg1 : i32, i32
  }
  func.func @transform_3(%arg0: i32, %arg1: i32, %arg2: i32) -> (i32, i32) {
    %c0_i32 = arith.constant 0 : i32
    %c0_i32_0 = arith.constant 0 : i32
    return %c0_i32, %arg1 : i32, i32
  }
  func.func @transform_4(%arg0: i32, %arg1: i32, %arg2: i32) -> (i32, i32) {
    %c0_i32 = arith.constant 0 : i32
    return %arg0, %arg1 : i32, i32
  }
}

module attributes {stable_mosaic.version = 11 : i64} {
  func.func @_maxpool_kernel(%arg0: i32, %arg1: memref<1x9x9x64xf32, #tpu.memory_space<vmem>>, %arg2: memref<1x9x9x64xf32, #tpu.memory_space<vmem>>, %arg3: memref<1x9x9x64xf32, #tpu.memory_space<vmem>>, %arg4: memref<1x9x9x64xf32, #tpu.memory_space<vmem>>, %arg5: memref<1x8x8x64xf32, #tpu.memory_space<vmem>>) attributes {dimension_semantics = [#tpu.dimension_semantics<parallel>], iteration_bounds = array<i64: 2>, scalar_prefetch = 0 : i64, scratch_operands = 0 : i64, tpu.core_type = #tpu.core_type<tc>, window_params = [{transform_indices = @transform_0, window_bounds = array<i64: 1, 9, 9, 64>}, {transform_indices = @transform_1, window_bounds = array<i64: 1, 9, 9, 64>}, {transform_indices = @transform_2, window_bounds = array<i64: 1, 9, 9, 64>}, {transform_indices = @transform_3, window_bounds = array<i64: 1, 9, 9, 64>}, {transform_indices = @transform_4, window_bounds = array<i64: 1, 8, 8, 64>}]} {
    %c0 = arith.constant 0 : index
    %c0_0 = arith.constant 0 : index
    %c0_1 = arith.constant 0 : index
    %c0_2 = arith.constant 0 : index
    %0 = vector.load %arg1[%c0, %c0_0, %c0_1, %c0_2] : memref<1x9x9x64xf32, #tpu.memory_space<vmem>>, vector<1x8x8x64xf32>
    %c0_3 = arith.constant 0 : index
    %c0_4 = arith.constant 0 : index
    %c0_5 = arith.constant 0 : index
    %c0_6 = arith.constant 0 : index
    %1 = vector.load %arg2[%c0_3, %c0_4, %c0_5, %c0_6] : memref<1x9x9x64xf32, #tpu.memory_space<vmem>>, vector<1x8x8x64xf32>
    %2 = arith.maximumf %0, %1 : vector<1x8x8x64xf32>
    %c0_7 = arith.constant 0 : index
    %c0_8 = arith.constant 0 : index
    %c1 = arith.constant 1 : index
    %c0_9 = arith.constant 0 : index
    %3 = vector.load %arg1[%c0_7, %c0_8, %c1, %c0_9] : memref<1x9x9x64xf32, #tpu.memory_space<vmem>>, vector<1x8x8x64xf32>
    %4 = arith.maximumf %2, %3 : vector<1x8x8x64xf32>
    %c0_10 = arith.constant 0 : index
    %c0_11 = arith.constant 0 : index
    %c0_12 = arith.constant 0 : index
    %c0_13 = arith.constant 0 : index
    %5 = vector.load %arg3[%c0_10, %c0_11, %c0_12, %c0_13] : memref<1x9x9x64xf32, #tpu.memory_space<vmem>>, vector<1x8x8x64xf32>
    %6 = arith.maximumf %4, %5 : vector<1x8x8x64xf32>
    %c0_14 = arith.constant 0 : index
    %c0_15 = arith.constant 0 : index
    %c0_16 = arith.constant 0 : index
    %c0_17 = arith.constant 0 : index
    %7 = vector.load %arg4[%c0_14, %c0_15, %c0_16, %c0_17] : memref<1x9x9x64xf32, #tpu.memory_space<vmem>>, vector<1x8x8x64xf32>
    %8 = arith.maximumf %6, %7 : vector<1x8x8x64xf32>
    %c0_18 = arith.constant 0 : index
    %c0_19 = arith.constant 0 : index
    %c1_20 = arith.constant 1 : index
    %c0_21 = arith.constant 0 : index
    %9 = vector.load %arg3[%c0_18, %c0_19, %c1_20, %c0_21] : memref<1x9x9x64xf32, #tpu.memory_space<vmem>>, vector<1x8x8x64xf32>
    %10 = arith.maximumf %8, %9 : vector<1x8x8x64xf32>
    %c0_22 = arith.constant 0 : index
    %c1_23 = arith.constant 1 : index
    %c0_24 = arith.constant 0 : index
    %c0_25 = arith.constant 0 : index
    %11 = vector.load %arg1[%c0_22, %c1_23, %c0_24, %c0_25] : memref<1x9x9x64xf32, #tpu.memory_space<vmem>>, vector<1x8x8x64xf32>
    %12 = arith.maximumf %10, %11 : vector<1x8x8x64xf32>
    %c0_26 = arith.constant 0 : index
    %c1_27 = arith.constant 1 : index
    %c0_28 = arith.constant 0 : index
    %c0_29 = arith.constant 0 : index
    %13 = vector.load %arg2[%c0_26, %c1_27, %c0_28, %c0_29] : memref<1x9x9x64xf32, #tpu.memory_space<vmem>>, vector<1x8x8x64xf32>
    %14 = arith.maximumf %12, %13 : vector<1x8x8x64xf32>
    %c0_30 = arith.constant 0 : index
    %c1_31 = arith.constant 1 : index
    %c1_32 = arith.constant 1 : index
    %c0_33 = arith.constant 0 : index
    %15 = vector.load %arg1[%c0_30, %c1_31, %c1_32, %c0_33] : memref<1x9x9x64xf32, #tpu.memory_space<vmem>>, vector<1x8x8x64xf32>
    %16 = arith.maximumf %14, %15 : vector<1x8x8x64xf32>
    %c0_34 = arith.constant 0 : index
    %c0_35 = arith.constant 0 : index
    %c0_36 = arith.constant 0 : index
    %c0_37 = arith.constant 0 : index
    %17 = vector.load %arg5[%c0_34, %c0_35, %c0_36, %c0_37] : memref<1x8x8x64xf32, #tpu.memory_space<vmem>>, vector<1x8x8x64xf32>
    tpu.vector_store %arg5[%c0_34, %c0_35, %c0_36, %c0_37], %16 {strides = array<i32>} : memref<1x8x8x64xf32, #tpu.memory_space<vmem>>, vector<1x8x8x64xf32>,
    return
  }
  func.func @transform_0(%arg0: i32) -> (i32, i32, i32, i32) {
    %c0_i32 = arith.constant 0 : i32
    %c0_i32_0 = arith.constant 0 : i32
    %c0_i32_1 = arith.constant 0 : i32
    %c0_i32_2 = arith.constant 0 : i32
    return %arg0, %c0_i32, %c0_i32_0, %c0_i32_1 : i32, i32, i32, i32
  }
  func.func @transform_1(%arg0: i32) -> (i32, i32, i32, i32) {
    %c0_i32 = arith.constant 0 : i32
    %c0_i32_0 = arith.constant 0 : i32
    %c0_i32_1 = arith.constant 0 : i32
    %c0_i32_2 = arith.constant 0 : i32
    return %arg0, %c0_i32, %c0_i32_0, %c0_i32_1 : i32, i32, i32, i32
  }
  func.func @transform_2(%arg0: i32) -> (i32, i32, i32, i32) {
    %c0_i32 = arith.constant 0 : i32
    %c0_i32_0 = arith.constant 0 : i32
    %c0_i32_1 = arith.constant 0 : i32
    %c0_i32_2 = arith.constant 0 : i32
    return %arg0, %c0_i32, %c0_i32_0, %c0_i32_1 : i32, i32, i32, i32
  }
  func.func @transform_3(%arg0: i32) -> (i32, i32, i32, i32) {
    %c0_i32 = arith.constant 0 : i32
    %c0_i32_0 = arith.constant 0 : i32
    %c0_i32_1 = arith.constant 0 : i32
    %c0_i32_2 = arith.constant 0 : i32
    return %arg0, %c0_i32, %c0_i32_0, %c0_i32_1 : i32, i32, i32, i32
  }
  func.func @transform_4(%arg0: i32) -> (i32, i32, i32, i32) {
    %c0_i32 = arith.constant 0 : i32
    %c0_i32_0 = arith.constant 0 : i32
    %c0_i32_1 = arith.constant 0 : i32
    %c0_i32_2 = arith.constant 0 : i32
    return %arg0, %c0_i32, %c0_i32_0, %c0_i32_1 : i32, i32, i32, i32
  }
}

module attributes {stable_mosaic.version = 11 : i64} {
  func.func @_matmul_affine_kernel(%arg0: i32, %arg1: i32, %arg2: i32, %arg3: memref<128x128xbf16, #tpu.memory_space<vmem>>, %arg4: memref<128x128xbf16, #tpu.memory_space<vmem>>, %arg5: memref<1x128xf32, #tpu.memory_space<vmem>>, %arg6: memref<1x128xf32, #tpu.memory_space<vmem>>, %arg7: memref<128x128xf32, #tpu.memory_space<vmem>>, %arg8: memref<128x128xf32, #tpu.memory_space<vmem>>) attributes {dimension_semantics = [#tpu.dimension_semantics<parallel>, #tpu.dimension_semantics<parallel>, #tpu.dimension_semantics<arbitrary>], iteration_bounds = array<i64: 1, 1, 5>, scalar_prefetch = 0 : i64, scratch_operands = 1 : i64, tpu.core_type = #tpu.core_type<tc>, window_params = [{transform_indices = @transform_0, window_bounds = array<i64: 128, 128>}, {transform_indices = @transform_1, window_bounds = array<i64: 128, 128>}, {transform_indices = @transform_2, window_bounds = array<i64: 1, 128>}, {transform_indices = @transform_3, window_bounds = array<i64: 1, 128>}, {transform_indices = @transform_4, window_bounds = array<i64: 128, 128>}]} {
    %c0_i32 = arith.constant 0 : i32
    %0 = arith.cmpi eq, %arg2, %c0_i32 : i32
    %1 = arith.extui %0 : i1 to i32
    %c0_i32_0 = arith.constant 0 : i32
    %2 = arith.cmpi ne, %1, %c0_i32_0 : i32
    scf.if %2 {
      %cst_9 = arith.constant 0.000000e+00 : f32
      %12 = vector.broadcast %cst_9 : f32 to vector<128x128xf32>
      %c0_10 = arith.constant 0 : index
      %c0_11 = arith.constant 0 : index
      %13 = vector.load %arg8[%c0_10, %c0_11] : memref<128x128xf32, #tpu.memory_space<vmem>>, vector<128x128xf32>
      tpu.vector_store %arg8[%c0_10, %c0_11], %12 {strides = array<i32>} : memref<128x128xf32, #tpu.memory_space<vmem>>, vector<128x128xf32>,
    } else {
    }
    %c0 = arith.constant 0 : index
    %c0_1 = arith.constant 0 : index
    %3 = vector.load %arg8[%c0, %c0_1] : memref<128x128xf32, #tpu.memory_space<vmem>>, vector<128x128xf32>
    %c0_2 = arith.constant 0 : index
    %c0_3 = arith.constant 0 : index
    %4 = vector.load %arg3[%c0_2, %c0_3] : memref<128x128xbf16, #tpu.memory_space<vmem>>, vector<128x128xbf16>
    %c0_4 = arith.constant 0 : index
    %c0_5 = arith.constant 0 : index
    %5 = vector.load %arg4[%c0_4, %c0_5] : memref<128x128xbf16, #tpu.memory_space<vmem>>, vector<128x128xbf16>
    %cst = arith.constant dense<0.000000e+00> : vector<128x128xf32>
    %6 = tpu.matmul %4, %5, %cst {dimension_numbers = #tpu.dot_dimension_numbers<[1], [0], [0], [1], [0, 0, 1, 1], [], []>} : vector<128x128xbf16>, vector<128x128xbf16>, vector<128x128xf32> -> vector<128x128xf32>
    %7 = arith.addf %3, %6 : vector<128x128xf32>
    %c0_6 = arith.constant 0 : index
    %c0_7 = arith.constant 0 : index
    %8 = vector.load %arg8[%c0_6, %c0_7] : memref<128x128xf32, #tpu.memory_space<vmem>>, vector<128x128xf32>
    tpu.vector_store %arg8[%c0_6, %c0_7], %7 {strides = array<i32>} : memref<128x128xf32, #tpu.memory_space<vmem>>, vector<128x128xf32>,
    %c4_i32 = arith.constant 4 : i32
    %9 = arith.cmpi eq, %arg2, %c4_i32 : i32
    %10 = arith.extui %9 : i1 to i32
    %c0_i32_8 = arith.constant 0 : i32
    %11 = arith.cmpi ne, %10, %c0_i32_8 : i32
    scf.if %11 {
      %c0_9 = arith.constant 0 : index
      %c0_10 = arith.constant 0 : index
      %12 = vector.load %arg8[%c0_9, %c0_10] : memref<128x128xf32, #tpu.memory_space<vmem>>, vector<128x128xf32>
      %c0_11 = arith.constant 0 : index
      %c0_12 = arith.constant 0 : index
      %13 = vector.load %arg5[%c0_11, %c0_12] : memref<1x128xf32, #tpu.memory_space<vmem>>, vector<1x128xf32>
      %14 = vector.broadcast %13 : vector<1x128xf32> to vector<128x128xf32>
      %15 = arith.mulf %12, %14 : vector<128x128xf32>
      %c0_13 = arith.constant 0 : index
      %c0_14 = arith.constant 0 : index
      %16 = vector.load %arg6[%c0_13, %c0_14] : memref<1x128xf32, #tpu.memory_space<vmem>>, vector<1x128xf32>
      %17 = vector.broadcast %16 : vector<1x128xf32> to vector<128x128xf32>
      %18 = arith.addf %15, %17 : vector<128x128xf32>
      %cst_15 = arith.constant 0.000000e+00 : f32
      %19 = vector.broadcast %cst_15 : f32 to vector<128x128xf32>
      %20 = arith.maximumf %18, %19 : vector<128x128xf32>
      %c0_16 = arith.constant 0 : index
      %c0_17 = arith.constant 0 : index
      %21 = vector.load %arg7[%c0_16, %c0_17] : memref<128x128xf32, #tpu.memory_space<vmem>>, vector<128x128xf32>
      tpu.vector_store %arg7[%c0_16, %c0_17], %20 {strides = array<i32>} : memref<128x128xf32, #tpu.memory_space<vmem>>, vector<128x128xf32>,
    } else {
    }
    return
  }
  func.func @transform_0(%arg0: i32, %arg1: i32, %arg2: i32) -> (i32, i32) {
    %c0_i32 = arith.constant 0 : i32
    return %arg0, %arg2 : i32, i32
  }
  func.func @transform_1(%arg0: i32, %arg1: i32, %arg2: i32) -> (i32, i32) {
    %c0_i32 = arith.constant 0 : i32
    return %arg2, %arg1 : i32, i32
  }
  func.func @transform_2(%arg0: i32, %arg1: i32, %arg2: i32) -> (i32, i32) {
    %c0_i32 = arith.constant 0 : i32
    %c0_i32_0 = arith.constant 0 : i32
    return %c0_i32, %arg1 : i32, i32
  }
  func.func @transform_3(%arg0: i32, %arg1: i32, %arg2: i32) -> (i32, i32) {
    %c0_i32 = arith.constant 0 : i32
    %c0_i32_0 = arith.constant 0 : i32
    return %c0_i32, %arg1 : i32, i32
  }
  func.func @transform_4(%arg0: i32, %arg1: i32, %arg2: i32) -> (i32, i32) {
    %c0_i32 = arith.constant 0 : i32
    return %arg0, %arg1 : i32, i32
  }
}

module attributes {stable_mosaic.version = 11 : i64} {
  func.func @_matmul_affine_kernel(%arg0: i32, %arg1: i32, %arg2: i32, %arg3: memref<128x128xbf16, #tpu.memory_space<vmem>>, %arg4: memref<128x128xbf16, #tpu.memory_space<vmem>>, %arg5: memref<1x128xf32, #tpu.memory_space<vmem>>, %arg6: memref<1x128xf32, #tpu.memory_space<vmem>>, %arg7: memref<128x128xf32, #tpu.memory_space<vmem>>, %arg8: memref<128x128xf32, #tpu.memory_space<vmem>>) attributes {dimension_semantics = [#tpu.dimension_semantics<parallel>, #tpu.dimension_semantics<parallel>, #tpu.dimension_semantics<arbitrary>], iteration_bounds = array<i64: 1, 1, 5>, scalar_prefetch = 0 : i64, scratch_operands = 1 : i64, tpu.core_type = #tpu.core_type<tc>, window_params = [{transform_indices = @transform_0, window_bounds = array<i64: 128, 128>}, {transform_indices = @transform_1, window_bounds = array<i64: 128, 128>}, {transform_indices = @transform_2, window_bounds = array<i64: 1, 128>}, {transform_indices = @transform_3, window_bounds = array<i64: 1, 128>}, {transform_indices = @transform_4, window_bounds = array<i64: 128, 128>}]} {
    %c0_i32 = arith.constant 0 : i32
    %0 = arith.cmpi eq, %arg2, %c0_i32 : i32
    %1 = arith.extui %0 : i1 to i32
    %c0_i32_0 = arith.constant 0 : i32
    %2 = arith.cmpi ne, %1, %c0_i32_0 : i32
    scf.if %2 {
      %cst_9 = arith.constant 0.000000e+00 : f32
      %12 = vector.broadcast %cst_9 : f32 to vector<128x128xf32>
      %c0_10 = arith.constant 0 : index
      %c0_11 = arith.constant 0 : index
      %13 = vector.load %arg8[%c0_10, %c0_11] : memref<128x128xf32, #tpu.memory_space<vmem>>, vector<128x128xf32>
      tpu.vector_store %arg8[%c0_10, %c0_11], %12 {strides = array<i32>} : memref<128x128xf32, #tpu.memory_space<vmem>>, vector<128x128xf32>,
    } else {
    }
    %c0 = arith.constant 0 : index
    %c0_1 = arith.constant 0 : index
    %3 = vector.load %arg8[%c0, %c0_1] : memref<128x128xf32, #tpu.memory_space<vmem>>, vector<128x128xf32>
    %c0_2 = arith.constant 0 : index
    %c0_3 = arith.constant 0 : index
    %4 = vector.load %arg3[%c0_2, %c0_3] : memref<128x128xbf16, #tpu.memory_space<vmem>>, vector<128x128xbf16>
    %c0_4 = arith.constant 0 : index
    %c0_5 = arith.constant 0 : index
    %5 = vector.load %arg4[%c0_4, %c0_5] : memref<128x128xbf16, #tpu.memory_space<vmem>>, vector<128x128xbf16>
    %cst = arith.constant dense<0.000000e+00> : vector<128x128xf32>
    %6 = tpu.matmul %4, %5, %cst {dimension_numbers = #tpu.dot_dimension_numbers<[1], [0], [0], [1], [0, 0, 1, 1], [], []>} : vector<128x128xbf16>, vector<128x128xbf16>, vector<128x128xf32> -> vector<128x128xf32>
    %7 = arith.addf %3, %6 : vector<128x128xf32>
    %c0_6 = arith.constant 0 : index
    %c0_7 = arith.constant 0 : index
    %8 = vector.load %arg8[%c0_6, %c0_7] : memref<128x128xf32, #tpu.memory_space<vmem>>, vector<128x128xf32>
    tpu.vector_store %arg8[%c0_6, %c0_7], %7 {strides = array<i32>} : memref<128x128xf32, #tpu.memory_space<vmem>>, vector<128x128xf32>,
    %c4_i32 = arith.constant 4 : i32
    %9 = arith.cmpi eq, %arg2, %c4_i32 : i32
    %10 = arith.extui %9 : i1 to i32
    %c0_i32_8 = arith.constant 0 : i32
    %11 = arith.cmpi ne, %10, %c0_i32_8 : i32
    scf.if %11 {
      %c0_9 = arith.constant 0 : index
      %c0_10 = arith.constant 0 : index
      %12 = vector.load %arg8[%c0_9, %c0_10] : memref<128x128xf32, #tpu.memory_space<vmem>>, vector<128x128xf32>
      %c0_11 = arith.constant 0 : index
      %c0_12 = arith.constant 0 : index
      %13 = vector.load %arg5[%c0_11, %c0_12] : memref<1x128xf32, #tpu.memory_space<vmem>>, vector<1x128xf32>
      %14 = vector.broadcast %13 : vector<1x128xf32> to vector<128x128xf32>
      %15 = arith.mulf %12, %14 : vector<128x128xf32>
      %c0_13 = arith.constant 0 : index
      %c0_14 = arith.constant 0 : index
      %16 = vector.load %arg6[%c0_13, %c0_14] : memref<1x128xf32, #tpu.memory_space<vmem>>, vector<1x128xf32>
      %17 = vector.broadcast %16 : vector<1x128xf32> to vector<128x128xf32>
      %18 = arith.addf %15, %17 : vector<128x128xf32>
      %cst_15 = arith.constant 0.000000e+00 : f32
      %19 = vector.broadcast %cst_15 : f32 to vector<128x128xf32>
      %20 = arith.maximumf %18, %19 : vector<128x128xf32>
      %c0_16 = arith.constant 0 : index
      %c0_17 = arith.constant 0 : index
      %21 = vector.load %arg7[%c0_16, %c0_17] : memref<128x128xf32, #tpu.memory_space<vmem>>, vector<128x128xf32>
      tpu.vector_store %arg7[%c0_16, %c0_17], %20 {strides = array<i32>} : memref<128x128xf32, #tpu.memory_space<vmem>>, vector<128x128xf32>,
    } else {
    }
    return
  }
  func.func @transform_0(%arg0: i32, %arg1: i32, %arg2: i32) -> (i32, i32) {
    %c0_i32 = arith.constant 0 : i32
    return %arg0, %arg2 : i32, i32
  }
  func.func @transform_1(%arg0: i32, %arg1: i32, %arg2: i32) -> (i32, i32) {
    %c0_i32 = arith.constant 0 : i32
    return %arg2, %arg1 : i32, i32
  }
  func.func @transform_2(%arg0: i32, %arg1: i32, %arg2: i32) -> (i32, i32) {
    %c0_i32 = arith.constant 0 : i32
    %c0_i32_0 = arith.constant 0 : i32
    return %c0_i32, %arg1 : i32, i32
  }
  func.func @transform_3(%arg0: i32, %arg1: i32, %arg2: i32) -> (i32, i32) {
    %c0_i32 = arith.constant 0 : i32
    %c0_i32_0 = arith.constant 0 : i32
    return %c0_i32, %arg1 : i32, i32
  }
  func.func @transform_4(%arg0: i32, %arg1: i32, %arg2: i32) -> (i32, i32) {
    %c0_i32 = arith.constant 0 : i32
    return %arg0, %arg1 : i32, i32
  }
}

module attributes {stable_mosaic.version = 11 : i64} {
  func.func @_matmul_affine_kernel(%arg0: i32, %arg1: i32, %arg2: i32, %arg3: memref<128x128xbf16, #tpu.memory_space<vmem>>, %arg4: memref<128x128xbf16, #tpu.memory_space<vmem>>, %arg5: memref<1x128xf32, #tpu.memory_space<vmem>>, %arg6: memref<1x128xf32, #tpu.memory_space<vmem>>, %arg7: memref<128x128xf32, #tpu.memory_space<vmem>>, %arg8: memref<128x128xf32, #tpu.memory_space<vmem>>, %arg9: memref<128x128xf32, #tpu.memory_space<vmem>>) attributes {dimension_semantics = [#tpu.dimension_semantics<parallel>, #tpu.dimension_semantics<parallel>, #tpu.dimension_semantics<arbitrary>], iteration_bounds = array<i64: 1, 1, 5>, scalar_prefetch = 0 : i64, scratch_operands = 1 : i64, tpu.core_type = #tpu.core_type<tc>, window_params = [{transform_indices = @transform_0, window_bounds = array<i64: 128, 128>}, {transform_indices = @transform_1, window_bounds = array<i64: 128, 128>}, {transform_indices = @transform_2, window_bounds = array<i64: 1, 128>}, {transform_indices = @transform_3, window_bounds = array<i64: 1, 128>}, {transform_indices = @transform_4, window_bounds = array<i64: 128, 128>}, {transform_indices = @transform_5, window_bounds = array<i64: 128, 128>}]} {
    %c0_i32 = arith.constant 0 : i32
    %0 = arith.cmpi eq, %arg2, %c0_i32 : i32
    %1 = arith.extui %0 : i1 to i32
    %c0_i32_0 = arith.constant 0 : i32
    %2 = arith.cmpi ne, %1, %c0_i32_0 : i32
    scf.if %2 {
      %cst_9 = arith.constant 0.000000e+00 : f32
      %12 = vector.broadcast %cst_9 : f32 to vector<128x128xf32>
      %c0_10 = arith.constant 0 : index
      %c0_11 = arith.constant 0 : index
      %13 = vector.load %arg9[%c0_10, %c0_11] : memref<128x128xf32, #tpu.memory_space<vmem>>, vector<128x128xf32>
      tpu.vector_store %arg9[%c0_10, %c0_11], %12 {strides = array<i32>} : memref<128x128xf32, #tpu.memory_space<vmem>>, vector<128x128xf32>,
    } else {
    }
    %c0 = arith.constant 0 : index
    %c0_1 = arith.constant 0 : index
    %3 = vector.load %arg9[%c0, %c0_1] : memref<128x128xf32, #tpu.memory_space<vmem>>, vector<128x128xf32>
    %c0_2 = arith.constant 0 : index
    %c0_3 = arith.constant 0 : index
    %4 = vector.load %arg3[%c0_2, %c0_3] : memref<128x128xbf16, #tpu.memory_space<vmem>>, vector<128x128xbf16>
    %c0_4 = arith.constant 0 : index
    %c0_5 = arith.constant 0 : index
    %5 = vector.load %arg4[%c0_4, %c0_5] : memref<128x128xbf16, #tpu.memory_space<vmem>>, vector<128x128xbf16>
    %cst = arith.constant dense<0.000000e+00> : vector<128x128xf32>
    %6 = tpu.matmul %4, %5, %cst {dimension_numbers = #tpu.dot_dimension_numbers<[1], [0], [0], [1], [0, 0, 1, 1], [], []>} : vector<128x128xbf16>, vector<128x128xbf16>, vector<128x128xf32> -> vector<128x128xf32>
    %7 = arith.addf %3, %6 : vector<128x128xf32>
    %c0_6 = arith.constant 0 : index
    %c0_7 = arith.constant 0 : index
    %8 = vector.load %arg9[%c0_6, %c0_7] : memref<128x128xf32, #tpu.memory_space<vmem>>, vector<128x128xf32>
    tpu.vector_store %arg9[%c0_6, %c0_7], %7 {strides = array<i32>} : memref<128x128xf32, #tpu.memory_space<vmem>>, vector<128x128xf32>,
    %c4_i32 = arith.constant 4 : i32
    %9 = arith.cmpi eq, %arg2, %c4_i32 : i32
    %10 = arith.extui %9 : i1 to i32
    %c0_i32_8 = arith.constant 0 : i32
    %11 = arith.cmpi ne, %10, %c0_i32_8 : i32
    scf.if %11 {
      %c0_9 = arith.constant 0 : index
      %c0_10 = arith.constant 0 : index
      %12 = vector.load %arg9[%c0_9, %c0_10] : memref<128x128xf32, #tpu.memory_space<vmem>>, vector<128x128xf32>
      %c0_11 = arith.constant 0 : index
      %c0_12 = arith.constant 0 : index
      %13 = vector.load %arg5[%c0_11, %c0_12] : memref<1x128xf32, #tpu.memory_space<vmem>>, vector<1x128xf32>
      %14 = vector.broadcast %13 : vector<1x128xf32> to vector<128x128xf32>
      %15 = arith.mulf %12, %14 : vector<128x128xf32>
      %c0_13 = arith.constant 0 : index
      %c0_14 = arith.constant 0 : index
      %16 = vector.load %arg6[%c0_13, %c0_14] : memref<1x128xf32, #tpu.memory_space<vmem>>, vector<1x128xf32>
      %17 = vector.broadcast %16 : vector<1x128xf32> to vector<128x128xf32>
      %18 = arith.addf %15, %17 : vector<128x128xf32>
      %c0_15 = arith.constant 0 : index
      %c0_16 = arith.constant 0 : index
      %19 = vector.load %arg7[%c0_15, %c0_16] : memref<128x128xf32, #tpu.memory_space<vmem>>, vector<128x128xf32>
      %20 = arith.addf %18, %19 : vector<128x128xf32>
      %cst_17 = arith.constant 0.000000e+00 : f32
      %21 = vector.broadcast %cst_17 : f32 to vector<128x128xf32>
      %22 = arith.maximumf %20, %21 : vector<128x128xf32>
      %c0_18 = arith.constant 0 : index
      %c0_19 = arith.constant 0 : index
      %23 = vector.load %arg8[%c0_18, %c0_19] : memref<128x128xf32, #tpu.memory_space<vmem>>, vector<128x128xf32>
      tpu.vector_store %arg8[%c0_18, %c0_19], %22 {strides = array<i32>} : memref<128x128xf32, #tpu.memory_space<vmem>>, vector<128x128xf32>,
    } else {
    }
    return
  }
  func.func @transform_0(%arg0: i32, %arg1: i32, %arg2: i32) -> (i32, i32) {
    %c0_i32 = arith.constant 0 : i32
    return %arg0, %arg2 : i32, i32
  }
  func.func @transform_1(%arg0: i32, %arg1: i32, %arg2: i32) -> (i32, i32) {
    %c0_i32 = arith.constant 0 : i32
    return %arg2, %arg1 : i32, i32
  }
  func.func @transform_2(%arg0: i32, %arg1: i32, %arg2: i32) -> (i32, i32) {
    %c0_i32 = arith.constant 0 : i32
    %c0_i32_0 = arith.constant 0 : i32
    return %c0_i32, %arg1 : i32, i32
  }
  func.func @transform_3(%arg0: i32, %arg1: i32, %arg2: i32) -> (i32, i32) {
    %c0_i32 = arith.constant 0 : i32
    %c0_i32_0 = arith.constant 0 : i32
    return %c0_i32, %arg1 : i32, i32
  }
  func.func @transform_4(%arg0: i32, %arg1: i32, %arg2: i32) -> (i32, i32) {
    %c0_i32 = arith.constant 0 : i32
    return %arg0, %arg1 : i32, i32
  }
  func.func @transform_5(%arg0: i32, %arg1: i32, %arg2: i32) -> (i32, i32) {
    %c0_i32 = arith.constant 0 : i32
    return %arg0, %arg1 : i32, i32
  }
}

module attributes {stable_mosaic.version = 11 : i64} {
  func.func @_matmul_affine_kernel(%arg0: i32, %arg1: i32, %arg2: i32, %arg3: memref<128x128xbf16, #tpu.memory_space<vmem>>, %arg4: memref<128x128xbf16, #tpu.memory_space<vmem>>, %arg5: memref<1x128xf32, #tpu.memory_space<vmem>>, %arg6: memref<1x128xf32, #tpu.memory_space<vmem>>, %arg7: memref<128x128xf32, #tpu.memory_space<vmem>>, %arg8: memref<128x128xf32, #tpu.memory_space<vmem>>, %arg9: memref<128x128xf32, #tpu.memory_space<vmem>>) attributes {dimension_semantics = [#tpu.dimension_semantics<parallel>, #tpu.dimension_semantics<parallel>, #tpu.dimension_semantics<arbitrary>], iteration_bounds = array<i64: 1, 1, 5>, scalar_prefetch = 0 : i64, scratch_operands = 1 : i64, tpu.core_type = #tpu.core_type<tc>, window_params = [{transform_indices = @transform_0, window_bounds = array<i64: 128, 128>}, {transform_indices = @transform_1, window_bounds = array<i64: 128, 128>}, {transform_indices = @transform_2, window_bounds = array<i64: 1, 128>}, {transform_indices = @transform_3, window_bounds = array<i64: 1, 128>}, {transform_indices = @transform_4, window_bounds = array<i64: 128, 128>}, {transform_indices = @transform_5, window_bounds = array<i64: 128, 128>}]} {
    %c0_i32 = arith.constant 0 : i32
    %0 = arith.cmpi eq, %arg2, %c0_i32 : i32
    %1 = arith.extui %0 : i1 to i32
    %c0_i32_0 = arith.constant 0 : i32
    %2 = arith.cmpi ne, %1, %c0_i32_0 : i32
    scf.if %2 {
      %cst_9 = arith.constant 0.000000e+00 : f32
      %12 = vector.broadcast %cst_9 : f32 to vector<128x128xf32>
      %c0_10 = arith.constant 0 : index
      %c0_11 = arith.constant 0 : index
      %13 = vector.load %arg9[%c0_10, %c0_11] : memref<128x128xf32, #tpu.memory_space<vmem>>, vector<128x128xf32>
      tpu.vector_store %arg9[%c0_10, %c0_11], %12 {strides = array<i32>} : memref<128x128xf32, #tpu.memory_space<vmem>>, vector<128x128xf32>,
    } else {
    }
    %c0 = arith.constant 0 : index
    %c0_1 = arith.constant 0 : index
    %3 = vector.load %arg9[%c0, %c0_1] : memref<128x128xf32, #tpu.memory_space<vmem>>, vector<128x128xf32>
    %c0_2 = arith.constant 0 : index
    %c0_3 = arith.constant 0 : index
    %4 = vector.load %arg3[%c0_2, %c0_3] : memref<128x128xbf16, #tpu.memory_space<vmem>>, vector<128x128xbf16>
    %c0_4 = arith.constant 0 : index
    %c0_5 = arith.constant 0 : index
    %5 = vector.load %arg4[%c0_4, %c0_5] : memref<128x128xbf16, #tpu.memory_space<vmem>>, vector<128x128xbf16>
    %cst = arith.constant dense<0.000000e+00> : vector<128x128xf32>
    %6 = tpu.matmul %4, %5, %cst {dimension_numbers = #tpu.dot_dimension_numbers<[1], [0], [0], [1], [0, 0, 1, 1], [], []>} : vector<128x128xbf16>, vector<128x128xbf16>, vector<128x128xf32> -> vector<128x128xf32>
    %7 = arith.addf %3, %6 : vector<128x128xf32>
    %c0_6 = arith.constant 0 : index
    %c0_7 = arith.constant 0 : index
    %8 = vector.load %arg9[%c0_6, %c0_7] : memref<128x128xf32, #tpu.memory_space<vmem>>, vector<128x128xf32>
    tpu.vector_store %arg9[%c0_6, %c0_7], %7 {strides = array<i32>} : memref<128x128xf32, #tpu.memory_space<vmem>>, vector<128x128xf32>,
    %c4_i32 = arith.constant 4 : i32
    %9 = arith.cmpi eq, %arg2, %c4_i32 : i32
    %10 = arith.extui %9 : i1 to i32
    %c0_i32_8 = arith.constant 0 : i32
    %11 = arith.cmpi ne, %10, %c0_i32_8 : i32
    scf.if %11 {
      %c0_9 = arith.constant 0 : index
      %c0_10 = arith.constant 0 : index
      %12 = vector.load %arg9[%c0_9, %c0_10] : memref<128x128xf32, #tpu.memory_space<vmem>>, vector<128x128xf32>
      %c0_11 = arith.constant 0 : index
      %c0_12 = arith.constant 0 : index
      %13 = vector.load %arg5[%c0_11, %c0_12] : memref<1x128xf32, #tpu.memory_space<vmem>>, vector<1x128xf32>
      %14 = vector.broadcast %13 : vector<1x128xf32> to vector<128x128xf32>
      %15 = arith.mulf %12, %14 : vector<128x128xf32>
      %c0_13 = arith.constant 0 : index
      %c0_14 = arith.constant 0 : index
      %16 = vector.load %arg6[%c0_13, %c0_14] : memref<1x128xf32, #tpu.memory_space<vmem>>, vector<1x128xf32>
      %17 = vector.broadcast %16 : vector<1x128xf32> to vector<128x128xf32>
      %18 = arith.addf %15, %17 : vector<128x128xf32>
      %c0_15 = arith.constant 0 : index
      %c0_16 = arith.constant 0 : index
      %19 = vector.load %arg7[%c0_15, %c0_16] : memref<128x128xf32, #tpu.memory_space<vmem>>, vector<128x128xf32>
      %20 = arith.addf %18, %19 : vector<128x128xf32>
      %cst_17 = arith.constant 0.000000e+00 : f32
      %21 = vector.broadcast %cst_17 : f32 to vector<128x128xf32>
      %22 = arith.maximumf %20, %21 : vector<128x128xf32>
      %c0_18 = arith.constant 0 : index
      %c0_19 = arith.constant 0 : index
      %23 = vector.load %arg8[%c0_18, %c0_19] : memref<128x128xf32, #tpu.memory_space<vmem>>, vector<128x128xf32>
      tpu.vector_store %arg8[%c0_18, %c0_19], %22 {strides = array<i32>} : memref<128x128xf32, #tpu.memory_space<vmem>>, vector<128x128xf32>,
    } else {
    }
    return
  }
  func.func @transform_0(%arg0: i32, %arg1: i32, %arg2: i32) -> (i32, i32) {
    %c0_i32 = arith.constant 0 : i32
    return %arg0, %arg2 : i32, i32
  }
  func.func @transform_1(%arg0: i32, %arg1: i32, %arg2: i32) -> (i32, i32) {
    %c0_i32 = arith.constant 0 : i32
    return %arg2, %arg1 : i32, i32
  }
  func.func @transform_2(%arg0: i32, %arg1: i32, %arg2: i32) -> (i32, i32) {
    %c0_i32 = arith.constant 0 : i32
    %c0_i32_0 = arith.constant 0 : i32
    return %c0_i32, %arg1 : i32, i32
  }
  func.func @transform_3(%arg0: i32, %arg1: i32, %arg2: i32) -> (i32, i32) {
    %c0_i32 = arith.constant 0 : i32
    %c0_i32_0 = arith.constant 0 : i32
    return %c0_i32, %arg1 : i32, i32
  }
  func.func @transform_4(%arg0: i32, %arg1: i32, %arg2: i32) -> (i32, i32) {
    %c0_i32 = arith.constant 0 : i32
    return %arg0, %arg1 : i32, i32
  }
  func.func @transform_5(%arg0: i32, %arg1: i32, %arg2: i32) -> (i32, i32) {
    %c0_i32 = arith.constant 0 : i32
    return %arg0, %arg1 : i32, i32
  }
}

module attributes {stable_mosaic.version = 11 : i64} {
  func.func @_matmul_affine_kernel(%arg0: i32, %arg1: i32, %arg2: i32, %arg3: memref<32x128xbf16, #tpu.memory_space<vmem>>, %arg4: memref<128x128xbf16, #tpu.memory_space<vmem>>, %arg5: memref<1x128xf32, #tpu.memory_space<vmem>>, %arg6: memref<1x128xf32, #tpu.memory_space<vmem>>, %arg7: memref<32x128xf32, #tpu.memory_space<vmem>>, %arg8: memref<32x128xf32, #tpu.memory_space<vmem>>) attributes {dimension_semantics = [#tpu.dimension_semantics<parallel>, #tpu.dimension_semantics<parallel>, #tpu.dimension_semantics<arbitrary>], iteration_bounds = array<i64: 1, 1, 5>, scalar_prefetch = 0 : i64, scratch_operands = 1 : i64, tpu.core_type = #tpu.core_type<tc>, window_params = [{transform_indices = @transform_0, window_bounds = array<i64: 32, 128>}, {transform_indices = @transform_1, window_bounds = array<i64: 128, 128>}, {transform_indices = @transform_2, window_bounds = array<i64: 1, 128>}, {transform_indices = @transform_3, window_bounds = array<i64: 1, 128>}, {transform_indices = @transform_4, window_bounds = array<i64: 32, 128>}]} {
    %c0_i32 = arith.constant 0 : i32
    %0 = arith.cmpi eq, %arg2, %c0_i32 : i32
    %1 = arith.extui %0 : i1 to i32
    %c0_i32_0 = arith.constant 0 : i32
    %2 = arith.cmpi ne, %1, %c0_i32_0 : i32
    scf.if %2 {
      %cst_9 = arith.constant 0.000000e+00 : f32
      %12 = vector.broadcast %cst_9 : f32 to vector<32x128xf32>
      %c0_10 = arith.constant 0 : index
      %c0_11 = arith.constant 0 : index
      %13 = vector.load %arg8[%c0_10, %c0_11] : memref<32x128xf32, #tpu.memory_space<vmem>>, vector<32x128xf32>
      tpu.vector_store %arg8[%c0_10, %c0_11], %12 {strides = array<i32>} : memref<32x128xf32, #tpu.memory_space<vmem>>, vector<32x128xf32>,
    } else {
    }
    %c0 = arith.constant 0 : index
    %c0_1 = arith.constant 0 : index
    %3 = vector.load %arg8[%c0, %c0_1] : memref<32x128xf32, #tpu.memory_space<vmem>>, vector<32x128xf32>
    %c0_2 = arith.constant 0 : index
    %c0_3 = arith.constant 0 : index
    %4 = vector.load %arg3[%c0_2, %c0_3] : memref<32x128xbf16, #tpu.memory_space<vmem>>, vector<32x128xbf16>
    %c0_4 = arith.constant 0 : index
    %c0_5 = arith.constant 0 : index
    %5 = vector.load %arg4[%c0_4, %c0_5] : memref<128x128xbf16, #tpu.memory_space<vmem>>, vector<128x128xbf16>
    %cst = arith.constant dense<0.000000e+00> : vector<32x128xf32>
    %6 = tpu.matmul %4, %5, %cst {dimension_numbers = #tpu.dot_dimension_numbers<[1], [0], [0], [1], [0, 0, 1, 1], [], []>} : vector<32x128xbf16>, vector<128x128xbf16>, vector<32x128xf32> -> vector<32x128xf32>
    %7 = arith.addf %3, %6 : vector<32x128xf32>
    %c0_6 = arith.constant 0 : index
    %c0_7 = arith.constant 0 : index
    %8 = vector.load %arg8[%c0_6, %c0_7] : memref<32x128xf32, #tpu.memory_space<vmem>>, vector<32x128xf32>
    tpu.vector_store %arg8[%c0_6, %c0_7], %7 {strides = array<i32>} : memref<32x128xf32, #tpu.memory_space<vmem>>, vector<32x128xf32>,
    %c4_i32 = arith.constant 4 : i32
    %9 = arith.cmpi eq, %arg2, %c4_i32 : i32
    %10 = arith.extui %9 : i1 to i32
    %c0_i32_8 = arith.constant 0 : i32
    %11 = arith.cmpi ne, %10, %c0_i32_8 : i32
    scf.if %11 {
      %c0_9 = arith.constant 0 : index
      %c0_10 = arith.constant 0 : index
      %12 = vector.load %arg8[%c0_9, %c0_10] : memref<32x128xf32, #tpu.memory_space<vmem>>, vector<32x128xf32>
      %c0_11 = arith.constant 0 : index
      %c0_12 = arith.constant 0 : index
      %13 = vector.load %arg5[%c0_11, %c0_12] : memref<1x128xf32, #tpu.memory_space<vmem>>, vector<1x128xf32>
      %14 = vector.broadcast %13 : vector<1x128xf32> to vector<32x128xf32>
      %15 = arith.mulf %12, %14 : vector<32x128xf32>
      %c0_13 = arith.constant 0 : index
      %c0_14 = arith.constant 0 : index
      %16 = vector.load %arg6[%c0_13, %c0_14] : memref<1x128xf32, #tpu.memory_space<vmem>>, vector<1x128xf32>
      %17 = vector.broadcast %16 : vector<1x128xf32> to vector<32x128xf32>
      %18 = arith.addf %15, %17 : vector<32x128xf32>
      %cst_15 = arith.constant 0.000000e+00 : f32
      %19 = vector.broadcast %cst_15 : f32 to vector<32x128xf32>
      %20 = arith.maximumf %18, %19 : vector<32x128xf32>
      %c0_16 = arith.constant 0 : index
      %c0_17 = arith.constant 0 : index
      %21 = vector.load %arg7[%c0_16, %c0_17] : memref<32x128xf32, #tpu.memory_space<vmem>>, vector<32x128xf32>
      tpu.vector_store %arg7[%c0_16, %c0_17], %20 {strides = array<i32>} : memref<32x128xf32, #tpu.memory_space<vmem>>, vector<32x128xf32>,
    } else {
    }
    return
  }
  func.func @transform_0(%arg0: i32, %arg1: i32, %arg2: i32) -> (i32, i32) {
    %c0_i32 = arith.constant 0 : i32
    return %arg0, %arg2 : i32, i32
  }
  func.func @transform_1(%arg0: i32, %arg1: i32, %arg2: i32) -> (i32, i32) {
    %c0_i32 = arith.constant 0 : i32
    return %arg2, %arg1 : i32, i32
  }
  func.func @transform_2(%arg0: i32, %arg1: i32, %arg2: i32) -> (i32, i32) {
    %c0_i32 = arith.constant 0 : i32
    %c0_i32_0 = arith.constant 0 : i32
    return %c0_i32, %arg1 : i32, i32
  }
  func.func @transform_3(%arg0: i32, %arg1: i32, %arg2: i32) -> (i32, i32) {
    %c0_i32 = arith.constant 0 : i32
    %c0_i32_0 = arith.constant 0 : i32
    return %c0_i32, %arg1 : i32, i32
  }
  func.func @transform_4(%arg0: i32, %arg1: i32, %arg2: i32) -> (i32, i32) {
    %c0_i32 = arith.constant 0 : i32
    return %arg0, %arg1 : i32, i32
  }
}

module attributes {stable_mosaic.version = 11 : i64} {
  func.func @_matmul_affine_kernel(%arg0: i32, %arg1: i32, %arg2: i32, %arg3: memref<32x128xbf16, #tpu.memory_space<vmem>>, %arg4: memref<128x128xbf16, #tpu.memory_space<vmem>>, %arg5: memref<1x128xf32, #tpu.memory_space<vmem>>, %arg6: memref<1x128xf32, #tpu.memory_space<vmem>>, %arg7: memref<32x128xf32, #tpu.memory_space<vmem>>, %arg8: memref<32x128xf32, #tpu.memory_space<vmem>>) attributes {dimension_semantics = [#tpu.dimension_semantics<parallel>, #tpu.dimension_semantics<parallel>, #tpu.dimension_semantics<arbitrary>], iteration_bounds = array<i64: 1, 1, 1>, scalar_prefetch = 0 : i64, scratch_operands = 1 : i64, tpu.core_type = #tpu.core_type<tc>, window_params = [{transform_indices = @transform_0, window_bounds = array<i64: 32, 128>}, {transform_indices = @transform_1, window_bounds = array<i64: 128, 128>}, {transform_indices = @transform_2, window_bounds = array<i64: 1, 128>}, {transform_indices = @transform_3, window_bounds = array<i64: 1, 128>}, {transform_indices = @transform_4, window_bounds = array<i64: 32, 128>}]} {
    %c0_i32 = arith.constant 0 : i32
    %0 = arith.cmpi eq, %arg2, %c0_i32 : i32
    %1 = arith.extui %0 : i1 to i32
    %c0_i32_0 = arith.constant 0 : i32
    %2 = arith.cmpi ne, %1, %c0_i32_0 : i32
    scf.if %2 {
      %cst_10 = arith.constant 0.000000e+00 : f32
      %12 = vector.broadcast %cst_10 : f32 to vector<32x128xf32>
      %c0_11 = arith.constant 0 : index
      %c0_12 = arith.constant 0 : index
      %13 = vector.load %arg8[%c0_11, %c0_12] : memref<32x128xf32, #tpu.memory_space<vmem>>, vector<32x128xf32>
      tpu.vector_store %arg8[%c0_11, %c0_12], %12 {strides = array<i32>} : memref<32x128xf32, #tpu.memory_space<vmem>>, vector<32x128xf32>,
    } else {
    }
    %c0 = arith.constant 0 : index
    %c0_1 = arith.constant 0 : index
    %3 = vector.load %arg8[%c0, %c0_1] : memref<32x128xf32, #tpu.memory_space<vmem>>, vector<32x128xf32>
    %c0_2 = arith.constant 0 : index
    %c0_3 = arith.constant 0 : index
    %4 = vector.load %arg3[%c0_2, %c0_3] : memref<32x128xbf16, #tpu.memory_space<vmem>>, vector<32x128xbf16>
    %c0_4 = arith.constant 0 : index
    %c0_5 = arith.constant 0 : index
    %5 = vector.load %arg4[%c0_4, %c0_5] : memref<128x128xbf16, #tpu.memory_space<vmem>>, vector<128x128xbf16>
    %cst = arith.constant dense<0.000000e+00> : vector<32x128xf32>
    %6 = tpu.matmul %4, %5, %cst {dimension_numbers = #tpu.dot_dimension_numbers<[1], [0], [0], [1], [0, 0, 1, 1], [], []>} : vector<32x128xbf16>, vector<128x128xbf16>, vector<32x128xf32> -> vector<32x128xf32>
    %7 = arith.addf %3, %6 : vector<32x128xf32>
    %c0_6 = arith.constant 0 : index
    %c0_7 = arith.constant 0 : index
    %8 = vector.load %arg8[%c0_6, %c0_7] : memref<32x128xf32, #tpu.memory_space<vmem>>, vector<32x128xf32>
    tpu.vector_store %arg8[%c0_6, %c0_7], %7 {strides = array<i32>} : memref<32x128xf32, #tpu.memory_space<vmem>>, vector<32x128xf32>,
    %c0_i32_8 = arith.constant 0 : i32
    %9 = arith.cmpi eq, %arg2, %c0_i32_8 : i32
    %10 = arith.extui %9 : i1 to i32
    %c0_i32_9 = arith.constant 0 : i32
    %11 = arith.cmpi ne, %10, %c0_i32_9 : i32
    scf.if %11 {
      %c0_10 = arith.constant 0 : index
      %c0_11 = arith.constant 0 : index
      %12 = vector.load %arg8[%c0_10, %c0_11] : memref<32x128xf32, #tpu.memory_space<vmem>>, vector<32x128xf32>
      %c0_12 = arith.constant 0 : index
      %c0_13 = arith.constant 0 : index
      %13 = vector.load %arg5[%c0_12, %c0_13] : memref<1x128xf32, #tpu.memory_space<vmem>>, vector<1x128xf32>
      %14 = vector.broadcast %13 : vector<1x128xf32> to vector<32x128xf32>
      %15 = arith.mulf %12, %14 : vector<32x128xf32>
      %c0_14 = arith.constant 0 : index
      %c0_15 = arith.constant 0 : index
      %16 = vector.load %arg6[%c0_14, %c0_15] : memref<1x128xf32, #tpu.memory_space<vmem>>, vector<1x128xf32>
      %17 = vector.broadcast %16 : vector<1x128xf32> to vector<32x128xf32>
      %18 = arith.addf %15, %17 : vector<32x128xf32>
      %c0_16 = arith.constant 0 : index
      %c0_17 = arith.constant 0 : index
      %19 = vector.load %arg7[%c0_16, %c0_17] : memref<32x128xf32, #tpu.memory_space<vmem>>, vector<32x128xf32>
      tpu.vector_store %arg7[%c0_16, %c0_17], %18 {strides = array<i32>} : memref<32x128xf32, #tpu.memory_space<vmem>>, vector<32x128xf32>,
    } else {
    }
    return
  }
  func.func @transform_0(%arg0: i32, %arg1: i32, %arg2: i32) -> (i32, i32) {
    %c0_i32 = arith.constant 0 : i32
    return %arg0, %arg2 : i32, i32
  }
  func.func @transform_1(%arg0: i32, %arg1: i32, %arg2: i32) -> (i32, i32) {
    %c0_i32 = arith.constant 0 : i32
    return %arg2, %arg1 : i32, i32
  }
  func.func @transform_2(%arg0: i32, %arg1: i32, %arg2: i32) -> (i32, i32) {
    %c0_i32 = arith.constant 0 : i32
    %c0_i32_0 = arith.constant 0 : i32
    return %c0_i32, %arg1 : i32, i32
  }
  func.func @transform_3(%arg0: i32, %arg1: i32, %arg2: i32) -> (i32, i32) {
    %c0_i32 = arith.constant 0 : i32
    %c0_i32_0 = arith.constant 0 : i32
    return %c0_i32, %arg1 : i32, i32
  }
  func.func @transform_4(%arg0: i32, %arg1: i32, %arg2: i32) -> (i32, i32) {
    %c0_i32 = arith.constant 0 : i32
    return %arg0, %arg1 : i32, i32
  }
}

module attributes {stable_mosaic.version = 11 : i64} {
  func.func @_matmul_affine_kernel(%arg0: i32, %arg1: i32, %arg2: i32, %arg3: memref<32x128xbf16, #tpu.memory_space<vmem>>, %arg4: memref<128x128xbf16, #tpu.memory_space<vmem>>, %arg5: memref<1x128xf32, #tpu.memory_space<vmem>>, %arg6: memref<1x128xf32, #tpu.memory_space<vmem>>, %arg7: memref<32x128xf32, #tpu.memory_space<vmem>>, %arg8: memref<32x128xf32, #tpu.memory_space<vmem>>, %arg9: memref<32x128xf32, #tpu.memory_space<vmem>>) attributes {dimension_semantics = [#tpu.dimension_semantics<parallel>, #tpu.dimension_semantics<parallel>, #tpu.dimension_semantics<arbitrary>], iteration_bounds = array<i64: 1, 1, 9>, scalar_prefetch = 0 : i64, scratch_operands = 1 : i64, tpu.core_type = #tpu.core_type<tc>, window_params = [{transform_indices = @transform_0, window_bounds = array<i64: 32, 128>}, {transform_indices = @transform_1, window_bounds = array<i64: 128, 128>}, {transform_indices = @transform_2, window_bounds = array<i64: 1, 128>}, {transform_indices = @transform_3, window_bounds = array<i64: 1, 128>}, {transform_indices = @transform_4, window_bounds = array<i64: 32, 128>}, {transform_indices = @transform_5, window_bounds = array<i64: 32, 128>}]} {
    %c0_i32 = arith.constant 0 : i32
    %0 = arith.cmpi eq, %arg2, %c0_i32 : i32
    %1 = arith.extui %0 : i1 to i32
    %c0_i32_0 = arith.constant 0 : i32
    %2 = arith.cmpi ne, %1, %c0_i32_0 : i32
    scf.if %2 {
      %cst_9 = arith.constant 0.000000e+00 : f32
      %12 = vector.broadcast %cst_9 : f32 to vector<32x128xf32>
      %c0_10 = arith.constant 0 : index
      %c0_11 = arith.constant 0 : index
      %13 = vector.load %arg9[%c0_10, %c0_11] : memref<32x128xf32, #tpu.memory_space<vmem>>, vector<32x128xf32>
      tpu.vector_store %arg9[%c0_10, %c0_11], %12 {strides = array<i32>} : memref<32x128xf32, #tpu.memory_space<vmem>>, vector<32x128xf32>,
    } else {
    }
    %c0 = arith.constant 0 : index
    %c0_1 = arith.constant 0 : index
    %3 = vector.load %arg9[%c0, %c0_1] : memref<32x128xf32, #tpu.memory_space<vmem>>, vector<32x128xf32>
    %c0_2 = arith.constant 0 : index
    %c0_3 = arith.constant 0 : index
    %4 = vector.load %arg3[%c0_2, %c0_3] : memref<32x128xbf16, #tpu.memory_space<vmem>>, vector<32x128xbf16>
    %c0_4 = arith.constant 0 : index
    %c0_5 = arith.constant 0 : index
    %5 = vector.load %arg4[%c0_4, %c0_5] : memref<128x128xbf16, #tpu.memory_space<vmem>>, vector<128x128xbf16>
    %cst = arith.constant dense<0.000000e+00> : vector<32x128xf32>
    %6 = tpu.matmul %4, %5, %cst {dimension_numbers = #tpu.dot_dimension_numbers<[1], [0], [0], [1], [0, 0, 1, 1], [], []>} : vector<32x128xbf16>, vector<128x128xbf16>, vector<32x128xf32> -> vector<32x128xf32>
    %7 = arith.addf %3, %6 : vector<32x128xf32>
    %c0_6 = arith.constant 0 : index
    %c0_7 = arith.constant 0 : index
    %8 = vector.load %arg9[%c0_6, %c0_7] : memref<32x128xf32, #tpu.memory_space<vmem>>, vector<32x128xf32>
    tpu.vector_store %arg9[%c0_6, %c0_7], %7 {strides = array<i32>} : memref<32x128xf32, #tpu.memory_space<vmem>>, vector<32x128xf32>,
    %c8_i32 = arith.constant 8 : i32
    %9 = arith.cmpi eq, %arg2, %c8_i32 : i32
    %10 = arith.extui %9 : i1 to i32
    %c0_i32_8 = arith.constant 0 : i32
    %11 = arith.cmpi ne, %10, %c0_i32_8 : i32
    scf.if %11 {
      %c0_9 = arith.constant 0 : index
      %c0_10 = arith.constant 0 : index
      %12 = vector.load %arg9[%c0_9, %c0_10] : memref<32x128xf32, #tpu.memory_space<vmem>>, vector<32x128xf32>
      %c0_11 = arith.constant 0 : index
      %c0_12 = arith.constant 0 : index
      %13 = vector.load %arg5[%c0_11, %c0_12] : memref<1x128xf32, #tpu.memory_space<vmem>>, vector<1x128xf32>
      %14 = vector.broadcast %13 : vector<1x128xf32> to vector<32x128xf32>
      %15 = arith.mulf %12, %14 : vector<32x128xf32>
      %c0_13 = arith.constant 0 : index
      %c0_14 = arith.constant 0 : index
      %16 = vector.load %arg6[%c0_13, %c0_14] : memref<1x128xf32, #tpu.memory_space<vmem>>, vector<1x128xf32>
      %17 = vector.broadcast %16 : vector<1x128xf32> to vector<32x128xf32>
      %18 = arith.addf %15, %17 : vector<32x128xf32>
      %c0_15 = arith.constant 0 : index
      %c0_16 = arith.constant 0 : index
      %19 = vector.load %arg7[%c0_15, %c0_16] : memref<32x128xf32, #tpu.memory_space<vmem>>, vector<32x128xf32>
      %20 = arith.addf %18, %19 : vector<32x128xf32>
      %cst_17 = arith.constant 0.000000e+00 : f32
      %21 = vector.broadcast %cst_17 : f32 to vector<32x128xf32>
      %22 = arith.maximumf %20, %21 : vector<32x128xf32>
      %c0_18 = arith.constant 0 : index
      %c0_19 = arith.constant 0 : index
      %23 = vector.load %arg8[%c0_18, %c0_19] : memref<32x128xf32, #tpu.memory_space<vmem>>, vector<32x128xf32>
      tpu.vector_store %arg8[%c0_18, %c0_19], %22 {strides = array<i32>} : memref<32x128xf32, #tpu.memory_space<vmem>>, vector<32x128xf32>,
    } else {
    }
    return
  }
  func.func @transform_0(%arg0: i32, %arg1: i32, %arg2: i32) -> (i32, i32) {
    %c0_i32 = arith.constant 0 : i32
    return %arg0, %arg2 : i32, i32
  }
  func.func @transform_1(%arg0: i32, %arg1: i32, %arg2: i32) -> (i32, i32) {
    %c0_i32 = arith.constant 0 : i32
    return %arg2, %arg1 : i32, i32
  }
  func.func @transform_2(%arg0: i32, %arg1: i32, %arg2: i32) -> (i32, i32) {
    %c0_i32 = arith.constant 0 : i32
    %c0_i32_0 = arith.constant 0 : i32
    return %c0_i32, %arg1 : i32, i32
  }
  func.func @transform_3(%arg0: i32, %arg1: i32, %arg2: i32) -> (i32, i32) {
    %c0_i32 = arith.constant 0 : i32
    %c0_i32_0 = arith.constant 0 : i32
    return %c0_i32, %arg1 : i32, i32
  }
  func.func @transform_4(%arg0: i32, %arg1: i32, %arg2: i32) -> (i32, i32) {
    %c0_i32 = arith.constant 0 : i32
    return %arg0, %arg1 : i32, i32
  }
  func.func @transform_5(%arg0: i32, %arg1: i32, %arg2: i32) -> (i32, i32) {
    %c0_i32 = arith.constant 0 : i32
    return %arg0, %arg1 : i32, i32
  }
}

module attributes {stable_mosaic.version = 11 : i64} {
  func.func @_matmul_affine_kernel(%arg0: i32, %arg1: i32, %arg2: i32, %arg3: memref<32x128xbf16, #tpu.memory_space<vmem>>, %arg4: memref<128x128xbf16, #tpu.memory_space<vmem>>, %arg5: memref<1x128xf32, #tpu.memory_space<vmem>>, %arg6: memref<1x128xf32, #tpu.memory_space<vmem>>, %arg7: memref<32x128xf32, #tpu.memory_space<vmem>>, %arg8: memref<32x128xf32, #tpu.memory_space<vmem>>) attributes {dimension_semantics = [#tpu.dimension_semantics<parallel>, #tpu.dimension_semantics<parallel>, #tpu.dimension_semantics<arbitrary>], iteration_bounds = array<i64: 1, 1, 9>, scalar_prefetch = 0 : i64, scratch_operands = 1 : i64, tpu.core_type = #tpu.core_type<tc>, window_params = [{transform_indices = @transform_0, window_bounds = array<i64: 32, 128>}, {transform_indices = @transform_1, window_bounds = array<i64: 128, 128>}, {transform_indices = @transform_2, window_bounds = array<i64: 1, 128>}, {transform_indices = @transform_3, window_bounds = array<i64: 1, 128>}, {transform_indices = @transform_4, window_bounds = array<i64: 32, 128>}]} {
    %c0_i32 = arith.constant 0 : i32
    %0 = arith.cmpi eq, %arg2, %c0_i32 : i32
    %1 = arith.extui %0 : i1 to i32
    %c0_i32_0 = arith.constant 0 : i32
    %2 = arith.cmpi ne, %1, %c0_i32_0 : i32
    scf.if %2 {
      %cst_9 = arith.constant 0.000000e+00 : f32
      %12 = vector.broadcast %cst_9 : f32 to vector<32x128xf32>
      %c0_10 = arith.constant 0 : index
      %c0_11 = arith.constant 0 : index
      %13 = vector.load %arg8[%c0_10, %c0_11] : memref<32x128xf32, #tpu.memory_space<vmem>>, vector<32x128xf32>
      tpu.vector_store %arg8[%c0_10, %c0_11], %12 {strides = array<i32>} : memref<32x128xf32, #tpu.memory_space<vmem>>, vector<32x128xf32>,
    } else {
    }
    %c0 = arith.constant 0 : index
    %c0_1 = arith.constant 0 : index
    %3 = vector.load %arg8[%c0, %c0_1] : memref<32x128xf32, #tpu.memory_space<vmem>>, vector<32x128xf32>
    %c0_2 = arith.constant 0 : index
    %c0_3 = arith.constant 0 : index
    %4 = vector.load %arg3[%c0_2, %c0_3] : memref<32x128xbf16, #tpu.memory_space<vmem>>, vector<32x128xbf16>
    %c0_4 = arith.constant 0 : index
    %c0_5 = arith.constant 0 : index
    %5 = vector.load %arg4[%c0_4, %c0_5] : memref<128x128xbf16, #tpu.memory_space<vmem>>, vector<128x128xbf16>
    %cst = arith.constant dense<0.000000e+00> : vector<32x128xf32>
    %6 = tpu.matmul %4, %5, %cst {dimension_numbers = #tpu.dot_dimension_numbers<[1], [0], [0], [1], [0, 0, 1, 1], [], []>} : vector<32x128xbf16>, vector<128x128xbf16>, vector<32x128xf32> -> vector<32x128xf32>
    %7 = arith.addf %3, %6 : vector<32x128xf32>
    %c0_6 = arith.constant 0 : index
    %c0_7 = arith.constant 0 : index
    %8 = vector.load %arg8[%c0_6, %c0_7] : memref<32x128xf32, #tpu.memory_space<vmem>>, vector<32x128xf32>
    tpu.vector_store %arg8[%c0_6, %c0_7], %7 {strides = array<i32>} : memref<32x128xf32, #tpu.memory_space<vmem>>, vector<32x128xf32>,
    %c8_i32 = arith.constant 8 : i32
    %9 = arith.cmpi eq, %arg2, %c8_i32 : i32
    %10 = arith.extui %9 : i1 to i32
    %c0_i32_8 = arith.constant 0 : i32
    %11 = arith.cmpi ne, %10, %c0_i32_8 : i32
    scf.if %11 {
      %c0_9 = arith.constant 0 : index
      %c0_10 = arith.constant 0 : index
      %12 = vector.load %arg8[%c0_9, %c0_10] : memref<32x128xf32, #tpu.memory_space<vmem>>, vector<32x128xf32>
      %c0_11 = arith.constant 0 : index
      %c0_12 = arith.constant 0 : index
      %13 = vector.load %arg5[%c0_11, %c0_12] : memref<1x128xf32, #tpu.memory_space<vmem>>, vector<1x128xf32>
      %14 = vector.broadcast %13 : vector<1x128xf32> to vector<32x128xf32>
      %15 = arith.mulf %12, %14 : vector<32x128xf32>
      %c0_13 = arith.constant 0 : index
      %c0_14 = arith.constant 0 : index
      %16 = vector.load %arg6[%c0_13, %c0_14] : memref<1x128xf32, #tpu.memory_space<vmem>>, vector<1x128xf32>
      %17 = vector.broadcast %16 : vector<1x128xf32> to vector<32x128xf32>
      %18 = arith.addf %15, %17 : vector<32x128xf32>
      %cst_15 = arith.constant 0.000000e+00 : f32
      %19 = vector.broadcast %cst_15 : f32 to vector<32x128xf32>
      %20 = arith.maximumf %18, %19 : vector<32x128xf32>
      %c0_16 = arith.constant 0 : index
      %c0_17 = arith.constant 0 : index
      %21 = vector.load %arg7[%c0_16, %c0_17] : memref<32x128xf32, #tpu.memory_space<vmem>>, vector<32x128xf32>
      tpu.vector_store %arg7[%c0_16, %c0_17], %20 {strides = array<i32>} : memref<32x128xf32, #tpu.memory_space<vmem>>, vector<32x128xf32>,
    } else {
    }
    return
  }
  func.func @transform_0(%arg0: i32, %arg1: i32, %arg2: i32) -> (i32, i32) {
    %c0_i32 = arith.constant 0 : i32
    return %arg0, %arg2 : i32, i32
  }
  func.func @transform_1(%arg0: i32, %arg1: i32, %arg2: i32) -> (i32, i32) {
    %c0_i32 = arith.constant 0 : i32
    return %arg2, %arg1 : i32, i32
  }
  func.func @transform_2(%arg0: i32, %arg1: i32, %arg2: i32) -> (i32, i32) {
    %c0_i32 = arith.constant 0 : i32
    %c0_i32_0 = arith.constant 0 : i32
    return %c0_i32, %arg1 : i32, i32
  }
  func.func @transform_3(%arg0: i32, %arg1: i32, %arg2: i32) -> (i32, i32) {
    %c0_i32 = arith.constant 0 : i32
    %c0_i32_0 = arith.constant 0 : i32
    return %c0_i32, %arg1 : i32, i32
  }
  func.func @transform_4(%arg0: i32, %arg1: i32, %arg2: i32) -> (i32, i32) {
    %c0_i32 = arith.constant 0 : i32
    return %arg0, %arg1 : i32, i32
  }
}

module attributes {stable_mosaic.version = 11 : i64} {
  func.func @_matmul_affine_kernel(%arg0: i32, %arg1: i32, %arg2: i32, %arg3: memref<8x128xbf16, #tpu.memory_space<vmem>>, %arg4: memref<128x256xbf16, #tpu.memory_space<vmem>>, %arg5: memref<1x256xf32, #tpu.memory_space<vmem>>, %arg6: memref<1x256xf32, #tpu.memory_space<vmem>>, %arg7: memref<8x256xf32, #tpu.memory_space<vmem>>, %arg8: memref<8x256xf32, #tpu.memory_space<vmem>>) attributes {dimension_semantics = [#tpu.dimension_semantics<parallel>, #tpu.dimension_semantics<parallel>, #tpu.dimension_semantics<arbitrary>], iteration_bounds = array<i64: 1, 1, 9>, scalar_prefetch = 0 : i64, scratch_operands = 1 : i64, tpu.core_type = #tpu.core_type<tc>, window_params = [{transform_indices = @transform_0, window_bounds = array<i64: 8, 128>}, {transform_indices = @transform_1, window_bounds = array<i64: 128, 256>}, {transform_indices = @transform_2, window_bounds = array<i64: 1, 256>}, {transform_indices = @transform_3, window_bounds = array<i64: 1, 256>}, {transform_indices = @transform_4, window_bounds = array<i64: 8, 256>}]} {
    %c0_i32 = arith.constant 0 : i32
    %0 = arith.cmpi eq, %arg2, %c0_i32 : i32
    %1 = arith.extui %0 : i1 to i32
    %c0_i32_0 = arith.constant 0 : i32
    %2 = arith.cmpi ne, %1, %c0_i32_0 : i32
    scf.if %2 {
      %cst_9 = arith.constant 0.000000e+00 : f32
      %12 = vector.broadcast %cst_9 : f32 to vector<8x256xf32>
      %c0_10 = arith.constant 0 : index
      %c0_11 = arith.constant 0 : index
      %13 = vector.load %arg8[%c0_10, %c0_11] : memref<8x256xf32, #tpu.memory_space<vmem>>, vector<8x256xf32>
      tpu.vector_store %arg8[%c0_10, %c0_11], %12 {strides = array<i32>} : memref<8x256xf32, #tpu.memory_space<vmem>>, vector<8x256xf32>,
    } else {
    }
    %c0 = arith.constant 0 : index
    %c0_1 = arith.constant 0 : index
    %3 = vector.load %arg8[%c0, %c0_1] : memref<8x256xf32, #tpu.memory_space<vmem>>, vector<8x256xf32>
    %c0_2 = arith.constant 0 : index
    %c0_3 = arith.constant 0 : index
    %4 = vector.load %arg3[%c0_2, %c0_3] : memref<8x128xbf16, #tpu.memory_space<vmem>>, vector<8x128xbf16>
    %c0_4 = arith.constant 0 : index
    %c0_5 = arith.constant 0 : index
    %5 = vector.load %arg4[%c0_4, %c0_5] : memref<128x256xbf16, #tpu.memory_space<vmem>>, vector<128x256xbf16>
    %cst = arith.constant dense<0.000000e+00> : vector<8x256xf32>
    %6 = tpu.matmul %4, %5, %cst {dimension_numbers = #tpu.dot_dimension_numbers<[1], [0], [0], [1], [0, 0, 1, 1], [], []>} : vector<8x128xbf16>, vector<128x256xbf16>, vector<8x256xf32> -> vector<8x256xf32>
    %7 = arith.addf %3, %6 : vector<8x256xf32>
    %c0_6 = arith.constant 0 : index
    %c0_7 = arith.constant 0 : index
    %8 = vector.load %arg8[%c0_6, %c0_7] : memref<8x256xf32, #tpu.memory_space<vmem>>, vector<8x256xf32>
    tpu.vector_store %arg8[%c0_6, %c0_7], %7 {strides = array<i32>} : memref<8x256xf32, #tpu.memory_space<vmem>>, vector<8x256xf32>,
    %c8_i32 = arith.constant 8 : i32
    %9 = arith.cmpi eq, %arg2, %c8_i32 : i32
    %10 = arith.extui %9 : i1 to i32
    %c0_i32_8 = arith.constant 0 : i32
    %11 = arith.cmpi ne, %10, %c0_i32_8 : i32
    scf.if %11 {
      %c0_9 = arith.constant 0 : index
      %c0_10 = arith.constant 0 : index
      %12 = vector.load %arg8[%c0_9, %c0_10] : memref<8x256xf32, #tpu.memory_space<vmem>>, vector<8x256xf32>
      %c0_11 = arith.constant 0 : index
      %c0_12 = arith.constant 0 : index
      %13 = vector.load %arg5[%c0_11, %c0_12] : memref<1x256xf32, #tpu.memory_space<vmem>>, vector<1x256xf32>
      %14 = vector.broadcast %13 : vector<1x256xf32> to vector<8x256xf32>
      %15 = arith.mulf %12, %14 : vector<8x256xf32>
      %c0_13 = arith.constant 0 : index
      %c0_14 = arith.constant 0 : index
      %16 = vector.load %arg6[%c0_13, %c0_14] : memref<1x256xf32, #tpu.memory_space<vmem>>, vector<1x256xf32>
      %17 = vector.broadcast %16 : vector<1x256xf32> to vector<8x256xf32>
      %18 = arith.addf %15, %17 : vector<8x256xf32>
      %cst_15 = arith.constant 0.000000e+00 : f32
      %19 = vector.broadcast %cst_15 : f32 to vector<8x256xf32>
      %20 = arith.maximumf %18, %19 : vector<8x256xf32>
      %c0_16 = arith.constant 0 : index
      %c0_17 = arith.constant 0 : index
      %21 = vector.load %arg7[%c0_16, %c0_17] : memref<8x256xf32, #tpu.memory_space<vmem>>, vector<8x256xf32>
      tpu.vector_store %arg7[%c0_16, %c0_17], %20 {strides = array<i32>} : memref<8x256xf32, #tpu.memory_space<vmem>>, vector<8x256xf32>,
    } else {
    }
    return
  }
  func.func @transform_0(%arg0: i32, %arg1: i32, %arg2: i32) -> (i32, i32) {
    %c0_i32 = arith.constant 0 : i32
    return %arg0, %arg2 : i32, i32
  }
  func.func @transform_1(%arg0: i32, %arg1: i32, %arg2: i32) -> (i32, i32) {
    %c0_i32 = arith.constant 0 : i32
    return %arg2, %arg1 : i32, i32
  }
  func.func @transform_2(%arg0: i32, %arg1: i32, %arg2: i32) -> (i32, i32) {
    %c0_i32 = arith.constant 0 : i32
    %c0_i32_0 = arith.constant 0 : i32
    return %c0_i32, %arg1 : i32, i32
  }
  func.func @transform_3(%arg0: i32, %arg1: i32, %arg2: i32) -> (i32, i32) {
    %c0_i32 = arith.constant 0 : i32
    %c0_i32_0 = arith.constant 0 : i32
    return %c0_i32, %arg1 : i32, i32
  }
  func.func @transform_4(%arg0: i32, %arg1: i32, %arg2: i32) -> (i32, i32) {
    %c0_i32 = arith.constant 0 : i32
    return %arg0, %arg1 : i32, i32
  }
}

module attributes {stable_mosaic.version = 11 : i64} {
  func.func @_matmul_affine_kernel(%arg0: i32, %arg1: i32, %arg2: i32, %arg3: memref<8x256xbf16, #tpu.memory_space<vmem>>, %arg4: memref<256x256xbf16, #tpu.memory_space<vmem>>, %arg5: memref<1x256xf32, #tpu.memory_space<vmem>>, %arg6: memref<1x256xf32, #tpu.memory_space<vmem>>, %arg7: memref<8x256xf32, #tpu.memory_space<vmem>>, %arg8: memref<8x256xf32, #tpu.memory_space<vmem>>) attributes {dimension_semantics = [#tpu.dimension_semantics<parallel>, #tpu.dimension_semantics<parallel>, #tpu.dimension_semantics<arbitrary>], iteration_bounds = array<i64: 1, 1, 9>, scalar_prefetch = 0 : i64, scratch_operands = 1 : i64, tpu.core_type = #tpu.core_type<tc>, window_params = [{transform_indices = @transform_0, window_bounds = array<i64: 8, 256>}, {transform_indices = @transform_1, window_bounds = array<i64: 256, 256>}, {transform_indices = @transform_2, window_bounds = array<i64: 1, 256>}, {transform_indices = @transform_3, window_bounds = array<i64: 1, 256>}, {transform_indices = @transform_4, window_bounds = array<i64: 8, 256>}]} {
    %c0_i32 = arith.constant 0 : i32
    %0 = arith.cmpi eq, %arg2, %c0_i32 : i32
    %1 = arith.extui %0 : i1 to i32
    %c0_i32_0 = arith.constant 0 : i32
    %2 = arith.cmpi ne, %1, %c0_i32_0 : i32
    scf.if %2 {
      %cst_9 = arith.constant 0.000000e+00 : f32
      %12 = vector.broadcast %cst_9 : f32 to vector<8x256xf32>
      %c0_10 = arith.constant 0 : index
      %c0_11 = arith.constant 0 : index
      %13 = vector.load %arg8[%c0_10, %c0_11] : memref<8x256xf32, #tpu.memory_space<vmem>>, vector<8x256xf32>
      tpu.vector_store %arg8[%c0_10, %c0_11], %12 {strides = array<i32>} : memref<8x256xf32, #tpu.memory_space<vmem>>, vector<8x256xf32>,
    } else {
    }
    %c0 = arith.constant 0 : index
    %c0_1 = arith.constant 0 : index
    %3 = vector.load %arg8[%c0, %c0_1] : memref<8x256xf32, #tpu.memory_space<vmem>>, vector<8x256xf32>
    %c0_2 = arith.constant 0 : index
    %c0_3 = arith.constant 0 : index
    %4 = vector.load %arg3[%c0_2, %c0_3] : memref<8x256xbf16, #tpu.memory_space<vmem>>, vector<8x256xbf16>
    %c0_4 = arith.constant 0 : index
    %c0_5 = arith.constant 0 : index
    %5 = vector.load %arg4[%c0_4, %c0_5] : memref<256x256xbf16, #tpu.memory_space<vmem>>, vector<256x256xbf16>
    %cst = arith.constant dense<0.000000e+00> : vector<8x256xf32>
    %6 = tpu.matmul %4, %5, %cst {dimension_numbers = #tpu.dot_dimension_numbers<[1], [0], [0], [1], [0, 0, 1, 1], [], []>} : vector<8x256xbf16>, vector<256x256xbf16>, vector<8x256xf32> -> vector<8x256xf32>
    %7 = arith.addf %3, %6 : vector<8x256xf32>
    %c0_6 = arith.constant 0 : index
    %c0_7 = arith.constant 0 : index
    %8 = vector.load %arg8[%c0_6, %c0_7] : memref<8x256xf32, #tpu.memory_space<vmem>>, vector<8x256xf32>
    tpu.vector_store %arg8[%c0_6, %c0_7], %7 {strides = array<i32>} : memref<8x256xf32, #tpu.memory_space<vmem>>, vector<8x256xf32>,
    %c8_i32 = arith.constant 8 : i32
    %9 = arith.cmpi eq, %arg2, %c8_i32 : i32
    %10 = arith.extui %9 : i1 to i32
    %c0_i32_8 = arith.constant 0 : i32
    %11 = arith.cmpi ne, %10, %c0_i32_8 : i32
    scf.if %11 {
      %c0_9 = arith.constant 0 : index
      %c0_10 = arith.constant 0 : index
      %12 = vector.load %arg8[%c0_9, %c0_10] : memref<8x256xf32, #tpu.memory_space<vmem>>, vector<8x256xf32>
      %c0_11 = arith.constant 0 : index
      %c0_12 = arith.constant 0 : index
      %13 = vector.load %arg5[%c0_11, %c0_12] : memref<1x256xf32, #tpu.memory_space<vmem>>, vector<1x256xf32>
      %14 = vector.broadcast %13 : vector<1x256xf32> to vector<8x256xf32>
      %15 = arith.mulf %12, %14 : vector<8x256xf32>
      %c0_13 = arith.constant 0 : index
      %c0_14 = arith.constant 0 : index
      %16 = vector.load %arg6[%c0_13, %c0_14] : memref<1x256xf32, #tpu.memory_space<vmem>>, vector<1x256xf32>
      %17 = vector.broadcast %16 : vector<1x256xf32> to vector<8x256xf32>
      %18 = arith.addf %15, %17 : vector<8x256xf32>
      %cst_15 = arith.constant 0.000000e+00 : f32
      %19 = vector.broadcast %cst_15 : f32 to vector<8x256xf32>
      %20 = arith.maximumf %18, %19 : vector<8x256xf32>
      %c0_16 = arith.constant 0 : index
      %c0_17 = arith.constant 0 : index
      %21 = vector.load %arg7[%c0_16, %c0_17] : memref<8x256xf32, #tpu.memory_space<vmem>>, vector<8x256xf32>
      tpu.vector_store %arg7[%c0_16, %c0_17], %20 {strides = array<i32>} : memref<8x256xf32, #tpu.memory_space<vmem>>, vector<8x256xf32>,
    } else {
    }
    return
  }
  func.func @transform_0(%arg0: i32, %arg1: i32, %arg2: i32) -> (i32, i32) {
    %c0_i32 = arith.constant 0 : i32
    return %arg0, %arg2 : i32, i32
  }
  func.func @transform_1(%arg0: i32, %arg1: i32, %arg2: i32) -> (i32, i32) {
    %c0_i32 = arith.constant 0 : i32
    return %arg2, %arg1 : i32, i32
  }
  func.func @transform_2(%arg0: i32, %arg1: i32, %arg2: i32) -> (i32, i32) {
    %c0_i32 = arith.constant 0 : i32
    %c0_i32_0 = arith.constant 0 : i32
    return %c0_i32, %arg1 : i32, i32
  }
  func.func @transform_3(%arg0: i32, %arg1: i32, %arg2: i32) -> (i32, i32) {
    %c0_i32 = arith.constant 0 : i32
    %c0_i32_0 = arith.constant 0 : i32
    return %c0_i32, %arg1 : i32, i32
  }
  func.func @transform_4(%arg0: i32, %arg1: i32, %arg2: i32) -> (i32, i32) {
    %c0_i32 = arith.constant 0 : i32
    return %arg0, %arg1 : i32, i32
  }
}

module attributes {stable_mosaic.version = 11 : i64} {
  func.func @_matmul_affine_kernel(%arg0: i32, %arg1: i32, %arg2: i32, %arg3: memref<8x256xbf16, #tpu.memory_space<vmem>>, %arg4: memref<256x256xbf16, #tpu.memory_space<vmem>>, %arg5: memref<1x256xf32, #tpu.memory_space<vmem>>, %arg6: memref<1x256xf32, #tpu.memory_space<vmem>>, %arg7: memref<8x256xf32, #tpu.memory_space<vmem>>, %arg8: memref<8x256xf32, #tpu.memory_space<vmem>>, %arg9: memref<8x256xf32, #tpu.memory_space<vmem>>) attributes {dimension_semantics = [#tpu.dimension_semantics<parallel>, #tpu.dimension_semantics<parallel>, #tpu.dimension_semantics<arbitrary>], iteration_bounds = array<i64: 1, 1, 9>, scalar_prefetch = 0 : i64, scratch_operands = 1 : i64, tpu.core_type = #tpu.core_type<tc>, window_params = [{transform_indices = @transform_0, window_bounds = array<i64: 8, 256>}, {transform_indices = @transform_1, window_bounds = array<i64: 256, 256>}, {transform_indices = @transform_2, window_bounds = array<i64: 1, 256>}, {transform_indices = @transform_3, window_bounds = array<i64: 1, 256>}, {transform_indices = @transform_4, window_bounds = array<i64: 8, 256>}, {transform_indices = @transform_5, window_bounds = array<i64: 8, 256>}]} {
    %c0_i32 = arith.constant 0 : i32
    %0 = arith.cmpi eq, %arg2, %c0_i32 : i32
    %1 = arith.extui %0 : i1 to i32
    %c0_i32_0 = arith.constant 0 : i32
    %2 = arith.cmpi ne, %1, %c0_i32_0 : i32
    scf.if %2 {
      %cst_9 = arith.constant 0.000000e+00 : f32
      %12 = vector.broadcast %cst_9 : f32 to vector<8x256xf32>
      %c0_10 = arith.constant 0 : index
      %c0_11 = arith.constant 0 : index
      %13 = vector.load %arg9[%c0_10, %c0_11] : memref<8x256xf32, #tpu.memory_space<vmem>>, vector<8x256xf32>
      tpu.vector_store %arg9[%c0_10, %c0_11], %12 {strides = array<i32>} : memref<8x256xf32, #tpu.memory_space<vmem>>, vector<8x256xf32>,
    } else {
    }
    %c0 = arith.constant 0 : index
    %c0_1 = arith.constant 0 : index
    %3 = vector.load %arg9[%c0, %c0_1] : memref<8x256xf32, #tpu.memory_space<vmem>>, vector<8x256xf32>
    %c0_2 = arith.constant 0 : index
    %c0_3 = arith.constant 0 : index
    %4 = vector.load %arg3[%c0_2, %c0_3] : memref<8x256xbf16, #tpu.memory_space<vmem>>, vector<8x256xbf16>
    %c0_4 = arith.constant 0 : index
    %c0_5 = arith.constant 0 : index
    %5 = vector.load %arg4[%c0_4, %c0_5] : memref<256x256xbf16, #tpu.memory_space<vmem>>, vector<256x256xbf16>
    %cst = arith.constant dense<0.000000e+00> : vector<8x256xf32>
    %6 = tpu.matmul %4, %5, %cst {dimension_numbers = #tpu.dot_dimension_numbers<[1], [0], [0], [1], [0, 0, 1, 1], [], []>} : vector<8x256xbf16>, vector<256x256xbf16>, vector<8x256xf32> -> vector<8x256xf32>
    %7 = arith.addf %3, %6 : vector<8x256xf32>
    %c0_6 = arith.constant 0 : index
    %c0_7 = arith.constant 0 : index
    %8 = vector.load %arg9[%c0_6, %c0_7] : memref<8x256xf32, #tpu.memory_space<vmem>>, vector<8x256xf32>
    tpu.vector_store %arg9[%c0_6, %c0_7], %7 {strides = array<i32>} : memref<8x256xf32, #tpu.memory_space<vmem>>, vector<8x256xf32>,
    %c8_i32 = arith.constant 8 : i32
    %9 = arith.cmpi eq, %arg2, %c8_i32 : i32
    %10 = arith.extui %9 : i1 to i32
    %c0_i32_8 = arith.constant 0 : i32
    %11 = arith.cmpi ne, %10, %c0_i32_8 : i32
    scf.if %11 {
      %c0_9 = arith.constant 0 : index
      %c0_10 = arith.constant 0 : index
      %12 = vector.load %arg9[%c0_9, %c0_10] : memref<8x256xf32, #tpu.memory_space<vmem>>, vector<8x256xf32>
      %c0_11 = arith.constant 0 : index
      %c0_12 = arith.constant 0 : index
      %13 = vector.load %arg5[%c0_11, %c0_12] : memref<1x256xf32, #tpu.memory_space<vmem>>, vector<1x256xf32>
      %14 = vector.broadcast %13 : vector<1x256xf32> to vector<8x256xf32>
      %15 = arith.mulf %12, %14 : vector<8x256xf32>
      %c0_13 = arith.constant 0 : index
      %c0_14 = arith.constant 0 : index
      %16 = vector.load %arg6[%c0_13, %c0_14] : memref<1x256xf32, #tpu.memory_space<vmem>>, vector<1x256xf32>
      %17 = vector.broadcast %16 : vector<1x256xf32> to vector<8x256xf32>
      %18 = arith.addf %15, %17 : vector<8x256xf32>
      %c0_15 = arith.constant 0 : index
      %c0_16 = arith.constant 0 : index
      %19 = vector.load %arg7[%c0_15, %c0_16] : memref<8x256xf32, #tpu.memory_space<vmem>>, vector<8x256xf32>
      %20 = arith.addf %18, %19 : vector<8x256xf32>
      %cst_17 = arith.constant 0.000000e+00 : f32
      %21 = vector.broadcast %cst_17 : f32 to vector<8x256xf32>
      %22 = arith.maximumf %20, %21 : vector<8x256xf32>
      %c0_18 = arith.constant 0 : index
      %c0_19 = arith.constant 0 : index
      %23 = vector.load %arg8[%c0_18, %c0_19] : memref<8x256xf32, #tpu.memory_space<vmem>>, vector<8x256xf32>
      tpu.vector_store %arg8[%c0_18, %c0_19], %22 {strides = array<i32>} : memref<8x256xf32, #tpu.memory_space<vmem>>, vector<8x256xf32>,
    } else {
    }
    return
  }
  func.func @transform_0(%arg0: i32, %arg1: i32, %arg2: i32) -> (i32, i32) {
    %c0_i32 = arith.constant 0 : i32
    return %arg0, %arg2 : i32, i32
  }
  func.func @transform_1(%arg0: i32, %arg1: i32, %arg2: i32) -> (i32, i32) {
    %c0_i32 = arith.constant 0 : i32
    return %arg2, %arg1 : i32, i32
  }
  func.func @transform_2(%arg0: i32, %arg1: i32, %arg2: i32) -> (i32, i32) {
    %c0_i32 = arith.constant 0 : i32
    %c0_i32_0 = arith.constant 0 : i32
    return %c0_i32, %arg1 : i32, i32
  }
  func.func @transform_3(%arg0: i32, %arg1: i32, %arg2: i32) -> (i32, i32) {
    %c0_i32 = arith.constant 0 : i32
    %c0_i32_0 = arith.constant 0 : i32
    return %c0_i32, %arg1 : i32, i32
  }
  func.func @transform_4(%arg0: i32, %arg1: i32, %arg2: i32) -> (i32, i32) {
    %c0_i32 = arith.constant 0 : i32
    return %arg0, %arg1 : i32, i32
  }
  func.func @transform_5(%arg0: i32, %arg1: i32, %arg2: i32) -> (i32, i32) {
    %c0_i32 = arith.constant 0 : i32
    return %arg0, %arg1 : i32, i32
  }
}

module attributes {stable_mosaic.version = 11 : i64} {
  func.func @_matmul_affine_kernel(%arg0: i32, %arg1: i32, %arg2: i32, %arg3: memref<8x128xbf16, #tpu.memory_space<vmem>>, %arg4: memref<128x256xbf16, #tpu.memory_space<vmem>>, %arg5: memref<1x256xf32, #tpu.memory_space<vmem>>, %arg6: memref<1x256xf32, #tpu.memory_space<vmem>>, %arg7: memref<8x256xf32, #tpu.memory_space<vmem>>, %arg8: memref<8x256xf32, #tpu.memory_space<vmem>>) attributes {dimension_semantics = [#tpu.dimension_semantics<parallel>, #tpu.dimension_semantics<parallel>, #tpu.dimension_semantics<arbitrary>], iteration_bounds = array<i64: 1, 1, 1>, scalar_prefetch = 0 : i64, scratch_operands = 1 : i64, tpu.core_type = #tpu.core_type<tc>, window_params = [{transform_indices = @transform_0, window_bounds = array<i64: 8, 128>}, {transform_indices = @transform_1, window_bounds = array<i64: 128, 256>}, {transform_indices = @transform_2, window_bounds = array<i64: 1, 256>}, {transform_indices = @transform_3, window_bounds = array<i64: 1, 256>}, {transform_indices = @transform_4, window_bounds = array<i64: 8, 256>}]} {
    %c0_i32 = arith.constant 0 : i32
    %0 = arith.cmpi eq, %arg2, %c0_i32 : i32
    %1 = arith.extui %0 : i1 to i32
    %c0_i32_0 = arith.constant 0 : i32
    %2 = arith.cmpi ne, %1, %c0_i32_0 : i32
    scf.if %2 {
      %cst_10 = arith.constant 0.000000e+00 : f32
      %12 = vector.broadcast %cst_10 : f32 to vector<8x256xf32>
      %c0_11 = arith.constant 0 : index
      %c0_12 = arith.constant 0 : index
      %13 = vector.load %arg8[%c0_11, %c0_12] : memref<8x256xf32, #tpu.memory_space<vmem>>, vector<8x256xf32>
      tpu.vector_store %arg8[%c0_11, %c0_12], %12 {strides = array<i32>} : memref<8x256xf32, #tpu.memory_space<vmem>>, vector<8x256xf32>,
    } else {
    }
    %c0 = arith.constant 0 : index
    %c0_1 = arith.constant 0 : index
    %3 = vector.load %arg8[%c0, %c0_1] : memref<8x256xf32, #tpu.memory_space<vmem>>, vector<8x256xf32>
    %c0_2 = arith.constant 0 : index
    %c0_3 = arith.constant 0 : index
    %4 = vector.load %arg3[%c0_2, %c0_3] : memref<8x128xbf16, #tpu.memory_space<vmem>>, vector<8x128xbf16>
    %c0_4 = arith.constant 0 : index
    %c0_5 = arith.constant 0 : index
    %5 = vector.load %arg4[%c0_4, %c0_5] : memref<128x256xbf16, #tpu.memory_space<vmem>>, vector<128x256xbf16>
    %cst = arith.constant dense<0.000000e+00> : vector<8x256xf32>
    %6 = tpu.matmul %4, %5, %cst {dimension_numbers = #tpu.dot_dimension_numbers<[1], [0], [0], [1], [0, 0, 1, 1], [], []>} : vector<8x128xbf16>, vector<128x256xbf16>, vector<8x256xf32> -> vector<8x256xf32>
    %7 = arith.addf %3, %6 : vector<8x256xf32>
    %c0_6 = arith.constant 0 : index
    %c0_7 = arith.constant 0 : index
    %8 = vector.load %arg8[%c0_6, %c0_7] : memref<8x256xf32, #tpu.memory_space<vmem>>, vector<8x256xf32>
    tpu.vector_store %arg8[%c0_6, %c0_7], %7 {strides = array<i32>} : memref<8x256xf32, #tpu.memory_space<vmem>>, vector<8x256xf32>,
    %c0_i32_8 = arith.constant 0 : i32
    %9 = arith.cmpi eq, %arg2, %c0_i32_8 : i32
    %10 = arith.extui %9 : i1 to i32
    %c0_i32_9 = arith.constant 0 : i32
    %11 = arith.cmpi ne, %10, %c0_i32_9 : i32
    scf.if %11 {
      %c0_10 = arith.constant 0 : index
      %c0_11 = arith.constant 0 : index
      %12 = vector.load %arg8[%c0_10, %c0_11] : memref<8x256xf32, #tpu.memory_space<vmem>>, vector<8x256xf32>
      %c0_12 = arith.constant 0 : index
      %c0_13 = arith.constant 0 : index
      %13 = vector.load %arg5[%c0_12, %c0_13] : memref<1x256xf32, #tpu.memory_space<vmem>>, vector<1x256xf32>
      %14 = vector.broadcast %13 : vector<1x256xf32> to vector<8x256xf32>
      %15 = arith.mulf %12, %14 : vector<8x256xf32>
      %c0_14 = arith.constant 0 : index
      %c0_15 = arith.constant 0 : index
      %16 = vector.load %arg6[%c0_14, %c0_15] : memref<1x256xf32, #tpu.memory_space<vmem>>, vector<1x256xf32>
      %17 = vector.broadcast %16 : vector<1x256xf32> to vector<8x256xf32>
      %18 = arith.addf %15, %17 : vector<8x256xf32>
      %c0_16 = arith.constant 0 : index
      %c0_17 = arith.constant 0 : index
      %19 = vector.load %arg7[%c0_16, %c0_17] : memref<8x256xf32, #tpu.memory_space<vmem>>, vector<8x256xf32>
      tpu.vector_store %arg7[%c0_16, %c0_17], %18 {strides = array<i32>} : memref<8x256xf32, #tpu.memory_space<vmem>>, vector<8x256xf32>,
    } else {
    }
    return
  }
  func.func @transform_0(%arg0: i32, %arg1: i32, %arg2: i32) -> (i32, i32) {
    %c0_i32 = arith.constant 0 : i32
    return %arg0, %arg2 : i32, i32
  }
  func.func @transform_1(%arg0: i32, %arg1: i32, %arg2: i32) -> (i32, i32) {
    %c0_i32 = arith.constant 0 : i32
    return %arg2, %arg1 : i32, i32
  }
  func.func @transform_2(%arg0: i32, %arg1: i32, %arg2: i32) -> (i32, i32) {
    %c0_i32 = arith.constant 0 : i32
    %c0_i32_0 = arith.constant 0 : i32
    return %c0_i32, %arg1 : i32, i32
  }
  func.func @transform_3(%arg0: i32, %arg1: i32, %arg2: i32) -> (i32, i32) {
    %c0_i32 = arith.constant 0 : i32
    %c0_i32_0 = arith.constant 0 : i32
    return %c0_i32, %arg1 : i32, i32
  }
  func.func @transform_4(%arg0: i32, %arg1: i32, %arg2: i32) -> (i32, i32) {
    %c0_i32 = arith.constant 0 : i32
    return %arg0, %arg1 : i32, i32
  }
}

module attributes {stable_mosaic.version = 11 : i64} {
  func.func @_matmul_affine_kernel(%arg0: i32, %arg1: i32, %arg2: i32, %arg3: memref<8x256xbf16, #tpu.memory_space<vmem>>, %arg4: memref<256x512xbf16, #tpu.memory_space<vmem>>, %arg5: memref<1x512xf32, #tpu.memory_space<vmem>>, %arg6: memref<1x512xf32, #tpu.memory_space<vmem>>, %arg7: memref<8x512xf32, #tpu.memory_space<vmem>>, %arg8: memref<8x512xf32, #tpu.memory_space<vmem>>) attributes {dimension_semantics = [#tpu.dimension_semantics<parallel>, #tpu.dimension_semantics<parallel>, #tpu.dimension_semantics<arbitrary>], iteration_bounds = array<i64: 1, 1, 9>, scalar_prefetch = 0 : i64, scratch_operands = 1 : i64, tpu.core_type = #tpu.core_type<tc>, window_params = [{transform_indices = @transform_0, window_bounds = array<i64: 8, 256>}, {transform_indices = @transform_1, window_bounds = array<i64: 256, 512>}, {transform_indices = @transform_2, window_bounds = array<i64: 1, 512>}, {transform_indices = @transform_3, window_bounds = array<i64: 1, 512>}, {transform_indices = @transform_4, window_bounds = array<i64: 8, 512>}]} {
    %c0_i32 = arith.constant 0 : i32
    %0 = arith.cmpi eq, %arg2, %c0_i32 : i32
    %1 = arith.extui %0 : i1 to i32
    %c0_i32_0 = arith.constant 0 : i32
    %2 = arith.cmpi ne, %1, %c0_i32_0 : i32
    scf.if %2 {
      %cst_9 = arith.constant 0.000000e+00 : f32
      %12 = vector.broadcast %cst_9 : f32 to vector<8x512xf32>
      %c0_10 = arith.constant 0 : index
      %c0_11 = arith.constant 0 : index
      %13 = vector.load %arg8[%c0_10, %c0_11] : memref<8x512xf32, #tpu.memory_space<vmem>>, vector<8x512xf32>
      tpu.vector_store %arg8[%c0_10, %c0_11], %12 {strides = array<i32>} : memref<8x512xf32, #tpu.memory_space<vmem>>, vector<8x512xf32>,
    } else {
    }
    %c0 = arith.constant 0 : index
    %c0_1 = arith.constant 0 : index
    %3 = vector.load %arg8[%c0, %c0_1] : memref<8x512xf32, #tpu.memory_space<vmem>>, vector<8x512xf32>
    %c0_2 = arith.constant 0 : index
    %c0_3 = arith.constant 0 : index
    %4 = vector.load %arg3[%c0_2, %c0_3] : memref<8x256xbf16, #tpu.memory_space<vmem>>, vector<8x256xbf16>
    %c0_4 = arith.constant 0 : index
    %c0_5 = arith.constant 0 : index
    %5 = vector.load %arg4[%c0_4, %c0_5] : memref<256x512xbf16, #tpu.memory_space<vmem>>, vector<256x512xbf16>
    %cst = arith.constant dense<0.000000e+00> : vector<8x512xf32>
    %6 = tpu.matmul %4, %5, %cst {dimension_numbers = #tpu.dot_dimension_numbers<[1], [0], [0], [1], [0, 0, 1, 1], [], []>} : vector<8x256xbf16>, vector<256x512xbf16>, vector<8x512xf32> -> vector<8x512xf32>
    %7 = arith.addf %3, %6 : vector<8x512xf32>
    %c0_6 = arith.constant 0 : index
    %c0_7 = arith.constant 0 : index
    %8 = vector.load %arg8[%c0_6, %c0_7] : memref<8x512xf32, #tpu.memory_space<vmem>>, vector<8x512xf32>
    tpu.vector_store %arg8[%c0_6, %c0_7], %7 {strides = array<i32>} : memref<8x512xf32, #tpu.memory_space<vmem>>, vector<8x512xf32>,
    %c8_i32 = arith.constant 8 : i32
    %9 = arith.cmpi eq, %arg2, %c8_i32 : i32
    %10 = arith.extui %9 : i1 to i32
    %c0_i32_8 = arith.constant 0 : i32
    %11 = arith.cmpi ne, %10, %c0_i32_8 : i32
    scf.if %11 {
      %c0_9 = arith.constant 0 : index
      %c0_10 = arith.constant 0 : index
      %12 = vector.load %arg8[%c0_9, %c0_10] : memref<8x512xf32, #tpu.memory_space<vmem>>, vector<8x512xf32>
      %c0_11 = arith.constant 0 : index
      %c0_12 = arith.constant 0 : index
      %13 = vector.load %arg5[%c0_11, %c0_12] : memref<1x512xf32, #tpu.memory_space<vmem>>, vector<1x512xf32>
      %14 = vector.broadcast %13 : vector<1x512xf32> to vector<8x512xf32>
      %15 = arith.mulf %12, %14 : vector<8x512xf32>
      %c0_13 = arith.constant 0 : index
      %c0_14 = arith.constant 0 : index
      %16 = vector.load %arg6[%c0_13, %c0_14] : memref<1x512xf32, #tpu.memory_space<vmem>>, vector<1x512xf32>
      %17 = vector.broadcast %16 : vector<1x512xf32> to vector<8x512xf32>
      %18 = arith.addf %15, %17 : vector<8x512xf32>
      %cst_15 = arith.constant 0.000000e+00 : f32
      %19 = vector.broadcast %cst_15 : f32 to vector<8x512xf32>
      %20 = arith.maximumf %18, %19 : vector<8x512xf32>
      %c0_16 = arith.constant 0 : index
      %c0_17 = arith.constant 0 : index
      %21 = vector.load %arg7[%c0_16, %c0_17] : memref<8x512xf32, #tpu.memory_space<vmem>>, vector<8x512xf32>
      tpu.vector_store %arg7[%c0_16, %c0_17], %20 {strides = array<i32>} : memref<8x512xf32, #tpu.memory_space<vmem>>, vector<8x512xf32>,
    } else {
    }
    return
  }
  func.func @transform_0(%arg0: i32, %arg1: i32, %arg2: i32) -> (i32, i32) {
    %c0_i32 = arith.constant 0 : i32
    return %arg0, %arg2 : i32, i32
  }
  func.func @transform_1(%arg0: i32, %arg1: i32, %arg2: i32) -> (i32, i32) {
    %c0_i32 = arith.constant 0 : i32
    return %arg2, %arg1 : i32, i32
  }
  func.func @transform_2(%arg0: i32, %arg1: i32, %arg2: i32) -> (i32, i32) {
    %c0_i32 = arith.constant 0 : i32
    %c0_i32_0 = arith.constant 0 : i32
    return %c0_i32, %arg1 : i32, i32
  }
  func.func @transform_3(%arg0: i32, %arg1: i32, %arg2: i32) -> (i32, i32) {
    %c0_i32 = arith.constant 0 : i32
    %c0_i32_0 = arith.constant 0 : i32
    return %c0_i32, %arg1 : i32, i32
  }
  func.func @transform_4(%arg0: i32, %arg1: i32, %arg2: i32) -> (i32, i32) {
    %c0_i32 = arith.constant 0 : i32
    return %arg0, %arg1 : i32, i32
  }
}

module attributes {stable_mosaic.version = 11 : i64} {
  func.func @_matmul_affine_kernel(%arg0: i32, %arg1: i32, %arg2: i32, %arg3: memref<8x256xbf16, #tpu.memory_space<vmem>>, %arg4: memref<256x512xbf16, #tpu.memory_space<vmem>>, %arg5: memref<1x512xf32, #tpu.memory_space<vmem>>, %arg6: memref<1x512xf32, #tpu.memory_space<vmem>>, %arg7: memref<8x512xf32, #tpu.memory_space<vmem>>, %arg8: memref<8x512xf32, #tpu.memory_space<vmem>>) attributes {dimension_semantics = [#tpu.dimension_semantics<parallel>, #tpu.dimension_semantics<parallel>, #tpu.dimension_semantics<arbitrary>], iteration_bounds = array<i64: 1, 1, 1>, scalar_prefetch = 0 : i64, scratch_operands = 1 : i64, tpu.core_type = #tpu.core_type<tc>, window_params = [{transform_indices = @transform_0, window_bounds = array<i64: 8, 256>}, {transform_indices = @transform_1, window_bounds = array<i64: 256, 512>}, {transform_indices = @transform_2, window_bounds = array<i64: 1, 512>}, {transform_indices = @transform_3, window_bounds = array<i64: 1, 512>}, {transform_indices = @transform_4, window_bounds = array<i64: 8, 512>}]} {
    %c0_i32 = arith.constant 0 : i32
    %0 = arith.cmpi eq, %arg2, %c0_i32 : i32
    %1 = arith.extui %0 : i1 to i32
    %c0_i32_0 = arith.constant 0 : i32
    %2 = arith.cmpi ne, %1, %c0_i32_0 : i32
    scf.if %2 {
      %cst_10 = arith.constant 0.000000e+00 : f32
      %12 = vector.broadcast %cst_10 : f32 to vector<8x512xf32>
      %c0_11 = arith.constant 0 : index
      %c0_12 = arith.constant 0 : index
      %13 = vector.load %arg8[%c0_11, %c0_12] : memref<8x512xf32, #tpu.memory_space<vmem>>, vector<8x512xf32>
      tpu.vector_store %arg8[%c0_11, %c0_12], %12 {strides = array<i32>} : memref<8x512xf32, #tpu.memory_space<vmem>>, vector<8x512xf32>,
    } else {
    }
    %c0 = arith.constant 0 : index
    %c0_1 = arith.constant 0 : index
    %3 = vector.load %arg8[%c0, %c0_1] : memref<8x512xf32, #tpu.memory_space<vmem>>, vector<8x512xf32>
    %c0_2 = arith.constant 0 : index
    %c0_3 = arith.constant 0 : index
    %4 = vector.load %arg3[%c0_2, %c0_3] : memref<8x256xbf16, #tpu.memory_space<vmem>>, vector<8x256xbf16>
    %c0_4 = arith.constant 0 : index
    %c0_5 = arith.constant 0 : index
    %5 = vector.load %arg4[%c0_4, %c0_5] : memref<256x512xbf16, #tpu.memory_space<vmem>>, vector<256x512xbf16>
    %cst = arith.constant dense<0.000000e+00> : vector<8x512xf32>
    %6 = tpu.matmul %4, %5, %cst {dimension_numbers = #tpu.dot_dimension_numbers<[1], [0], [0], [1], [0, 0, 1, 1], [], []>} : vector<8x256xbf16>, vector<256x512xbf16>, vector<8x512xf32> -> vector<8x512xf32>
    %7 = arith.addf %3, %6 : vector<8x512xf32>
    %c0_6 = arith.constant 0 : index
    %c0_7 = arith.constant 0 : index
    %8 = vector.load %arg8[%c0_6, %c0_7] : memref<8x512xf32, #tpu.memory_space<vmem>>, vector<8x512xf32>
    tpu.vector_store %arg8[%c0_6, %c0_7], %7 {strides = array<i32>} : memref<8x512xf32, #tpu.memory_space<vmem>>, vector<8x512xf32>,
    %c0_i32_8 = arith.constant 0 : i32
    %9 = arith.cmpi eq, %arg2, %c0_i32_8 : i32
    %10 = arith.extui %9 : i1 to i32
    %c0_i32_9 = arith.constant 0 : i32
    %11 = arith.cmpi ne, %10, %c0_i32_9 : i32
    scf.if %11 {
      %c0_10 = arith.constant 0 : index
      %c0_11 = arith.constant 0 : index
      %12 = vector.load %arg8[%c0_10, %c0_11] : memref<8x512xf32, #tpu.memory_space<vmem>>, vector<8x512xf32>
      %c0_12 = arith.constant 0 : index
      %c0_13 = arith.constant 0 : index
      %13 = vector.load %arg5[%c0_12, %c0_13] : memref<1x512xf32, #tpu.memory_space<vmem>>, vector<1x512xf32>
      %14 = vector.broadcast %13 : vector<1x512xf32> to vector<8x512xf32>
      %15 = arith.mulf %12, %14 : vector<8x512xf32>
      %c0_14 = arith.constant 0 : index
      %c0_15 = arith.constant 0 : index
      %16 = vector.load %arg6[%c0_14, %c0_15] : memref<1x512xf32, #tpu.memory_space<vmem>>, vector<1x512xf32>
      %17 = vector.broadcast %16 : vector<1x512xf32> to vector<8x512xf32>
      %18 = arith.addf %15, %17 : vector<8x512xf32>
      %c0_16 = arith.constant 0 : index
      %c0_17 = arith.constant 0 : index
      %19 = vector.load %arg7[%c0_16, %c0_17] : memref<8x512xf32, #tpu.memory_space<vmem>>, vector<8x512xf32>
      tpu.vector_store %arg7[%c0_16, %c0_17], %18 {strides = array<i32>} : memref<8x512xf32, #tpu.memory_space<vmem>>, vector<8x512xf32>,
    } else {
    }
    return
  }
  func.func @transform_0(%arg0: i32, %arg1: i32, %arg2: i32) -> (i32, i32) {
    %c0_i32 = arith.constant 0 : i32
    return %arg0, %arg2 : i32, i32
  }
  func.func @transform_1(%arg0: i32, %arg1: i32, %arg2: i32) -> (i32, i32) {
    %c0_i32 = arith.constant 0 : i32
    return %arg2, %arg1 : i32, i32
  }
  func.func @transform_2(%arg0: i32, %arg1: i32, %arg2: i32) -> (i32, i32) {
    %c0_i32 = arith.constant 0 : i32
    %c0_i32_0 = arith.constant 0 : i32
    return %c0_i32, %arg1 : i32, i32
  }
  func.func @transform_3(%arg0: i32, %arg1: i32, %arg2: i32) -> (i32, i32) {
    %c0_i32 = arith.constant 0 : i32
    %c0_i32_0 = arith.constant 0 : i32
    return %c0_i32, %arg1 : i32, i32
  }
  func.func @transform_4(%arg0: i32, %arg1: i32, %arg2: i32) -> (i32, i32) {
    %c0_i32 = arith.constant 0 : i32
    return %arg0, %arg1 : i32, i32
  }
}

module attributes {stable_mosaic.version = 11 : i64} {
  func.func @_matmul_affine_kernel(%arg0: i32, %arg1: i32, %arg2: i32, %arg3: memref<8x512xbf16, #tpu.memory_space<vmem>>, %arg4: memref<512x512xbf16, #tpu.memory_space<vmem>>, %arg5: memref<1x512xf32, #tpu.memory_space<vmem>>, %arg6: memref<1x512xf32, #tpu.memory_space<vmem>>, %arg7: memref<8x512xf32, #tpu.memory_space<vmem>>, %arg8: memref<8x512xf32, #tpu.memory_space<vmem>>, %arg9: memref<8x512xf32, #tpu.memory_space<vmem>>) attributes {dimension_semantics = [#tpu.dimension_semantics<parallel>, #tpu.dimension_semantics<parallel>, #tpu.dimension_semantics<arbitrary>], iteration_bounds = array<i64: 1, 1, 9>, scalar_prefetch = 0 : i64, scratch_operands = 1 : i64, tpu.core_type = #tpu.core_type<tc>, window_params = [{transform_indices = @transform_0, window_bounds = array<i64: 8, 512>}, {transform_indices = @transform_1, window_bounds = array<i64: 512, 512>}, {transform_indices = @transform_2, window_bounds = array<i64: 1, 512>}, {transform_indices = @transform_3, window_bounds = array<i64: 1, 512>}, {transform_indices = @transform_4, window_bounds = array<i64: 8, 512>}, {transform_indices = @transform_5, window_bounds = array<i64: 8, 512>}]} {
    %c0_i32 = arith.constant 0 : i32
    %0 = arith.cmpi eq, %arg2, %c0_i32 : i32
    %1 = arith.extui %0 : i1 to i32
    %c0_i32_0 = arith.constant 0 : i32
    %2 = arith.cmpi ne, %1, %c0_i32_0 : i32
    scf.if %2 {
      %cst_9 = arith.constant 0.000000e+00 : f32
      %12 = vector.broadcast %cst_9 : f32 to vector<8x512xf32>
      %c0_10 = arith.constant 0 : index
      %c0_11 = arith.constant 0 : index
      %13 = vector.load %arg9[%c0_10, %c0_11] : memref<8x512xf32, #tpu.memory_space<vmem>>, vector<8x512xf32>
      tpu.vector_store %arg9[%c0_10, %c0_11], %12 {strides = array<i32>} : memref<8x512xf32, #tpu.memory_space<vmem>>, vector<8x512xf32>,
    } else {
    }
    %c0 = arith.constant 0 : index
    %c0_1 = arith.constant 0 : index
    %3 = vector.load %arg9[%c0, %c0_1] : memref<8x512xf32, #tpu.memory_space<vmem>>, vector<8x512xf32>
    %c0_2 = arith.constant 0 : index
    %c0_3 = arith.constant 0 : index
    %4 = vector.load %arg3[%c0_2, %c0_3] : memref<8x512xbf16, #tpu.memory_space<vmem>>, vector<8x512xbf16>
    %c0_4 = arith.constant 0 : index
    %c0_5 = arith.constant 0 : index
    %5 = vector.load %arg4[%c0_4, %c0_5] : memref<512x512xbf16, #tpu.memory_space<vmem>>, vector<512x512xbf16>
    %cst = arith.constant dense<0.000000e+00> : vector<8x512xf32>
    %6 = tpu.matmul %4, %5, %cst {dimension_numbers = #tpu.dot_dimension_numbers<[1], [0], [0], [1], [0, 0, 1, 1], [], []>} : vector<8x512xbf16>, vector<512x512xbf16>, vector<8x512xf32> -> vector<8x512xf32>
    %7 = arith.addf %3, %6 : vector<8x512xf32>
    %c0_6 = arith.constant 0 : index
    %c0_7 = arith.constant 0 : index
    %8 = vector.load %arg9[%c0_6, %c0_7] : memref<8x512xf32, #tpu.memory_space<vmem>>, vector<8x512xf32>
    tpu.vector_store %arg9[%c0_6, %c0_7], %7 {strides = array<i32>} : memref<8x512xf32, #tpu.memory_space<vmem>>, vector<8x512xf32>,
    %c8_i32 = arith.constant 8 : i32
    %9 = arith.cmpi eq, %arg2, %c8_i32 : i32
    %10 = arith.extui %9 : i1 to i32
    %c0_i32_8 = arith.constant 0 : i32
    %11 = arith.cmpi ne, %10, %c0_i32_8 : i32
    scf.if %11 {
      %c0_9 = arith.constant 0 : index
      %c0_10 = arith.constant 0 : index
      %12 = vector.load %arg9[%c0_9, %c0_10] : memref<8x512xf32, #tpu.memory_space<vmem>>, vector<8x512xf32>
      %c0_11 = arith.constant 0 : index
      %c0_12 = arith.constant 0 : index
      %13 = vector.load %arg5[%c0_11, %c0_12] : memref<1x512xf32, #tpu.memory_space<vmem>>, vector<1x512xf32>
      %14 = vector.broadcast %13 : vector<1x512xf32> to vector<8x512xf32>
      %15 = arith.mulf %12, %14 : vector<8x512xf32>
      %c0_13 = arith.constant 0 : index
      %c0_14 = arith.constant 0 : index
      %16 = vector.load %arg6[%c0_13, %c0_14] : memref<1x512xf32, #tpu.memory_space<vmem>>, vector<1x512xf32>
      %17 = vector.broadcast %16 : vector<1x512xf32> to vector<8x512xf32>
      %18 = arith.addf %15, %17 : vector<8x512xf32>
      %c0_15 = arith.constant 0 : index
      %c0_16 = arith.constant 0 : index
      %19 = vector.load %arg7[%c0_15, %c0_16] : memref<8x512xf32, #tpu.memory_space<vmem>>, vector<8x512xf32>
      %20 = arith.addf %18, %19 : vector<8x512xf32>
      %cst_17 = arith.constant 0.000000e+00 : f32
      %21 = vector.broadcast %cst_17 : f32 to vector<8x512xf32>
      %22 = arith.maximumf %20, %21 : vector<8x512xf32>
      %c0_18 = arith.constant 0 : index
      %c0_19 = arith.constant 0 : index
      %23 = vector.load %arg8[%c0_18, %c0_19] : memref<8x512xf32, #tpu.memory_space<vmem>>, vector<8x512xf32>
      tpu.vector_store %arg8[%c0_18, %c0_19], %22 {strides = array<i32>} : memref<8x512xf32, #tpu.memory_space<vmem>>, vector<8x512xf32>,
    } else {
    }
    return
  }
  func.func @transform_0(%arg0: i32, %arg1: i32, %arg2: i32) -> (i32, i32) {
    %c0_i32 = arith.constant 0 : i32
    return %arg0, %arg2 : i32, i32
  }
  func.func @transform_1(%arg0: i32, %arg1: i32, %arg2: i32) -> (i32, i32) {
    %c0_i32 = arith.constant 0 : i32
    return %arg2, %arg1 : i32, i32
  }
  func.func @transform_2(%arg0: i32, %arg1: i32, %arg2: i32) -> (i32, i32) {
    %c0_i32 = arith.constant 0 : i32
    %c0_i32_0 = arith.constant 0 : i32
    return %c0_i32, %arg1 : i32, i32
  }
  func.func @transform_3(%arg0: i32, %arg1: i32, %arg2: i32) -> (i32, i32) {
    %c0_i32 = arith.constant 0 : i32
    %c0_i32_0 = arith.constant 0 : i32
    return %c0_i32, %arg1 : i32, i32
  }
  func.func @transform_4(%arg0: i32, %arg1: i32, %arg2: i32) -> (i32, i32) {
    %c0_i32 = arith.constant 0 : i32
    return %arg0, %arg1 : i32, i32
  }
  func.func @transform_5(%arg0: i32, %arg1: i32, %arg2: i32) -> (i32, i32) {
    %c0_i32 = arith.constant 0 : i32
    return %arg0, %arg1 : i32, i32
  }
}

module attributes {stable_mosaic.version = 11 : i64} {
  func.func @_matmul_affine_kernel(%arg0: i32, %arg1: i32, %arg2: i32, %arg3: memref<8x512xbf16, #tpu.memory_space<vmem>>, %arg4: memref<512x512xbf16, #tpu.memory_space<vmem>>, %arg5: memref<1x512xf32, #tpu.memory_space<vmem>>, %arg6: memref<1x512xf32, #tpu.memory_space<vmem>>, %arg7: memref<8x512xf32, #tpu.memory_space<vmem>>, %arg8: memref<8x512xf32, #tpu.memory_space<vmem>>) attributes {dimension_semantics = [#tpu.dimension_semantics<parallel>, #tpu.dimension_semantics<parallel>, #tpu.dimension_semantics<arbitrary>], iteration_bounds = array<i64: 1, 1, 9>, scalar_prefetch = 0 : i64, scratch_operands = 1 : i64, tpu.core_type = #tpu.core_type<tc>, window_params = [{transform_indices = @transform_0, window_bounds = array<i64: 8, 512>}, {transform_indices = @transform_1, window_bounds = array<i64: 512, 512>}, {transform_indices = @transform_2, window_bounds = array<i64: 1, 512>}, {transform_indices = @transform_3, window_bounds = array<i64: 1, 512>}, {transform_indices = @transform_4, window_bounds = array<i64: 8, 512>}]} {
    %c0_i32 = arith.constant 0 : i32
    %0 = arith.cmpi eq, %arg2, %c0_i32 : i32
    %1 = arith.extui %0 : i1 to i32
    %c0_i32_0 = arith.constant 0 : i32
    %2 = arith.cmpi ne, %1, %c0_i32_0 : i32
    scf.if %2 {
      %cst_9 = arith.constant 0.000000e+00 : f32
      %12 = vector.broadcast %cst_9 : f32 to vector<8x512xf32>
      %c0_10 = arith.constant 0 : index
      %c0_11 = arith.constant 0 : index
      %13 = vector.load %arg8[%c0_10, %c0_11] : memref<8x512xf32, #tpu.memory_space<vmem>>, vector<8x512xf32>
      tpu.vector_store %arg8[%c0_10, %c0_11], %12 {strides = array<i32>} : memref<8x512xf32, #tpu.memory_space<vmem>>, vector<8x512xf32>,
    } else {
    }
    %c0 = arith.constant 0 : index
    %c0_1 = arith.constant 0 : index
    %3 = vector.load %arg8[%c0, %c0_1] : memref<8x512xf32, #tpu.memory_space<vmem>>, vector<8x512xf32>
    %c0_2 = arith.constant 0 : index
    %c0_3 = arith.constant 0 : index
    %4 = vector.load %arg3[%c0_2, %c0_3] : memref<8x512xbf16, #tpu.memory_space<vmem>>, vector<8x512xbf16>
    %c0_4 = arith.constant 0 : index
    %c0_5 = arith.constant 0 : index
    %5 = vector.load %arg4[%c0_4, %c0_5] : memref<512x512xbf16, #tpu.memory_space<vmem>>, vector<512x512xbf16>
    %cst = arith.constant dense<0.000000e+00> : vector<8x512xf32>
    %6 = tpu.matmul %4, %5, %cst {dimension_numbers = #tpu.dot_dimension_numbers<[1], [0], [0], [1], [0, 0, 1, 1], [], []>} : vector<8x512xbf16>, vector<512x512xbf16>, vector<8x512xf32> -> vector<8x512xf32>
    %7 = arith.addf %3, %6 : vector<8x512xf32>
    %c0_6 = arith.constant 0 : index
    %c0_7 = arith.constant 0 : index
    %8 = vector.load %arg8[%c0_6, %c0_7] : memref<8x512xf32, #tpu.memory_space<vmem>>, vector<8x512xf32>
    tpu.vector_store %arg8[%c0_6, %c0_7], %7 {strides = array<i32>} : memref<8x512xf32, #tpu.memory_space<vmem>>, vector<8x512xf32>,
    %c8_i32 = arith.constant 8 : i32
    %9 = arith.cmpi eq, %arg2, %c8_i32 : i32
    %10 = arith.extui %9 : i1 to i32
    %c0_i32_8 = arith.constant 0 : i32
    %11 = arith.cmpi ne, %10, %c0_i32_8 : i32
    scf.if %11 {
      %c0_9 = arith.constant 0 : index
      %c0_10 = arith.constant 0 : index
      %12 = vector.load %arg8[%c0_9, %c0_10] : memref<8x512xf32, #tpu.memory_space<vmem>>, vector<8x512xf32>
      %c0_11 = arith.constant 0 : index
      %c0_12 = arith.constant 0 : index
      %13 = vector.load %arg5[%c0_11, %c0_12] : memref<1x512xf32, #tpu.memory_space<vmem>>, vector<1x512xf32>
      %14 = vector.broadcast %13 : vector<1x512xf32> to vector<8x512xf32>
      %15 = arith.mulf %12, %14 : vector<8x512xf32>
      %c0_13 = arith.constant 0 : index
      %c0_14 = arith.constant 0 : index
      %16 = vector.load %arg6[%c0_13, %c0_14] : memref<1x512xf32, #tpu.memory_space<vmem>>, vector<1x512xf32>
      %17 = vector.broadcast %16 : vector<1x512xf32> to vector<8x512xf32>
      %18 = arith.addf %15, %17 : vector<8x512xf32>
      %cst_15 = arith.constant 0.000000e+00 : f32
      %19 = vector.broadcast %cst_15 : f32 to vector<8x512xf32>
      %20 = arith.maximumf %18, %19 : vector<8x512xf32>
      %c0_16 = arith.constant 0 : index
      %c0_17 = arith.constant 0 : index
      %21 = vector.load %arg7[%c0_16, %c0_17] : memref<8x512xf32, #tpu.memory_space<vmem>>, vector<8x512xf32>
      tpu.vector_store %arg7[%c0_16, %c0_17], %20 {strides = array<i32>} : memref<8x512xf32, #tpu.memory_space<vmem>>, vector<8x512xf32>,
    } else {
    }
    return
  }
  func.func @transform_0(%arg0: i32, %arg1: i32, %arg2: i32) -> (i32, i32) {
    %c0_i32 = arith.constant 0 : i32
    return %arg0, %arg2 : i32, i32
  }
  func.func @transform_1(%arg0: i32, %arg1: i32, %arg2: i32) -> (i32, i32) {
    %c0_i32 = arith.constant 0 : i32
    return %arg2, %arg1 : i32, i32
  }
  func.func @transform_2(%arg0: i32, %arg1: i32, %arg2: i32) -> (i32, i32) {
    %c0_i32 = arith.constant 0 : i32
    %c0_i32_0 = arith.constant 0 : i32
    return %c0_i32, %arg1 : i32, i32
  }
  func.func @transform_3(%arg0: i32, %arg1: i32, %arg2: i32) -> (i32, i32) {
    %c0_i32 = arith.constant 0 : i32
    %c0_i32_0 = arith.constant 0 : i32
    return %c0_i32, %arg1 : i32, i32
  }
  func.func @transform_4(%arg0: i32, %arg1: i32, %arg2: i32) -> (i32, i32) {
    %c0_i32 = arith.constant 0 : i32
    return %arg0, %arg1 : i32, i32
  }
}

module attributes {stable_mosaic.version = 11 : i64} {
  func.func @_avgpool_kernel(%arg0: i32, %arg1: memref<2x1x512xf32, #tpu.memory_space<vmem>>, %arg2: memref<2x512xf32, #tpu.memory_space<vmem>>) attributes {dimension_semantics = [#tpu.dimension_semantics<arbitrary>], iteration_bounds = array<i64: 1>, scalar_prefetch = 0 : i64, scratch_operands = 0 : i64, tpu.core_type = #tpu.core_type<tc>, window_params = [{pipeline_mode = #tpu.pipeline_mode<synchronous>, transform_indices = @transform_0, window_bounds = array<i64: 2, 1, 512>}, {pipeline_mode = #tpu.pipeline_mode<synchronous>, transform_indices = @transform_1, window_bounds = array<i64: 2, 512>}]} {
    %c0 = arith.constant 0 : index
    %c0_0 = arith.constant 0 : index
    %c0_1 = arith.constant 0 : index
    %0 = vector.load %arg1[%c0, %c0_0, %c0_1] : memref<2x1x512xf32, #tpu.memory_space<vmem>>, vector<2x1x512xf32>
    %cst = arith.constant dense<0.000000e+00> : vector<2x512xf32>
    %1 = vector.multi_reduction <add>, %0, %cst [1] : vector<2x1x512xf32> to vector<2x512xf32>
    %cst_2 = arith.constant 1.000000e+00 : f32
    %2 = vector.broadcast %cst_2 : f32 to vector<2x512xf32>
    %3 = arith.mulf %1, %2 : vector<2x512xf32>
    %c0_3 = arith.constant 0 : index
    %c0_4 = arith.constant 0 : index
    %4 = vector.load %arg2[%c0_3, %c0_4] : memref<2x512xf32, #tpu.memory_space<vmem>>, vector<2x512xf32>
    tpu.vector_store %arg2[%c0_3, %c0_4], %3 {strides = array<i32>} : memref<2x512xf32, #tpu.memory_space<vmem>>, vector<2x512xf32>,
    return
  }
  func.func @transform_0(%arg0: i32) -> (i32, i32, i32) {
    %c0_i32 = arith.constant 0 : i32
    %c0_i32_0 = arith.constant 0 : i32
    %c0_i32_1 = arith.constant 0 : i32
    %c0_i32_2 = arith.constant 0 : i32
    return %c0_i32, %c0_i32_0, %c0_i32_1 : i32, i32, i32
  }
  func.func @transform_1(%arg0: i32) -> (i32, i32) {
    %c0_i32 = arith.constant 0 : i32
    %c0_i32_0 = arith.constant 0 : i32
    %c0_i32_1 = arith.constant 0 : i32
    return %c0_i32, %c0_i32_0 : i32, i32
  }
}

module attributes {stable_mosaic.version = 11 : i64} {
  func.func @_matmul_affine_kernel(%arg0: i32, %arg1: i32, %arg2: i32, %arg3: memref<8x512xbf16, #tpu.memory_space<vmem>>, %arg4: memref<512x128xbf16, #tpu.memory_space<vmem>>, %arg5: memref<1x128xf32, #tpu.memory_space<vmem>>, %arg6: memref<1x128xf32, #tpu.memory_space<vmem>>, %arg7: memref<8x128xf32, #tpu.memory_space<vmem>>, %arg8: memref<8x128xf32, #tpu.memory_space<vmem>>) attributes {dimension_semantics = [#tpu.dimension_semantics<parallel>, #tpu.dimension_semantics<parallel>, #tpu.dimension_semantics<arbitrary>], iteration_bounds = array<i64: 1, 1, 1>, scalar_prefetch = 0 : i64, scratch_operands = 1 : i64, tpu.core_type = #tpu.core_type<tc>, window_params = [{transform_indices = @transform_0, window_bounds = array<i64: 8, 512>}, {transform_indices = @transform_1, window_bounds = array<i64: 512, 128>}, {transform_indices = @transform_2, window_bounds = array<i64: 1, 128>}, {transform_indices = @transform_3, window_bounds = array<i64: 1, 128>}, {transform_indices = @transform_4, window_bounds = array<i64: 8, 128>}]} {
    %c0_i32 = arith.constant 0 : i32
    %0 = arith.cmpi eq, %arg2, %c0_i32 : i32
    %1 = arith.extui %0 : i1 to i32
    %c0_i32_0 = arith.constant 0 : i32
    %2 = arith.cmpi ne, %1, %c0_i32_0 : i32
    scf.if %2 {
      %cst_10 = arith.constant 0.000000e+00 : f32
      %12 = vector.broadcast %cst_10 : f32 to vector<8x128xf32>
      %c0_11 = arith.constant 0 : index
      %c0_12 = arith.constant 0 : index
      %13 = vector.load %arg8[%c0_11, %c0_12] : memref<8x128xf32, #tpu.memory_space<vmem>>, vector<8x128xf32>
      tpu.vector_store %arg8[%c0_11, %c0_12], %12 {strides = array<i32>} : memref<8x128xf32, #tpu.memory_space<vmem>>, vector<8x128xf32>,
    } else {
    }
    %c0 = arith.constant 0 : index
    %c0_1 = arith.constant 0 : index
    %3 = vector.load %arg8[%c0, %c0_1] : memref<8x128xf32, #tpu.memory_space<vmem>>, vector<8x128xf32>
    %c0_2 = arith.constant 0 : index
    %c0_3 = arith.constant 0 : index
    %4 = vector.load %arg3[%c0_2, %c0_3] : memref<8x512xbf16, #tpu.memory_space<vmem>>, vector<8x512xbf16>
    %c0_4 = arith.constant 0 : index
    %c0_5 = arith.constant 0 : index
    %5 = vector.load %arg4[%c0_4, %c0_5] : memref<512x128xbf16, #tpu.memory_space<vmem>>, vector<512x128xbf16>
    %cst = arith.constant dense<0.000000e+00> : vector<8x128xf32>
    %6 = tpu.matmul %4, %5, %cst {dimension_numbers = #tpu.dot_dimension_numbers<[1], [0], [0], [1], [0, 0, 1, 1], [], []>} : vector<8x512xbf16>, vector<512x128xbf16>, vector<8x128xf32> -> vector<8x128xf32>
    %7 = arith.addf %3, %6 : vector<8x128xf32>
    %c0_6 = arith.constant 0 : index
    %c0_7 = arith.constant 0 : index
    %8 = vector.load %arg8[%c0_6, %c0_7] : memref<8x128xf32, #tpu.memory_space<vmem>>, vector<8x128xf32>
    tpu.vector_store %arg8[%c0_6, %c0_7], %7 {strides = array<i32>} : memref<8x128xf32, #tpu.memory_space<vmem>>, vector<8x128xf32>,
    %c0_i32_8 = arith.constant 0 : i32
    %9 = arith.cmpi eq, %arg2, %c0_i32_8 : i32
    %10 = arith.extui %9 : i1 to i32
    %c0_i32_9 = arith.constant 0 : i32
    %11 = arith.cmpi ne, %10, %c0_i32_9 : i32
    scf.if %11 {
      %c0_10 = arith.constant 0 : index
      %c0_11 = arith.constant 0 : index
      %12 = vector.load %arg8[%c0_10, %c0_11] : memref<8x128xf32, #tpu.memory_space<vmem>>, vector<8x128xf32>
      %c0_12 = arith.constant 0 : index
      %c0_13 = arith.constant 0 : index
      %13 = vector.load %arg5[%c0_12, %c0_13] : memref<1x128xf32, #tpu.memory_space<vmem>>, vector<1x128xf32>
      %14 = vector.broadcast %13 : vector<1x128xf32> to vector<8x128xf32>
      %15 = arith.mulf %12, %14 : vector<8x128xf32>
      %c0_14 = arith.constant 0 : index
      %c0_15 = arith.constant 0 : index
      %16 = vector.load %arg6[%c0_14, %c0_15] : memref<1x128xf32, #tpu.memory_space<vmem>>, vector<1x128xf32>
      %17 = vector.broadcast %16 : vector<1x128xf32> to vector<8x128xf32>
      %18 = arith.addf %15, %17 : vector<8x128xf32>
      %c0_16 = arith.constant 0 : index
      %c0_17 = arith.constant 0 : index
      %19 = vector.load %arg7[%c0_16, %c0_17] : memref<8x128xf32, #tpu.memory_space<vmem>>, vector<8x128xf32>
      tpu.vector_store %arg7[%c0_16, %c0_17], %18 {strides = array<i32>} : memref<8x128xf32, #tpu.memory_space<vmem>>, vector<8x128xf32>,
    } else {
    }
    return
  }
  func.func @transform_0(%arg0: i32, %arg1: i32, %arg2: i32) -> (i32, i32) {
    %c0_i32 = arith.constant 0 : i32
    return %arg0, %arg2 : i32, i32
  }
  func.func @transform_1(%arg0: i32, %arg1: i32, %arg2: i32) -> (i32, i32) {
    %c0_i32 = arith.constant 0 : i32
    return %arg2, %arg1 : i32, i32
  }
  func.func @transform_2(%arg0: i32, %arg1: i32, %arg2: i32) -> (i32, i32) {
    %c0_i32 = arith.constant 0 : i32
    %c0_i32_0 = arith.constant 0 : i32
    return %c0_i32, %arg1 : i32, i32
  }
  func.func @transform_3(%arg0: i32, %arg1: i32, %arg2: i32) -> (i32, i32) {
    %c0_i32 = arith.constant 0 : i32
    %c0_i32_0 = arith.constant 0 : i32
    return %c0_i32, %arg1 : i32, i32
  }
  func.func @transform_4(%arg0: i32, %arg1: i32, %arg2: i32) -> (i32, i32) {
    %c0_i32 = arith.constant 0 : i32
    return %arg0, %arg1 : i32, i32
  }
}

</mosaic_0001>

<bundles_post_ra>
// kernel: _lambda_.24
= control target key start
LH: loop header
LB: loop body
LE: loop exit
PB: predicated region body
PF: predicated region fallthrough
CT: control target
= control target key end

     0   :  { %s576_s15 = smov 0   ;;  %s723_s0 = inlined_call_operand.vmem [shape: f32[2,9,9,64], index: 0, kind: input, shape index: {}]   ;;  %s724_s1 = inlined_call_operand.vmem [shape: f32[2,9,9,64], index: 1, kind: input, shape index: {}]   ;;  %s725_s2 = inlined_call_operand.vmem [shape: f32[2,9,9,64], index: 2, kind: input, shape index: {}]   ;;  %s726_s3 = inlined_call_operand.vmem [shape: f32[2,9,9,64], index: 3, kind: input, shape index: {}]   ;;  %s727_s4 = inlined_call_operand.vmem [shape: f32[2,8,8,64], index: 4, kind: output, shape index: {}]  }
   0x1 LB: > { %s496_s16 = sadd.s32 4294967295, %s549_s15   ;;  %p500_p0 = scmp.ge.s32.totalorder %s549_s15, 1  ;;  %s549_s15 = sphi %s576_s15, %s14_s15  }
   0x2   : > { %p192_p1 = scmp.lt.s32.totalorder %s549_s15, 3 }
   0x4   : > { %p193_p2 = pnand %p500_p0, %p192_p1 }
   0x5   : > { %p233_p3 = scmp.lt.s32.totalorder (!%p193_p2), %s496_s16, 1 }
   0x6   : > { %196 = sbr.rel (%p193_p2) target bundleno = 51 (0x33), region = 36 }
   0xb   : > { %s729_s16 = smov (!%p233_p3, %s496_s16), 1  ;;  %vm396_vm0 = vcmask 523264  }
   0xc   : > { %s534_s17 = smul.u32 144, %s729_s16  ;;  %s533_s30 = sshll.u32 %s729_s16, 6 }
   0xd   : > { %s677_s7 = scalar_lea.vmem %s727_s4, %s533_s30 }
   0xe   : > { %s590_s20 = scalar_lea.vmem %s723_s0, %s534_s17  ;;  %s595_s23 = scalar_lea.vmem %s724_s1, %s534_s17 }
   0xf   : > { %s600_s26 = scalar_lea.vmem %s725_s2, %s534_s17  ;;  %s605_s29 = scalar_lea.vmem %s726_s3, %s534_s17  ;;  %v258_v0 = vld [vmem:[%s590_s20] sm:$0xff]  ;;  %v507_v5 = vld [vmem:[%s590_s20 + $0x10] sm:$0xff] }
  0x10   : > { %v266_v1 = vld [vmem:[%s595_s23] sm:$0xff]  ;;  %v613_v6 = vld [vmem:[%s595_s23 + $0x10] sm:$0xff] }
  0x11   : > { %v282_v2 = vld [vmem:[%s590_s20 + $0x1] sm:$0xff]  ;;  %v274_v3 = vmax.f32 %v258_v0, %v266_v1  ;;  %v616_v7 = vld [vmem:[%s590_s20 + $0x11] sm:$0xff]  ;;  %v275_v10 = vmax.f32 %v507_v5, %v613_v6 }
  0x12   : > { %v298_v4 = vld [vmem:[%s600_s26] sm:$0xff]  ;;  %v299_v11 = vld [vmem:[%s600_s26 + $0x10] sm:$0xff] }
  0x13   : > { %v290_v8 = vmax.f32 %v274_v3, %v282_v2  ;;  %v314_v9 = vld [vmem:[%s605_s29] sm:$0xff]  ;;  %v291_v17 = vmax.f32 %v275_v10, %v616_v7  ;;  %v315_v18 = vld [vmem:[%s605_s29 + $0x10] sm:$0xff] }
  0x14   : > { %v508_v12 = vld [vmem:[%s590_s20 + $0x20] sm:$0xff]  ;;  %v509_v21 = vld [vmem:[%s590_s20 + $0x30] sm:$0xff] }
  0x15   : > { %v623_v13 = vld [vmem:[%s595_s23 + $0x20] sm:$0xff]  ;;  %v306_v15 = vmax.f32 %v290_v8, %v298_v4  ;;  %v635_v22 = vld [vmem:[%s595_s23 + $0x30] sm:$0xff]  ;;  %v307_v25 = vmax.f32 %v291_v17, %v299_v11 }
  0x16   : > { %v626_v14 = vld [vmem:[%s590_s20 + $0x21] sm:$0xff]  ;;  %v276_v19 = vmax.f32 %v508_v12, %v623_v13  ;;  %v638_v23 = vld [vmem:[%s590_s20 + $0x31] sm:$0xff]  ;;  %v277_v29 = vmax.f32 %v509_v21, %v635_v22 }
  0x17   : > { %v330_v16 = vld [vmem:[%s600_s26 + $0x1] sm:$0xff]  ;;  %v322_v24 = vmax.f32 %v306_v15, %v314_v9  ;;  %v331_v26 = vld [vmem:[%s600_s26 + $0x11] sm:$0xff]  ;;  %v323_v34 = vmax.f32 %v307_v25, %v315_v18 }
  0x18   : > { %v300_v20 = vld [vmem:[%s600_s26 + $0x20] sm:$0xff]  ;;  %v292_v27 = vmax.f32 %v276_v19, %v626_v14  ;;  %v301_v30 = vld [vmem:[%s600_s26 + $0x30] sm:$0xff]  ;;  %v293_v37 = vmax.f32 %v277_v29, %v638_v23 }
  0x19   : > { %v316_v28 = vld [vmem:[%s605_s29 + $0x20] sm:$0xff]  ;;  %v338_v33 = vmax.f32 %v322_v24, %v330_v16  ;;  %v317_v39 = vld [vmem:[%s605_s29 + $0x30] sm:$0xff]  ;;  %v339_v44 = vmax.f32 %v323_v34, %v331_v26 }
  0x1a   : > { %v510_v31 = vld [vmem:[%s590_s20 + $0x40] sm:$0xff]  ;;  %v308_v35 = vmax.f32 %v292_v27, %v300_v20  ;;  %v511_v41 = vld [vmem:[%s590_s20 + $0x50] sm:$0xff]  ;;  %v309_v46 = vmax.f32 %v293_v37, %v301_v30 }
  0x1b   : > { %v647_v32 = vld [vmem:[%s595_s23 + $0x40] sm:$0xff]  ;;  %v658_v42 = vld [vmem:[%s595_s23 + $0x50] sm:$0xff]  ;;  %v355_v43 = vmax.f32 %v338_v33, %v507_v5  ;;  %v356_v55 = vmax.f32 %v339_v44, %v508_v12 }
  0x1c   : > { %v332_v36 = vld [vmem:[%s600_s26 + $0x21] sm:$0xff]  ;;  %v278_v40 = vmax.f32 %v510_v31, %v647_v32  ;;  %v324_v45 = vmax.f32 %v308_v35, %v316_v28  ;;  %v527_v48 = vld [vmem:[%s590_s20 + $0x51] sm:$0xff]  ;;  %v279_v51 = vmax.f32 %v511_v41, %v658_v42  ;;  %v325_v57 = vmax.f32 %v309_v46, %v317_v39 }
  0x1d   : > { %v652_v38 = vld [vmem:[%s590_s20 + $0x41] sm:$0xff]  ;;  %v333_v49 = vld [vmem:[%s600_s26 + $0x31] sm:$0xff]  ;;  %v372_v54 = vmax.f32 %v355_v43, %v613_v6  ;;  %v373_v4 = vmax.f32 %v356_v55, %v623_v13 }
  0x1e   : > { %v302_v47 = vld [vmem:[%s600_s26 + $0x40] sm:$0xff]  ;;  %v294_v50 = vmax.f32 %v278_v40, %v652_v38  ;;  %v340_v56 = vmax.f32 %v324_v45, %v332_v36  ;;  %v303_v59 = vld [vmem:[%s600_s26 + $0x50] sm:$0xff]  ;;  %v295_v63 = vmax.f32 %v279_v51, %v527_v48  ;;  %v341_v6 = vmax.f32 %v325_v57, %v333_v49 }
  0x1f   : > { %v512_v52 = vld [vmem:[%s590_s20 + $0x60] sm:$0xff]  ;;  %v513_v1 = vld [vmem:[%s590_s20 + $0x70] sm:$0xff]  ;;  %v388_v3 = vmax.f32 %v372_v54, %v616_v7  ;;  %v389_v7 = vmax.f32 %v373_v4, %v626_v14 }
  0x20   : > { %v668_v53 = vld [vmem:[%s595_s23 + $0x60] sm:$0xff]  ;;  %v310_v61 = vmax.f32 %v294_v50, %v302_v47  ;;  %v521_v2 = vld [vmem:[%s595_s23 + $0x70] sm:$0xff]  ;;  %v357_v5 = vmax.f32 %v340_v56, %v509_v21  ;;  %v311_v12 = vmax.f32 %v295_v63, %v303_v59  ;;  %v358_v13 = vmax.f32 %v341_v6, %v510_v31 }
  0x21   : > { %v318_v58 = vld [vmem:[%s605_s29 + $0x40] sm:$0xff]  ;;  %v280_v0 = vmax.f32 %v512_v52, %v668_v53  ;;  %v319_v8 = vld [vmem:[%s605_s29 + $0x50] sm:$0xff]  ;;  %v281_v16 = vmax.f32 %v513_v1, %v521_v2  ;;  %397 = vst.msk [vmem:[%s677_s7] sm:$0xff] %vm396_vm0, %v388_v3 }
  0x22   : > { %v528_v60 = vld [vmem:[%s590_s20 + $0x61] sm:$0xff]  ;;  %v529_v10 = vld [vmem:[%s590_s20 + $0x71] sm:$0xff]  ;;  %v326_v11 = vmax.f32 %v310_v61, %v318_v58  ;;  %v374_v17 = vmax.f32 %v357_v5, %v635_v22  ;;  %v327_v24 = vmax.f32 %v311_v12, %v319_v8  ;;  %398 = vst.msk [vmem:[%s677_s7 + $0x8] sm:$0xff] %vm396_vm0, %v389_v7  ;;  %v375_v14 = vmax.f32 %v358_v13, %v647_v32 }
  0x23   : > { %v334_v62 = vld [vmem:[%s600_s26 + $0x41] sm:$0xff]  ;;  %v296_v15 = vmax.f32 %v280_v0, %v528_v60  ;;  %v335_v18 = vld [vmem:[%s600_s26 + $0x51] sm:$0xff]  ;;  %v297_v26 = vmax.f32 %v281_v16, %v529_v10 }
  0x24   : > { %v304_v9 = vld [vmem:[%s600_s26 + $0x60] sm:$0xff]  ;;  %v305_v20 = vld [vmem:[%s600_s26 + $0x70] sm:$0xff]  ;;  %v342_v21 = vmax.f32 %v326_v11, %v334_v62  ;;  %v390_v27 = vmax.f32 %v374_v17, %v638_v23  ;;  %v343_v30 = vmax.f32 %v327_v24, %v335_v18  ;;  %v391_v34 = vmax.f32 %v375_v14, %v652_v38 }
  0x25   : > { %v320_v19 = vld [vmem:[%s605_s29 + $0x60] sm:$0xff]  ;;  %v312_v25 = vmax.f32 %v296_v15, %v304_v9  ;;  %v321_v22 = vld [vmem:[%s605_s29 + $0x70] sm:$0xff]  ;;  %v313_v33 = vmax.f32 %v297_v26, %v305_v20 }
  0x26   : > { %v336_v28 = vld [vmem:[%s600_s26 + $0x61] sm:$0xff]  ;;  %v359_v29 = vmax.f32 %v342_v21, %v511_v41  ;;  %399 = vst.msk [vmem:[%s677_s7 + $0x10] sm:$0xff] %vm396_vm0, %v390_v27  ;;  %v337_v35 = vld [vmem:[%s600_s26 + $0x71] sm:$0xff]  ;;  %v360_v23 = vmax.f32 %v343_v30, %v512_v52 }
  0x27   : > { %v328_v31 = vmax.f32 %v312_v25, %v320_v19  ;;  %v329_v32 = vmax.f32 %v313_v33, %v321_v22  ;;  %400 = vst.msk [vmem:[%s677_s7 + $0x18] sm:$0xff] %vm396_vm0, %v391_v34  ;;  %v514_v39 = vld [vmem:[%s590_s20 + $0x80] sm:$0xff] }
  0x28   : > { %v376_v36 = vmax.f32 %v359_v29, %v658_v42  ;;  %v377_v41 = vmax.f32 %v360_v23, %v668_v53  ;;  %v522_v45 = vld [vmem:[%s595_s23 + $0x80] sm:$0xff] }
  0x29   : > { %v344_v37 = vmax.f32 %v328_v31, %v336_v28  ;;  %v345_v44 = vmax.f32 %v329_v32, %v337_v35  ;;  %v530_v47 = vld [vmem:[%s590_s20 + $0x81] sm:$0xff] }
  0x2a   : > { %v392_v40 = vmax.f32 %v376_v36, %v527_v48  ;;  %v393_v38 = vmax.f32 %v377_v41, %v528_v60 }
  0x2b   : > { %v361_v43 = vmax.f32 %v344_v37, %v513_v1  ;;  %v362_v42 = vmax.f32 %v345_v44, %v514_v39 }
  0x2c   : > { %401 = vst.msk [vmem:[%s677_s7 + $0x20] sm:$0xff] %vm396_vm0, %v392_v40 }
  0x2d   : > { %v378_v46 = vmax.f32 %v361_v43, %v521_v2  ;;  %402 = vst.msk [vmem:[%s677_s7 + $0x28] sm:$0xff] %vm396_vm0, %v393_v38  ;;  %v379_v50 = vmax.f32 %v362_v42, %v522_v45 }
  0x2f   : > { %v394_v49 = vmax.f32 %v378_v46, %v529_v10  ;;  %v395_v51 = vmax.f32 %v379_v50, %v530_v47 }
  0x31   : > { %403 = vst.msk [vmem:[%s677_s7 + $0x30] sm:$0xff] %vm396_vm0, %v394_v49 }
  0x32   : > { %404 = vst.msk [vmem:[%s677_s7 + $0x38] sm:$0xff] %vm396_vm0, %v395_v51 }
  0x33 PF: > { %s14_s15 = sadd.s32 1, %s549_s15  }
  0x34   : > { %p11_p4 = scmp.ge.s32.totalorder %s14_s15, 4  }
  0x36   :  { %13 = sbr.rel (!%p11_p4) target bundleno = 1 (0x1), region = 77 }

// kernel: _lambda_.23
= control target key start
LH: loop header
LB: loop body
LE: loop exit
PB: predicated region body
PF: predicated region fallthrough
CT: control target
= control target key end

     0   :  { %s1582_s15 = smov 0   ;;  %s1584_s16 = smov 0   ;;  %s1847_s0 = inlined_call_operand.vmem [shape: bf16[512,256], index: 0, kind: input, shape index: {}]   ;;  %s1848_s1 = inlined_call_operand.vmem [shape: bf16[256,128], index: 1, kind: input, shape index: {}]   ;;  %s1849_s2 = inlined_call_operand.vmem [shape: f32[1,128], index: 2, kind: input, shape index: {}]   ;;  %s1850_s3 = inlined_call_operand.vmem [shape: f32[1,128], index: 3, kind: input, shape index: {}]   ;;  %s1851_s4 = inlined_call_operand.vmem [shape: f32[512,128], index: 4, kind: output, shape index: {}]  }
   0x1   :  { %s1586_s17 = smov 0  }
   0x2 LB: > { %s33_s18 = sadd.s32 1, %s1551_s16  ;;  %p1242_p0 = scmp.ge.s32.totalorder %s1555_s17, 1  ;;  %s1555_s17 = sphi %s1586_s17, %s14_s17   ;;  %s1551_s16 = sphi %s1584_s16, %s1853_s16   ;;  %s1547_s15 = sphi %s1582_s15, %s1852_s15  }
   0x3   : > { %p35_p1 = scmp.ge.s32.totalorder %s33_s18, 2  ;;  %p224_p2 = scmp.lt.s32.totalorder %s1555_s17, 3 }
   0x5   : > { %s1855_s18 = smov (%p35_p1, %s33_s18), 0  ;;  %p225_p3 = pnand %p1242_p0, %p224_p2 }
   0x6   : > { %s1243_s5 = sshll.u32 (!%p225_p3), %s1547_s15, 5 }
   0x7   : > { %228 = sbr.rel (%p225_p3) target bundleno = 306 (0x132), region = 36  ;;  %p274_p4 = scmp.lt.s32.totalorder (!%p225_p3), %s1243_s5, 63 }
   0xc   : > { %v1482_v0 = vld [vmem:[%s1848_s1 + $0x38] sm:$0xff]  ;;  %v1481_v2 = vld [vmem:[%s1848_s1 + $0x30] sm:$0xff]  ;;  %v1480_v4 = vld [vmem:[%s1848_s1 + $0x28] sm:$0xff]  ;;  %s1857_s5 = smov (!%p274_p4, %s1243_s5), 63 }
   0xd   : > { %v1490_v1 = vld [vmem:[%s1848_s1 + $0x78] sm:$0xff]  ;;  %696 = vmatpush.bf16.msra.mxu0 %v1482_v0  ;;  %1491 = vmatpush.bf16.msra.mxu2 %v1482_v0  ;;  %v1489_v3 = vld [vmem:[%s1848_s1 + $0x70] sm:$0xff]  ;;  %v1488_v5 = vld [vmem:[%s1848_s1 + $0x68] sm:$0xff]  ;;  %s1442_s21 = sshll.u32 %s1857_s5, 3 }
   0xe   : > { %785 = vmatpush.bf16.msra.mxu1 %v1490_v1  ;;  %1499 = vmatpush.bf16.msra.mxu3 %v1490_v1  ;;  %v1479_v6 = vld [vmem:[%s1848_s1 + $0x20] sm:$0xff]  ;;  %v1478_v8 = vld [vmem:[%s1848_s1 + $0x18] sm:$0xff]  ;;  %v1477_v10 = vld [vmem:[%s1848_s1 + $0x10] sm:$0xff]  ;;  %s1650_s26 = scalar_lea.vmem %s1847_s0, %s1442_s21  ;;  %s1742_s14 = scalar_lea.vmem %s1851_s4, %s1442_s21 }
   0xf   : > { %v1487_v7 = vld [vmem:[%s1848_s1 + $0x60] sm:$0xff]  ;;  %v1486_v9 = vld [vmem:[%s1848_s1 + $0x58] sm:$0xff]  ;;  %v1485_v11 = vld [vmem:[%s1848_s1 + $0x50] sm:$0xff] }
  0x10   : > { %v1476_v12 = vld [vmem:[%s1848_s1 + $0x8] sm:$0xff]  ;;  %v1475_v14 = vld [vmem:[%s1848_s1] sm:$0xff]  ;;  %v1258_v28 = vld [vmem:[%s1650_s26 + $0x10] sm:$0xf] }
  0x11   : > { %697 = vmatpush.bf16.msra.mxu0 %v1481_v2  ;;  %1492 = vmatpush.bf16.msra.mxu2 %v1481_v2  ;;  %v1484_v13 = vld [vmem:[%s1848_s1 + $0x48] sm:$0xff]  ;;  %v1483_v15 = vld [vmem:[%s1848_s1 + $0x40] sm:$0xff]  ;;  %v1446_v29 = vld [vmem:[%s1650_s26 + $0x14] sm:$0xf0] }
  0x12   : > { %786 = vmatpush.bf16.msra.mxu1 %v1489_v3  ;;  %1500 = vmatpush.bf16.msra.mxu3 %v1489_v3  ;;  %v1250_v16 = vld [vmem:[%s1650_s26] sm:$0xf]  ;;  %v1444_v17 = vld [vmem:[%s1650_s26 + $0x4] sm:$0xf0]  ;;  %v1443_v20 = vld [vmem:[%s1650_s26 + $0x4] sm:$0xf]  ;;  %v1259_v36 = vor.u32 %v1446_v29, %v1258_v28 }
  0x13   : > { %v1314_v18 = vld [vmem:[%s1650_s26 + $0x80] sm:$0xf]  ;;  %v1460_v19 = vld [vmem:[%s1650_s26 + $0x84] sm:$0xf0]  ;;  %v1252_v21 = vld [vmem:[%s1650_s26 + $0x8] sm:$0xf0]  ;;  %v1251_v24 = vor.u32 %v1444_v17, %v1250_v16 }
  0x14   : > { %v1459_v22 = vld [vmem:[%s1650_s26 + $0x84] sm:$0xf]  ;;  %v1316_v23 = vld [vmem:[%s1650_s26 + $0x88] sm:$0xf0]  ;;  %v1315_v25 = vor.u32 %v1460_v19, %v1314_v18  ;;  %v1255_v26 = vor.u32 %v1443_v20, %v1252_v21  ;;  %v1322_v30 = vld [vmem:[%s1650_s26 + $0x90] sm:$0xf] }
  0x15   : > { %698 = vmatpush.bf16.msra.mxu0 %v1480_v4  ;;  %1493 = vmatpush.bf16.msra.mxu2 %v1480_v4  ;;  %v1319_v27 = vor.u32 %v1459_v22, %v1316_v23  ;;  %v1462_v31 = vld [vmem:[%s1650_s26 + $0x94] sm:$0xf0]  ;;  %v1445_v32 = vld [vmem:[%s1650_s26 + $0x14] sm:$0xf]  ;;  %v1260_v33 = vld [vmem:[%s1650_s26 + $0x18] sm:$0xf0] }
  0x16   : > { %787 = vmatpush.bf16.msra.mxu1 %v1488_v5  ;;  %1501 = vmatpush.bf16.msra.mxu3 %v1488_v5  ;;  %v1461_v34 = vld [vmem:[%s1650_s26 + $0x94] sm:$0xf]  ;;  %v1324_v35 = vld [vmem:[%s1650_s26 + $0x98] sm:$0xf0]  ;;  %v1323_v37 = vor.u32 %v1462_v31, %v1322_v30  ;;  %v1263_v38 = vor.u32 %v1445_v32, %v1260_v33  ;;  %v1266_v40 = vld [vmem:[%s1650_s26 + $0x20] sm:$0xf] }
  0x17   : > { %v1327_v39 = vor.u32 %v1461_v34, %v1324_v35  ;;  %v1448_v41 = vld [vmem:[%s1650_s26 + $0x24] sm:$0xf0]  ;;  %v1330_v42 = vld [vmem:[%s1650_s26 + $0xa0] sm:$0xf]  ;;  %v1447_v44 = vld [vmem:[%s1650_s26 + $0x24] sm:$0xf] }
  0x18   : > { %v1464_v43 = vld [vmem:[%s1650_s26 + $0xa4] sm:$0xf0]  ;;  %v1268_v45 = vld [vmem:[%s1650_s26 + $0x28] sm:$0xf0]  ;;  %v1463_v46 = vld [vmem:[%s1650_s26 + $0xa4] sm:$0xf]  ;;  %v1267_v48 = vor.u32 %v1448_v41, %v1266_v40 }
  0x19   : > { %699 = vmatpush.bf16.msra.mxu0 %v1479_v6  ;;  %1494 = vmatpush.bf16.msra.mxu2 %v1479_v6  ;;  %v1332_v47 = vld [vmem:[%s1650_s26 + $0xa8] sm:$0xf0]  ;;  %v1331_v49 = vor.u32 %v1464_v43, %v1330_v42  ;;  %v1271_v50 = vor.u32 %v1447_v44, %v1268_v45  ;;  %v1274_v52 = vld [vmem:[%s1650_s26 + $0x30] sm:$0xf]  ;;  %v1450_v53 = vld [vmem:[%s1650_s26 + $0x34] sm:$0xf0] }
  0x1a   : > { %788 = vmatpush.bf16.msra.mxu1 %v1487_v7  ;;  %1502 = vmatpush.bf16.msra.mxu3 %v1487_v7  ;;  %v1335_v51 = vor.u32 %v1463_v46, %v1332_v47  ;;  %v1338_v54 = vld [vmem:[%s1650_s26 + $0xb0] sm:$0xf]  ;;  %v1466_v55 = vld [vmem:[%s1650_s26 + $0xb4] sm:$0xf0]  ;;  %v1449_v56 = vld [vmem:[%s1650_s26 + $0x34] sm:$0xf]  ;;  %v1275_v60 = vor.u32 %v1450_v53, %v1274_v52 }
  0x1b   : > { %v1276_v57 = vld [vmem:[%s1650_s26 + $0x38] sm:$0xf0]  ;;  %v1465_v58 = vld [vmem:[%s1650_s26 + $0xb4] sm:$0xf]  ;;  %v1339_v61 = vor.u32 %v1466_v55, %v1338_v54  ;;  %v1282_v0 = vld [vmem:[%s1650_s26 + $0x40] sm:$0xf] }
  0x1c   : > { %v1340_v59 = vld [vmem:[%s1650_s26 + $0xb8] sm:$0xf0]  ;;  %v1279_v62 = vor.u32 %v1449_v56, %v1276_v57  ;;  %v1452_v1 = vld [vmem:[%s1650_s26 + $0x44] sm:$0xf0]  ;;  %v1346_v2 = vld [vmem:[%s1650_s26 + $0xc0] sm:$0xf] }
  0x1d   : > { %700 = vmatpush.bf16.msra.mxu0 %v1478_v8  ;;  %1495 = vmatpush.bf16.msra.mxu2 %v1478_v8  ;;  %v1343_v63 = vor.u32 %v1465_v58, %v1340_v59  ;;  %v1468_v3 = vld [vmem:[%s1650_s26 + $0xc4] sm:$0xf0]  ;;  %v1451_v4 = vld [vmem:[%s1650_s26 + $0x44] sm:$0xf]  ;;  %v1284_v5 = vld [vmem:[%s1650_s26 + $0x48] sm:$0xf0]  ;;  %v1283_v8 = vor.u32 %v1452_v1, %v1282_v0 }
  0x1e   : > { %789 = vmatpush.bf16.msra.mxu1 %v1486_v9  ;;  %1503 = vmatpush.bf16.msra.mxu3 %v1486_v9  ;;  %v1467_v6 = vld [vmem:[%s1650_s26 + $0xc4] sm:$0xf]  ;;  %v1348_v7 = vld [vmem:[%s1650_s26 + $0xc8] sm:$0xf0]  ;;  %v1347_v9 = vor.u32 %v1468_v3, %v1346_v2  ;;  %v1453_v16 = vld [vmem:[%s1650_s26 + $0x54] sm:$0xf] }
  0x1f   : > { %v1292_v17 = vld [vmem:[%s1650_s26 + $0x58] sm:$0xf0]  ;;  %v1469_v18 = vld [vmem:[%s1650_s26 + $0xd4] sm:$0xf]  ;;  %v1455_v28 = vld [vmem:[%s1650_s26 + $0x64] sm:$0xf] }
  0x20   : > { %v1356_v19 = vld [vmem:[%s1650_s26 + $0xd8] sm:$0xf0]  ;;  %v1295_v22 = vor.u32 %v1453_v16, %v1292_v17  ;;  %v1300_v29 = vld [vmem:[%s1650_s26 + $0x68] sm:$0xf0]  ;;  %v1471_v30 = vld [vmem:[%s1650_s26 + $0xe4] sm:$0xf] }
  0x21   : > { %701 = vmatpush.bf16.msra.mxu0 %v1477_v10  ;;  %1496 = vmatpush.bf16.msra.mxu2 %v1477_v10  ;;  %v1287_v10 = vor.u32 %v1451_v4, %v1284_v5  ;;  %v1359_v23 = vor.u32 %v1469_v18, %v1356_v19  ;;  %v1364_v31 = vld [vmem:[%s1650_s26 + $0xe8] sm:$0xf0]  ;;  %v1303_v34 = vor.u32 %v1455_v28, %v1300_v29  ;;  %v1457_v40 = vld [vmem:[%s1650_s26 + $0x74] sm:$0xf]  ;;  %v1308_v41 = vld [vmem:[%s1650_s26 + $0x78] sm:$0xf0] }
  0x22   : > { %790 = vmatpush.bf16.msra.mxu1 %v1485_v11  ;;  %1504 = vmatpush.bf16.msra.mxu3 %v1485_v11  ;;  %v1351_v11 = vor.u32 %v1467_v6, %v1348_v7  ;;  %v1367_v35 = vor.u32 %v1471_v30, %v1364_v31  ;;  %v1473_v42 = vld [vmem:[%s1650_s26 + $0xf4] sm:$0xf]  ;;  %v1372_v43 = vld [vmem:[%s1650_s26 + $0xf8] sm:$0xf0]  ;;  %v1311_v46 = vor.u32 %v1457_v40, %v1308_v41  ;;  %v1733_v52 = vld [vmem:[%s1850_s3] ss:$0 sm:$0xff] }
  0x23   : > { %v1375_v47 = vor.u32 %v1473_v42, %v1372_v43 }
  0x25   : > { %702 = vmatpush.bf16.msra.mxu0 %v1476_v12  ;;  %1497 = vmatpush.bf16.msra.mxu2 %v1476_v12  ;;  %v1290_v12 = vld [vmem:[%s1650_s26 + $0x50] sm:$0xf] }
  0x26   : > { %791 = vmatpush.bf16.msra.mxu1 %v1484_v13  ;;  %1505 = vmatpush.bf16.msra.mxu3 %v1484_v13  ;;  %v1454_v13 = vld [vmem:[%s1650_s26 + $0x54] sm:$0xf0] }
  0x27   : > { %v1291_v20 = vor.u32 %v1454_v13, %v1290_v12 }
  0x29   : > { %703 = vmatpush.bf16.msra.mxu0 %v1475_v14  ;;  %1498 = vmatpush.bf16.msra.mxu2 %v1475_v14  ;;  %v1354_v14 = vld [vmem:[%s1650_s26 + $0xd0] sm:$0xf] }
  0x2a   : > { %792 = vmatpush.bf16.msra.mxu1 %v1483_v15  ;;  %1506 = vmatpush.bf16.msra.mxu3 %v1483_v15  ;;  %v1470_v15 = vld [vmem:[%s1650_s26 + $0xd4] sm:$0xf0] }
  0x2b   : > { %v1355_v21 = vor.u32 %v1470_v15, %v1354_v14 }
  0x2c   : > { %704 = vmatmul.bf16.vlgmr.msra.gmra.mxu0 %v1251_v24  ;;  %744 = vmatmul.bf16.vlgmr.msra.gmra.mxu2 %v1315_v25  ;;  %v1298_v24 = vld [vmem:[%s1650_s26 + $0x60] sm:$0xf]  ;;  %v1456_v25 = vld [vmem:[%s1650_s26 + $0x64] sm:$0xf0] }
  0x2d   : > { %793 = vmatmul.bf16.vlgmr.msra.gmra.mxu1 %v1255_v26  ;;  %833 = vmatmul.bf16.vlgmr.msra.gmra.mxu3 %v1319_v27  ;;  %v1362_v26 = vld [vmem:[%s1650_s26 + $0xe0] sm:$0xf]  ;;  %v1472_v27 = vld [vmem:[%s1650_s26 + $0xe4] sm:$0xf0]  ;;  %v1299_v32 = vor.u32 %v1456_v25, %v1298_v24 }
  0x2e   : > { %v1363_v33 = vor.u32 %v1472_v27, %v1362_v26 }
  0x3c   : > { %709 = vmatmul.bf16.gmra.mxu0 %v1259_v36  ;;  %749 = vmatmul.bf16.gmra.mxu2 %v1323_v37  ;;  %v1306_v36 = vld [vmem:[%s1650_s26 + $0x70] sm:$0xf]  ;;  %v1458_v37 = vld [vmem:[%s1650_s26 + $0x74] sm:$0xf0] }
  0x3d   : > { %798 = vmatmul.bf16.gmra.mxu1 %v1263_v38  ;;  %838 = vmatmul.bf16.gmra.mxu3 %v1327_v39  ;;  %v1370_v38 = vld [vmem:[%s1650_s26 + $0xf0] sm:$0xf]  ;;  %v1474_v39 = vld [vmem:[%s1650_s26 + $0xf4] sm:$0xf0]  ;;  %v1307_v44 = vor.u32 %v1458_v37, %v1306_v36 }
  0x3e   : > { %v1371_v45 = vor.u32 %v1474_v39, %v1370_v38 }
  0x4c   : > { %714 = vmatmul.bf16.gmra.mxu0 %v1267_v48  ;;  %754 = vmatmul.bf16.gmra.mxu2 %v1331_v49  ;;  %v1728_v49 = vld [vmem:[%s1849_s2] ss:$0 sm:$0xff] }
  0x4d   : > { %803 = vmatmul.bf16.gmra.mxu1 %v1271_v50  ;;  %843 = vmatmul.bf16.gmra.mxu3 %v1335_v51 }
  0x5c   : > { %719 = vmatmul.bf16.gmra.mxu0 %v1275_v60  ;;  %759 = vmatmul.bf16.gmra.mxu2 %v1339_v61 }
  0x5d   : > { %808 = vmatmul.bf16.gmra.mxu1 %v1279_v62  ;;  %848 = vmatmul.bf16.gmra.mxu3 %v1343_v63 }
  0x6c   : > { %724 = vmatmul.bf16.gmra.mxu0 %v1283_v8  ;;  %764 = vmatmul.bf16.gmra.mxu2 %v1347_v9 }
  0x6d   : > { %813 = vmatmul.bf16.gmra.mxu1 %v1287_v10  ;;  %853 = vmatmul.bf16.gmra.mxu3 %v1351_v11 }
  0x7c   : > { %729 = vmatmul.bf16.gmra.mxu0 %v1291_v20  ;;  %769 = vmatmul.bf16.gmra.mxu2 %v1355_v21 }
  0x7d   : > { %818 = vmatmul.bf16.gmra.mxu1 %v1295_v22  ;;  %858 = vmatmul.bf16.gmra.mxu3 %v1359_v23 }
  0x8c   : > { %734 = vmatmul.bf16.gmra.mxu0 %v1299_v32  ;;  %774 = vmatmul.bf16.gmra.mxu2 %v1363_v33 }
  0x8d   : > { %823 = vmatmul.bf16.gmra.mxu1 %v1303_v34  ;;  %863 = vmatmul.bf16.gmra.mxu3 %v1367_v35 }
  0x9c   : > { %739 = vmatmul.bf16.gmra.mxu0 %v1307_v44  ;;  %779 = vmatmul.bf16.gmra.mxu2 %v1371_v45 }
  0x9d   : > { %828 = vmatmul.bf16.gmra.mxu1 %v1311_v46  ;;  %868 = vmatmul.bf16.gmra.mxu3 %v1375_v47 }
  0xa9   : > { %v705_v48 = vpop.f32.mrf.mxu0 }
  0xaa   : > { %v794_v50 = vpop.f32.mrf.mxu1 }
  0xab   : > { %v795_v51 = vadd.f32 %v794_v50, %v705_v48 }
  0xad   : > { %v977_v53 = vmul.f32 %v1728_v49, %v795_v51 }
  0xaf   : > { %v1013_v54 = vadd.f32 %v1733_v52, %v977_v53  ;;  %v745_v55 = vpop.f32.mrf.mxu2 }
  0xb0   : > { %v834_v56 = vpop.f32.mrf.mxu3 }
  0xb1   : > { %v1045_v57 = vmax.f32 %v1013_v54, 0.0  ;;  %v835_v58 = vadd.f32 %v834_v56, %v745_v55  ;;  %v707_v59 = vpop.f32.mrf.mxu0 }
  0xb2   : > { %v796_v60 = vpop.f32.mrf.mxu1 }
  0xb3   : > { %1077 = vst [vmem:[%s1742_s14] sm:$0xff] %v1045_v57  ;;  %v993_v61 = vmul.f32 %v1728_v49, %v835_v58  ;;  %v797_v62 = vadd.f32 %v796_v60, %v707_v59 }
  0xb5   : > { %v1029_v63 = vadd.f32 %v1733_v52, %v993_v61  ;;  %v978_v0 = vmul.f32 %v1728_v49, %v797_v62 }
  0xb7   : > { %v1061_v1 = vmax.f32 %v1029_v63, 0.0  ;;  %v1014_v2 = vadd.f32 %v1733_v52, %v978_v0  ;;  %v747_v3 = vpop.f32.mrf.mxu2 }
  0xb8   : > { %v836_v4 = vpop.f32.mrf.mxu3 }
  0xb9   : > { %1093 = vst [vmem:[%s1742_s14 + $0x80] sm:$0xff] %v1061_v1  ;;  %v1046_v5 = vmax.f32 %v1014_v2, 0.0  ;;  %v837_v6 = vadd.f32 %v836_v4, %v747_v3  ;;  %v710_v7 = vpop.f32.mrf.mxu0 }
  0xba   : > { %v799_v8 = vpop.f32.mrf.mxu1 }
  0xbb   : > { %1078 = vst [vmem:[%s1742_s14 + $0x8] sm:$0xff] %v1046_v5  ;;  %v994_v9 = vmul.f32 %v1728_v49, %v837_v6  ;;  %v800_v10 = vadd.f32 %v799_v8, %v710_v7 }
  0xbd   : > { %v1030_v11 = vadd.f32 %v1733_v52, %v994_v9  ;;  %v979_v12 = vmul.f32 %v1728_v49, %v800_v10 }
  0xbf   : > { %v1062_v13 = vmax.f32 %v1030_v11, 0.0  ;;  %v1015_v14 = vadd.f32 %v1733_v52, %v979_v12  ;;  %v750_v15 = vpop.f32.mrf.mxu2 }
  0xc0   : > { %v839_v16 = vpop.f32.mrf.mxu3 }
  0xc1   : > { %1094 = vst [vmem:[%s1742_s14 + $0x88] sm:$0xff] %v1062_v13  ;;  %v1047_v17 = vmax.f32 %v1015_v14, 0.0  ;;  %v840_v18 = vadd.f32 %v839_v16, %v750_v15  ;;  %v712_v19 = vpop.f32.mrf.mxu0 }
  0xc2   : > { %v801_v20 = vpop.f32.mrf.mxu1 }
  0xc3   : > { %1079 = vst [vmem:[%s1742_s14 + $0x10] sm:$0xff] %v1047_v17  ;;  %v995_v21 = vmul.f32 %v1728_v49, %v840_v18  ;;  %v802_v22 = vadd.f32 %v801_v20, %v712_v19 }
  0xc5   : > { %v1031_v23 = vadd.f32 %v1733_v52, %v995_v21  ;;  %v980_v24 = vmul.f32 %v1728_v49, %v802_v22 }
  0xc7   : > { %v1063_v25 = vmax.f32 %v1031_v23, 0.0  ;;  %v1016_v26 = vadd.f32 %v1733_v52, %v980_v24  ;;  %v752_v27 = vpop.f32.mrf.mxu2 }
  0xc8   : > { %v841_v28 = vpop.f32.mrf.mxu3 }
  0xc9   : > { %1095 = vst [vmem:[%s1742_s14 + $0x90] sm:$0xff] %v1063_v25  ;;  %v1048_v29 = vmax.f32 %v1016_v26, 0.0  ;;  %v842_v30 = vadd.f32 %v841_v28, %v752_v27  ;;  %v715_v31 = vpop.f32.mrf.mxu0 }
  0xca   : > { %v804_v32 = vpop.f32.mrf.mxu1 }
  0xcb   : > { %1080 = vst [vmem:[%s1742_s14 + $0x18] sm:$0xff] %v1048_v29  ;;  %v996_v33 = vmul.f32 %v1728_v49, %v842_v30  ;;  %v805_v34 = vadd.f32 %v804_v32, %v715_v31 }
  0xcd   : > { %v1032_v35 = vadd.f32 %v1733_v52, %v996_v33  ;;  %v981_v36 = vmul.f32 %v1728_v49, %v805_v34 }
  0xcf   : > { %v1064_v37 = vmax.f32 %v1032_v35, 0.0  ;;  %v1017_v38 = vadd.f32 %v1733_v52, %v981_v36  ;;  %v755_v39 = vpop.f32.mrf.mxu2 }
  0xd0   : > { %v844_v40 = vpop.f32.mrf.mxu3 }
  0xd1   : > { %1096 = vst [vmem:[%s1742_s14 + $0x98] sm:$0xff] %v1064_v37  ;;  %v1049_v41 = vmax.f32 %v1017_v38, 0.0  ;;  %v845_v42 = vadd.f32 %v844_v40, %v755_v39  ;;  %v717_v43 = vpop.f32.mrf.mxu0 }
  0xd2   : > { %v806_v44 = vpop.f32.mrf.mxu1 }
  0xd3   : > { %1081 = vst [vmem:[%s1742_s14 + $0x20] sm:$0xff] %v1049_v41  ;;  %v997_v45 = vmul.f32 %v1728_v49, %v845_v42  ;;  %v807_v46 = vadd.f32 %v806_v44, %v717_v43 }
  0xd5   : > { %v1033_v47 = vadd.f32 %v1733_v52, %v997_v45  ;;  %v982_v48 = vmul.f32 %v1728_v49, %v807_v46 }
  0xd7   : > { %v1065_v50 = vmax.f32 %v1033_v47, 0.0  ;;  %v1018_v51 = vadd.f32 %v1733_v52, %v982_v48  ;;  %v757_v53 = vpop.f32.mrf.mxu2 }
  0xd8   : > { %v846_v54 = vpop.f32.mrf.mxu3 }
  0xd9   : > { %1097 = vst [vmem:[%s1742_s14 + $0xa0] sm:$0xff] %v1065_v50  ;;  %v1050_v55 = vmax.f32 %v1018_v51, 0.0  ;;  %v847_v56 = vadd.f32 %v846_v54, %v757_v53  ;;  %v720_v57 = vpop.f32.mrf.mxu0 }
  0xda   : > { %v809_v58 = vpop.f32.mrf.mxu1 }
  0xdb   : > { %1082 = vst [vmem:[%s1742_s14 + $0x28] sm:$0xff] %v1050_v55  ;;  %v998_v59 = vmul.f32 %v1728_v49, %v847_v56  ;;  %v810_v60 = vadd.f32 %v809_v58, %v720_v57 }
  0xdd   : > { %v1034_v61 = vadd.f32 %v1733_v52, %v998_v59  ;;  %v983_v62 = vmul.f32 %v1728_v49, %v810_v60 }
  0xdf   : > { %v1066_v63 = vmax.f32 %v1034_v61, 0.0  ;;  %v1019_v0 = vadd.f32 %v1733_v52, %v983_v62  ;;  %v760_v1 = vpop.f32.mrf.mxu2 }
  0xe0   : > { %v849_v2 = vpop.f32.mrf.mxu3 }
  0xe1   : > { %1098 = vst [vmem:[%s1742_s14 + $0xa8] sm:$0xff] %v1066_v63  ;;  %v1051_v3 = vmax.f32 %v1019_v0, 0.0  ;;  %v850_v4 = vadd.f32 %v849_v2, %v760_v1  ;;  %v722_v5 = vpop.f32.mrf.mxu0 }
  0xe2   : > { %v811_v6 = vpop.f32.mrf.mxu1 }
  0xe3   : > { %1083 = vst [vmem:[%s1742_s14 + $0x30] sm:$0xff] %v1051_v3  ;;  %v999_v7 = vmul.f32 %v1728_v49, %v850_v4  ;;  %v812_v8 = vadd.f32 %v811_v6, %v722_v5 }
  0xe5   : > { %v1035_v9 = vadd.f32 %v1733_v52, %v999_v7  ;;  %v984_v10 = vmul.f32 %v1728_v49, %v812_v8 }
  0xe7   : > { %v1067_v11 = vmax.f32 %v1035_v9, 0.0  ;;  %v1020_v12 = vadd.f32 %v1733_v52, %v984_v10  ;;  %v762_v13 = vpop.f32.mrf.mxu2 }
  0xe8   : > { %v851_v14 = vpop.f32.mrf.mxu3 }
  0xe9   : > { %1099 = vst [vmem:[%s1742_s14 + $0xb0] sm:$0xff] %v1067_v11  ;;  %v1052_v15 = vmax.f32 %v1020_v12, 0.0  ;;  %v852_v16 = vadd.f32 %v851_v14, %v762_v13  ;;  %v725_v17 = vpop.f32.mrf.mxu0 }
  0xea   : > { %v814_v18 = vpop.f32.mrf.mxu1 }
  0xeb   : > { %1084 = vst [vmem:[%s1742_s14 + $0x38] sm:$0xff] %v1052_v15  ;;  %v1000_v19 = vmul.f32 %v1728_v49, %v852_v16  ;;  %v815_v20 = vadd.f32 %v814_v18, %v725_v17 }
  0xed   : > { %v1036_v21 = vadd.f32 %v1733_v52, %v1000_v19  ;;  %v985_v22 = vmul.f32 %v1728_v49, %v815_v20 }
  0xef   : > { %v1068_v23 = vmax.f32 %v1036_v21, 0.0  ;;  %v1021_v24 = vadd.f32 %v1733_v52, %v985_v22  ;;  %v765_v25 = vpop.f32.mrf.mxu2 }
  0xf0   : > { %v854_v26 = vpop.f32.mrf.mxu3 }
  0xf1   : > { %1100 = vst [vmem:[%s1742_s14 + $0xb8] sm:$0xff] %v1068_v23  ;;  %v1053_v27 = vmax.f32 %v1021_v24, 0.0  ;;  %v855_v28 = vadd.f32 %v854_v26, %v765_v25  ;;  %v727_v29 = vpop.f32.mrf.mxu0 }
  0xf2   : > { %v816_v30 = vpop.f32.mrf.mxu1 }
  0xf3   : > { %1085 = vst [vmem:[%s1742_s14 + $0x40] sm:$0xff] %v1053_v27  ;;  %v1001_v31 = vmul.f32 %v1728_v49, %v855_v28  ;;  %v817_v32 = vadd.f32 %v816_v30, %v727_v29 }
  0xf5   : > { %v1037_v33 = vadd.f32 %v1733_v52, %v1001_v31  ;;  %v986_v34 = vmul.f32 %v1728_v49, %v817_v32 }
  0xf7   : > { %v1069_v35 = vmax.f32 %v1037_v33, 0.0  ;;  %v1022_v36 = vadd.f32 %v1733_v52, %v986_v34  ;;  %v767_v37 = vpop.f32.mrf.mxu2 }
  0xf8   : > { %v856_v38 = vpop.f32.mrf.mxu3 }
  0xf9   : > { %1101 = vst [vmem:[%s1742_s14 + $0xc0] sm:$0xff] %v1069_v35  ;;  %v1054_v39 = vmax.f32 %v1022_v36, 0.0  ;;  %v857_v40 = vadd.f32 %v856_v38, %v767_v37  ;;  %v730_v41 = vpop.f32.mrf.mxu0 }
  0xfa   : > { %v819_v42 = vpop.f32.mrf.mxu1 }
  0xfb   : > { %1086 = vst [vmem:[%s1742_s14 + $0x48] sm:$0xff] %v1054_v39  ;;  %v1002_v43 = vmul.f32 %v1728_v49, %v857_v40  ;;  %v820_v44 = vadd.f32 %v819_v42, %v730_v41 }
  0xfd   : > { %v1038_v45 = vadd.f32 %v1733_v52, %v1002_v43  ;;  %v987_v46 = vmul.f32 %v1728_v49, %v820_v44 }
  0xff   : > { %v1070_v47 = vmax.f32 %v1038_v45, 0.0  ;;  %v1023_v48 = vadd.f32 %v1733_v52, %v987_v46  ;;  %v770_v50 = vpop.f32.mrf.mxu2 }
 0x100   : > { %v859_v51 = vpop.f32.mrf.mxu3 }
 0x101   : > { %1102 = vst [vmem:[%s1742_s14 + $0xc8] sm:$0xff] %v1070_v47  ;;  %v1055_v53 = vmax.f32 %v1023_v48, 0.0  ;;  %v860_v54 = vadd.f32 %v859_v51, %v770_v50  ;;  %v732_v55 = vpop.f32.mrf.mxu0 }
 0x102   : > { %v821_v56 = vpop.f32.mrf.mxu1 }
 0x103   : > { %1087 = vst [vmem:[%s1742_s14 + $0x50] sm:$0xff] %v1055_v53  ;;  %v1003_v57 = vmul.f32 %v1728_v49, %v860_v54  ;;  %v822_v58 = vadd.f32 %v821_v56, %v732_v55 }
 0x105   : > { %v1039_v59 = vadd.f32 %v1733_v52, %v1003_v57  ;;  %v988_v60 = vmul.f32 %v1728_v49, %v822_v58 }
 0x107   : > { %v1071_v61 = vmax.f32 %v1039_v59, 0.0  ;;  %v1024_v62 = vadd.f32 %v1733_v52, %v988_v60  ;;  %v772_v63 = vpop.f32.mrf.mxu2 }
 0x108   : > { %v861_v0 = vpop.f32.mrf.mxu3 }
 0x109   : > { %1103 = vst [vmem:[%s1742_s14 + $0xd0] sm:$0xff] %v1071_v61  ;;  %v1056_v1 = vmax.f32 %v1024_v62, 0.0  ;;  %v862_v2 = vadd.f32 %v861_v0, %v772_v63  ;;  %v735_v3 = vpop.f32.mrf.mxu0 }
 0x10a   : > { %v824_v4 = vpop.f32.mrf.mxu1 }
 0x10b   : > { %1088 = vst [vmem:[%s1742_s14 + $0x58] sm:$0xff] %v1056_v1  ;;  %v1004_v5 = vmul.f32 %v1728_v49, %v862_v2  ;;  %v825_v6 = vadd.f32 %v824_v4, %v735_v3 }
 0x10d   : > { %v1040_v7 = vadd.f32 %v1733_v52, %v1004_v5  ;;  %v989_v8 = vmul.f32 %v1728_v49, %v825_v6 }
 0x10f   : > { %v1072_v9 = vmax.f32 %v1040_v7, 0.0  ;;  %v1025_v10 = vadd.f32 %v1733_v52, %v989_v8  ;;  %v775_v11 = vpop.f32.mrf.mxu2 }
 0x110   : > { %v864_v12 = vpop.f32.mrf.mxu3 }
 0x111   : > { %1104 = vst [vmem:[%s1742_s14 + $0xd8] sm:$0xff] %v1072_v9  ;;  %v1057_v13 = vmax.f32 %v1025_v10, 0.0  ;;  %v865_v14 = vadd.f32 %v864_v12, %v775_v11  ;;  %v737_v15 = vpop.f32.mrf.mxu0 }
 0x112   : > { %v826_v16 = vpop.f32.mrf.mxu1 }
 0x113   : > { %1089 = vst [vmem:[%s1742_s14 + $0x60] sm:$0xff] %v1057_v13  ;;  %v1005_v17 = vmul.f32 %v1728_v49, %v865_v14  ;;  %v827_v18 = vadd.f32 %v826_v16, %v737_v15 }
 0x115   : > { %v1041_v19 = vadd.f32 %v1733_v52, %v1005_v17  ;;  %v990_v20 = vmul.f32 %v1728_v49, %v827_v18 }
 0x117   : > { %v1073_v21 = vmax.f32 %v1041_v19, 0.0  ;;  %v1026_v22 = vadd.f32 %v1733_v52, %v990_v20  ;;  %v777_v23 = vpop.f32.mrf.mxu2 }
 0x118   : > { %v866_v24 = vpop.f32.mrf.mxu3 }
 0x119   : > { %1105 = vst [vmem:[%s1742_s14 + $0xe0] sm:$0xff] %v1073_v21  ;;  %v1058_v25 = vmax.f32 %v1026_v22, 0.0  ;;  %v867_v26 = vadd.f32 %v866_v24, %v777_v23  ;;  %v740_v27 = vpop.f32.mrf.mxu0 }
 0x11a   : > { %v829_v28 = vpop.f32.mrf.mxu1 }
 0x11b   : > { %1090 = vst [vmem:[%s1742_s14 + $0x68] sm:$0xff] %v1058_v25  ;;  %v1006_v29 = vmul.f32 %v1728_v49, %v867_v26  ;;  %v830_v30 = vadd.f32 %v829_v28, %v740_v27 }
 0x11d   : > { %v1042_v31 = vadd.f32 %v1733_v52, %v1006_v29  ;;  %v991_v32 = vmul.f32 %v1728_v49, %v830_v30 }
 0x11f   : > { %v1074_v33 = vmax.f32 %v1042_v31, 0.0  ;;  %v1027_v34 = vadd.f32 %v1733_v52, %v991_v32  ;;  %v780_v35 = vpop.f32.mrf.mxu2 }
 0x120   : > { %v869_v36 = vpop.f32.mrf.mxu3 }
 0x121   : > { %1106 = vst [vmem:[%s1742_s14 + $0xe8] sm:$0xff] %v1074_v33  ;;  %v1059_v37 = vmax.f32 %v1027_v34, 0.0  ;;  %v870_v38 = vadd.f32 %v869_v36, %v780_v35  ;;  %v742_v39 = vpop.f32.mrf.mxu0 }
 0x122   : > { %v831_v40 = vpop.f32.mrf.mxu1 }
 0x123   : > { %1091 = vst [vmem:[%s1742_s14 + $0x70] sm:$0xff] %v1059_v37  ;;  %v1007_v41 = vmul.f32 %v1728_v49, %v870_v38  ;;  %v832_v42 = vadd.f32 %v831_v40, %v742_v39 }
 0x125   : > { %v1043_v43 = vadd.f32 %v1733_v52, %v1007_v41  ;;  %v992_v44 = vmul.f32 %v1728_v49, %v832_v42 }
 0x127   : > { %v1075_v45 = vmax.f32 %v1043_v43, 0.0  ;;  %v1028_v46 = vadd.f32 %v1733_v52, %v992_v44  ;;  %v782_v47 = vpop.f32.mrf.mxu2 }
 0x128   : > { %v871_v48 = vpop.f32.mrf.mxu3 }
 0x129   : > { %1107 = vst [vmem:[%s1742_s14 + $0xf0] sm:$0xff] %v1075_v45  ;;  %v1060_v50 = vmax.f32 %v1028_v46, 0.0  ;;  %v872_v51 = vadd.f32 %v871_v48, %v782_v47 }
 0x12b   : > { %1092 = vst [vmem:[%s1742_s14 + $0x78] sm:$0xff] %v1060_v50  ;;  %v1008_v53 = vmul.f32 %v1728_v49, %v872_v51 }
 0x12d   : > { %v1044_v54 = vadd.f32 %v1733_v52, %v1008_v53 }
 0x12f   : > { %v1076_v55 = vmax.f32 %v1044_v54, 0.0 }
 0x131   : > { %1108 = vst [vmem:[%s1742_s14 + $0xf8] sm:$0xff] %v1076_v55 }
 0x132 PF: > { %s14_s17 = sadd.s32 1, %s1555_s17   ;;  %s1852_s15 = smov %s1551_s16 }
 0x133   : > { %p11_p5 = scmp.ge.s32.totalorder %s14_s17, 4   ;;  %s1853_s16 = smov %s1855_s18 }
 0x135   :  { %13 = sbr.rel (!%p11_p5) target bundleno = 2 (0x2), region = 83 }

// kernel: _lambda_.25
= control target key start
LH: loop header
LB: loop body
LE: loop exit
PB: predicated region body
PF: predicated region fallthrough
CT: control target
= control target key end

     0   :  { %s1085_s15 = smov 0   ;;  %s1087_s16 = smov 0   ;;  %s1262_s0 = inlined_call_operand.vmem [shape: bf16[128,640], index: 0, kind: input, shape index: {}]   ;;  %s1263_s1 = inlined_call_operand.vmem [shape: bf16[640,128], index: 1, kind: input, shape index: {}]   ;;  %s1264_s2 = inlined_call_operand.vmem [shape: f32[1,128], index: 2, kind: input, shape index: {}]   ;;  %s1265_s3 = inlined_call_operand.vmem [shape: f32[1,128], index: 3, kind: input, shape index: {}]   ;;  %s1266_s4 = inlined_call_operand.vmem [shape: f32[128,128], index: 4, kind: output, shape index: {}]  }
   0x1   :  { %s1089_s17 = smov 0   ;;  %s1091_s18 = smov 0  }
   0x2   :  { %s1093_s19 = smov 0  }
   0x3 LB: > { %s26_s20 = sadd.s32 1, %s1053_s18  ;;  %p49_p1 = scmp.ne.s32.totalorder %s1045_s16, %s1041_s15  ;;  %s1057_s19 = sphi %s1093_s19, %s14_s19   ;;  %s1053_s18 = sphi %s1091_s18, %s1270_s18   ;;  %s1049_s17 = sphi %s1089_s17, %s1269_s17   ;;  %s1045_s16 = sphi %s1087_s16, %s1268_s16   ;;  %s1041_s15 = sphi %s1085_s15, %s1267_s15  }
   0x4   : > { %p27_p0 = scmp.ge.s32.totalorder %s26_s20, 5  ;;  %p50_p2 = scmp.eq.s32.totalorder %s1057_s19, 0 }
   0x5   : > { %s42_s22 = sadd.s32 1, %s1045_s16  ;;  %p859_p5 = scmp.ge.s32.totalorder %s1057_s19, 5 }
   0x6   : > { %s1272_s20 = smov (%p27_p0, %s26_s20), 0  ;;  %p51_p3 = por %p50_p2, %p49_p1 }
   0x7   : > { %s38_s21 = ssub.s32 %s1053_s18, %s1272_s20  ;;  %195 = sbr.rel (%p859_p5) target bundleno = 32 (0x20), region = 24 }
   0x8   : > { %p40_p4 = scmp.eq.s32.totalorder %s38_s21, 0 }
   0xa   : > { %s1120_s23 = scalar_select %p40_p4, %s1045_s16, %s42_s22  }
   0xc   : > { %198 = sbr.rel (!%p51_p3) target bundleno = 32 (0x20), region = 28  ;;  %s200_s24 = sand.u32 (%p51_p3), 1, %s1045_s16  }
   0xd   : > { %s861_s25 = sshll.u32 (%p51_p3), %s1053_s18, 2  ;;  %s860_s26 = sshll.u32 (%p51_p3), %s200_s24, 6 }
   0xe   : > { %s1128_s29 = scalar_lea.vmem (%p51_p3), %s1262_s0, %s861_s25  ;;  %s202_s30 = scalar_lea.vmem (%p51_p3), [#allocation3], %s860_s26 }
   0xf   : > { %v224_v0 = vld [vmem:[%s1128_s29] sm:$0xf] (%p51_p3)  ;;  %v226_v1 = vld [vmem:[%s1128_s29 + $0x14] sm:$0xf] (%p51_p3)  ;;  %v228_v2 = vld [vmem:[%s1128_s29 + $0x28] sm:$0xf] (%p51_p3) }
  0x10   : > { %225 = vst [vmem:[%s202_s30] sm:$0xf] (%p51_p3), %v224_v0  ;;  %v230_v3 = vld [vmem:[%s1128_s29 + $0x3c] sm:$0xf] (%p51_p3)  ;;  %v232_v4 = vld [vmem:[%s1128_s29 + $0x50] sm:$0xf] (%p51_p3) }
  0x11   : > { %227 = vst [vmem:[%s202_s30 + $0x4] sm:$0xf] %v226_v1  ;;  %v234_v5 = vld [vmem:[%s1128_s29 + $0x64] sm:$0xf]  ;;  %v236_v6 = vld [vmem:[%s1128_s29 + $0x78] sm:$0xf] }
  0x12   : > { %229 = vst [vmem:[%s202_s30 + $0x8] sm:$0xf] %v228_v2  ;;  %v238_v7 = vld [vmem:[%s1128_s29 + $0x8c] sm:$0xf]  ;;  %v240_v8 = vld [vmem:[%s1128_s29 + $0xa0] sm:$0xf] }
  0x13   : > { %231 = vst [vmem:[%s202_s30 + $0xc] sm:$0xf] %v230_v3  ;;  %v242_v9 = vld [vmem:[%s1128_s29 + $0xb4] sm:$0xf]  ;;  %v244_v10 = vld [vmem:[%s1128_s29 + $0xc8] sm:$0xf] }
  0x14   : > { %233 = vst [vmem:[%s202_s30 + $0x10] sm:$0xf] %v232_v4  ;;  %v246_v11 = vld [vmem:[%s1128_s29 + $0xdc] sm:$0xf]  ;;  %v248_v12 = vld [vmem:[%s1128_s29 + $0xf0] sm:$0xf] }
  0x15   : > { %235 = vst [vmem:[%s202_s30 + $0x14] sm:$0xf] %v234_v5  ;;  %v250_v13 = vld [vmem:[%s1128_s29 + $0x104] sm:$0xf]  ;;  %v252_v14 = vld [vmem:[%s1128_s29 + $0x118] sm:$0xf] }
  0x16   : > { %237 = vst [vmem:[%s202_s30 + $0x18] sm:$0xf] %v236_v6  ;;  %v254_v15 = vld [vmem:[%s1128_s29 + $0x12c] sm:$0xf] }
  0x17   : > { %239 = vst [vmem:[%s202_s30 + $0x1c] sm:$0xf] %v238_v7 }
  0x18   : > { %241 = vst [vmem:[%s202_s30 + $0x20] sm:$0xf] %v240_v8 }
  0x19   : > { %243 = vst [vmem:[%s202_s30 + $0x24] sm:$0xf] %v242_v9 }
  0x1a   : > { %245 = vst [vmem:[%s202_s30 + $0x28] sm:$0xf] %v244_v10 }
  0x1b   : > { %247 = vst [vmem:[%s202_s30 + $0x2c] sm:$0xf] %v246_v11 }
  0x1c   : > { %249 = vst [vmem:[%s202_s30 + $0x30] sm:$0xf] %v248_v12 }
  0x1d   : > { %251 = vst [vmem:[%s202_s30 + $0x34] sm:$0xf] %v250_v13 }
  0x1e   : > { %253 = vst [vmem:[%s202_s30 + $0x38] sm:$0xf] %v252_v14 }
  0x1f   : > { %255 = vst [vmem:[%s202_s30 + $0x3c] sm:$0xf] %v254_v15 }
  0x20 PF: > { %p862_p6 = scmp.ge.s32.totalorder %s1057_s19, 1  ;;  %p322_p7 = scmp.lt.s32.totalorder %s1057_s19, 6 }
  0x22   : > { %p323_p8 = pnand %p862_p6, %p322_p7 }
  0x23   : > { %s329_s5 = sand.u32 (!%p323_p8), 1, %s1041_s15   ;;  %s864_s6 = sshll.u32 (!%p323_p8), %s1049_s17, 4 }
  0x24   : > { %326 = sbr.rel (%p323_p8) target bundleno = 279 (0x117), region = 73  ;;  %s863_s7 = sshll.u32 (!%p323_p8), %s329_s5, 6 }
  0x25   : > { %p373_p9 = scmp.lt.s32.totalorder (!%p323_p8), %s864_s6, 79  ;;  %s1155_s12 = scalar_lea.vmem (!%p323_p8), [#allocation3], %s863_s7 }
  0x26   : > { %p866_p10 = scmp.ne.s32.totalorder (!%p323_p8), %s1049_s17, 0 }
  0x29   : > { %s1274_s6 = smov (!%p373_p9, %s864_s6), 79  ;;  %399 = sbr.rel (%p866_p10) target bundleno = 63 (0x3f), region = 81 }
  0x2a   : > { %s865_s8 = sshll.u32 %s1274_s6, 2 }
  0x2b   : > { %s1153_s11 = scalar_lea.vmem %s1263_s1, %s865_s8 }
  0x2e   : > { %v1059_v16 = vmov 0.0  }
  0x2f   : > { %400 = vst [vmem:[#allocation2 + $0x30] sm:$0xff] %v1059_v16 }
  0x30   : > { %401 = vst [vmem:[#allocation2] sm:$0xff] %v1059_v16 }
  0x31   : > { %402 = vst [vmem:[#allocation2 + $0x58] sm:$0xff] %v1059_v16 }
  0x32   : > { %403 = vst [vmem:[#allocation2 + $0x18] sm:$0xff] %v1059_v16 }
  0x33   : > { %404 = vst [vmem:[#allocation2 + $0x50] sm:$0xff] %v1059_v16 }
  0x34   : > { %405 = vst [vmem:[#allocation2 + $0x68] sm:$0xff] %v1059_v16 }
  0x35   : > { %406 = vst [vmem:[#allocation2 + $0x8] sm:$0xff] %v1059_v16 }
  0x36   : > { %407 = vst [vmem:[#allocation2 + $0x48] sm:$0xff] %v1059_v16 }
  0x37   : > { %408 = vst [vmem:[#allocation2 + $0x40] sm:$0xff] %v1059_v16 }
  0x38   : > { %409 = vst [vmem:[#allocation2 + $0x20] sm:$0xff] %v1059_v16 }
  0x39   : > { %410 = vst [vmem:[#allocation2 + $0x10] sm:$0xff] %v1059_v16 }
  0x3a   : > { %411 = vst [vmem:[#allocation2 + $0x38] sm:$0xff] %v1059_v16 }
  0x3b   : > { %412 = vst [vmem:[#allocation2 + $0x60] sm:$0xff] %v1059_v16 }
  0x3c   : > { %413 = vst [vmem:[#allocation2 + $0x70] sm:$0xff] %v1059_v16 }
  0x3d   : > { %414 = vst [vmem:[#allocation2 + $0x78] sm:$0xff] %v1059_v16 }
  0x3e   : > { %415 = vst [vmem:[#allocation2 + $0x28] sm:$0xff] %v1059_v16 }
  0x3f PF: > { %v951_v17 = vld [vmem:[%s1153_s11 + $0x38] sm:$0xff]  ;;  %v950_v18 = vld [vmem:[%s1153_s11 + $0x30] sm:$0xff]  ;;  %v949_v19 = vld [vmem:[%s1153_s11 + $0x28] sm:$0xff]  ;;  %p931_p11 = scmp.ne.s32.totalorder %s1049_s17, 4 }
  0x40   : > { %560 = vmatpush.bf16.msra.mxu0 %v951_v17  ;;  %952 = vmatpush.bf16.msra.mxu1 %v951_v17  ;;  %v948_v20 = vld [vmem:[%s1153_s11 + $0x20] sm:$0xff]  ;;  %v947_v21 = vld [vmem:[%s1153_s11 + $0x18] sm:$0xff]  ;;  %v946_v22 = vld [vmem:[%s1153_s11 + $0x10] sm:$0xff] }
  0x41   : > { %953 = vmatpush.bf16.msra.mxu2 %v951_v17  ;;  %954 = vmatpush.bf16.msra.mxu3 %v951_v17  ;;  %v945_v23 = vld [vmem:[%s1153_s11 + $0x8] sm:$0xff]  ;;  %v944_v24 = vld [vmem:[%s1153_s11] sm:$0xff]  ;;  %v938_v26 = vld [vmem:[%s1155_s12 + $0x10] sm:$0xff] }
  0x42   : > { %v936_v25 = vld [vmem:[%s1155_s12] sm:$0xff]  ;;  %v942_v28 = vld [vmem:[%s1155_s12 + $0x30] sm:$0xff]  ;;  %v937_v29 = vld [vmem:[%s1155_s12 + $0x8] sm:$0xff] }
  0x43   : > { %v940_v27 = vld [vmem:[%s1155_s12 + $0x20] sm:$0xff]  ;;  %v939_v30 = vld [vmem:[%s1155_s12 + $0x18] sm:$0xff]  ;;  %v941_v31 = vld [vmem:[%s1155_s12 + $0x28] sm:$0xff] }
  0x44   : > { %561 = vmatpush.bf16.msra.mxu0 %v950_v18  ;;  %955 = vmatpush.bf16.msra.mxu1 %v950_v18  ;;  %v943_v32 = vld [vmem:[%s1155_s12 + $0x38] sm:$0xff]  ;;  %v416_v33 = vld [vmem:[#allocation2 + $0x30] sm:$0xff]  ;;  %v424_v39 = vld [vmem:[#allocation2 + $0x40] sm:$0xff] }
  0x45   : > { %956 = vmatpush.bf16.msra.mxu2 %v950_v18  ;;  %957 = vmatpush.bf16.msra.mxu3 %v950_v18  ;;  %v420_v34 = vld [vmem:[#allocation2 + $0x50] sm:$0xff]  ;;  %v428_v40 = vld [vmem:[#allocation2 + $0x60] sm:$0xff]  ;;  %v421_v42 = vld [vmem:[#allocation2 + $0x68] sm:$0xff] }
  0x46   : > { %v417_v41 = vld [vmem:[#allocation2] sm:$0xff]  ;;  %v429_v52 = vld [vmem:[#allocation2 + $0x70] sm:$0xff]  ;;  %v418_v53 = vld [vmem:[#allocation2 + $0x58] sm:$0xff] }
  0x47   : > { %v425_v51 = vld [vmem:[#allocation2 + $0x20] sm:$0xff]  ;;  %v422_v54 = vld [vmem:[#allocation2 + $0x8] sm:$0xff]  ;;  %v426_v63 = vld [vmem:[#allocation2 + $0x10] sm:$0xff] }
  0x48   : > { %562 = vmatpush.bf16.msra.mxu0 %v949_v19  ;;  %958 = vmatpush.bf16.msra.mxu1 %v949_v19  ;;  %v430_v0 = vld [vmem:[#allocation2 + $0x78] sm:$0xff]  ;;  %v423_v2 = vld [vmem:[#allocation2 + $0x48] sm:$0xff] }
  0x49   : > { %959 = vmatpush.bf16.msra.mxu2 %v949_v19  ;;  %960 = vmatpush.bf16.msra.mxu3 %v949_v19  ;;  %v419_v1 = vld [vmem:[#allocation2 + $0x18] sm:$0xff]  ;;  %v431_v12 = vld [vmem:[#allocation2 + $0x28] sm:$0xff] }
  0x4a   : > { %v427_v11 = vld [vmem:[#allocation2 + $0x38] sm:$0xff] }
  0x4c   : > { %563 = vmatpush.bf16.msra.mxu0 %v948_v20  ;;  %961 = vmatpush.bf16.msra.mxu1 %v948_v20 }
  0x4d   : > { %962 = vmatpush.bf16.msra.mxu2 %v948_v20  ;;  %963 = vmatpush.bf16.msra.mxu3 %v948_v20 }
  0x50   : > { %564 = vmatpush.bf16.msra.mxu0 %v947_v21  ;;  %964 = vmatpush.bf16.msra.mxu1 %v947_v21 }
  0x51   : > { %965 = vmatpush.bf16.msra.mxu2 %v947_v21  ;;  %966 = vmatpush.bf16.msra.mxu3 %v947_v21 }
  0x54   : > { %565 = vmatpush.bf16.msra.mxu0 %v946_v22  ;;  %967 = vmatpush.bf16.msra.mxu1 %v946_v22 }
  0x55   : > { %968 = vmatpush.bf16.msra.mxu2 %v946_v22  ;;  %969 = vmatpush.bf16.msra.mxu3 %v946_v22 }
  0x58   : > { %566 = vmatpush.bf16.msra.mxu0 %v945_v23  ;;  %970 = vmatpush.bf16.msra.mxu1 %v945_v23 }
  0x59   : > { %971 = vmatpush.bf16.msra.mxu2 %v945_v23  ;;  %972 = vmatpush.bf16.msra.mxu3 %v945_v23 }
  0x5c   : > { %567 = vmatpush.bf16.msra.mxu0 %v944_v24  ;;  %973 = vmatpush.bf16.msra.mxu1 %v944_v24 }
  0x5d   : > { %974 = vmatpush.bf16.msra.mxu2 %v944_v24  ;;  %975 = vmatpush.bf16.msra.mxu3 %v944_v24 }
  0x5f   : > { %568 = vmatmul.bf16.vlgmr.msra.gmra.mxu0 %v936_v25  ;;  %578 = vmatmul.bf16.vlgmr.msra.gmra.mxu1 %v938_v26 }
  0x60   : > { %588 = vmatmul.bf16.vlgmr.msra.gmra.mxu2 %v940_v27  ;;  %598 = vmatmul.bf16.vlgmr.msra.gmra.mxu3 %v942_v28 }
  0x6f   : > { %573 = vmatmul.bf16.gmra.mxu0 %v937_v29  ;;  %583 = vmatmul.bf16.gmra.mxu1 %v939_v30 }
  0x70   : > { %593 = vmatmul.bf16.gmra.mxu2 %v941_v31  ;;  %603 = vmatmul.bf16.gmra.mxu3 %v943_v32 }
  0xdc   : > { %v569_v35 = vpop.f32.mrf.mxu0  ;;  %v579_v36 = vpop.f32.mrf.mxu1 }
  0xdd   : > { %v609_v37 = vadd.f32 %v569_v35, %v416_v33  ;;  %v613_v38 = vadd.f32 %v579_v36, %v420_v34 }
  0xdf   : > { %625 = vst [vmem:[#allocation2 + $0x30] sm:$0xff] %v609_v37 }
  0xe0   : > { %629 = vst [vmem:[#allocation2 + $0x50] sm:$0xff] %v613_v38 }
  0xe3   : > { %v589_v43 = vpop.f32.mrf.mxu2  ;;  %v599_v44 = vpop.f32.mrf.mxu3 }
  0xe4   : > { %v617_v45 = vadd.f32 %v589_v43, %v424_v39  ;;  %v621_v46 = vadd.f32 %v599_v44, %v428_v40  ;;  %v571_v47 = vpop.f32.mrf.mxu0  ;;  %v581_v48 = vpop.f32.mrf.mxu1 }
  0xe5   : > { %v610_v49 = vadd.f32 %v571_v47, %v417_v41  ;;  %v614_v50 = vadd.f32 %v581_v48, %v421_v42 }
  0xe6   : > { %633 = vst [vmem:[#allocation2 + $0x40] sm:$0xff] %v617_v45 }
  0xe7   : > { %637 = vst [vmem:[#allocation2 + $0x60] sm:$0xff] %v621_v46 }
  0xe8   : > { %626 = vst [vmem:[#allocation2] sm:$0xff] %v610_v49 }
  0xe9   : > { %630 = vst [vmem:[#allocation2 + $0x68] sm:$0xff] %v614_v50 }
  0xeb   : > { %v591_v55 = vpop.f32.mrf.mxu2  ;;  %v601_v56 = vpop.f32.mrf.mxu3 }
  0xec   : > { %v618_v57 = vadd.f32 %v591_v55, %v425_v51  ;;  %v622_v58 = vadd.f32 %v601_v56, %v429_v52  ;;  %v574_v59 = vpop.f32.mrf.mxu0  ;;  %v584_v60 = vpop.f32.mrf.mxu1 }
  0xed   : > { %v611_v61 = vadd.f32 %v574_v59, %v418_v53  ;;  %v615_v62 = vadd.f32 %v584_v60, %v422_v54 }
  0xee   : > { %634 = vst [vmem:[#allocation2 + $0x20] sm:$0xff] %v618_v57 }
  0xef   : > { %638 = vst [vmem:[#allocation2 + $0x70] sm:$0xff] %v622_v58 }
  0xf0   : > { %627 = vst [vmem:[#allocation2 + $0x58] sm:$0xff] %v611_v61 }
  0xf1   : > { %631 = vst [vmem:[#allocation2 + $0x8] sm:$0xff] %v615_v62 }
  0xf3   : > { %v594_v3 = vpop.f32.mrf.mxu2  ;;  %v604_v4 = vpop.f32.mrf.mxu3 }
  0xf4   : > { %v619_v5 = vadd.f32 %v594_v3, %v426_v63  ;;  %v623_v6 = vadd.f32 %v604_v4, %v430_v0  ;;  %v576_v7 = vpop.f32.mrf.mxu0  ;;  %v586_v8 = vpop.f32.mrf.mxu1 }
  0xf5   : > { %v612_v9 = vadd.f32 %v576_v7, %v419_v1  ;;  %v616_v10 = vadd.f32 %v586_v8, %v423_v2 }
  0xf6   : > { %635 = vst [vmem:[#allocation2 + $0x10] sm:$0xff] %v619_v5 }
  0xf7   : > { %639 = vst [vmem:[#allocation2 + $0x78] sm:$0xff] %v623_v6 }
  0xf8   : > { %628 = vst [vmem:[#allocation2 + $0x18] sm:$0xff] %v612_v9 }
  0xf9   : > { %632 = vst [vmem:[#allocation2 + $0x48] sm:$0xff] %v616_v10 }
  0xfb   : > { %v596_v13 = vpop.f32.mrf.mxu2  ;;  %v606_v14 = vpop.f32.mrf.mxu3  ;;  %644 = sbr.rel (%p931_p11) target bundleno = 279 (0x117), region = 85 }
  0xfc   : > { %v620_v15 = vadd.f32 %v596_v13, %v427_v11  ;;  %v624_v16 = vadd.f32 %v606_v14, %v431_v12 }
  0xfe   : > { %636 = vst [vmem:[#allocation2 + $0x38] sm:$0xff] %v620_v15 }
  0xff   : > { %640 = vst [vmem:[#allocation2 + $0x28] sm:$0xff] %v624_v16 }
 0x100   : > { %v645_v17 = vld [vmem:[#allocation2 + $0x30] sm:$0xff]  ;;  %v1017_v18 = vld [vmem:[%s1264_s2] ss:$0 sm:$0xff]  ;;  %v647_v23 = vld [vmem:[#allocation2 + $0x58] sm:$0xff] }
 0x101   : > { %v1181_v19 = vld [vmem:[%s1265_s3] ss:$0 sm:$0xff]  ;;  %v665_v21 = vmul.f32 %v1017_v18, %v645_v17  ;;  %v648_v24 = vld [vmem:[#allocation2 + $0x18] sm:$0xff]  ;;  %v649_v25 = vld [vmem:[#allocation2 + $0x50] sm:$0xff]  ;;  %v667_v26 = vmul.f32 %v1017_v18, %v647_v23 }
 0x102   : > { %v646_v20 = vld [vmem:[#allocation2] sm:$0xff]  ;;  %v668_v27 = vmul.f32 %v1017_v18, %v648_v24  ;;  %v669_v28 = vmul.f32 %v1017_v18, %v649_v25  ;;  %v650_v29 = vld [vmem:[#allocation2 + $0x68] sm:$0xff]  ;;  %v655_v46 = vld [vmem:[#allocation2 + $0x10] sm:$0xff] }
 0x103   : > { %v666_v22 = vmul.f32 %v1017_v18, %v646_v20  ;;  %v651_v30 = vld [vmem:[#allocation2 + $0x8] sm:$0xff]  ;;  %v685_v32 = vadd.f32 %v1181_v19, %v665_v21  ;;  %v670_v34 = vmul.f32 %v1017_v18, %v650_v29  ;;  %v687_v36 = vadd.f32 %v1181_v19, %v667_v26  ;;  %v653_v40 = vld [vmem:[#allocation2 + $0x40] sm:$0xff]  ;;  %v658_v52 = vld [vmem:[#allocation2 + $0x70] sm:$0xff] }
 0x104   : > { %v652_v31 = vld [vmem:[#allocation2 + $0x48] sm:$0xff]  ;;  %v671_v35 = vmul.f32 %v1017_v18, %v651_v30  ;;  %v688_v37 = vadd.f32 %v1181_v19, %v668_v27  ;;  %v689_v38 = vadd.f32 %v1181_v19, %v669_v28  ;;  %v654_v41 = vld [vmem:[#allocation2 + $0x20] sm:$0xff]  ;;  %v659_v53 = vld [vmem:[#allocation2 + $0x78] sm:$0xff]  ;;  %v673_v56 = vmul.f32 %v1017_v18, %v653_v40 }
 0x105   : > { %v686_v33 = vadd.f32 %v1181_v19, %v666_v22  ;;  %v672_v39 = vmul.f32 %v1017_v18, %v652_v31  ;;  %v701_v42 = vmax.f32 %v685_v32, 0.0  ;;  %v690_v44 = vadd.f32 %v1181_v19, %v670_v34  ;;  %v656_v47 = vld [vmem:[#allocation2 + $0x38] sm:$0xff]  ;;  %v657_v48 = vld [vmem:[#allocation2 + $0x60] sm:$0xff] }
 0x106   : > { %v691_v45 = vadd.f32 %v1181_v19, %v671_v35  ;;  %v703_v49 = vmax.f32 %v687_v36, 0.0  ;;  %v704_v50 = vmax.f32 %v688_v37, 0.0  ;;  %v705_v54 = vmax.f32 %v689_v38, 0.0  ;;  %v660_v58 = vld [vmem:[#allocation2 + $0x28] sm:$0xff] }
 0x107   : > { %v702_v43 = vmax.f32 %v686_v33, 0.0  ;;  %v692_v51 = vadd.f32 %v1181_v19, %v672_v39  ;;  %717 = vst [vmem:[%s1266_s4] sm:$0xff] %v701_v42  ;;  %v706_v55 = vmax.f32 %v690_v44, 0.0  ;;  %v674_v57 = vmul.f32 %v1017_v18, %v654_v41 }
 0x108   : > { %v707_v59 = vmax.f32 %v691_v45, 0.0  ;;  %v675_v60 = vmul.f32 %v1017_v18, %v655_v46  ;;  %v676_v61 = vmul.f32 %v1017_v18, %v656_v47  ;;  %v677_v62 = vmul.f32 %v1017_v18, %v657_v48  ;;  %719 = vst [vmem:[%s1266_s4 + $0x10] sm:$0xff] %v703_v49 }
 0x109   : > { %718 = vst [vmem:[%s1266_s4 + $0x8] sm:$0xff] %v702_v43  ;;  %v693_v63 = vadd.f32 %v1181_v19, %v673_v56  ;;  %v694_v0 = vadd.f32 %v1181_v19, %v674_v57  ;;  %v678_v1 = vmul.f32 %v1017_v18, %v658_v52  ;;  %v679_v2 = vmul.f32 %v1017_v18, %v659_v53 }
 0x10a   : > { %720 = vst [vmem:[%s1266_s4 + $0x18] sm:$0xff] %v704_v50  ;;  %v708_v3 = vmax.f32 %v692_v51, 0.0  ;;  %v695_v4 = vadd.f32 %v1181_v19, %v675_v60  ;;  %v696_v5 = vadd.f32 %v1181_v19, %v676_v61  ;;  %v680_v6 = vmul.f32 %v1017_v18, %v660_v58 }
 0x10b   : > { %721 = vst [vmem:[%s1266_s4 + $0x20] sm:$0xff] %v705_v54  ;;  %v709_v7 = vmax.f32 %v693_v63, 0.0  ;;  %v697_v8 = vadd.f32 %v1181_v19, %v677_v62  ;;  %v710_v9 = vmax.f32 %v694_v0, 0.0  ;;  %v698_v10 = vadd.f32 %v1181_v19, %v678_v1 }
 0x10c   : > { %722 = vst [vmem:[%s1266_s4 + $0x28] sm:$0xff] %v706_v55  ;;  %v711_v11 = vmax.f32 %v695_v4, 0.0  ;;  %v699_v12 = vadd.f32 %v1181_v19, %v679_v2  ;;  %v712_v13 = vmax.f32 %v696_v5, 0.0  ;;  %v700_v14 = vadd.f32 %v1181_v19, %v680_v6 }
 0x10d   : > { %723 = vst [vmem:[%s1266_s4 + $0x30] sm:$0xff] %v707_v59  ;;  %v713_v15 = vmax.f32 %v697_v8, 0.0  ;;  %v714_v16 = vmax.f32 %v698_v10, 0.0 }
 0x10e   : > { %724 = vst [vmem:[%s1266_s4 + $0x38] sm:$0xff] %v708_v3  ;;  %v715_v17 = vmax.f32 %v699_v12, 0.0  ;;  %v716_v18 = vmax.f32 %v700_v14, 0.0 }
 0x10f   : > { %725 = vst [vmem:[%s1266_s4 + $0x40] sm:$0xff] %v709_v7 }
 0x110   : > { %726 = vst [vmem:[%s1266_s4 + $0x48] sm:$0xff] %v710_v9 }
 0x111   : > { %727 = vst [vmem:[%s1266_s4 + $0x50] sm:$0xff] %v711_v11 }
 0x112   : > { %728 = vst [vmem:[%s1266_s4 + $0x58] sm:$0xff] %v712_v13 }
 0x113   : > { %729 = vst [vmem:[%s1266_s4 + $0x60] sm:$0xff] %v713_v15 }
 0x114   : > { %730 = vst [vmem:[%s1266_s4 + $0x68] sm:$0xff] %v714_v16 }
 0x115   : > { %731 = vst [vmem:[%s1266_s4 + $0x70] sm:$0xff] %v715_v17 }
 0x116   : > { %732 = vst [vmem:[%s1266_s4 + $0x78] sm:$0xff] %v716_v18 }
 0x117 PF: > { %s14_s19 = sadd.s32 1, %s1057_s19   ;;  %s1267_s15 = smov %s1045_s16 }
 0x118   : > { %p11_p12 = scmp.ge.s32.totalorder %s14_s19, 7   ;;  %s1268_s16 = smov %s1120_s23 }
 0x119   : > { %s1269_s17 = smov %s1053_s18  ;;  %s1270_s18 = smov %s1272_s20 }
 0x11a   :  { %13 = sbr.rel (!%p11_p12) target bundleno = 3 (0x3), region = 129 }

// kernel: _lambda_.27
= control target key start
LH: loop header
LB: loop body
LE: loop exit
PB: predicated region body
PF: predicated region fallthrough
CT: control target
= control target key end

     0   :  { %9 = vsyncpa [#allocation5], 0  ;;  %s1398_s0 = inlined_call_operand.vmem [shape: bf16[128,640], index: 0, kind: input, shape index: {}]   ;;  %s1399_s1 = inlined_call_operand.vmem [shape: bf16[640,128], index: 1, kind: input, shape index: {}]   ;;  %s1400_s2 = inlined_call_operand.hbm [shape: f32[1,128], index: 2, kind: input, shape index: {}]   ;;  %s1401_s3 = inlined_call_operand.hbm [shape: f32[1,128], index: 3, kind: input, shape index: {}]   ;;  %s1402_s4 = inlined_call_operand.vmem [shape: f32[128,128], index: 4, kind: output, shape index: {}]  }
   0x1   :  { %10 = vsyncpa [#allocation7], 0  ;;  %s1192_s15 = smov 0   ;;  %s1194_s16 = smov 0  }
   0x2   :  { %s1196_s17 = smov 0   ;;  %s1198_s18 = smov 0  }
   0x3   :  { %s1200_s19 = smov 0  }
   0x4 LB: > { %s869_s20 = sadd.s32 4294967295, %s1162_s19   ;;  %s28_s21 = sadd.s32 1, %s1158_s18  ;;  %s1162_s19 = sphi %s1200_s19, %s16_s19   ;;  %s1158_s18 = sphi %s1198_s18, %s1409_s18   ;;  %s1154_s17 = sphi %s1196_s17, %s1408_s17   ;;  %s1150_s16 = sphi %s1194_s16, %s1407_s16   ;;  %s1146_s15 = sphi %s1192_s15, %s1406_s15  }
   0x5   : > { %p29_p0 = scmp.ge.s32.totalorder %s28_s21, 5  ;;  %s44_s22 = sadd.s32 1, %s1150_s16 }
   0x6   : > { %p51_p1 = scmp.ne.s32.totalorder %s1150_s16, %s1146_s15  ;;  %p52_p2 = scmp.eq.s32.totalorder %s1162_s19, 0 }
   0x7   : > { %s1411_s21 = smov (%p29_p0, %s28_s21), 0  ;;  %p870_p4 = scmp.ge.s32.totalorder %s1162_s19, 1 }
   0x8   : > { %p1225_p3 = por %p52_p2, %p51_p1  ;;  %s40_s24 = ssub.s32 %s1158_s18, %s1411_s21 }
   0x9   : > { %p176_p5 = scmp.lt.s32.totalorder %s1162_s19, 6  ;;  %p42_p6 = scmp.eq.s32.totalorder %s40_s24, 0 }
   0xa   : > { %p1237_p8 = scmp.eq.s32.totalorder %s869_s20, 0  ;;  %s189_s30 = sshll.u32 %s1400_s2, 4  ;;  %s190_s30 = int_to_ptr.hbm [resolvable:$true] %s189_s30 }
   0xb   : > { %p1233_p7 = pnand %p870_p4, %p176_p5  ;;  %s1164_s5 = smov [#allocation4]  }
   0xc   : > { %s1242_s27 = scalar_select %p42_p6, %s1150_s16, %s44_s22  }
   0xd   : > { %p1000_p9 = pneg %p1233_p7  ;;  %s191_s6 = sshll.u32 %s1164_s5, 4  ;;  %s192_s6 = int_to_ptr.vmem [resolvable:$true] %s191_s6 }
   0xe   : > { %s202_s9 = sshll.u32 %s1401_s3, 4  ;;  %s1165_s10 = smov [#allocation6]   ;;  %s203_s9 = int_to_ptr.hbm [resolvable:$true] %s202_s9 }
   0xf   : > { %p1001_p10 = pnand %p1237_p8, %p1000_p9  ;;  %s204_s11 = sshll.u32 %s1165_s10, 4  ;;  %s205_s11 = int_to_ptr.vmem [resolvable:$true] %s204_s11 }
  0x10   : > { %p873_p11 = scmp.ge.s32.totalorder %s1162_s19, 5 }
  0x11   : > { %1003 = dma.hbm_to_vmem [thread:$0]  (!%p1001_p10), %s190_s30, 16, %s192_s6, [#allocation5]  }
  0x12   : > { %1006 = dma.hbm_to_vmem [thread:$0]  (!%p1001_p10), %s203_s9, 16, %s205_s11, [#allocation7]  }
  0x13   : > { %211 = sbr.rel (%p873_p11) target bundleno = 44 (0x2c), region = 24 }
  0x18   : > { %214 = sbr.rel (!%p1225_p3) target bundleno = 44 (0x2c), region = 28  ;;  %s216_s12 = sand.u32 (%p1225_p3), 1, %s1150_s16  }
  0x19   : > { %s875_s13 = sshll.u32 (%p1225_p3), %s1158_s18, 2  ;;  %s874_s14 = sshll.u32 (%p1225_p3), %s216_s12, 6 }
  0x1a   : > { %s1262_s24 = scalar_lea.vmem (%p1225_p3), %s1398_s0, %s875_s13  ;;  %s218_s23 = scalar_lea.vmem (%p1225_p3), [#allocation3], %s874_s14 }
  0x1b   : > { %v240_v0 = vld [vmem:[%s1262_s24] sm:$0xf] (%p1225_p3)  ;;  %v242_v1 = vld [vmem:[%s1262_s24 + $0x14] sm:$0xf] (%p1225_p3)  ;;  %v244_v2 = vld [vmem:[%s1262_s24 + $0x28] sm:$0xf] (%p1225_p3) }
  0x1c   : > { %241 = vst [vmem:[%s218_s23] sm:$0xf] (%p1225_p3), %v240_v0  ;;  %v246_v3 = vld [vmem:[%s1262_s24 + $0x3c] sm:$0xf] (%p1225_p3)  ;;  %v248_v4 = vld [vmem:[%s1262_s24 + $0x50] sm:$0xf] (%p1225_p3) }
  0x1d   : > { %243 = vst [vmem:[%s218_s23 + $0x4] sm:$0xf] %v242_v1  ;;  %v250_v5 = vld [vmem:[%s1262_s24 + $0x64] sm:$0xf]  ;;  %v252_v6 = vld [vmem:[%s1262_s24 + $0x78] sm:$0xf] }
  0x1e   : > { %245 = vst [vmem:[%s218_s23 + $0x8] sm:$0xf] %v244_v2  ;;  %v254_v7 = vld [vmem:[%s1262_s24 + $0x8c] sm:$0xf]  ;;  %v256_v8 = vld [vmem:[%s1262_s24 + $0xa0] sm:$0xf] }
  0x1f   : > { %247 = vst [vmem:[%s218_s23 + $0xc] sm:$0xf] %v246_v3  ;;  %v258_v9 = vld [vmem:[%s1262_s24 + $0xb4] sm:$0xf]  ;;  %v260_v10 = vld [vmem:[%s1262_s24 + $0xc8] sm:$0xf] }
  0x20   : > { %249 = vst [vmem:[%s218_s23 + $0x10] sm:$0xf] %v248_v4  ;;  %v262_v11 = vld [vmem:[%s1262_s24 + $0xdc] sm:$0xf]  ;;  %v264_v12 = vld [vmem:[%s1262_s24 + $0xf0] sm:$0xf] }
  0x21   : > { %251 = vst [vmem:[%s218_s23 + $0x14] sm:$0xf] %v250_v5  ;;  %v266_v13 = vld [vmem:[%s1262_s24 + $0x104] sm:$0xf]  ;;  %v268_v14 = vld [vmem:[%s1262_s24 + $0x118] sm:$0xf] }
  0x22   : > { %253 = vst [vmem:[%s218_s23 + $0x18] sm:$0xf] %v252_v6  ;;  %v270_v15 = vld [vmem:[%s1262_s24 + $0x12c] sm:$0xf] }
  0x23   : > { %255 = vst [vmem:[%s218_s23 + $0x1c] sm:$0xf] %v254_v7 }
  0x24   : > { %257 = vst [vmem:[%s218_s23 + $0x20] sm:$0xf] %v256_v8 }
  0x25   : > { %259 = vst [vmem:[%s218_s23 + $0x24] sm:$0xf] %v258_v9 }
  0x26   : > { %261 = vst [vmem:[%s218_s23 + $0x28] sm:$0xf] %v260_v10 }
  0x27   : > { %263 = vst [vmem:[%s218_s23 + $0x2c] sm:$0xf] %v262_v11 }
  0x28   : > { %265 = vst [vmem:[%s218_s23 + $0x30] sm:$0xf] %v264_v12 }
  0x29   : > { %267 = vst [vmem:[%s218_s23 + $0x34] sm:$0xf] %v266_v13 }
  0x2a   : > { %269 = vst [vmem:[%s218_s23 + $0x38] sm:$0xf] %v268_v14 }
  0x2b   : > { %271 = vst [vmem:[%s218_s23 + $0x3c] sm:$0xf] %v270_v15 }
  0x2c PF: > { %342 = sbr.rel (%p1233_p7) target bundleno = 292 (0x124), region = 73  ;;  %s345_s28 = sand.u32 (!%p1233_p7), 1, %s1146_s15  }
  0x2d   : > { %s877_s29 = sshll.u32 (!%p1233_p7), %s345_s28, 6 }
  0x2e   : > { %s1283_s30 = scalar_lea.vmem (!%p1233_p7), [#allocation3], %s877_s29 }
  0x31   : > { %1137 = dma.done.wait (%p1237_p8), [#allocation5], 16  }
  0x32   : > { %1139 = vsyncadd (%p1237_p8), [#allocation5], 4294967280 }
  0x33   : > { %1141 = dma.done.wait (%p1237_p8), [#allocation7], 16  }
  0x34   : > { %1143 = vsyncadd (%p1237_p8), [#allocation7], 4294967280  ;;  %s880_s25 = sshll.u32 %s1154_s17, 4  ;;  %p882_p13 = scmp.ne.s32.totalorder %s1154_s17, 0 }
  0x35   : > { %p393_p12 = scmp.lt.s32.totalorder %s880_s25, 79 }
  0x36   : > { %413 = sbr.rel (%p882_p13) target bundleno = 76 (0x4c), region = 89 }
  0x37   : > { %s1413_s25 = smov (!%p393_p12, %s880_s25), 79 }
  0x38   : > { %s881_s5 = sshll.u32 %s1413_s25, 2 }
  0x39   : > { %s1297_s7 = scalar_lea.vmem %s1399_s1, %s881_s5 }
  0x3b   : > { %v1166_v16 = vmov 0.0  }
  0x3c   : > { %414 = vst [vmem:[#allocation2 + $0x30] sm:$0xff] %v1166_v16 }
  0x3d   : > { %415 = vst [vmem:[#allocation2] sm:$0xff] %v1166_v16 }
  0x3e   : > { %416 = vst [vmem:[#allocation2 + $0x58] sm:$0xff] %v1166_v16 }
  0x3f   : > { %417 = vst [vmem:[#allocation2 + $0x18] sm:$0xff] %v1166_v16 }
  0x40   : > { %418 = vst [vmem:[#allocation2 + $0x50] sm:$0xff] %v1166_v16 }
  0x41   : > { %419 = vst [vmem:[#allocation2 + $0x68] sm:$0xff] %v1166_v16 }
  0x42   : > { %420 = vst [vmem:[#allocation2 + $0x8] sm:$0xff] %v1166_v16 }
  0x43   : > { %421 = vst [vmem:[#allocation2 + $0x48] sm:$0xff] %v1166_v16 }
  0x44   : > { %422 = vst [vmem:[#allocation2 + $0x40] sm:$0xff] %v1166_v16 }
  0x45   : > { %423 = vst [vmem:[#allocation2 + $0x20] sm:$0xff] %v1166_v16 }
  0x46   : > { %424 = vst [vmem:[#allocation2 + $0x10] sm:$0xff] %v1166_v16 }
  0x47   : > { %425 = vst [vmem:[#allocation2 + $0x38] sm:$0xff] %v1166_v16 }
  0x48   : > { %426 = vst [vmem:[#allocation2 + $0x60] sm:$0xff] %v1166_v16 }
  0x49   : > { %427 = vst [vmem:[#allocation2 + $0x70] sm:$0xff] %v1166_v16 }
  0x4a   : > { %428 = vst [vmem:[#allocation2 + $0x78] sm:$0xff] %v1166_v16 }
  0x4b   : > { %429 = vst [vmem:[#allocation2 + $0x28] sm:$0xff] %v1166_v16 }
  0x4c PF: > { %v967_v17 = vld [vmem:[%s1297_s7 + $0x38] sm:$0xff]  ;;  %v966_v18 = vld [vmem:[%s1297_s7 + $0x30] sm:$0xff]  ;;  %v965_v19 = vld [vmem:[%s1297_s7 + $0x28] sm:$0xff]  ;;  %p947_p0 = scmp.ne.s32.totalorder %s1154_s17, 4 }
  0x4d   : > { %574 = vmatpush.bf16.msra.mxu0 %v967_v17  ;;  %968 = vmatpush.bf16.msra.mxu1 %v967_v17  ;;  %v964_v20 = vld [vmem:[%s1297_s7 + $0x20] sm:$0xff]  ;;  %v963_v21 = vld [vmem:[%s1297_s7 + $0x18] sm:$0xff]  ;;  %v962_v22 = vld [vmem:[%s1297_s7 + $0x10] sm:$0xff] }
  0x4e   : > { %969 = vmatpush.bf16.msra.mxu2 %v967_v17  ;;  %970 = vmatpush.bf16.msra.mxu3 %v967_v17  ;;  %v961_v23 = vld [vmem:[%s1297_s7 + $0x8] sm:$0xff]  ;;  %v960_v24 = vld [vmem:[%s1297_s7] sm:$0xff]  ;;  %v954_v26 = vld [vmem:[%s1283_s30 + $0x10] sm:$0xff] }
  0x4f   : > { %v952_v25 = vld [vmem:[%s1283_s30] sm:$0xff]  ;;  %v958_v28 = vld [vmem:[%s1283_s30 + $0x30] sm:$0xff]  ;;  %v953_v29 = vld [vmem:[%s1283_s30 + $0x8] sm:$0xff] }
  0x50   : > { %v956_v27 = vld [vmem:[%s1283_s30 + $0x20] sm:$0xff]  ;;  %v955_v30 = vld [vmem:[%s1283_s30 + $0x18] sm:$0xff]  ;;  %v957_v31 = vld [vmem:[%s1283_s30 + $0x28] sm:$0xff] }
  0x51   : > { %575 = vmatpush.bf16.msra.mxu0 %v966_v18  ;;  %971 = vmatpush.bf16.msra.mxu1 %v966_v18  ;;  %v959_v32 = vld [vmem:[%s1283_s30 + $0x38] sm:$0xff]  ;;  %v430_v33 = vld [vmem:[#allocation2 + $0x30] sm:$0xff]  ;;  %v438_v39 = vld [vmem:[#allocation2 + $0x40] sm:$0xff] }
  0x52   : > { %972 = vmatpush.bf16.msra.mxu2 %v966_v18  ;;  %973 = vmatpush.bf16.msra.mxu3 %v966_v18  ;;  %v434_v34 = vld [vmem:[#allocation2 + $0x50] sm:$0xff]  ;;  %v442_v40 = vld [vmem:[#allocation2 + $0x60] sm:$0xff]  ;;  %v435_v42 = vld [vmem:[#allocation2 + $0x68] sm:$0xff] }
  0x53   : > { %v431_v41 = vld [vmem:[#allocation2] sm:$0xff]  ;;  %v443_v52 = vld [vmem:[#allocation2 + $0x70] sm:$0xff]  ;;  %v432_v53 = vld [vmem:[#allocation2 + $0x58] sm:$0xff] }
  0x54   : > { %v439_v51 = vld [vmem:[#allocation2 + $0x20] sm:$0xff]  ;;  %v436_v54 = vld [vmem:[#allocation2 + $0x8] sm:$0xff]  ;;  %v440_v63 = vld [vmem:[#allocation2 + $0x10] sm:$0xff] }
  0x55   : > { %576 = vmatpush.bf16.msra.mxu0 %v965_v19  ;;  %974 = vmatpush.bf16.msra.mxu1 %v965_v19  ;;  %v444_v0 = vld [vmem:[#allocation2 + $0x78] sm:$0xff]  ;;  %v437_v2 = vld [vmem:[#allocation2 + $0x48] sm:$0xff] }
  0x56   : > { %975 = vmatpush.bf16.msra.mxu2 %v965_v19  ;;  %976 = vmatpush.bf16.msra.mxu3 %v965_v19  ;;  %v433_v1 = vld [vmem:[#allocation2 + $0x18] sm:$0xff]  ;;  %v445_v12 = vld [vmem:[#allocation2 + $0x28] sm:$0xff] }
  0x57   : > { %v441_v11 = vld [vmem:[#allocation2 + $0x38] sm:$0xff] }
  0x59   : > { %577 = vmatpush.bf16.msra.mxu0 %v964_v20  ;;  %977 = vmatpush.bf16.msra.mxu1 %v964_v20 }
  0x5a   : > { %978 = vmatpush.bf16.msra.mxu2 %v964_v20  ;;  %979 = vmatpush.bf16.msra.mxu3 %v964_v20 }
  0x5d   : > { %578 = vmatpush.bf16.msra.mxu0 %v963_v21  ;;  %980 = vmatpush.bf16.msra.mxu1 %v963_v21 }
  0x5e   : > { %981 = vmatpush.bf16.msra.mxu2 %v963_v21  ;;  %982 = vmatpush.bf16.msra.mxu3 %v963_v21 }
  0x61   : > { %579 = vmatpush.bf16.msra.mxu0 %v962_v22  ;;  %983 = vmatpush.bf16.msra.mxu1 %v962_v22 }
  0x62   : > { %984 = vmatpush.bf16.msra.mxu2 %v962_v22  ;;  %985 = vmatpush.bf16.msra.mxu3 %v962_v22 }
  0x65   : > { %580 = vmatpush.bf16.msra.mxu0 %v961_v23  ;;  %986 = vmatpush.bf16.msra.mxu1 %v961_v23 }
  0x66   : > { %987 = vmatpush.bf16.msra.mxu2 %v961_v23  ;;  %988 = vmatpush.bf16.msra.mxu3 %v961_v23 }
  0x69   : > { %581 = vmatpush.bf16.msra.mxu0 %v960_v24  ;;  %989 = vmatpush.bf16.msra.mxu1 %v960_v24 }
  0x6a   : > { %990 = vmatpush.bf16.msra.mxu2 %v960_v24  ;;  %991 = vmatpush.bf16.msra.mxu3 %v960_v24 }
  0x6c   : > { %582 = vmatmul.bf16.vlgmr.msra.gmra.mxu0 %v952_v25  ;;  %592 = vmatmul.bf16.vlgmr.msra.gmra.mxu1 %v954_v26 }
  0x6d   : > { %602 = vmatmul.bf16.vlgmr.msra.gmra.mxu2 %v956_v27  ;;  %612 = vmatmul.bf16.vlgmr.msra.gmra.mxu3 %v958_v28 }
  0x7c   : > { %587 = vmatmul.bf16.gmra.mxu0 %v953_v29  ;;  %597 = vmatmul.bf16.gmra.mxu1 %v955_v30 }
  0x7d   : > { %607 = vmatmul.bf16.gmra.mxu2 %v957_v31  ;;  %617 = vmatmul.bf16.gmra.mxu3 %v959_v32 }
  0xe9   : > { %v583_v35 = vpop.f32.mrf.mxu0  ;;  %v593_v36 = vpop.f32.mrf.mxu1 }
  0xea   : > { %v623_v37 = vadd.f32 %v583_v35, %v430_v33  ;;  %v627_v38 = vadd.f32 %v593_v36, %v434_v34 }
  0xec   : > { %639 = vst [vmem:[#allocation2 + $0x30] sm:$0xff] %v623_v37 }
  0xed   : > { %643 = vst [vmem:[#allocation2 + $0x50] sm:$0xff] %v627_v38 }
  0xf0   : > { %v603_v43 = vpop.f32.mrf.mxu2  ;;  %v613_v44 = vpop.f32.mrf.mxu3 }
  0xf1   : > { %v631_v45 = vadd.f32 %v603_v43, %v438_v39  ;;  %v635_v46 = vadd.f32 %v613_v44, %v442_v40  ;;  %v585_v47 = vpop.f32.mrf.mxu0  ;;  %v595_v48 = vpop.f32.mrf.mxu1 }
  0xf2   : > { %v624_v49 = vadd.f32 %v585_v47, %v431_v41  ;;  %v628_v50 = vadd.f32 %v595_v48, %v435_v42 }
  0xf3   : > { %647 = vst [vmem:[#allocation2 + $0x40] sm:$0xff] %v631_v45 }
  0xf4   : > { %651 = vst [vmem:[#allocation2 + $0x60] sm:$0xff] %v635_v46 }
  0xf5   : > { %640 = vst [vmem:[#allocation2] sm:$0xff] %v624_v49 }
  0xf6   : > { %644 = vst [vmem:[#allocation2 + $0x68] sm:$0xff] %v628_v50 }
  0xf8   : > { %v605_v55 = vpop.f32.mrf.mxu2  ;;  %v615_v56 = vpop.f32.mrf.mxu3 }
  0xf9   : > { %v632_v57 = vadd.f32 %v605_v55, %v439_v51  ;;  %v636_v58 = vadd.f32 %v615_v56, %v443_v52  ;;  %v588_v59 = vpop.f32.mrf.mxu0  ;;  %v598_v60 = vpop.f32.mrf.mxu1 }
  0xfa   : > { %v625_v61 = vadd.f32 %v588_v59, %v432_v53  ;;  %v629_v62 = vadd.f32 %v598_v60, %v436_v54 }
  0xfb   : > { %648 = vst [vmem:[#allocation2 + $0x20] sm:$0xff] %v632_v57 }
  0xfc   : > { %652 = vst [vmem:[#allocation2 + $0x70] sm:$0xff] %v636_v58 }
  0xfd   : > { %641 = vst [vmem:[#allocation2 + $0x58] sm:$0xff] %v625_v61 }
  0xfe   : > { %645 = vst [vmem:[#allocation2 + $0x8] sm:$0xff] %v629_v62 }
 0x100   : > { %v608_v3 = vpop.f32.mrf.mxu2  ;;  %v618_v4 = vpop.f32.mrf.mxu3 }
 0x101   : > { %v633_v5 = vadd.f32 %v608_v3, %v440_v63  ;;  %v637_v6 = vadd.f32 %v618_v4, %v444_v0  ;;  %v590_v7 = vpop.f32.mrf.mxu0  ;;  %v600_v8 = vpop.f32.mrf.mxu1 }
 0x102   : > { %v626_v9 = vadd.f32 %v590_v7, %v433_v1  ;;  %v630_v10 = vadd.f32 %v600_v8, %v437_v2 }
 0x103   : > { %649 = vst [vmem:[#allocation2 + $0x10] sm:$0xff] %v633_v5 }
 0x104   : > { %653 = vst [vmem:[#allocation2 + $0x78] sm:$0xff] %v637_v6 }
 0x105   : > { %642 = vst [vmem:[#allocation2 + $0x18] sm:$0xff] %v626_v9 }
 0x106   : > { %646 = vst [vmem:[#allocation2 + $0x48] sm:$0xff] %v630_v10 }
 0x108   : > { %v610_v13 = vpop.f32.mrf.mxu2  ;;  %v620_v14 = vpop.f32.mrf.mxu3  ;;  %658 = sbr.rel (%p947_p0) target bundleno = 292 (0x124), region = 93 }
 0x109   : > { %v634_v15 = vadd.f32 %v610_v13, %v441_v11  ;;  %v638_v16 = vadd.f32 %v620_v14, %v445_v12 }
 0x10b   : > { %650 = vst [vmem:[#allocation2 + $0x38] sm:$0xff] %v634_v15 }
 0x10c   : > { %654 = vst [vmem:[#allocation2 + $0x28] sm:$0xff] %v638_v16 }
 0x10d   : > { %v659_v17 = vld [vmem:[#allocation2 + $0x30] sm:$0xff]  ;;  %v1054_v18 = vld [vmem:[#allocation4] ss:$0 sm:$0xff]  ;;  %v1317_v19 = vld [vmem:[#allocation6] ss:$0 sm:$0xff] }
 0x10e   : > { %v660_v20 = vld [vmem:[#allocation2] sm:$0xff]  ;;  %v679_v21 = vmul.f32 %v1054_v18, %v659_v17  ;;  %v661_v23 = vld [vmem:[#allocation2 + $0x58] sm:$0xff]  ;;  %v663_v25 = vld [vmem:[#allocation2 + $0x50] sm:$0xff] }
 0x10f   : > { %v680_v22 = vmul.f32 %v1054_v18, %v660_v20  ;;  %v662_v24 = vld [vmem:[#allocation2 + $0x18] sm:$0xff]  ;;  %v681_v26 = vmul.f32 %v1054_v18, %v661_v23  ;;  %v683_v28 = vmul.f32 %v1054_v18, %v663_v25  ;;  %v664_v29 = vld [vmem:[#allocation2 + $0x68] sm:$0xff]  ;;  %v667_v40 = vld [vmem:[#allocation2 + $0x40] sm:$0xff] }
 0x110   : > { %v682_v27 = vmul.f32 %v1054_v18, %v662_v24  ;;  %v665_v30 = vld [vmem:[#allocation2 + $0x8] sm:$0xff]  ;;  %v699_v32 = vadd.f32 %v1317_v19, %v679_v21  ;;  %v684_v34 = vmul.f32 %v1054_v18, %v664_v29  ;;  %v668_v41 = vld [vmem:[#allocation2 + $0x20] sm:$0xff]  ;;  %v669_v46 = vld [vmem:[#allocation2 + $0x10] sm:$0xff]  ;;  %v687_v56 = vmul.f32 %v1054_v18, %v667_v40 }
 0x111   : > { %v666_v31 = vld [vmem:[#allocation2 + $0x48] sm:$0xff]  ;;  %v700_v33 = vadd.f32 %v1317_v19, %v680_v22  ;;  %v685_v35 = vmul.f32 %v1054_v18, %v665_v30  ;;  %v701_v36 = vadd.f32 %v1317_v19, %v681_v26  ;;  %v703_v38 = vadd.f32 %v1317_v19, %v683_v28  ;;  %v671_v48 = vld [vmem:[#allocation2 + $0x60] sm:$0xff]  ;;  %v672_v52 = vld [vmem:[#allocation2 + $0x70] sm:$0xff] }
 0x112   : > { %v702_v37 = vadd.f32 %v1317_v19, %v682_v27  ;;  %v686_v39 = vmul.f32 %v1054_v18, %v666_v31  ;;  %v715_v42 = vmax.f32 %v699_v32, 0.0  ;;  %v704_v44 = vadd.f32 %v1317_v19, %v684_v34  ;;  %v670_v47 = vld [vmem:[#allocation2 + $0x38] sm:$0xff] }
 0x113   : > { %v716_v43 = vmax.f32 %v700_v33, 0.0  ;;  %v705_v45 = vadd.f32 %v1317_v19, %v685_v35  ;;  %v717_v49 = vmax.f32 %v701_v36, 0.0  ;;  %v673_v53 = vld [vmem:[#allocation2 + $0x78] sm:$0xff]  ;;  %v719_v54 = vmax.f32 %v703_v38, 0.0  ;;  %v674_v58 = vld [vmem:[#allocation2 + $0x28] sm:$0xff] }
 0x114   : > { %v718_v50 = vmax.f32 %v702_v37, 0.0  ;;  %v706_v51 = vadd.f32 %v1317_v19, %v686_v39  ;;  %731 = vst [vmem:[%s1402_s4] sm:$0xff] %v715_v42  ;;  %v720_v55 = vmax.f32 %v704_v44, 0.0  ;;  %v688_v57 = vmul.f32 %v1054_v18, %v668_v41 }
 0x115   : > { %732 = vst [vmem:[%s1402_s4 + $0x8] sm:$0xff] %v716_v43  ;;  %v721_v59 = vmax.f32 %v705_v45, 0.0  ;;  %v689_v60 = vmul.f32 %v1054_v18, %v669_v46  ;;  %v690_v61 = vmul.f32 %v1054_v18, %v670_v47  ;;  %v691_v62 = vmul.f32 %v1054_v18, %v671_v48 }
 0x116   : > { %733 = vst [vmem:[%s1402_s4 + $0x10] sm:$0xff] %v717_v49  ;;  %v707_v63 = vadd.f32 %v1317_v19, %v687_v56  ;;  %v708_v0 = vadd.f32 %v1317_v19, %v688_v57  ;;  %v692_v1 = vmul.f32 %v1054_v18, %v672_v52  ;;  %v693_v2 = vmul.f32 %v1054_v18, %v673_v53 }
 0x117   : > { %734 = vst [vmem:[%s1402_s4 + $0x18] sm:$0xff] %v718_v50  ;;  %v722_v3 = vmax.f32 %v706_v51, 0.0  ;;  %v709_v4 = vadd.f32 %v1317_v19, %v689_v60  ;;  %v710_v5 = vadd.f32 %v1317_v19, %v690_v61  ;;  %v694_v6 = vmul.f32 %v1054_v18, %v674_v58 }
 0x118   : > { %735 = vst [vmem:[%s1402_s4 + $0x20] sm:$0xff] %v719_v54  ;;  %v723_v7 = vmax.f32 %v707_v63, 0.0  ;;  %v711_v8 = vadd.f32 %v1317_v19, %v691_v62  ;;  %v724_v9 = vmax.f32 %v708_v0, 0.0  ;;  %v712_v10 = vadd.f32 %v1317_v19, %v692_v1 }
 0x119   : > { %736 = vst [vmem:[%s1402_s4 + $0x28] sm:$0xff] %v720_v55  ;;  %v725_v11 = vmax.f32 %v709_v4, 0.0  ;;  %v713_v12 = vadd.f32 %v1317_v19, %v693_v2  ;;  %v726_v13 = vmax.f32 %v710_v5, 0.0  ;;  %v714_v14 = vadd.f32 %v1317_v19, %v694_v6 }
 0x11a   : > { %737 = vst [vmem:[%s1402_s4 + $0x30] sm:$0xff] %v721_v59  ;;  %v727_v15 = vmax.f32 %v711_v8, 0.0  ;;  %v728_v16 = vmax.f32 %v712_v10, 0.0 }
 0x11b   : > { %738 = vst [vmem:[%s1402_s4 + $0x38] sm:$0xff] %v722_v3  ;;  %v729_v17 = vmax.f32 %v713_v12, 0.0  ;;  %v730_v18 = vmax.f32 %v714_v14, 0.0 }
 0x11c   : > { %739 = vst [vmem:[%s1402_s4 + $0x40] sm:$0xff] %v723_v7 }
 0x11d   : > { %740 = vst [vmem:[%s1402_s4 + $0x48] sm:$0xff] %v724_v9 }
 0x11e   : > { %741 = vst [vmem:[%s1402_s4 + $0x50] sm:$0xff] %v725_v11 }
 0x11f   : > { %742 = vst [vmem:[%s1402_s4 + $0x58] sm:$0xff] %v726_v13 }
 0x120   : > { %743 = vst [vmem:[%s1402_s4 + $0x60] sm:$0xff] %v727_v15 }
 0x121   : > { %744 = vst [vmem:[%s1402_s4 + $0x68] sm:$0xff] %v728_v16 }
 0x122   : > { %745 = vst [vmem:[%s1402_s4 + $0x70] sm:$0xff] %v729_v17 }
 0x123   : > { %746 = vst [vmem:[%s1402_s4 + $0x78] sm:$0xff] %v730_v18 }
 0x124 PF: > { %s16_s19 = sadd.s32 1, %s1162_s19   ;;  %s1406_s15 = smov %s1150_s16 }
 0x125   : > { %p13_p1 = scmp.ge.s32.totalorder %s16_s19, 7   ;;  %s1407_s16 = smov %s1242_s27 }
 0x126   : > { %s1408_s17 = smov %s1158_s18  ;;  %s1409_s18 = smov %s1411_s21 }
 0x127   :  { %15 = sbr.rel (!%p13_p1) target bundleno = 4 (0x4), region = 134 }
 0x12c   :  { %775 = vsyncpa [#allocation5], 1 }
 0x12d   :  { %777 = vsyncpa [#allocation5 + $0x1], 1 }
 0x12e   :  { %778 = vsyncpa [#allocation7], 1 }

// kernel: _lambda_.26
= control target key start
LH: loop header
LB: loop body
LE: loop exit
PB: predicated region body
PF: predicated region fallthrough
CT: control target
= control target key end

     0   :  { %s1201_s18 = smov 0   ;;  %s1203_s19 = smov 0   ;;  %s1444_s0 = inlined_call_operand.vmem [shape: bf16[128,640], index: 0, kind: input, shape index: {}]   ;;  %s1445_s1 = inlined_call_operand.vmem [shape: bf16[640,128], index: 1, kind: input, shape index: {}]   ;;  %s1446_s2 = inlined_call_operand.vmem [shape: f32[1,128], index: 2, kind: input, shape index: {}]   ;;  %s1447_s3 = inlined_call_operand.vmem [shape: f32[1,128], index: 3, kind: input, shape index: {}]   ;;  %s1448_s4 = inlined_call_operand.vmem [shape: f32[128,128], index: 4, kind: input, shape index: {}]   ;;  %s1449_s5 = inlined_call_operand.vmem [shape: f32[128,128], index: 5, kind: output, shape index: {}]  }
   0x1   :  { %s1205_s20 = smov 0   ;;  %s1207_s21 = smov 0  }
   0x2   :  { %s1209_s22 = smov 0  }
   0x3 LB: > { %s27_s23 = sadd.s32 1, %s1164_s21  ;;  %p50_p1 = scmp.ne.s32.totalorder %s1156_s19, %s1152_s18  ;;  %s1168_s22 = sphi %s1209_s22, %s15_s22   ;;  %s1164_s21 = sphi %s1207_s21, %s1453_s21   ;;  %s1160_s20 = sphi %s1205_s20, %s1452_s20   ;;  %s1156_s19 = sphi %s1203_s19, %s1451_s19   ;;  %s1152_s18 = sphi %s1201_s18, %s1450_s18  }
   0x4   : > { %p28_p0 = scmp.ge.s32.totalorder %s27_s23, 5  ;;  %p51_p2 = scmp.eq.s32.totalorder %s1168_s22, 0 }
   0x5   : > { %s43_s25 = sadd.s32 1, %s1156_s19  ;;  %p970_p5 = scmp.ge.s32.totalorder %s1168_s22, 5 }
   0x6   : > { %s1455_s23 = smov (%p28_p0, %s27_s23), 0  ;;  %p52_p3 = por %p51_p2, %p50_p1 }
   0x7   : > { %s39_s24 = ssub.s32 %s1164_s21, %s1455_s23  ;;  %236 = sbr.rel (%p970_p5) target bundleno = 32 (0x20), region = 28 }
   0x8   : > { %p41_p4 = scmp.eq.s32.totalorder %s39_s24, 0 }
   0xa   : > { %s1236_s26 = scalar_select %p41_p4, %s1156_s19, %s43_s25  }
   0xc   : > { %239 = sbr.rel (!%p52_p3) target bundleno = 32 (0x20), region = 32  ;;  %s241_s27 = sand.u32 (%p52_p3), 1, %s1156_s19  }
   0xd   : > { %s972_s28 = sshll.u32 (%p52_p3), %s1164_s21, 2  ;;  %s971_s29 = sshll.u32 (%p52_p3), %s241_s27, 6 }
   0xe   : > { %s1244_s7 = scalar_lea.vmem (%p52_p3), %s1444_s0, %s972_s28  ;;  %s243_s8 = scalar_lea.vmem (%p52_p3), [#allocation3], %s971_s29 }
   0xf   : > { %v265_v0 = vld [vmem:[%s1244_s7] sm:$0xf] (%p52_p3)  ;;  %v267_v1 = vld [vmem:[%s1244_s7 + $0x14] sm:$0xf] (%p52_p3)  ;;  %v269_v2 = vld [vmem:[%s1244_s7 + $0x28] sm:$0xf] (%p52_p3) }
  0x10   : > { %266 = vst [vmem:[%s243_s8] sm:$0xf] (%p52_p3), %v265_v0  ;;  %v271_v3 = vld [vmem:[%s1244_s7 + $0x3c] sm:$0xf] (%p52_p3)  ;;  %v273_v4 = vld [vmem:[%s1244_s7 + $0x50] sm:$0xf] (%p52_p3) }
  0x11   : > { %268 = vst [vmem:[%s243_s8 + $0x4] sm:$0xf] %v267_v1  ;;  %v275_v5 = vld [vmem:[%s1244_s7 + $0x64] sm:$0xf]  ;;  %v277_v6 = vld [vmem:[%s1244_s7 + $0x78] sm:$0xf] }
  0x12   : > { %270 = vst [vmem:[%s243_s8 + $0x8] sm:$0xf] %v269_v2  ;;  %v279_v7 = vld [vmem:[%s1244_s7 + $0x8c] sm:$0xf]  ;;  %v281_v8 = vld [vmem:[%s1244_s7 + $0xa0] sm:$0xf] }
  0x13   : > { %272 = vst [vmem:[%s243_s8 + $0xc] sm:$0xf] %v271_v3  ;;  %v283_v9 = vld [vmem:[%s1244_s7 + $0xb4] sm:$0xf]  ;;  %v285_v10 = vld [vmem:[%s1244_s7 + $0xc8] sm:$0xf] }
  0x14   : > { %274 = vst [vmem:[%s243_s8 + $0x10] sm:$0xf] %v273_v4  ;;  %v287_v11 = vld [vmem:[%s1244_s7 + $0xdc] sm:$0xf]  ;;  %v289_v12 = vld [vmem:[%s1244_s7 + $0xf0] sm:$0xf] }
  0x15   : > { %276 = vst [vmem:[%s243_s8 + $0x14] sm:$0xf] %v275_v5  ;;  %v291_v13 = vld [vmem:[%s1244_s7 + $0x104] sm:$0xf]  ;;  %v293_v14 = vld [vmem:[%s1244_s7 + $0x118] sm:$0xf] }
  0x16   : > { %278 = vst [vmem:[%s243_s8 + $0x18] sm:$0xf] %v277_v6  ;;  %v295_v15 = vld [vmem:[%s1244_s7 + $0x12c] sm:$0xf] }
  0x17   : > { %280 = vst [vmem:[%s243_s8 + $0x1c] sm:$0xf] %v279_v7 }
  0x18   : > { %282 = vst [vmem:[%s243_s8 + $0x20] sm:$0xf] %v281_v8 }
  0x19   : > { %284 = vst [vmem:[%s243_s8 + $0x24] sm:$0xf] %v283_v9 }
  0x1a   : > { %286 = vst [vmem:[%s243_s8 + $0x28] sm:$0xf] %v285_v10 }
  0x1b   : > { %288 = vst [vmem:[%s243_s8 + $0x2c] sm:$0xf] %v287_v11 }
  0x1c   : > { %290 = vst [vmem:[%s243_s8 + $0x30] sm:$0xf] %v289_v12 }
  0x1d   : > { %292 = vst [vmem:[%s243_s8 + $0x34] sm:$0xf] %v291_v13 }
  0x1e   : > { %294 = vst [vmem:[%s243_s8 + $0x38] sm:$0xf] %v293_v14 }
  0x1f   : > { %296 = vst [vmem:[%s243_s8 + $0x3c] sm:$0xf] %v295_v15 }
  0x20 PF: > { %p973_p6 = scmp.ge.s32.totalorder %s1168_s22, 1  ;;  %p363_p7 = scmp.lt.s32.totalorder %s1168_s22, 6 }
  0x22   : > { %p364_p8 = pnand %p973_p6, %p363_p7 }
  0x23   : > { %s370_s9 = sand.u32 (!%p364_p8), 1, %s1152_s18   ;;  %s975_s10 = sshll.u32 (!%p364_p8), %s1160_s20, 4 }
  0x24   : > { %367 = sbr.rel (%p364_p8) target bundleno = 281 (0x119), region = 77  ;;  %s974_s11 = sshll.u32 (!%p364_p8), %s370_s9, 6 }
  0x25   : > { %p424_p9 = scmp.lt.s32.totalorder (!%p364_p8), %s975_s10, 79  ;;  %s1271_s16 = scalar_lea.vmem (!%p364_p8), [#allocation3], %s974_s11 }
  0x26   : > { %p977_p10 = scmp.ne.s32.totalorder (!%p364_p8), %s1160_s20, 0 }
  0x29   : > { %s1457_s10 = smov (!%p424_p9, %s975_s10), 79  ;;  %459 = sbr.rel (%p977_p10) target bundleno = 63 (0x3f), region = 85 }
  0x2a   : > { %s976_s12 = sshll.u32 %s1457_s10, 2 }
  0x2b   : > { %s1269_s15 = scalar_lea.vmem %s1445_s1, %s976_s12 }
  0x2e   : > { %v1170_v16 = vmov 0.0  }
  0x2f   : > { %460 = vst [vmem:[#allocation2 + $0x30] sm:$0xff] %v1170_v16 }
  0x30   : > { %461 = vst [vmem:[#allocation2] sm:$0xff] %v1170_v16 }
  0x31   : > { %462 = vst [vmem:[#allocation2 + $0x58] sm:$0xff] %v1170_v16 }
  0x32   : > { %463 = vst [vmem:[#allocation2 + $0x18] sm:$0xff] %v1170_v16 }
  0x33   : > { %464 = vst [vmem:[#allocation2 + $0x50] sm:$0xff] %v1170_v16 }
  0x34   : > { %465 = vst [vmem:[#allocation2 + $0x68] sm:$0xff] %v1170_v16 }
  0x35   : > { %466 = vst [vmem:[#allocation2 + $0x8] sm:$0xff] %v1170_v16 }
  0x36   : > { %467 = vst [vmem:[#allocation2 + $0x48] sm:$0xff] %v1170_v16 }
  0x37   : > { %468 = vst [vmem:[#allocation2 + $0x40] sm:$0xff] %v1170_v16 }
  0x38   : > { %469 = vst [vmem:[#allocation2 + $0x20] sm:$0xff] %v1170_v16 }
  0x39   : > { %470 = vst [vmem:[#allocation2 + $0x10] sm:$0xff] %v1170_v16 }
  0x3a   : > { %471 = vst [vmem:[#allocation2 + $0x38] sm:$0xff] %v1170_v16 }
  0x3b   : > { %472 = vst [vmem:[#allocation2 + $0x60] sm:$0xff] %v1170_v16 }
  0x3c   : > { %473 = vst [vmem:[#allocation2 + $0x70] sm:$0xff] %v1170_v16 }
  0x3d   : > { %474 = vst [vmem:[#allocation2 + $0x78] sm:$0xff] %v1170_v16 }
  0x3e   : > { %475 = vst [vmem:[#allocation2 + $0x28] sm:$0xff] %v1170_v16 }
  0x3f PF: > { %v1062_v17 = vld [vmem:[%s1269_s15 + $0x38] sm:$0xff]  ;;  %v1061_v18 = vld [vmem:[%s1269_s15 + $0x30] sm:$0xff]  ;;  %v1060_v19 = vld [vmem:[%s1269_s15 + $0x28] sm:$0xff]  ;;  %p1042_p11 = scmp.ne.s32.totalorder %s1160_s20, 4 }
  0x40   : > { %620 = vmatpush.bf16.msra.mxu0 %v1062_v17  ;;  %1063 = vmatpush.bf16.msra.mxu1 %v1062_v17  ;;  %v1059_v20 = vld [vmem:[%s1269_s15 + $0x20] sm:$0xff]  ;;  %v1058_v21 = vld [vmem:[%s1269_s15 + $0x18] sm:$0xff]  ;;  %v1057_v22 = vld [vmem:[%s1269_s15 + $0x10] sm:$0xff] }
  0x41   : > { %1064 = vmatpush.bf16.msra.mxu2 %v1062_v17  ;;  %1065 = vmatpush.bf16.msra.mxu3 %v1062_v17  ;;  %v1056_v23 = vld [vmem:[%s1269_s15 + $0x8] sm:$0xff]  ;;  %v1055_v24 = vld [vmem:[%s1269_s15] sm:$0xff]  ;;  %v1049_v26 = vld [vmem:[%s1271_s16 + $0x10] sm:$0xff] }
  0x42   : > { %v1047_v25 = vld [vmem:[%s1271_s16] sm:$0xff]  ;;  %v1053_v28 = vld [vmem:[%s1271_s16 + $0x30] sm:$0xff]  ;;  %v1048_v29 = vld [vmem:[%s1271_s16 + $0x8] sm:$0xff] }
  0x43   : > { %v1051_v27 = vld [vmem:[%s1271_s16 + $0x20] sm:$0xff]  ;;  %v1050_v30 = vld [vmem:[%s1271_s16 + $0x18] sm:$0xff]  ;;  %v1052_v31 = vld [vmem:[%s1271_s16 + $0x28] sm:$0xff] }
  0x44   : > { %621 = vmatpush.bf16.msra.mxu0 %v1061_v18  ;;  %1066 = vmatpush.bf16.msra.mxu1 %v1061_v18  ;;  %v1054_v32 = vld [vmem:[%s1271_s16 + $0x38] sm:$0xff]  ;;  %v476_v33 = vld [vmem:[#allocation2 + $0x30] sm:$0xff]  ;;  %v484_v39 = vld [vmem:[#allocation2 + $0x40] sm:$0xff] }
  0x45   : > { %1067 = vmatpush.bf16.msra.mxu2 %v1061_v18  ;;  %1068 = vmatpush.bf16.msra.mxu3 %v1061_v18  ;;  %v480_v34 = vld [vmem:[#allocation2 + $0x50] sm:$0xff]  ;;  %v488_v40 = vld [vmem:[#allocation2 + $0x60] sm:$0xff]  ;;  %v481_v42 = vld [vmem:[#allocation2 + $0x68] sm:$0xff] }
  0x46   : > { %v477_v41 = vld [vmem:[#allocation2] sm:$0xff]  ;;  %v489_v52 = vld [vmem:[#allocation2 + $0x70] sm:$0xff]  ;;  %v478_v53 = vld [vmem:[#allocation2 + $0x58] sm:$0xff] }
  0x47   : > { %v485_v51 = vld [vmem:[#allocation2 + $0x20] sm:$0xff]  ;;  %v482_v54 = vld [vmem:[#allocation2 + $0x8] sm:$0xff]  ;;  %v486_v63 = vld [vmem:[#allocation2 + $0x10] sm:$0xff] }
  0x48   : > { %622 = vmatpush.bf16.msra.mxu0 %v1060_v19  ;;  %1069 = vmatpush.bf16.msra.mxu1 %v1060_v19  ;;  %v490_v0 = vld [vmem:[#allocation2 + $0x78] sm:$0xff]  ;;  %v483_v2 = vld [vmem:[#allocation2 + $0x48] sm:$0xff] }
  0x49   : > { %1070 = vmatpush.bf16.msra.mxu2 %v1060_v19  ;;  %1071 = vmatpush.bf16.msra.mxu3 %v1060_v19  ;;  %v479_v1 = vld [vmem:[#allocation2 + $0x18] sm:$0xff]  ;;  %v491_v12 = vld [vmem:[#allocation2 + $0x28] sm:$0xff] }
  0x4a   : > { %v487_v11 = vld [vmem:[#allocation2 + $0x38] sm:$0xff] }
  0x4c   : > { %623 = vmatpush.bf16.msra.mxu0 %v1059_v20  ;;  %1072 = vmatpush.bf16.msra.mxu1 %v1059_v20 }
  0x4d   : > { %1073 = vmatpush.bf16.msra.mxu2 %v1059_v20  ;;  %1074 = vmatpush.bf16.msra.mxu3 %v1059_v20 }
  0x50   : > { %624 = vmatpush.bf16.msra.mxu0 %v1058_v21  ;;  %1075 = vmatpush.bf16.msra.mxu1 %v1058_v21 }
  0x51   : > { %1076 = vmatpush.bf16.msra.mxu2 %v1058_v21  ;;  %1077 = vmatpush.bf16.msra.mxu3 %v1058_v21 }
  0x54   : > { %625 = vmatpush.bf16.msra.mxu0 %v1057_v22  ;;  %1078 = vmatpush.bf16.msra.mxu1 %v1057_v22 }
  0x55   : > { %1079 = vmatpush.bf16.msra.mxu2 %v1057_v22  ;;  %1080 = vmatpush.bf16.msra.mxu3 %v1057_v22 }
  0x58   : > { %626 = vmatpush.bf16.msra.mxu0 %v1056_v23  ;;  %1081 = vmatpush.bf16.msra.mxu1 %v1056_v23 }
  0x59   : > { %1082 = vmatpush.bf16.msra.mxu2 %v1056_v23  ;;  %1083 = vmatpush.bf16.msra.mxu3 %v1056_v23 }
  0x5c   : > { %627 = vmatpush.bf16.msra.mxu0 %v1055_v24  ;;  %1084 = vmatpush.bf16.msra.mxu1 %v1055_v24 }
  0x5d   : > { %1085 = vmatpush.bf16.msra.mxu2 %v1055_v24  ;;  %1086 = vmatpush.bf16.msra.mxu3 %v1055_v24 }
  0x5f   : > { %628 = vmatmul.bf16.vlgmr.msra.gmra.mxu0 %v1047_v25  ;;  %638 = vmatmul.bf16.vlgmr.msra.gmra.mxu1 %v1049_v26 }
  0x60   : > { %648 = vmatmul.bf16.vlgmr.msra.gmra.mxu2 %v1051_v27  ;;  %658 = vmatmul.bf16.vlgmr.msra.gmra.mxu3 %v1053_v28 }
  0x6f   : > { %633 = vmatmul.bf16.gmra.mxu0 %v1048_v29  ;;  %643 = vmatmul.bf16.gmra.mxu1 %v1050_v30 }
  0x70   : > { %653 = vmatmul.bf16.gmra.mxu2 %v1052_v31  ;;  %663 = vmatmul.bf16.gmra.mxu3 %v1054_v32 }
  0xdc   : > { %v629_v35 = vpop.f32.mrf.mxu0  ;;  %v639_v36 = vpop.f32.mrf.mxu1 }
  0xdd   : > { %v669_v37 = vadd.f32 %v629_v35, %v476_v33  ;;  %v673_v38 = vadd.f32 %v639_v36, %v480_v34 }
  0xdf   : > { %685 = vst [vmem:[#allocation2 + $0x30] sm:$0xff] %v669_v37 }
  0xe0   : > { %689 = vst [vmem:[#allocation2 + $0x50] sm:$0xff] %v673_v38 }
  0xe3   : > { %v649_v43 = vpop.f32.mrf.mxu2  ;;  %v659_v44 = vpop.f32.mrf.mxu3 }
  0xe4   : > { %v677_v45 = vadd.f32 %v649_v43, %v484_v39  ;;  %v681_v46 = vadd.f32 %v659_v44, %v488_v40  ;;  %v631_v47 = vpop.f32.mrf.mxu0  ;;  %v641_v48 = vpop.f32.mrf.mxu1 }
  0xe5   : > { %v670_v49 = vadd.f32 %v631_v47, %v477_v41  ;;  %v674_v50 = vadd.f32 %v641_v48, %v481_v42 }
  0xe6   : > { %693 = vst [vmem:[#allocation2 + $0x40] sm:$0xff] %v677_v45 }
  0xe7   : > { %697 = vst [vmem:[#allocation2 + $0x60] sm:$0xff] %v681_v46 }
  0xe8   : > { %686 = vst [vmem:[#allocation2] sm:$0xff] %v670_v49 }
  0xe9   : > { %690 = vst [vmem:[#allocation2 + $0x68] sm:$0xff] %v674_v50 }
  0xeb   : > { %v651_v55 = vpop.f32.mrf.mxu2  ;;  %v661_v56 = vpop.f32.mrf.mxu3 }
  0xec   : > { %v678_v57 = vadd.f32 %v651_v55, %v485_v51  ;;  %v682_v58 = vadd.f32 %v661_v56, %v489_v52  ;;  %v634_v59 = vpop.f32.mrf.mxu0  ;;  %v644_v60 = vpop.f32.mrf.mxu1 }
  0xed   : > { %v671_v61 = vadd.f32 %v634_v59, %v478_v53  ;;  %v675_v62 = vadd.f32 %v644_v60, %v482_v54 }
  0xee   : > { %694 = vst [vmem:[#allocation2 + $0x20] sm:$0xff] %v678_v57 }
  0xef   : > { %698 = vst [vmem:[#allocation2 + $0x70] sm:$0xff] %v682_v58 }
  0xf0   : > { %687 = vst [vmem:[#allocation2 + $0x58] sm:$0xff] %v671_v61 }
  0xf1   : > { %691 = vst [vmem:[#allocation2 + $0x8] sm:$0xff] %v675_v62 }
  0xf3   : > { %v654_v3 = vpop.f32.mrf.mxu2  ;;  %v664_v4 = vpop.f32.mrf.mxu3 }
  0xf4   : > { %v679_v5 = vadd.f32 %v654_v3, %v486_v63  ;;  %v683_v6 = vadd.f32 %v664_v4, %v490_v0  ;;  %v636_v7 = vpop.f32.mrf.mxu0  ;;  %v646_v8 = vpop.f32.mrf.mxu1 }
  0xf5   : > { %v672_v9 = vadd.f32 %v636_v7, %v479_v1  ;;  %v676_v10 = vadd.f32 %v646_v8, %v483_v2 }
  0xf6   : > { %695 = vst [vmem:[#allocation2 + $0x10] sm:$0xff] %v679_v5 }
  0xf7   : > { %699 = vst [vmem:[#allocation2 + $0x78] sm:$0xff] %v683_v6 }
  0xf8   : > { %688 = vst [vmem:[#allocation2 + $0x18] sm:$0xff] %v672_v9 }
  0xf9   : > { %692 = vst [vmem:[#allocation2 + $0x48] sm:$0xff] %v676_v10 }
  0xfb   : > { %v656_v13 = vpop.f32.mrf.mxu2  ;;  %v666_v14 = vpop.f32.mrf.mxu3  ;;  %704 = sbr.rel (%p1042_p11) target bundleno = 281 (0x119), region = 89 }
  0xfc   : > { %v680_v15 = vadd.f32 %v656_v13, %v487_v11  ;;  %v684_v16 = vadd.f32 %v666_v14, %v491_v12 }
  0xfe   : > { %696 = vst [vmem:[#allocation2 + $0x38] sm:$0xff] %v680_v15 }
  0xff   : > { %700 = vst [vmem:[#allocation2 + $0x28] sm:$0xff] %v684_v16 }
 0x100   : > { %v705_v17 = vld [vmem:[#allocation2 + $0x30] sm:$0xff]  ;;  %v1294_v18 = vld [vmem:[%s1446_s2] ss:$0 sm:$0xff]  ;;  %v707_v22 = vld [vmem:[#allocation2 + $0x58] sm:$0xff] }
 0x101   : > { %v1299_v19 = vld [vmem:[%s1447_s3] ss:$0 sm:$0xff]  ;;  %v725_v20 = vmul.f32 %v1294_v18, %v705_v17  ;;  %v762_v25 = vld [vmem:[%s1448_s4 + $0x8] sm:$0xff]  ;;  %v727_v26 = vmul.f32 %v1294_v18, %v707_v22  ;;  %v708_v27 = vld [vmem:[#allocation2 + $0x18] sm:$0xff] }
 0x102   : > { %v706_v21 = vld [vmem:[#allocation2] sm:$0xff]  ;;  %v763_v29 = vld [vmem:[%s1448_s4 + $0x10] sm:$0xff]  ;;  %v728_v30 = vmul.f32 %v1294_v18, %v708_v27  ;;  %v710_v32 = vld [vmem:[#allocation2 + $0x68] sm:$0xff] }
 0x103   : > { %v761_v23 = vld [vmem:[%s1448_s4] sm:$0xff]  ;;  %v726_v24 = vmul.f32 %v1294_v18, %v706_v21  ;;  %v745_v28 = vadd.f32 %v1299_v19, %v725_v20  ;;  %v709_v31 = vld [vmem:[#allocation2 + $0x50] sm:$0xff]  ;;  %v747_v34 = vadd.f32 %v1299_v19, %v727_v26  ;;  %v764_v35 = vld [vmem:[%s1448_s4 + $0x18] sm:$0xff]  ;;  %v730_v37 = vmul.f32 %v1294_v18, %v710_v32 }
 0x104   : > { %v729_v36 = vmul.f32 %v1294_v18, %v709_v31  ;;  %v711_v38 = vld [vmem:[#allocation2 + $0x8] sm:$0xff]  ;;  %v748_v40 = vadd.f32 %v1299_v19, %v728_v30  ;;  %v765_v41 = vld [vmem:[%s1448_s4 + $0x20] sm:$0xff]  ;;  %v767_v49 = vld [vmem:[%s1448_s4 + $0x30] sm:$0xff] }
 0x105   : > { %v746_v33 = vadd.f32 %v1299_v19, %v726_v24  ;;  %v777_v39 = vadd.f32 %v761_v23, %v745_v28  ;;  %v766_v42 = vld [vmem:[%s1448_s4 + $0x28] sm:$0xff]  ;;  %v731_v43 = vmul.f32 %v1294_v18, %v711_v38  ;;  %v779_v46 = vadd.f32 %v763_v29, %v747_v34  ;;  %v713_v50 = vld [vmem:[#allocation2 + $0x40] sm:$0xff]  ;;  %v715_v56 = vld [vmem:[#allocation2 + $0x10] sm:$0xff] }
 0x106   : > { %v712_v44 = vld [vmem:[#allocation2 + $0x48] sm:$0xff]  ;;  %v749_v47 = vadd.f32 %v1299_v19, %v729_v36  ;;  %v750_v48 = vadd.f32 %v1299_v19, %v730_v37  ;;  %v780_v52 = vadd.f32 %v764_v35, %v748_v40  ;;  %v714_v55 = vld [vmem:[#allocation2 + $0x20] sm:$0xff]  ;;  %v768_v61 = vld [vmem:[%s1448_s4 + $0x38] sm:$0xff]  ;;  %v733_v2 = vmul.f32 %v1294_v18, %v713_v50 }
 0x107   : > { %v778_v45 = vadd.f32 %v762_v25, %v746_v33  ;;  %v793_v51 = vmax.f32 %v777_v39, 0.0  ;;  %v751_v53 = vadd.f32 %v1299_v19, %v731_v43  ;;  %v732_v54 = vmul.f32 %v1294_v18, %v712_v44  ;;  %v716_v62 = vld [vmem:[#allocation2 + $0x38] sm:$0xff]  ;;  %v717_v3 = vld [vmem:[#allocation2 + $0x60] sm:$0xff]  ;;  %v718_v4 = vld [vmem:[#allocation2 + $0x70] sm:$0xff] }
 0x108   : > { %v795_v58 = vmax.f32 %v779_v46, 0.0  ;;  %v781_v59 = vadd.f32 %v765_v41, %v749_v47  ;;  %v782_v60 = vadd.f32 %v766_v42, %v750_v48  ;;  %v796_v63 = vmax.f32 %v780_v52, 0.0  ;;  %v769_v7 = vld [vmem:[%s1448_s4 + $0x40] sm:$0xff]  ;;  %v719_v10 = vld [vmem:[#allocation2 + $0x78] sm:$0xff]  ;;  %v770_v14 = vld [vmem:[%s1448_s4 + $0x48] sm:$0xff] }
 0x109   : > { %v794_v57 = vmax.f32 %v778_v45, 0.0  ;;  %809 = vst [vmem:[%s1449_s5] sm:$0xff] %v793_v51  ;;  %v783_v0 = vadd.f32 %v767_v49, %v751_v53  ;;  %v752_v1 = vadd.f32 %v1299_v19, %v732_v54  ;;  %v734_v8 = vmul.f32 %v1294_v18, %v714_v55  ;;  %v771_v15 = vld [vmem:[%s1448_s4 + $0x50] sm:$0xff]  ;;  %v772_v21 = vld [vmem:[%s1448_s4 + $0x58] sm:$0xff]  ;;  %v720_v24 = vld [vmem:[#allocation2 + $0x28] sm:$0xff] }
 0x10a   : > { %v797_v5 = vmax.f32 %v781_v59, 0.0  ;;  %v798_v6 = vmax.f32 %v782_v60, 0.0  ;;  %v735_v9 = vmul.f32 %v1294_v18, %v715_v56  ;;  %811 = vst [vmem:[%s1449_s5 + $0x10] sm:$0xff] %v795_v58  ;;  %v753_v13 = vadd.f32 %v1299_v19, %v733_v2  ;;  %v773_v28 = vld [vmem:[%s1448_s4 + $0x60] sm:$0xff]  ;;  %v774_v29 = vld [vmem:[%s1448_s4 + $0x68] sm:$0xff]  ;;  %v775_v35 = vld [vmem:[%s1448_s4 + $0x70] sm:$0xff] }
 0x10b   : > { %810 = vst [vmem:[%s1449_s5 + $0x8] sm:$0xff] %v794_v57  ;;  %v799_v11 = vmax.f32 %v783_v0, 0.0  ;;  %v784_v12 = vadd.f32 %v768_v61, %v752_v1  ;;  %v736_v16 = vmul.f32 %v1294_v18, %v716_v62  ;;  %v754_v17 = vadd.f32 %v1299_v19, %v734_v8  ;;  %v776_v44 = vld [vmem:[%s1448_s4 + $0x78] sm:$0xff] }
 0x10c   : > { %812 = vst [vmem:[%s1449_s5 + $0x18] sm:$0xff] %v796_v63  ;;  %v755_v20 = vadd.f32 %v1299_v19, %v735_v9  ;;  %v737_v22 = vmul.f32 %v1294_v18, %v717_v3  ;;  %v738_v23 = vmul.f32 %v1294_v18, %v718_v4  ;;  %v785_v26 = vadd.f32 %v769_v7, %v753_v13 }
 0x10d   : > { %813 = vst [vmem:[%s1449_s5 + $0x20] sm:$0xff] %v797_v5  ;;  %v800_v25 = vmax.f32 %v784_v12, 0.0  ;;  %v756_v27 = vadd.f32 %v1299_v19, %v736_v16  ;;  %v739_v30 = vmul.f32 %v1294_v18, %v719_v10  ;;  %v786_v31 = vadd.f32 %v770_v14, %v754_v17 }
 0x10e   : > { %814 = vst [vmem:[%s1449_s5 + $0x28] sm:$0xff] %v798_v6  ;;  %v787_v32 = vadd.f32 %v771_v15, %v755_v20  ;;  %v757_v33 = vadd.f32 %v1299_v19, %v737_v22  ;;  %v758_v34 = vadd.f32 %v1299_v19, %v738_v23  ;;  %v801_v36 = vmax.f32 %v785_v26, 0.0 }
 0x10f   : > { %815 = vst [vmem:[%s1449_s5 + $0x30] sm:$0xff] %v799_v11  ;;  %v788_v37 = vadd.f32 %v772_v21, %v756_v27  ;;  %v759_v38 = vadd.f32 %v1299_v19, %v739_v30  ;;  %v740_v39 = vmul.f32 %v1294_v18, %v720_v24  ;;  %v802_v40 = vmax.f32 %v786_v31, 0.0 }
 0x110   : > { %816 = vst [vmem:[%s1449_s5 + $0x38] sm:$0xff] %v800_v25  ;;  %v803_v41 = vmax.f32 %v787_v32, 0.0  ;;  %v789_v42 = vadd.f32 %v773_v28, %v757_v33  ;;  %v790_v43 = vadd.f32 %v774_v29, %v758_v34 }
 0x111   : > { %817 = vst [vmem:[%s1449_s5 + $0x40] sm:$0xff] %v801_v36  ;;  %v804_v45 = vmax.f32 %v788_v37, 0.0  ;;  %v791_v46 = vadd.f32 %v775_v35, %v759_v38  ;;  %v760_v18 = vadd.f32 %v1299_v19, %v740_v39 }
 0x112   : > { %818 = vst [vmem:[%s1449_s5 + $0x48] sm:$0xff] %v802_v40  ;;  %v805_v47 = vmax.f32 %v789_v42, 0.0  ;;  %v806_v48 = vmax.f32 %v790_v43, 0.0 }
 0x113   : > { %819 = vst [vmem:[%s1449_s5 + $0x50] sm:$0xff] %v803_v41  ;;  %v807_v49 = vmax.f32 %v791_v46, 0.0  ;;  %v792_v50 = vadd.f32 %v776_v44, %v760_v18 }
 0x114   : > { %820 = vst [vmem:[%s1449_s5 + $0x58] sm:$0xff] %v804_v45 }
 0x115   : > { %821 = vst [vmem:[%s1449_s5 + $0x60] sm:$0xff] %v805_v47  ;;  %v808_v19 = vmax.f32 %v792_v50, 0.0 }
 0x116   : > { %822 = vst [vmem:[%s1449_s5 + $0x68] sm:$0xff] %v806_v48 }
 0x117   : > { %823 = vst [vmem:[%s1449_s5 + $0x70] sm:$0xff] %v807_v49 }
 0x118   : > { %824 = vst [vmem:[%s1449_s5 + $0x78] sm:$0xff] %v808_v19 }
 0x119 PF: > { %s15_s22 = sadd.s32 1, %s1168_s22   ;;  %s1450_s18 = smov %s1156_s19 }
 0x11a   : > { %p12_p12 = scmp.ge.s32.totalorder %s15_s22, 7   ;;  %s1451_s19 = smov %s1236_s26 }
 0x11b   : > { %s1452_s20 = smov %s1164_s21  ;;  %s1453_s21 = smov %s1455_s23 }
 0x11c   :  { %14 = sbr.rel (!%p12_p12) target bundleno = 3 (0x3), region = 136 }

// kernel: _lambda_.28
= control target key start
LH: loop header
LB: loop body
LE: loop exit
PB: predicated region body
PF: predicated region fallthrough
CT: control target
= control target key end

     0   :  { %10 = vsyncpa [#allocation5], 0  ;;  %s1580_s0 = inlined_call_operand.vmem [shape: bf16[128,640], index: 0, kind: input, shape index: {}]   ;;  %s1581_s1 = inlined_call_operand.vmem [shape: bf16[640,128], index: 1, kind: input, shape index: {}]   ;;  %s1582_s2 = inlined_call_operand.hbm [shape: f32[1,128], index: 2, kind: input, shape index: {}]   ;;  %s1583_s3 = inlined_call_operand.hbm [shape: f32[1,128], index: 3, kind: input, shape index: {}]   ;;  %s1584_s4 = inlined_call_operand.vmem [shape: f32[128,128], index: 4, kind: input, shape index: {}]   ;;  %s1585_s5 = inlined_call_operand.vmem [shape: f32[128,128], index: 5, kind: output, shape index: {}]  }
   0x1   :  { %11 = vsyncpa [#allocation7], 0  ;;  %s1308_s18 = smov 0   ;;  %s1310_s19 = smov 0  }
   0x2   :  { %s1312_s20 = smov 0   ;;  %s1314_s21 = smov 0  }
   0x3   :  { %s1316_s22 = smov 0  }
   0x4 LB: > { %s979_s23 = sadd.s32 4294967295, %s1273_s22   ;;  %s29_s24 = sadd.s32 1, %s1269_s21  ;;  %s1273_s22 = sphi %s1316_s22, %s17_s22   ;;  %s1269_s21 = sphi %s1314_s21, %s1592_s21   ;;  %s1265_s20 = sphi %s1312_s20, %s1591_s20   ;;  %s1261_s19 = sphi %s1310_s19, %s1590_s19   ;;  %s1257_s18 = sphi %s1308_s18, %s1589_s18  }
   0x5   : > { %p30_p0 = scmp.ge.s32.totalorder %s29_s24, 5  ;;  %s45_s25 = sadd.s32 1, %s1261_s19 }
   0x6   : > { %p52_p1 = scmp.ne.s32.totalorder %s1261_s19, %s1257_s18  ;;  %p53_p2 = scmp.eq.s32.totalorder %s1273_s22, 0 }
   0x7   : > { %s1594_s24 = smov (%p30_p0, %s29_s24), 0  ;;  %p980_p4 = scmp.ge.s32.totalorder %s1273_s22, 1 }
   0x8   : > { %p1341_p3 = por %p53_p2, %p52_p1  ;;  %s41_s27 = ssub.s32 %s1269_s21, %s1594_s24 }
   0x9   : > { %p205_p5 = scmp.lt.s32.totalorder %s1273_s22, 6  ;;  %p43_p6 = scmp.eq.s32.totalorder %s41_s27, 0 }
   0xa   : > { %p1353_p8 = scmp.eq.s32.totalorder %s979_s23, 0  ;;  %s218_s8 = sshll.u32 %s1582_s2, 4  ;;  %s219_s8 = int_to_ptr.hbm [resolvable:$true] %s218_s8 }
   0xb   : > { %p1349_p7 = pnand %p980_p4, %p205_p5  ;;  %s1275_s9 = smov [#allocation4]  }
   0xc   : > { %s1358_s30 = scalar_select %p43_p6, %s1261_s19, %s45_s25  }
   0xd   : > { %p1111_p9 = pneg %p1349_p7  ;;  %s220_s10 = sshll.u32 %s1275_s9, 4  ;;  %s221_s10 = int_to_ptr.vmem [resolvable:$true] %s220_s10 }
   0xe   : > { %s231_s13 = sshll.u32 %s1583_s3, 4  ;;  %s1276_s14 = smov [#allocation6]   ;;  %s232_s13 = int_to_ptr.hbm [resolvable:$true] %s231_s13 }
   0xf   : > { %p1112_p10 = pnand %p1353_p8, %p1111_p9  ;;  %s233_s15 = sshll.u32 %s1276_s14, 4  ;;  %s234_s15 = int_to_ptr.vmem [resolvable:$true] %s233_s15 }
  0x10   : > { %p984_p11 = scmp.ge.s32.totalorder %s1273_s22, 5 }
  0x11   : > { %1114 = dma.hbm_to_vmem [thread:$0]  (!%p1112_p10), %s219_s8, 16, %s221_s10, [#allocation5]  }
  0x12   : > { %1117 = dma.hbm_to_vmem [thread:$0]  (!%p1112_p10), %s232_s13, 16, %s234_s15, [#allocation7]  }
  0x13   : > { %252 = sbr.rel (%p984_p11) target bundleno = 44 (0x2c), region = 28 }
  0x18   : > { %255 = sbr.rel (!%p1341_p3) target bundleno = 44 (0x2c), region = 32  ;;  %s257_s16 = sand.u32 (%p1341_p3), 1, %s1261_s19  }
  0x19   : > { %s986_s17 = sshll.u32 (%p1341_p3), %s1269_s21, 2  ;;  %s985_s23 = sshll.u32 (%p1341_p3), %s257_s16, 6 }
  0x1a   : > { %s1378_s6 = scalar_lea.vmem (%p1341_p3), %s1580_s0, %s986_s17  ;;  %s259_s26 = scalar_lea.vmem (%p1341_p3), [#allocation3], %s985_s23 }
  0x1b   : > { %v281_v0 = vld [vmem:[%s1378_s6] sm:$0xf] (%p1341_p3)  ;;  %v283_v1 = vld [vmem:[%s1378_s6 + $0x14] sm:$0xf] (%p1341_p3)  ;;  %v285_v2 = vld [vmem:[%s1378_s6 + $0x28] sm:$0xf] (%p1341_p3) }
  0x1c   : > { %282 = vst [vmem:[%s259_s26] sm:$0xf] (%p1341_p3), %v281_v0  ;;  %v287_v3 = vld [vmem:[%s1378_s6 + $0x3c] sm:$0xf] (%p1341_p3)  ;;  %v289_v4 = vld [vmem:[%s1378_s6 + $0x50] sm:$0xf] (%p1341_p3) }
  0x1d   : > { %284 = vst [vmem:[%s259_s26 + $0x4] sm:$0xf] %v283_v1  ;;  %v291_v5 = vld [vmem:[%s1378_s6 + $0x64] sm:$0xf]  ;;  %v293_v6 = vld [vmem:[%s1378_s6 + $0x78] sm:$0xf] }
  0x1e   : > { %286 = vst [vmem:[%s259_s26 + $0x8] sm:$0xf] %v285_v2  ;;  %v295_v7 = vld [vmem:[%s1378_s6 + $0x8c] sm:$0xf]  ;;  %v297_v8 = vld [vmem:[%s1378_s6 + $0xa0] sm:$0xf] }
  0x1f   : > { %288 = vst [vmem:[%s259_s26 + $0xc] sm:$0xf] %v287_v3  ;;  %v299_v9 = vld [vmem:[%s1378_s6 + $0xb4] sm:$0xf]  ;;  %v301_v10 = vld [vmem:[%s1378_s6 + $0xc8] sm:$0xf] }
  0x20   : > { %290 = vst [vmem:[%s259_s26 + $0x10] sm:$0xf] %v289_v4  ;;  %v303_v11 = vld [vmem:[%s1378_s6 + $0xdc] sm:$0xf]  ;;  %v305_v12 = vld [vmem:[%s1378_s6 + $0xf0] sm:$0xf] }
  0x21   : > { %292 = vst [vmem:[%s259_s26 + $0x14] sm:$0xf] %v291_v5  ;;  %v307_v13 = vld [vmem:[%s1378_s6 + $0x104] sm:$0xf]  ;;  %v309_v14 = vld [vmem:[%s1378_s6 + $0x118] sm:$0xf] }
  0x22   : > { %294 = vst [vmem:[%s259_s26 + $0x18] sm:$0xf] %v293_v6  ;;  %v311_v15 = vld [vmem:[%s1378_s6 + $0x12c] sm:$0xf] }
  0x23   : > { %296 = vst [vmem:[%s259_s26 + $0x1c] sm:$0xf] %v295_v7 }
  0x24   : > { %298 = vst [vmem:[%s259_s26 + $0x20] sm:$0xf] %v297_v8 }
  0x25   : > { %300 = vst [vmem:[%s259_s26 + $0x24] sm:$0xf] %v299_v9 }
  0x26   : > { %302 = vst [vmem:[%s259_s26 + $0x28] sm:$0xf] %v301_v10 }
  0x27   : > { %304 = vst [vmem:[%s259_s26 + $0x2c] sm:$0xf] %v303_v11 }
  0x28   : > { %306 = vst [vmem:[%s259_s26 + $0x30] sm:$0xf] %v305_v12 }
  0x29   : > { %308 = vst [vmem:[%s259_s26 + $0x34] sm:$0xf] %v307_v13 }
  0x2a   : > { %310 = vst [vmem:[%s259_s26 + $0x38] sm:$0xf] %v309_v14 }
  0x2b   : > { %312 = vst [vmem:[%s259_s26 + $0x3c] sm:$0xf] %v311_v15 }
  0x2c PF: > { %383 = sbr.rel (%p1349_p7) target bundleno = 294 (0x126), region = 77  ;;  %s386_s7 = sand.u32 (!%p1349_p7), 1, %s1257_s18  }
  0x2d   : > { %s988_s8 = sshll.u32 (!%p1349_p7), %s386_s7, 6 }
  0x2e   : > { %s1399_s9 = scalar_lea.vmem (!%p1349_p7), [#allocation3], %s988_s8 }
  0x31   : > { %1248 = dma.done.wait (%p1353_p8), [#allocation5], 16  }
  0x32   : > { %1250 = vsyncadd (%p1353_p8), [#allocation5], 4294967280 }
  0x33   : > { %1252 = dma.done.wait (%p1353_p8), [#allocation7], 16  }
  0x34   : > { %1254 = vsyncadd (%p1353_p8), [#allocation7], 4294967280  ;;  %s991_s28 = sshll.u32 %s1265_s20, 4  ;;  %p993_p13 = scmp.ne.s32.totalorder %s1265_s20, 0 }
  0x35   : > { %p444_p12 = scmp.lt.s32.totalorder %s991_s28, 79 }
  0x36   : > { %473 = sbr.rel (%p993_p13) target bundleno = 76 (0x4c), region = 93 }
  0x37   : > { %s1596_s28 = smov (!%p444_p12, %s991_s28), 79 }
  0x38   : > { %s992_s10 = sshll.u32 %s1596_s28, 2 }
  0x39   : > { %s1413_s12 = scalar_lea.vmem %s1581_s1, %s992_s10 }
  0x3b   : > { %v1277_v16 = vmov 0.0  }
  0x3c   : > { %474 = vst [vmem:[#allocation2 + $0x30] sm:$0xff] %v1277_v16 }
  0x3d   : > { %475 = vst [vmem:[#allocation2] sm:$0xff] %v1277_v16 }
  0x3e   : > { %476 = vst [vmem:[#allocation2 + $0x58] sm:$0xff] %v1277_v16 }
  0x3f   : > { %477 = vst [vmem:[#allocation2 + $0x18] sm:$0xff] %v1277_v16 }
  0x40   : > { %478 = vst [vmem:[#allocation2 + $0x50] sm:$0xff] %v1277_v16 }
  0x41   : > { %479 = vst [vmem:[#allocation2 + $0x68] sm:$0xff] %v1277_v16 }
  0x42   : > { %480 = vst [vmem:[#allocation2 + $0x8] sm:$0xff] %v1277_v16 }
  0x43   : > { %481 = vst [vmem:[#allocation2 + $0x48] sm:$0xff] %v1277_v16 }
  0x44   : > { %482 = vst [vmem:[#allocation2 + $0x40] sm:$0xff] %v1277_v16 }
  0x45   : > { %483 = vst [vmem:[#allocation2 + $0x20] sm:$0xff] %v1277_v16 }
  0x46   : > { %484 = vst [vmem:[#allocation2 + $0x10] sm:$0xff] %v1277_v16 }
  0x47   : > { %485 = vst [vmem:[#allocation2 + $0x38] sm:$0xff] %v1277_v16 }
  0x48   : > { %486 = vst [vmem:[#allocation2 + $0x60] sm:$0xff] %v1277_v16 }
  0x49   : > { %487 = vst [vmem:[#allocation2 + $0x70] sm:$0xff] %v1277_v16 }
  0x4a   : > { %488 = vst [vmem:[#allocation2 + $0x78] sm:$0xff] %v1277_v16 }
  0x4b   : > { %489 = vst [vmem:[#allocation2 + $0x28] sm:$0xff] %v1277_v16 }
  0x4c PF: > { %v1078_v17 = vld [vmem:[%s1413_s12 + $0x38] sm:$0xff]  ;;  %v1077_v18 = vld [vmem:[%s1413_s12 + $0x30] sm:$0xff]  ;;  %v1076_v19 = vld [vmem:[%s1413_s12 + $0x28] sm:$0xff]  ;;  %p1058_p0 = scmp.ne.s32.totalorder %s1265_s20, 4 }
  0x4d   : > { %634 = vmatpush.bf16.msra.mxu0 %v1078_v17  ;;  %1079 = vmatpush.bf16.msra.mxu1 %v1078_v17  ;;  %v1075_v20 = vld [vmem:[%s1413_s12 + $0x20] sm:$0xff]  ;;  %v1074_v21 = vld [vmem:[%s1413_s12 + $0x18] sm:$0xff]  ;;  %v1073_v22 = vld [vmem:[%s1413_s12 + $0x10] sm:$0xff] }
  0x4e   : > { %1080 = vmatpush.bf16.msra.mxu2 %v1078_v17  ;;  %1081 = vmatpush.bf16.msra.mxu3 %v1078_v17  ;;  %v1072_v23 = vld [vmem:[%s1413_s12 + $0x8] sm:$0xff]  ;;  %v1071_v24 = vld [vmem:[%s1413_s12] sm:$0xff]  ;;  %v1065_v26 = vld [vmem:[%s1399_s9 + $0x10] sm:$0xff] }
  0x4f   : > { %v1063_v25 = vld [vmem:[%s1399_s9] sm:$0xff]  ;;  %v1069_v28 = vld [vmem:[%s1399_s9 + $0x30] sm:$0xff]  ;;  %v1064_v29 = vld [vmem:[%s1399_s9 + $0x8] sm:$0xff] }
  0x50   : > { %v1067_v27 = vld [vmem:[%s1399_s9 + $0x20] sm:$0xff]  ;;  %v1066_v30 = vld [vmem:[%s1399_s9 + $0x18] sm:$0xff]  ;;  %v1068_v31 = vld [vmem:[%s1399_s9 + $0x28] sm:$0xff] }
  0x51   : > { %635 = vmatpush.bf16.msra.mxu0 %v1077_v18  ;;  %1082 = vmatpush.bf16.msra.mxu1 %v1077_v18  ;;  %v1070_v32 = vld [vmem:[%s1399_s9 + $0x38] sm:$0xff]  ;;  %v490_v33 = vld [vmem:[#allocation2 + $0x30] sm:$0xff]  ;;  %v498_v39 = vld [vmem:[#allocation2 + $0x40] sm:$0xff] }
  0x52   : > { %1083 = vmatpush.bf16.msra.mxu2 %v1077_v18  ;;  %1084 = vmatpush.bf16.msra.mxu3 %v1077_v18  ;;  %v494_v34 = vld [vmem:[#allocation2 + $0x50] sm:$0xff]  ;;  %v502_v40 = vld [vmem:[#allocation2 + $0x60] sm:$0xff]  ;;  %v495_v42 = vld [vmem:[#allocation2 + $0x68] sm:$0xff] }
  0x53   : > { %v491_v41 = vld [vmem:[#allocation2] sm:$0xff]  ;;  %v503_v52 = vld [vmem:[#allocation2 + $0x70] sm:$0xff]  ;;  %v492_v53 = vld [vmem:[#allocation2 + $0x58] sm:$0xff] }
  0x54   : > { %v499_v51 = vld [vmem:[#allocation2 + $0x20] sm:$0xff]  ;;  %v496_v54 = vld [vmem:[#allocation2 + $0x8] sm:$0xff]  ;;  %v500_v63 = vld [vmem:[#allocation2 + $0x10] sm:$0xff] }
  0x55   : > { %636 = vmatpush.bf16.msra.mxu0 %v1076_v19  ;;  %1085 = vmatpush.bf16.msra.mxu1 %v1076_v19  ;;  %v504_v0 = vld [vmem:[#allocation2 + $0x78] sm:$0xff]  ;;  %v497_v2 = vld [vmem:[#allocation2 + $0x48] sm:$0xff] }
  0x56   : > { %1086 = vmatpush.bf16.msra.mxu2 %v1076_v19  ;;  %1087 = vmatpush.bf16.msra.mxu3 %v1076_v19  ;;  %v493_v1 = vld [vmem:[#allocation2 + $0x18] sm:$0xff]  ;;  %v505_v12 = vld [vmem:[#allocation2 + $0x28] sm:$0xff] }
  0x57   : > { %v501_v11 = vld [vmem:[#allocation2 + $0x38] sm:$0xff] }
  0x59   : > { %637 = vmatpush.bf16.msra.mxu0 %v1075_v20  ;;  %1088 = vmatpush.bf16.msra.mxu1 %v1075_v20 }
  0x5a   : > { %1089 = vmatpush.bf16.msra.mxu2 %v1075_v20  ;;  %1090 = vmatpush.bf16.msra.mxu3 %v1075_v20 }
  0x5d   : > { %638 = vmatpush.bf16.msra.mxu0 %v1074_v21  ;;  %1091 = vmatpush.bf16.msra.mxu1 %v1074_v21 }
  0x5e   : > { %1092 = vmatpush.bf16.msra.mxu2 %v1074_v21  ;;  %1093 = vmatpush.bf16.msra.mxu3 %v1074_v21 }
  0x61   : > { %639 = vmatpush.bf16.msra.mxu0 %v1073_v22  ;;  %1094 = vmatpush.bf16.msra.mxu1 %v1073_v22 }
  0x62   : > { %1095 = vmatpush.bf16.msra.mxu2 %v1073_v22  ;;  %1096 = vmatpush.bf16.msra.mxu3 %v1073_v22 }
  0x65   : > { %640 = vmatpush.bf16.msra.mxu0 %v1072_v23  ;;  %1097 = vmatpush.bf16.msra.mxu1 %v1072_v23 }
  0x66   : > { %1098 = vmatpush.bf16.msra.mxu2 %v1072_v23  ;;  %1099 = vmatpush.bf16.msra.mxu3 %v1072_v23 }
  0x69   : > { %641 = vmatpush.bf16.msra.mxu0 %v1071_v24  ;;  %1100 = vmatpush.bf16.msra.mxu1 %v1071_v24 }
  0x6a   : > { %1101 = vmatpush.bf16.msra.mxu2 %v1071_v24  ;;  %1102 = vmatpush.bf16.msra.mxu3 %v1071_v24 }
  0x6c   : > { %642 = vmatmul.bf16.vlgmr.msra.gmra.mxu0 %v1063_v25  ;;  %652 = vmatmul.bf16.vlgmr.msra.gmra.mxu1 %v1065_v26 }
  0x6d   : > { %662 = vmatmul.bf16.vlgmr.msra.gmra.mxu2 %v1067_v27  ;;  %672 = vmatmul.bf16.vlgmr.msra.gmra.mxu3 %v1069_v28 }
  0x7c   : > { %647 = vmatmul.bf16.gmra.mxu0 %v1064_v29  ;;  %657 = vmatmul.bf16.gmra.mxu1 %v1066_v30 }
  0x7d   : > { %667 = vmatmul.bf16.gmra.mxu2 %v1068_v31  ;;  %677 = vmatmul.bf16.gmra.mxu3 %v1070_v32 }
  0xe9   : > { %v643_v35 = vpop.f32.mrf.mxu0  ;;  %v653_v36 = vpop.f32.mrf.mxu1 }
  0xea   : > { %v683_v37 = vadd.f32 %v643_v35, %v490_v33  ;;  %v687_v38 = vadd.f32 %v653_v36, %v494_v34 }
  0xec   : > { %699 = vst [vmem:[#allocation2 + $0x30] sm:$0xff] %v683_v37 }
  0xed   : > { %703 = vst [vmem:[#allocation2 + $0x50] sm:$0xff] %v687_v38 }
  0xf0   : > { %v663_v43 = vpop.f32.mrf.mxu2  ;;  %v673_v44 = vpop.f32.mrf.mxu3 }
  0xf1   : > { %v691_v45 = vadd.f32 %v663_v43, %v498_v39  ;;  %v695_v46 = vadd.f32 %v673_v44, %v502_v40  ;;  %v645_v47 = vpop.f32.mrf.mxu0  ;;  %v655_v48 = vpop.f32.mrf.mxu1 }
  0xf2   : > { %v684_v49 = vadd.f32 %v645_v47, %v491_v41  ;;  %v688_v50 = vadd.f32 %v655_v48, %v495_v42 }
  0xf3   : > { %707 = vst [vmem:[#allocation2 + $0x40] sm:$0xff] %v691_v45 }
  0xf4   : > { %711 = vst [vmem:[#allocation2 + $0x60] sm:$0xff] %v695_v46 }
  0xf5   : > { %700 = vst [vmem:[#allocation2] sm:$0xff] %v684_v49 }
  0xf6   : > { %704 = vst [vmem:[#allocation2 + $0x68] sm:$0xff] %v688_v50 }
  0xf8   : > { %v665_v55 = vpop.f32.mrf.mxu2  ;;  %v675_v56 = vpop.f32.mrf.mxu3 }
  0xf9   : > { %v692_v57 = vadd.f32 %v665_v55, %v499_v51  ;;  %v696_v58 = vadd.f32 %v675_v56, %v503_v52  ;;  %v648_v59 = vpop.f32.mrf.mxu0  ;;  %v658_v60 = vpop.f32.mrf.mxu1 }
  0xfa   : > { %v685_v61 = vadd.f32 %v648_v59, %v492_v53  ;;  %v689_v62 = vadd.f32 %v658_v60, %v496_v54 }
  0xfb   : > { %708 = vst [vmem:[#allocation2 + $0x20] sm:$0xff] %v692_v57 }
  0xfc   : > { %712 = vst [vmem:[#allocation2 + $0x70] sm:$0xff] %v696_v58 }
  0xfd   : > { %701 = vst [vmem:[#allocation2 + $0x58] sm:$0xff] %v685_v61 }
  0xfe   : > { %705 = vst [vmem:[#allocation2 + $0x8] sm:$0xff] %v689_v62 }
 0x100   : > { %v668_v3 = vpop.f32.mrf.mxu2  ;;  %v678_v4 = vpop.f32.mrf.mxu3 }
 0x101   : > { %v693_v5 = vadd.f32 %v668_v3, %v500_v63  ;;  %v697_v6 = vadd.f32 %v678_v4, %v504_v0  ;;  %v650_v7 = vpop.f32.mrf.mxu0  ;;  %v660_v8 = vpop.f32.mrf.mxu1 }
 0x102   : > { %v686_v9 = vadd.f32 %v650_v7, %v493_v1  ;;  %v690_v10 = vadd.f32 %v660_v8, %v497_v2 }
 0x103   : > { %709 = vst [vmem:[#allocation2 + $0x10] sm:$0xff] %v693_v5 }
 0x104   : > { %713 = vst [vmem:[#allocation2 + $0x78] sm:$0xff] %v697_v6 }
 0x105   : > { %702 = vst [vmem:[#allocation2 + $0x18] sm:$0xff] %v686_v9 }
 0x106   : > { %706 = vst [vmem:[#allocation2 + $0x48] sm:$0xff] %v690_v10 }
 0x108   : > { %v670_v13 = vpop.f32.mrf.mxu2  ;;  %v680_v14 = vpop.f32.mrf.mxu3  ;;  %718 = sbr.rel (%p1058_p0) target bundleno = 294 (0x126), region = 97 }
 0x109   : > { %v694_v15 = vadd.f32 %v670_v13, %v501_v11  ;;  %v698_v16 = vadd.f32 %v680_v14, %v505_v12 }
 0x10b   : > { %710 = vst [vmem:[#allocation2 + $0x38] sm:$0xff] %v694_v15 }
 0x10c   : > { %714 = vst [vmem:[#allocation2 + $0x28] sm:$0xff] %v698_v16 }
 0x10d   : > { %v719_v17 = vld [vmem:[#allocation2 + $0x30] sm:$0xff]  ;;  %v1433_v18 = vld [vmem:[#allocation4] ss:$0 sm:$0xff]  ;;  %v1435_v19 = vld [vmem:[#allocation6] ss:$0 sm:$0xff] }
 0x10e   : > { %v739_v20 = vmul.f32 %v1433_v18, %v719_v17  ;;  %v720_v21 = vld [vmem:[#allocation2] sm:$0xff]  ;;  %v721_v22 = vld [vmem:[#allocation2 + $0x58] sm:$0xff]  ;;  %v776_v25 = vld [vmem:[%s1584_s4 + $0x8] sm:$0xff] }
 0x10f   : > { %v775_v23 = vld [vmem:[%s1584_s4] sm:$0xff]  ;;  %v740_v24 = vmul.f32 %v1433_v18, %v720_v21  ;;  %v741_v26 = vmul.f32 %v1433_v18, %v721_v22  ;;  %v722_v27 = vld [vmem:[#allocation2 + $0x18] sm:$0xff]  ;;  %v777_v29 = vld [vmem:[%s1584_s4 + $0x10] sm:$0xff] }
 0x110   : > { %v759_v28 = vadd.f32 %v1435_v19, %v739_v20  ;;  %v742_v30 = vmul.f32 %v1433_v18, %v722_v27  ;;  %v723_v31 = vld [vmem:[#allocation2 + $0x50] sm:$0xff]  ;;  %v724_v32 = vld [vmem:[#allocation2 + $0x68] sm:$0xff]  ;;  %v778_v35 = vld [vmem:[%s1584_s4 + $0x18] sm:$0xff] }
 0x111   : > { %v760_v33 = vadd.f32 %v1435_v19, %v740_v24  ;;  %v761_v34 = vadd.f32 %v1435_v19, %v741_v26  ;;  %v743_v36 = vmul.f32 %v1433_v18, %v723_v31  ;;  %v744_v37 = vmul.f32 %v1433_v18, %v724_v32  ;;  %v725_v38 = vld [vmem:[#allocation2 + $0x8] sm:$0xff]  ;;  %v779_v41 = vld [vmem:[%s1584_s4 + $0x20] sm:$0xff]  ;;  %v781_v49 = vld [vmem:[%s1584_s4 + $0x30] sm:$0xff] }
 0x112   : > { %v791_v39 = vadd.f32 %v775_v23, %v759_v28  ;;  %v762_v40 = vadd.f32 %v1435_v19, %v742_v30  ;;  %v780_v42 = vld [vmem:[%s1584_s4 + $0x28] sm:$0xff]  ;;  %v745_v43 = vmul.f32 %v1433_v18, %v725_v38  ;;  %v727_v50 = vld [vmem:[#allocation2 + $0x40] sm:$0xff]  ;;  %v729_v56 = vld [vmem:[#allocation2 + $0x10] sm:$0xff] }
 0x113   : > { %v726_v44 = vld [vmem:[#allocation2 + $0x48] sm:$0xff]  ;;  %v792_v45 = vadd.f32 %v776_v25, %v760_v33  ;;  %v793_v46 = vadd.f32 %v777_v29, %v761_v34  ;;  %v763_v47 = vadd.f32 %v1435_v19, %v743_v36  ;;  %v764_v48 = vadd.f32 %v1435_v19, %v744_v37  ;;  %v728_v55 = vld [vmem:[#allocation2 + $0x20] sm:$0xff]  ;;  %v782_v61 = vld [vmem:[%s1584_s4 + $0x38] sm:$0xff] }
 0x114   : > { %v807_v51 = vmax.f32 %v791_v39, 0.0  ;;  %v794_v52 = vadd.f32 %v778_v35, %v762_v40  ;;  %v765_v53 = vadd.f32 %v1435_v19, %v745_v43  ;;  %v746_v54 = vmul.f32 %v1433_v18, %v726_v44  ;;  %v730_v62 = vld [vmem:[#allocation2 + $0x38] sm:$0xff]  ;;  %v731_v3 = vld [vmem:[#allocation2 + $0x60] sm:$0xff]  ;;  %v732_v4 = vld [vmem:[#allocation2 + $0x70] sm:$0xff] }
 0x115   : > { %v808_v57 = vmax.f32 %v792_v45, 0.0  ;;  %v809_v58 = vmax.f32 %v793_v46, 0.0  ;;  %v795_v59 = vadd.f32 %v779_v41, %v763_v47  ;;  %v796_v60 = vadd.f32 %v780_v42, %v764_v48  ;;  %v783_v7 = vld [vmem:[%s1584_s4 + $0x40] sm:$0xff]  ;;  %v733_v10 = vld [vmem:[#allocation2 + $0x78] sm:$0xff]  ;;  %v784_v14 = vld [vmem:[%s1584_s4 + $0x48] sm:$0xff] }
 0x116   : > { %823 = vst [vmem:[%s1585_s5] sm:$0xff] %v807_v51  ;;  %v810_v63 = vmax.f32 %v794_v52, 0.0  ;;  %v797_v0 = vadd.f32 %v781_v49, %v765_v53  ;;  %v766_v1 = vadd.f32 %v1435_v19, %v746_v54  ;;  %v747_v2 = vmul.f32 %v1433_v18, %v727_v50  ;;  %v785_v15 = vld [vmem:[%s1584_s4 + $0x50] sm:$0xff]  ;;  %v786_v21 = vld [vmem:[%s1584_s4 + $0x58] sm:$0xff]  ;;  %v734_v24 = vld [vmem:[#allocation2 + $0x28] sm:$0xff] }
 0x117   : > { %824 = vst [vmem:[%s1585_s5 + $0x8] sm:$0xff] %v808_v57  ;;  %v811_v5 = vmax.f32 %v795_v59, 0.0  ;;  %v812_v6 = vmax.f32 %v796_v60, 0.0  ;;  %v748_v8 = vmul.f32 %v1433_v18, %v728_v55  ;;  %v749_v9 = vmul.f32 %v1433_v18, %v729_v56  ;;  %v787_v28 = vld [vmem:[%s1584_s4 + $0x60] sm:$0xff]  ;;  %v788_v29 = vld [vmem:[%s1584_s4 + $0x68] sm:$0xff]  ;;  %v789_v35 = vld [vmem:[%s1584_s4 + $0x70] sm:$0xff] }
 0x118   : > { %825 = vst [vmem:[%s1585_s5 + $0x10] sm:$0xff] %v809_v58  ;;  %v813_v11 = vmax.f32 %v797_v0, 0.0  ;;  %v798_v12 = vadd.f32 %v782_v61, %v766_v1  ;;  %v767_v13 = vadd.f32 %v1435_v19, %v747_v2  ;;  %v750_v16 = vmul.f32 %v1433_v18, %v730_v62  ;;  %v790_v44 = vld [vmem:[%s1584_s4 + $0x78] sm:$0xff] }
 0x119   : > { %826 = vst [vmem:[%s1585_s5 + $0x18] sm:$0xff] %v810_v63  ;;  %v768_v17 = vadd.f32 %v1435_v19, %v748_v8  ;;  %v769_v20 = vadd.f32 %v1435_v19, %v749_v9  ;;  %v751_v22 = vmul.f32 %v1433_v18, %v731_v3  ;;  %v752_v23 = vmul.f32 %v1433_v18, %v732_v4 }
 0x11a   : > { %827 = vst [vmem:[%s1585_s5 + $0x20] sm:$0xff] %v811_v5  ;;  %v814_v25 = vmax.f32 %v798_v12, 0.0  ;;  %v799_v26 = vadd.f32 %v783_v7, %v767_v13  ;;  %v770_v27 = vadd.f32 %v1435_v19, %v750_v16  ;;  %v753_v30 = vmul.f32 %v1433_v18, %v733_v10 }
 0x11b   : > { %828 = vst [vmem:[%s1585_s5 + $0x28] sm:$0xff] %v812_v6  ;;  %v800_v31 = vadd.f32 %v784_v14, %v768_v17  ;;  %v801_v32 = vadd.f32 %v785_v15, %v769_v20  ;;  %v771_v33 = vadd.f32 %v1435_v19, %v751_v22  ;;  %v772_v34 = vadd.f32 %v1435_v19, %v752_v23 }
 0x11c   : > { %829 = vst [vmem:[%s1585_s5 + $0x30] sm:$0xff] %v813_v11  ;;  %v815_v36 = vmax.f32 %v799_v26, 0.0  ;;  %v802_v37 = vadd.f32 %v786_v21, %v770_v27  ;;  %v773_v38 = vadd.f32 %v1435_v19, %v753_v30  ;;  %v754_v39 = vmul.f32 %v1433_v18, %v734_v24 }
 0x11d   : > { %830 = vst [vmem:[%s1585_s5 + $0x38] sm:$0xff] %v814_v25  ;;  %v816_v40 = vmax.f32 %v800_v31, 0.0  ;;  %v817_v41 = vmax.f32 %v801_v32, 0.0  ;;  %v803_v42 = vadd.f32 %v787_v28, %v771_v33  ;;  %v804_v43 = vadd.f32 %v788_v29, %v772_v34 }
 0x11e   : > { %831 = vst [vmem:[%s1585_s5 + $0x40] sm:$0xff] %v815_v36  ;;  %v818_v45 = vmax.f32 %v802_v37, 0.0  ;;  %v805_v46 = vadd.f32 %v789_v35, %v773_v38  ;;  %v774_v18 = vadd.f32 %v1435_v19, %v754_v39 }
 0x11f   : > { %832 = vst [vmem:[%s1585_s5 + $0x48] sm:$0xff] %v816_v40  ;;  %v819_v47 = vmax.f32 %v803_v42, 0.0  ;;  %v820_v48 = vmax.f32 %v804_v43, 0.0 }
 0x120   : > { %833 = vst [vmem:[%s1585_s5 + $0x50] sm:$0xff] %v817_v41  ;;  %v821_v49 = vmax.f32 %v805_v46, 0.0  ;;  %v806_v50 = vadd.f32 %v790_v44, %v774_v18 }
 0x121   : > { %834 = vst [vmem:[%s1585_s5 + $0x58] sm:$0xff] %v818_v45 }
 0x122   : > { %835 = vst [vmem:[%s1585_s5 + $0x60] sm:$0xff] %v819_v47  ;;  %v822_v19 = vmax.f32 %v806_v50, 0.0 }
 0x123   : > { %836 = vst [vmem:[%s1585_s5 + $0x68] sm:$0xff] %v820_v48 }
 0x124   : > { %837 = vst [vmem:[%s1585_s5 + $0x70] sm:$0xff] %v821_v49 }
 0x125   : > { %838 = vst [vmem:[%s1585_s5 + $0x78] sm:$0xff] %v822_v19 }
 0x126 PF: > { %s17_s22 = sadd.s32 1, %s1273_s22   ;;  %s1589_s18 = smov %s1261_s19 }
 0x127   : > { %p14_p1 = scmp.ge.s32.totalorder %s17_s22, 7   ;;  %s1590_s19 = smov %s1358_s30 }
 0x128   : > { %s1591_s20 = smov %s1269_s21  ;;  %s1592_s21 = smov %s1594_s24 }
 0x129   :  { %16 = sbr.rel (!%p14_p1) target bundleno = 4 (0x4), region = 141 }
 0x12e   :  { %867 = vsyncpa [#allocation5], 1 }
 0x12f   :  { %869 = vsyncpa [#allocation5 + $0x1], 1 }
 0x130   :  { %870 = vsyncpa [#allocation7], 1 }

// kernel: _lambda_.29
= control target key start
LH: loop header
LB: loop body
LE: loop exit
PB: predicated region body
PF: predicated region fallthrough
CT: control target
= control target key end

     0   :  { %9 = vsyncpa [#allocation5], 0  ;;  %s1033_s0 = inlined_call_operand.vmem [shape: bf16[32,640], index: 0, kind: input, shape index: {}]   ;;  %s1034_s1 = inlined_call_operand.vmem [shape: bf16[640,128], index: 1, kind: input, shape index: {}]   ;;  %s1035_s2 = inlined_call_operand.hbm [shape: f32[1,128], index: 2, kind: input, shape index: {}]   ;;  %s1036_s3 = inlined_call_operand.hbm [shape: f32[1,128], index: 3, kind: input, shape index: {}]   ;;  %s1037_s4 = inlined_call_operand.vmem [shape: f32[32,128], index: 4, kind: output, shape index: {}]  }
   0x1   :  { %10 = vsyncpa [#allocation7], 0  ;;  %s912_s15 = smov 0   ;;  %s914_s16 = smov 0  }
   0x2   :  { %s916_s17 = smov 0   ;;  %s918_s18 = smov 0  }
   0x3   :  { %s920_s19 = smov 0  }
   0x4 LB: > { %s635_s20 = sadd.s32 4294967295, %s882_s19   ;;  %s28_s21 = sadd.s32 1, %s878_s18  ;;  %s882_s19 = sphi %s920_s19, %s16_s19   ;;  %s878_s18 = sphi %s918_s18, %s1044_s18   ;;  %s874_s17 = sphi %s916_s17, %s1043_s17   ;;  %s870_s16 = sphi %s914_s16, %s1042_s16   ;;  %s866_s15 = sphi %s912_s15, %s1041_s15  }
   0x5   : > { %p29_p0 = scmp.ge.s32.totalorder %s28_s21, 5  ;;  %s44_s22 = sadd.s32 1, %s870_s16 }
   0x6   : > { %p51_p1 = scmp.ne.s32.totalorder %s870_s16, %s866_s15  ;;  %p52_p2 = scmp.eq.s32.totalorder %s882_s19, 0 }
   0x7   : > { %s1046_s21 = smov (%p29_p0, %s28_s21), 0  ;;  %p636_p4 = scmp.ge.s32.totalorder %s882_s19, 1 }
   0x8   : > { %p945_p3 = por %p52_p2, %p51_p1  ;;  %s40_s24 = ssub.s32 %s878_s18, %s1046_s21 }
   0x9   : > { %p176_p5 = scmp.lt.s32.totalorder %s882_s19, 6  ;;  %p42_p6 = scmp.eq.s32.totalorder %s40_s24, 0 }
   0xa   : > { %p957_p8 = scmp.eq.s32.totalorder %s635_s20, 0  ;;  %s189_s30 = sshll.u32 %s1035_s2, 4  ;;  %s190_s30 = int_to_ptr.hbm [resolvable:$true] %s189_s30 }
   0xb   : > { %p953_p7 = pnand %p636_p4, %p176_p5  ;;  %s884_s5 = smov [#allocation4]  }
   0xc   : > { %s962_s27 = scalar_select %p42_p6, %s870_s16, %s44_s22  }
   0xd   : > { %p720_p9 = pneg %p953_p7  ;;  %s191_s6 = sshll.u32 %s884_s5, 4  ;;  %s192_s6 = int_to_ptr.vmem [resolvable:$true] %s191_s6 }
   0xe   : > { %s202_s9 = sshll.u32 %s1036_s3, 4  ;;  %s885_s10 = smov [#allocation6]   ;;  %s203_s9 = int_to_ptr.hbm [resolvable:$true] %s202_s9 }
   0xf   : > { %p721_p10 = pnand %p957_p8, %p720_p9  ;;  %s204_s11 = sshll.u32 %s885_s10, 4  ;;  %s205_s11 = int_to_ptr.vmem [resolvable:$true] %s204_s11 }
  0x10   : > { %p639_p11 = scmp.ge.s32.totalorder %s882_s19, 5 }
  0x11   : > { %723 = dma.hbm_to_vmem [thread:$0]  (!%p721_p10), %s190_s30, 16, %s192_s6, [#allocation5]  }
  0x12   : > { %726 = dma.hbm_to_vmem [thread:$0]  (!%p721_p10), %s203_s9, 16, %s205_s11, [#allocation7]  }
  0x13   : > { %211 = sbr.rel (%p639_p11) target bundleno = 32 (0x20), region = 24 }
  0x18   : > { %214 = sbr.rel (!%p945_p3) target bundleno = 32 (0x20), region = 28  ;;  %s216_s12 = sand.u32 (%p945_p3), 1, %s870_s16  }
  0x19   : > { %s641_s13 = sshll.u32 (%p945_p3), %s878_s18, 2  ;;  %s640_s14 = sshll.u32 (%p945_p3), %s216_s12, 4 }
  0x1a   : > { %s223_s24 = scalar_lea.vmem (%p945_p3), %s1033_s0, %s641_s13  ;;  %s218_s28 = scalar_lea.vmem (%p945_p3), [#allocation3], %s640_s14 }
  0x1b   : > { %v240_v0 = vld [vmem:[%s223_s24] sm:$0xf] (%p945_p3)  ;;  %v242_v1 = vld [vmem:[%s223_s24 + $0x14] sm:$0xf] (%p945_p3)  ;;  %v244_v2 = vld [vmem:[%s223_s24 + $0x28] sm:$0xf] (%p945_p3) }
  0x1c   : > { %241 = vst [vmem:[%s218_s28] sm:$0xf] (%p945_p3), %v240_v0  ;;  %v246_v3 = vld [vmem:[%s223_s24 + $0x3c] sm:$0xf] (%p945_p3) }
  0x1d   : > { %243 = vst [vmem:[%s218_s28 + $0x4] sm:$0xf] %v242_v1 }
  0x1e   : > { %245 = vst [vmem:[%s218_s28 + $0x8] sm:$0xf] %v244_v2 }
  0x1f   : > { %247 = vst [vmem:[%s218_s28 + $0xc] sm:$0xf] %v246_v3 }
  0x20 PF: > { %294 = sbr.rel (%p953_p7) target bundleno = 236 (0xec), region = 73  ;;  %s297_s23 = sand.u32 (!%p953_p7), 1, %s866_s15  }
  0x21   : > { %s985_s29 = sshll.u32 (!%p953_p7), %s297_s23, 4 }
  0x22   : > { %s299_s30 = scalar_lea.vmem (!%p953_p7), [#allocation3], %s985_s29 }
  0x25   : > { %857 = dma.done.wait (%p957_p8), [#allocation5], 16  }
  0x26   : > { %859 = vsyncadd (%p957_p8), [#allocation5], 4294967280 }
  0x27   : > { %861 = dma.done.wait (%p957_p8), [#allocation7], 16  }
  0x28   : > { %863 = vsyncadd (%p957_p8), [#allocation7], 4294967280  ;;  %s646_s25 = sshll.u32 %s874_s17, 4  ;;  %p648_p13 = scmp.ne.s32.totalorder %s874_s17, 0 }
  0x29   : > { %p345_p12 = scmp.lt.s32.totalorder %s646_s25, 79 }
  0x2a   : > { %365 = sbr.rel (%p648_p13) target bundleno = 52 (0x34), region = 89 }
  0x2b   : > { %s1048_s25 = smov (!%p345_p12, %s646_s25), 79 }
  0x2c   : > { %s647_s15 = sshll.u32 %s1048_s25, 2 }
  0x2d   : > { %s351_s7 = scalar_lea.vmem %s1034_s1, %s647_s15 }
  0x2f   : > { %v886_v4 = vmov 0.0  }
  0x30   : > { %366 = vst [vmem:[#allocation2 + $0x10] sm:$0xff] %v886_v4 }
  0x31   : > { %367 = vst [vmem:[#allocation2] sm:$0xff] %v886_v4 }
  0x32   : > { %368 = vst [vmem:[#allocation2 + $0x18] sm:$0xff] %v886_v4 }
  0x33   : > { %369 = vst [vmem:[#allocation2 + $0x8] sm:$0xff] %v886_v4 }
  0x34 PF: > { %v703_v5 = vld [vmem:[%s351_s7 + $0x38] sm:$0xff]  ;;  %v702_v6 = vld [vmem:[%s351_s7 + $0x30] sm:$0xff]  ;;  %v701_v7 = vld [vmem:[%s351_s7 + $0x28] sm:$0xff]  ;;  %p689_p0 = scmp.ne.s32.totalorder %s874_s17, 4 }
  0x35   : > { %454 = vmatpush.bf16.msra.mxu0 %v703_v5  ;;  %704 = vmatpush.bf16.msra.mxu1 %v703_v5  ;;  %v700_v8 = vld [vmem:[%s351_s7 + $0x20] sm:$0xff]  ;;  %v699_v9 = vld [vmem:[%s351_s7 + $0x18] sm:$0xff]  ;;  %v698_v10 = vld [vmem:[%s351_s7 + $0x10] sm:$0xff] }
  0x36   : > { %v697_v11 = vld [vmem:[%s351_s7 + $0x8] sm:$0xff]  ;;  %v696_v12 = vld [vmem:[%s351_s7] sm:$0xff] }
  0x37   : > { %v694_v13 = vld [vmem:[%s299_s30] sm:$0xff]  ;;  %v695_v14 = vld [vmem:[%s299_s30 + $0x8] sm:$0xff] }
  0x38   : > { %v370_v15 = vld [vmem:[#allocation2 + $0x10] sm:$0xff]  ;;  %v371_v21 = vld [vmem:[#allocation2] sm:$0xff] }
  0x39   : > { %455 = vmatpush.bf16.msra.mxu0 %v702_v6  ;;  %705 = vmatpush.bf16.msra.mxu1 %v702_v6  ;;  %v372_v16 = vld [vmem:[#allocation2 + $0x18] sm:$0xff] }
  0x3a   : > { %v373_v22 = vld [vmem:[#allocation2 + $0x8] sm:$0xff] }
  0x3d   : > { %456 = vmatpush.bf16.msra.mxu0 %v701_v7  ;;  %706 = vmatpush.bf16.msra.mxu1 %v701_v7 }
  0x41   : > { %457 = vmatpush.bf16.msra.mxu0 %v700_v8  ;;  %707 = vmatpush.bf16.msra.mxu1 %v700_v8 }
  0x45   : > { %458 = vmatpush.bf16.msra.mxu0 %v699_v9  ;;  %708 = vmatpush.bf16.msra.mxu1 %v699_v9 }
  0x49   : > { %459 = vmatpush.bf16.msra.mxu0 %v698_v10  ;;  %709 = vmatpush.bf16.msra.mxu1 %v698_v10 }
  0x4d   : > { %460 = vmatpush.bf16.msra.mxu0 %v697_v11  ;;  %710 = vmatpush.bf16.msra.mxu1 %v697_v11 }
  0x51   : > { %461 = vmatpush.bf16.msra.mxu0 %v696_v12  ;;  %711 = vmatpush.bf16.msra.mxu1 %v696_v12 }
  0x54   : > { %462 = vmatmul.bf16.vlgmr.msra.gmra.mxu0 %v694_v13  ;;  %467 = vmatmul.bf16.vlgmr.msra.gmra.mxu1 %v695_v14 }
  0xd1   : > { %v463_v17 = vpop.f32.mrf.mxu0  ;;  %v468_v18 = vpop.f32.mrf.mxu1 }
  0xd2   : > { %v473_v19 = vadd.f32 %v463_v17, %v370_v15  ;;  %v475_v20 = vadd.f32 %v468_v18, %v372_v16 }
  0xd4   : > { %477 = vst [vmem:[#allocation2 + $0x10] sm:$0xff] %v473_v19 }
  0xd5   : > { %479 = vst [vmem:[#allocation2 + $0x18] sm:$0xff] %v475_v20 }
  0xd9   : > { %v465_v23 = vpop.f32.mrf.mxu0  ;;  %v470_v24 = vpop.f32.mrf.mxu1  ;;  %484 = sbr.rel (%p689_p0) target bundleno = 236 (0xec), region = 93 }
  0xda   : > { %v474_v25 = vadd.f32 %v465_v23, %v371_v21  ;;  %v476_v26 = vadd.f32 %v470_v24, %v373_v22 }
  0xdc   : > { %478 = vst [vmem:[#allocation2] sm:$0xff] %v474_v25 }
  0xdd   : > { %480 = vst [vmem:[#allocation2 + $0x8] sm:$0xff] %v476_v26 }
  0xde   : > { %v485_v27 = vld [vmem:[#allocation2 + $0x10] sm:$0xff]  ;;  %v774_v28 = vld [vmem:[#allocation4] ss:$0 sm:$0xff]  ;;  %v775_v29 = vld [vmem:[#allocation6] ss:$0 sm:$0xff] }
  0xdf   : > { %v493_v31 = vmul.f32 %v774_v28, %v485_v27  ;;  %v487_v33 = vld [vmem:[#allocation2 + $0x18] sm:$0xff] }
  0xe0   : > { %v495_v35 = vmul.f32 %v774_v28, %v487_v33 }
  0xe1   : > { %v501_v37 = vadd.f32 %v775_v29, %v493_v31 }
  0xe2   : > { %v503_v39 = vadd.f32 %v775_v29, %v495_v35 }
  0xe3   : > { %v486_v30 = vld [vmem:[#allocation2] sm:$0xff]  ;;  %v505_v41 = vmax.f32 %v501_v37, 0.0 }
  0xe4   : > { %v494_v32 = vmul.f32 %v774_v28, %v486_v30  ;;  %v488_v34 = vld [vmem:[#allocation2 + $0x8] sm:$0xff]  ;;  %v507_v43 = vmax.f32 %v503_v39, 0.0 }
  0xe5   : > { %v496_v36 = vmul.f32 %v774_v28, %v488_v34  ;;  %509 = vst [vmem:[%s1037_s4] sm:$0xff] %v505_v41 }
  0xe6   : > { %v502_v38 = vadd.f32 %v775_v29, %v494_v32  ;;  %511 = vst [vmem:[%s1037_s4 + $0x10] sm:$0xff] %v507_v43 }
  0xe7   : > { %v504_v40 = vadd.f32 %v775_v29, %v496_v36 }
  0xe8   : > { %v506_v42 = vmax.f32 %v502_v38, 0.0 }
  0xe9   : > { %v508_v44 = vmax.f32 %v504_v40, 0.0 }
  0xea   : > { %510 = vst [vmem:[%s1037_s4 + $0x8] sm:$0xff] %v506_v42 }
  0xeb   : > { %512 = vst [vmem:[%s1037_s4 + $0x18] sm:$0xff] %v508_v44 }
  0xec PF: > { %s16_s19 = sadd.s32 1, %s882_s19   ;;  %s1041_s15 = smov %s870_s16 }
  0xed   : > { %p13_p1 = scmp.ge.s32.totalorder %s16_s19, 7   ;;  %s1042_s16 = smov %s962_s27 }
  0xee   : > { %s1043_s17 = smov %s878_s18  ;;  %s1044_s18 = smov %s1046_s21 }
  0xef   :  { %15 = sbr.rel (!%p13_p1) target bundleno = 4 (0x4), region = 134 }
  0xf4   :  { %541 = vsyncpa [#allocation5], 1 }
  0xf5   :  { %543 = vsyncpa [#allocation5 + $0x1], 1 }
  0xf6   :  { %544 = vsyncpa [#allocation7], 1 }

// kernel: _lambda_.31
= control target key start
LH: loop header
LB: loop body
LE: loop exit
PB: predicated region body
PF: predicated region fallthrough
CT: control target
= control target key end

     0   :  { %10 = vsyncpa [#allocation5], 0  ;;  %s1137_s0 = inlined_call_operand.vmem [shape: bf16[32,1152], index: 0, kind: input, shape index: {}]   ;;  %s1138_s1 = inlined_call_operand.vmem [shape: bf16[1152,128], index: 1, kind: input, shape index: {}]   ;;  %s1139_s2 = inlined_call_operand.hbm [shape: f32[1,128], index: 2, kind: input, shape index: {}]   ;;  %s1140_s3 = inlined_call_operand.hbm [shape: f32[1,128], index: 3, kind: input, shape index: {}]   ;;  %s1141_s4 = inlined_call_operand.vmem [shape: f32[32,128], index: 4, kind: input, shape index: {}]   ;;  %s1142_s5 = inlined_call_operand.vmem [shape: f32[32,128], index: 5, kind: output, shape index: {}]  }
   0x1   :  { %11 = vsyncpa [#allocation7], 0  ;;  %s1004_s18 = smov 0   ;;  %s1006_s19 = smov 0  }
   0x2   :  { %s1008_s20 = smov 0   ;;  %s1010_s21 = smov 0  }
   0x3   :  { %s1012_s22 = smov 0  }
   0x4 LB: > { %s721_s23 = sadd.s32 4294967295, %s969_s22   ;;  %s29_s24 = sadd.s32 1, %s965_s21  ;;  %s969_s22 = sphi %s1012_s22, %s17_s22   ;;  %s965_s21 = sphi %s1010_s21, %s1149_s21   ;;  %s961_s20 = sphi %s1008_s20, %s1148_s20   ;;  %s957_s19 = sphi %s1006_s19, %s1147_s19   ;;  %s953_s18 = sphi %s1004_s18, %s1146_s18  }
   0x5   : > { %p30_p0 = scmp.ge.s32.totalorder %s29_s24, 9  ;;  %s45_s25 = sadd.s32 1, %s957_s19 }
   0x6   : > { %p52_p1 = scmp.ne.s32.totalorder %s957_s19, %s953_s18  ;;  %p53_p2 = scmp.eq.s32.totalorder %s969_s22, 0 }
   0x7   : > { %s1151_s24 = smov (%p30_p0, %s29_s24), 0  ;;  %p722_p4 = scmp.ge.s32.totalorder %s969_s22, 1 }
   0x8   : > { %p1037_p3 = por %p53_p2, %p52_p1  ;;  %s41_s27 = ssub.s32 %s965_s21, %s1151_s24 }
   0x9   : > { %p205_p5 = scmp.lt.s32.totalorder %s969_s22, 10  ;;  %p43_p6 = scmp.eq.s32.totalorder %s41_s27, 0 }
   0xa   : > { %p1049_p8 = scmp.eq.s32.totalorder %s721_s23, 0  ;;  %s218_s8 = sshll.u32 %s1139_s2, 4  ;;  %s219_s8 = int_to_ptr.hbm [resolvable:$true] %s218_s8 }
   0xb   : > { %p1045_p7 = pnand %p722_p4, %p205_p5  ;;  %s971_s9 = smov [#allocation4]  }
   0xc   : > { %s1054_s30 = scalar_select %p43_p6, %s957_s19, %s45_s25  }
   0xd   : > { %p807_p9 = pneg %p1045_p7  ;;  %s220_s10 = sshll.u32 %s971_s9, 4  ;;  %s221_s10 = int_to_ptr.vmem [resolvable:$true] %s220_s10 }
   0xe   : > { %s231_s13 = sshll.u32 %s1140_s3, 4  ;;  %s972_s14 = smov [#allocation6]   ;;  %s232_s13 = int_to_ptr.hbm [resolvable:$true] %s231_s13 }
   0xf   : > { %p808_p10 = pnand %p1049_p8, %p807_p9  ;;  %s233_s15 = sshll.u32 %s972_s14, 4  ;;  %s234_s15 = int_to_ptr.vmem [resolvable:$true] %s233_s15 }
  0x10   : > { %p726_p11 = scmp.ge.s32.totalorder %s969_s22, 9 }
  0x11   : > { %810 = dma.hbm_to_vmem [thread:$0]  (!%p808_p10), %s219_s8, 16, %s221_s10, [#allocation5]  }
  0x12   : > { %813 = dma.hbm_to_vmem [thread:$0]  (!%p808_p10), %s232_s13, 16, %s234_s15, [#allocation7]  }
  0x13   : > { %252 = sbr.rel (%p726_p11) target bundleno = 32 (0x20), region = 28 }
  0x18   : > { %255 = sbr.rel (!%p1037_p3) target bundleno = 32 (0x20), region = 32  ;;  %s257_s16 = sand.u32 (%p1037_p3), 1, %s957_s19  }
  0x19   : > { %s728_s17 = sshll.u32 (%p1037_p3), %s965_s21, 2  ;;  %s727_s23 = sshll.u32 (%p1037_p3), %s257_s16, 4 }
  0x1a   : > { %s264_s6 = scalar_lea.vmem (%p1037_p3), %s1137_s0, %s728_s17  ;;  %s259_s7 = scalar_lea.vmem (%p1037_p3), [#allocation3], %s727_s23 }
  0x1b   : > { %v281_v0 = vld [vmem:[%s264_s6] sm:$0xf] (%p1037_p3)  ;;  %v283_v1 = vld [vmem:[%s264_s6 + $0x24] sm:$0xf] (%p1037_p3)  ;;  %v285_v2 = vld [vmem:[%s264_s6 + $0x48] sm:$0xf] (%p1037_p3) }
  0x1c   : > { %282 = vst [vmem:[%s259_s7] sm:$0xf] (%p1037_p3), %v281_v0  ;;  %v287_v3 = vld [vmem:[%s264_s6 + $0x6c] sm:$0xf] (%p1037_p3) }
  0x1d   : > { %284 = vst [vmem:[%s259_s7 + $0x4] sm:$0xf] %v283_v1 }
  0x1e   : > { %286 = vst [vmem:[%s259_s7 + $0x8] sm:$0xf] %v285_v2 }
  0x1f   : > { %288 = vst [vmem:[%s259_s7 + $0xc] sm:$0xf] %v287_v3 }
  0x20 PF: > { %335 = sbr.rel (%p1045_p7) target bundleno = 238 (0xee), region = 77  ;;  %s338_s26 = sand.u32 (!%p1045_p7), 1, %s953_s18  }
  0x21   : > { %s1077_s8 = sshll.u32 (!%p1045_p7), %s338_s26, 4 }
  0x22   : > { %s340_s9 = scalar_lea.vmem (!%p1045_p7), [#allocation3], %s1077_s8 }
  0x25   : > { %944 = dma.done.wait (%p1049_p8), [#allocation5], 16  }
  0x26   : > { %946 = vsyncadd (%p1049_p8), [#allocation5], 4294967280 }
  0x27   : > { %948 = dma.done.wait (%p1049_p8), [#allocation7], 16  }
  0x28   : > { %950 = vsyncadd (%p1049_p8), [#allocation7], 4294967280  ;;  %s733_s28 = sshll.u32 %s961_s20, 4  ;;  %p735_p13 = scmp.ne.s32.totalorder %s961_s20, 0 }
  0x29   : > { %p396_p12 = scmp.lt.s32.totalorder %s733_s28, 143 }
  0x2a   : > { %425 = sbr.rel (%p735_p13) target bundleno = 52 (0x34), region = 93 }
  0x2b   : > { %s1153_s28 = smov (!%p396_p12, %s733_s28), 143 }
  0x2c   : > { %s734_s18 = sshll.u32 %s1153_s28, 2 }
  0x2d   : > { %s402_s12 = scalar_lea.vmem %s1138_s1, %s734_s18 }
  0x2f   : > { %v973_v4 = vmov 0.0  }
  0x30   : > { %426 = vst [vmem:[#allocation2 + $0x10] sm:$0xff] %v973_v4 }
  0x31   : > { %427 = vst [vmem:[#allocation2] sm:$0xff] %v973_v4 }
  0x32   : > { %428 = vst [vmem:[#allocation2 + $0x18] sm:$0xff] %v973_v4 }
  0x33   : > { %429 = vst [vmem:[#allocation2 + $0x8] sm:$0xff] %v973_v4 }
  0x34 PF: > { %v790_v5 = vld [vmem:[%s402_s12 + $0x38] sm:$0xff]  ;;  %v789_v6 = vld [vmem:[%s402_s12 + $0x30] sm:$0xff]  ;;  %v788_v7 = vld [vmem:[%s402_s12 + $0x28] sm:$0xff]  ;;  %p776_p0 = scmp.ne.s32.totalorder %s961_s20, 8 }
  0x35   : > { %514 = vmatpush.bf16.msra.mxu0 %v790_v5  ;;  %791 = vmatpush.bf16.msra.mxu1 %v790_v5  ;;  %v787_v8 = vld [vmem:[%s402_s12 + $0x20] sm:$0xff]  ;;  %v786_v9 = vld [vmem:[%s402_s12 + $0x18] sm:$0xff]  ;;  %v785_v10 = vld [vmem:[%s402_s12 + $0x10] sm:$0xff] }
  0x36   : > { %v784_v11 = vld [vmem:[%s402_s12 + $0x8] sm:$0xff]  ;;  %v783_v12 = vld [vmem:[%s402_s12] sm:$0xff] }
  0x37   : > { %v781_v13 = vld [vmem:[%s340_s9] sm:$0xff]  ;;  %v782_v14 = vld [vmem:[%s340_s9 + $0x8] sm:$0xff] }
  0x38   : > { %v430_v15 = vld [vmem:[#allocation2 + $0x10] sm:$0xff]  ;;  %v431_v21 = vld [vmem:[#allocation2] sm:$0xff] }
  0x39   : > { %515 = vmatpush.bf16.msra.mxu0 %v789_v6  ;;  %792 = vmatpush.bf16.msra.mxu1 %v789_v6  ;;  %v432_v16 = vld [vmem:[#allocation2 + $0x18] sm:$0xff] }
  0x3a   : > { %v433_v22 = vld [vmem:[#allocation2 + $0x8] sm:$0xff] }
  0x3d   : > { %516 = vmatpush.bf16.msra.mxu0 %v788_v7  ;;  %793 = vmatpush.bf16.msra.mxu1 %v788_v7 }
  0x41   : > { %517 = vmatpush.bf16.msra.mxu0 %v787_v8  ;;  %794 = vmatpush.bf16.msra.mxu1 %v787_v8 }
  0x45   : > { %518 = vmatpush.bf16.msra.mxu0 %v786_v9  ;;  %795 = vmatpush.bf16.msra.mxu1 %v786_v9 }
  0x49   : > { %519 = vmatpush.bf16.msra.mxu0 %v785_v10  ;;  %796 = vmatpush.bf16.msra.mxu1 %v785_v10 }
  0x4d   : > { %520 = vmatpush.bf16.msra.mxu0 %v784_v11  ;;  %797 = vmatpush.bf16.msra.mxu1 %v784_v11 }
  0x51   : > { %521 = vmatpush.bf16.msra.mxu0 %v783_v12  ;;  %798 = vmatpush.bf16.msra.mxu1 %v783_v12 }
  0x54   : > { %522 = vmatmul.bf16.vlgmr.msra.gmra.mxu0 %v781_v13  ;;  %527 = vmatmul.bf16.vlgmr.msra.gmra.mxu1 %v782_v14 }
  0xd1   : > { %v523_v17 = vpop.f32.mrf.mxu0  ;;  %v528_v18 = vpop.f32.mrf.mxu1 }
  0xd2   : > { %v533_v19 = vadd.f32 %v523_v17, %v430_v15  ;;  %v535_v20 = vadd.f32 %v528_v18, %v432_v16 }
  0xd4   : > { %537 = vst [vmem:[#allocation2 + $0x10] sm:$0xff] %v533_v19 }
  0xd5   : > { %539 = vst [vmem:[#allocation2 + $0x18] sm:$0xff] %v535_v20 }
  0xd9   : > { %v525_v23 = vpop.f32.mrf.mxu0  ;;  %v530_v24 = vpop.f32.mrf.mxu1  ;;  %544 = sbr.rel (%p776_p0) target bundleno = 238 (0xee), region = 97 }
  0xda   : > { %v534_v25 = vadd.f32 %v525_v23, %v431_v21  ;;  %v536_v26 = vadd.f32 %v530_v24, %v433_v22 }
  0xdc   : > { %538 = vst [vmem:[#allocation2] sm:$0xff] %v534_v25 }
  0xdd   : > { %540 = vst [vmem:[#allocation2 + $0x8] sm:$0xff] %v536_v26 }
  0xde   : > { %v545_v27 = vld [vmem:[#allocation2 + $0x10] sm:$0xff]  ;;  %v861_v28 = vld [vmem:[#allocation4] ss:$0 sm:$0xff]  ;;  %v862_v29 = vld [vmem:[#allocation6] ss:$0 sm:$0xff] }
  0xdf   : > { %v553_v30 = vmul.f32 %v861_v28, %v545_v27  ;;  %v547_v32 = vld [vmem:[#allocation2 + $0x18] sm:$0xff]  ;;  %v565_v33 = vld [vmem:[%s1141_s4] sm:$0xff]  ;;  %v566_v38 = vld [vmem:[%s1141_s4 + $0x8] sm:$0xff] }
  0xe0   : > { %v555_v35 = vmul.f32 %v861_v28, %v547_v32  ;;  %v567_v39 = vld [vmem:[%s1141_s4 + $0x10] sm:$0xff]  ;;  %v568_v43 = vld [vmem:[%s1141_s4 + $0x18] sm:$0xff] }
  0xe1   : > { %v561_v37 = vadd.f32 %v862_v29, %v553_v30 }
  0xe2   : > { %v563_v42 = vadd.f32 %v862_v29, %v555_v35 }
  0xe3   : > { %v546_v31 = vld [vmem:[#allocation2] sm:$0xff]  ;;  %v569_v44 = vadd.f32 %v565_v33, %v561_v37 }
  0xe4   : > { %v554_v34 = vmul.f32 %v861_v28, %v546_v31  ;;  %v548_v36 = vld [vmem:[#allocation2 + $0x8] sm:$0xff]  ;;  %v571_v47 = vadd.f32 %v567_v39, %v563_v42 }
  0xe5   : > { %v556_v40 = vmul.f32 %v861_v28, %v548_v36  ;;  %v573_v48 = vmax.f32 %v569_v44, 0.0 }
  0xe6   : > { %v562_v41 = vadd.f32 %v862_v29, %v554_v34  ;;  %v575_v51 = vmax.f32 %v571_v47, 0.0 }
  0xe7   : > { %v564_v45 = vadd.f32 %v862_v29, %v556_v40  ;;  %577 = vst [vmem:[%s1142_s5] sm:$0xff] %v573_v48 }
  0xe8   : > { %v570_v46 = vadd.f32 %v566_v38, %v562_v41  ;;  %579 = vst [vmem:[%s1142_s5 + $0x10] sm:$0xff] %v575_v51 }
  0xe9   : > { %v572_v49 = vadd.f32 %v568_v43, %v564_v45 }
  0xea   : > { %v574_v50 = vmax.f32 %v570_v46, 0.0 }
  0xeb   : > { %v576_v52 = vmax.f32 %v572_v49, 0.0 }
  0xec   : > { %578 = vst [vmem:[%s1142_s5 + $0x8] sm:$0xff] %v574_v50 }
  0xed   : > { %580 = vst [vmem:[%s1142_s5 + $0x18] sm:$0xff] %v576_v52 }
  0xee PF: > { %s17_s22 = sadd.s32 1, %s969_s22   ;;  %s1146_s18 = smov %s957_s19 }
  0xef   : > { %p14_p1 = scmp.ge.s32.totalorder %s17_s22, 11   ;;  %s1147_s19 = smov %s1054_s30 }
  0xf0   : > { %s1148_s20 = smov %s965_s21  ;;  %s1149_s21 = smov %s1151_s24 }
  0xf1   :  { %16 = sbr.rel (!%p14_p1) target bundleno = 4 (0x4), region = 141 }
  0xf6   :  { %609 = vsyncpa [#allocation5], 1 }
  0xf7   :  { %611 = vsyncpa [#allocation5 + $0x1], 1 }
  0xf8   :  { %612 = vsyncpa [#allocation7], 1 }

// kernel: _lambda_.30
= control target key start
LH: loop header
LB: loop body
LE: loop exit
PB: predicated region body
PF: predicated region fallthrough
CT: control target
= control target key end

     0   :  { %9 = vsyncpa [#allocation4], 0  ;;  %s386_s0 = inlined_call_operand.vmem [shape: bf16[32,128], index: 0, kind: input, shape index: {}]   ;;  %s387_s1 = inlined_call_operand.vmem [shape: bf16[128,128], index: 1, kind: input, shape index: {}]   ;;  %s388_s2 = inlined_call_operand.hbm [shape: f32[1,128], index: 2, kind: input, shape index: {}]   ;;  %s389_s3 = inlined_call_operand.hbm [shape: f32[1,128], index: 3, kind: input, shape index: {}]   ;;  %s390_s4 = inlined_call_operand.vmem [shape: f32[32,128], index: 4, kind: output, shape index: {}]  }
   0x1   :  { %s20_s17 = sshll.u32 %s388_s2, 4  ;;  %s21_s17 = int_to_ptr.hbm [resolvable:$true] %s20_s17 }
   0x2   :  { %10 = vsyncpa [#allocation6], 0  ;;  %s311_s18 = smov [#allocation3]   ;;  %s31_s22 = sshll.u32 %s389_s3, 4  ;;  %s32_s22 = int_to_ptr.hbm [resolvable:$true] %s31_s22 }
   0x3   :  { %s22_s19 = sshll.u32 %s311_s18, 4  ;;  %s312_s23 = smov [#allocation5]   ;;  %s23_s19 = int_to_ptr.vmem [resolvable:$true] %s22_s19 }
   0x4   :  { %25 = dma.hbm_to_vmem [thread:$0]  %s21_s17, 16, %s23_s19, [#allocation4]  }
   0x5   :  { %s33_s24 = sshll.u32 %s312_s23, 4  ;;  %s34_s24 = int_to_ptr.vmem [resolvable:$true] %s33_s24 }
   0x6   :  { %36 = dma.hbm_to_vmem [thread:$0]  %s32_s22, 16, %s34_s24, [#allocation6]  }
   0x7   :  { %307 = dma.done.wait [#allocation4], 16  }
   0x8   :  { %308 = vsyncadd [#allocation4], 4294967280 }
   0x9   :  { %309 = dma.done.wait [#allocation6], 16  }
   0xa   :  { %310 = vsyncadd [#allocation6], 4294967280  ;;  %v246_v0 = vld [vmem:[%s387_s1 + $0x38] sm:$0xff]  ;;  %v245_v1 = vld [vmem:[%s387_s1 + $0x30] sm:$0xff] }
   0xb   :  { %137 = vmatpush.bf16.msra.mxu0 %v246_v0  ;;  %247 = vmatpush.bf16.msra.mxu1 %v246_v0  ;;  %v244_v2 = vld [vmem:[%s387_s1 + $0x28] sm:$0xff]  ;;  %v243_v3 = vld [vmem:[%s387_s1 + $0x20] sm:$0xff]  ;;  %v242_v4 = vld [vmem:[%s387_s1 + $0x18] sm:$0xff] }
   0xc   :  { %v241_v5 = vld [vmem:[%s387_s1 + $0x10] sm:$0xff]  ;;  %v240_v6 = vld [vmem:[%s387_s1 + $0x8] sm:$0xff]  ;;  %v239_v7 = vld [vmem:[%s387_s1] sm:$0xff] }
   0xd   :  { %v237_v8 = vld [vmem:[%s386_s0] sm:$0xff]  ;;  %v238_v9 = vld [vmem:[%s386_s0 + $0x8] sm:$0xff] }
   0xe   :  { %v257_v10 = vld [vmem:[#allocation3] ss:$0 sm:$0xff]  ;;  %v258_v11 = vld [vmem:[#allocation5] ss:$0 sm:$0xff] }
   0xf   :  { %138 = vmatpush.bf16.msra.mxu0 %v245_v1  ;;  %248 = vmatpush.bf16.msra.mxu1 %v245_v1 }
  0x13   :  { %139 = vmatpush.bf16.msra.mxu0 %v244_v2  ;;  %249 = vmatpush.bf16.msra.mxu1 %v244_v2 }
  0x17   :  { %140 = vmatpush.bf16.msra.mxu0 %v243_v3  ;;  %250 = vmatpush.bf16.msra.mxu1 %v243_v3 }
  0x1b   :  { %141 = vmatpush.bf16.msra.mxu0 %v242_v4  ;;  %251 = vmatpush.bf16.msra.mxu1 %v242_v4 }
  0x1f   :  { %142 = vmatpush.bf16.msra.mxu0 %v241_v5  ;;  %252 = vmatpush.bf16.msra.mxu1 %v241_v5 }
  0x23   :  { %143 = vmatpush.bf16.msra.mxu0 %v240_v6  ;;  %253 = vmatpush.bf16.msra.mxu1 %v240_v6 }
  0x27   :  { %144 = vmatpush.bf16.msra.mxu0 %v239_v7  ;;  %254 = vmatpush.bf16.msra.mxu1 %v239_v7 }
  0x2a   :  { %145 = vmatmul.bf16.vlgmr.msra.gmra.mxu0 %v237_v8  ;;  %150 = vmatmul.bf16.vlgmr.msra.gmra.mxu1 %v238_v9 }
  0xa7   :  { %v146_v12 = vpop.f32.mrf.mxu0  ;;  %v151_v13 = vpop.f32.mrf.mxu1 }
  0xa8   :  { %v175_v14 = vmul.f32 %v257_v10, %v146_v12  ;;  %v177_v15 = vmul.f32 %v257_v10, %v151_v13 }
  0xaa   :  { %v183_v16 = vadd.f32 %v258_v11, %v175_v14  ;;  %v185_v17 = vadd.f32 %v258_v11, %v177_v15 }
  0xac   :  { %187 = vst [vmem:[%s390_s4] sm:$0xff] %v183_v16 }
  0xad   :  { %189 = vst [vmem:[%s390_s4 + $0x10] sm:$0xff] %v185_v17 }
  0xaf   :  { %v148_v18 = vpop.f32.mrf.mxu0  ;;  %v153_v19 = vpop.f32.mrf.mxu1 }
  0xb0   :  { %v176_v20 = vmul.f32 %v257_v10, %v148_v18  ;;  %v178_v21 = vmul.f32 %v257_v10, %v153_v19 }
  0xb2   :  { %v184_v22 = vadd.f32 %v258_v11, %v176_v20  ;;  %v186_v23 = vadd.f32 %v258_v11, %v178_v21 }
  0xb4   :  { %188 = vst [vmem:[%s390_s4 + $0x8] sm:$0xff] %v184_v22 }
  0xb5   :  { %190 = vst [vmem:[%s390_s4 + $0x18] sm:$0xff] %v186_v23 }
  0xb6   :  { %195 = vsyncpa [#allocation4], 1 }
  0xb7   :  { %196 = vsyncpa [#allocation6], 1 }

// kernel: _lambda_.32
= control target key start
LH: loop header
LB: loop body
LE: loop exit
PB: predicated region body
PF: predicated region fallthrough
CT: control target
= control target key end

     0   :  { %9 = vsyncpa [#allocation5], 0  ;;  %s1033_s0 = inlined_call_operand.vmem [shape: bf16[32,1152], index: 0, kind: input, shape index: {}]   ;;  %s1034_s1 = inlined_call_operand.vmem [shape: bf16[1152,128], index: 1, kind: input, shape index: {}]   ;;  %s1035_s2 = inlined_call_operand.hbm [shape: f32[1,128], index: 2, kind: input, shape index: {}]   ;;  %s1036_s3 = inlined_call_operand.hbm [shape: f32[1,128], index: 3, kind: input, shape index: {}]   ;;  %s1037_s4 = inlined_call_operand.vmem [shape: f32[32,128], index: 4, kind: output, shape index: {}]  }
   0x1   :  { %10 = vsyncpa [#allocation7], 0  ;;  %s912_s15 = smov 0   ;;  %s914_s16 = smov 0  }
   0x2   :  { %s916_s17 = smov 0   ;;  %s918_s18 = smov 0  }
   0x3   :  { %s920_s19 = smov 0  }
   0x4 LB: > { %s635_s20 = sadd.s32 4294967295, %s882_s19   ;;  %s28_s21 = sadd.s32 1, %s878_s18  ;;  %s882_s19 = sphi %s920_s19, %s16_s19   ;;  %s878_s18 = sphi %s918_s18, %s1044_s18   ;;  %s874_s17 = sphi %s916_s17, %s1043_s17   ;;  %s870_s16 = sphi %s914_s16, %s1042_s16   ;;  %s866_s15 = sphi %s912_s15, %s1041_s15  }
   0x5   : > { %p29_p0 = scmp.ge.s32.totalorder %s28_s21, 9  ;;  %s44_s22 = sadd.s32 1, %s870_s16 }
   0x6   : > { %p51_p1 = scmp.ne.s32.totalorder %s870_s16, %s866_s15  ;;  %p52_p2 = scmp.eq.s32.totalorder %s882_s19, 0 }
   0x7   : > { %s1046_s21 = smov (%p29_p0, %s28_s21), 0  ;;  %p636_p4 = scmp.ge.s32.totalorder %s882_s19, 1 }
   0x8   : > { %p945_p3 = por %p52_p2, %p51_p1  ;;  %s40_s24 = ssub.s32 %s878_s18, %s1046_s21 }
   0x9   : > { %p176_p5 = scmp.lt.s32.totalorder %s882_s19, 10  ;;  %p42_p6 = scmp.eq.s32.totalorder %s40_s24, 0 }
   0xa   : > { %p957_p8 = scmp.eq.s32.totalorder %s635_s20, 0  ;;  %s189_s30 = sshll.u32 %s1035_s2, 4  ;;  %s190_s30 = int_to_ptr.hbm [resolvable:$true] %s189_s30 }
   0xb   : > { %p953_p7 = pnand %p636_p4, %p176_p5  ;;  %s884_s5 = smov [#allocation4]  }
   0xc   : > { %s962_s27 = scalar_select %p42_p6, %s870_s16, %s44_s22  }
   0xd   : > { %p720_p9 = pneg %p953_p7  ;;  %s191_s6 = sshll.u32 %s884_s5, 4  ;;  %s192_s6 = int_to_ptr.vmem [resolvable:$true] %s191_s6 }
   0xe   : > { %s202_s9 = sshll.u32 %s1036_s3, 4  ;;  %s885_s10 = smov [#allocation6]   ;;  %s203_s9 = int_to_ptr.hbm [resolvable:$true] %s202_s9 }
   0xf   : > { %p721_p10 = pnand %p957_p8, %p720_p9  ;;  %s204_s11 = sshll.u32 %s885_s10, 4  ;;  %s205_s11 = int_to_ptr.vmem [resolvable:$true] %s204_s11 }
  0x10   : > { %p639_p11 = scmp.ge.s32.totalorder %s882_s19, 9 }
  0x11   : > { %723 = dma.hbm_to_vmem [thread:$0]  (!%p721_p10), %s190_s30, 16, %s192_s6, [#allocation5]  }
  0x12   : > { %726 = dma.hbm_to_vmem [thread:$0]  (!%p721_p10), %s203_s9, 16, %s205_s11, [#allocation7]  }
  0x13   : > { %211 = sbr.rel (%p639_p11) target bundleno = 32 (0x20), region = 24 }
  0x18   : > { %214 = sbr.rel (!%p945_p3) target bundleno = 32 (0x20), region = 28  ;;  %s216_s12 = sand.u32 (%p945_p3), 1, %s870_s16  }
  0x19   : > { %s641_s13 = sshll.u32 (%p945_p3), %s878_s18, 2  ;;  %s640_s14 = sshll.u32 (%p945_p3), %s216_s12, 4 }
  0x1a   : > { %s223_s24 = scalar_lea.vmem (%p945_p3), %s1033_s0, %s641_s13  ;;  %s218_s28 = scalar_lea.vmem (%p945_p3), [#allocation3], %s640_s14 }
  0x1b   : > { %v240_v0 = vld [vmem:[%s223_s24] sm:$0xf] (%p945_p3)  ;;  %v242_v1 = vld [vmem:[%s223_s24 + $0x24] sm:$0xf] (%p945_p3)  ;;  %v244_v2 = vld [vmem:[%s223_s24 + $0x48] sm:$0xf] (%p945_p3) }
  0x1c   : > { %241 = vst [vmem:[%s218_s28] sm:$0xf] (%p945_p3), %v240_v0  ;;  %v246_v3 = vld [vmem:[%s223_s24 + $0x6c] sm:$0xf] (%p945_p3) }
  0x1d   : > { %243 = vst [vmem:[%s218_s28 + $0x4] sm:$0xf] %v242_v1 }
  0x1e   : > { %245 = vst [vmem:[%s218_s28 + $0x8] sm:$0xf] %v244_v2 }
  0x1f   : > { %247 = vst [vmem:[%s218_s28 + $0xc] sm:$0xf] %v246_v3 }
  0x20 PF: > { %294 = sbr.rel (%p953_p7) target bundleno = 236 (0xec), region = 73  ;;  %s297_s23 = sand.u32 (!%p953_p7), 1, %s866_s15  }
  0x21   : > { %s985_s29 = sshll.u32 (!%p953_p7), %s297_s23, 4 }
  0x22   : > { %s299_s30 = scalar_lea.vmem (!%p953_p7), [#allocation3], %s985_s29 }
  0x25   : > { %857 = dma.done.wait (%p957_p8), [#allocation5], 16  }
  0x26   : > { %859 = vsyncadd (%p957_p8), [#allocation5], 4294967280 }
  0x27   : > { %861 = dma.done.wait (%p957_p8), [#allocation7], 16  }
  0x28   : > { %863 = vsyncadd (%p957_p8), [#allocation7], 4294967280  ;;  %s646_s25 = sshll.u32 %s874_s17, 4  ;;  %p648_p13 = scmp.ne.s32.totalorder %s874_s17, 0 }
  0x29   : > { %p345_p12 = scmp.lt.s32.totalorder %s646_s25, 143 }
  0x2a   : > { %365 = sbr.rel (%p648_p13) target bundleno = 52 (0x34), region = 89 }
  0x2b   : > { %s1048_s25 = smov (!%p345_p12, %s646_s25), 143 }
  0x2c   : > { %s647_s15 = sshll.u32 %s1048_s25, 2 }
  0x2d   : > { %s351_s7 = scalar_lea.vmem %s1034_s1, %s647_s15 }
  0x2f   : > { %v886_v4 = vmov 0.0  }
  0x30   : > { %366 = vst [vmem:[#allocation2 + $0x10] sm:$0xff] %v886_v4 }
  0x31   : > { %367 = vst [vmem:[#allocation2] sm:$0xff] %v886_v4 }
  0x32   : > { %368 = vst [vmem:[#allocation2 + $0x18] sm:$0xff] %v886_v4 }
  0x33   : > { %369 = vst [vmem:[#allocation2 + $0x8] sm:$0xff] %v886_v4 }
  0x34 PF: > { %v703_v5 = vld [vmem:[%s351_s7 + $0x38] sm:$0xff]  ;;  %v702_v6 = vld [vmem:[%s351_s7 + $0x30] sm:$0xff]  ;;  %v701_v7 = vld [vmem:[%s351_s7 + $0x28] sm:$0xff]  ;;  %p689_p0 = scmp.ne.s32.totalorder %s874_s17, 8 }
  0x35   : > { %454 = vmatpush.bf16.msra.mxu0 %v703_v5  ;;  %704 = vmatpush.bf16.msra.mxu1 %v703_v5  ;;  %v700_v8 = vld [vmem:[%s351_s7 + $0x20] sm:$0xff]  ;;  %v699_v9 = vld [vmem:[%s351_s7 + $0x18] sm:$0xff]  ;;  %v698_v10 = vld [vmem:[%s351_s7 + $0x10] sm:$0xff] }
  0x36   : > { %v697_v11 = vld [vmem:[%s351_s7 + $0x8] sm:$0xff]  ;;  %v696_v12 = vld [vmem:[%s351_s7] sm:$0xff] }
  0x37   : > { %v694_v13 = vld [vmem:[%s299_s30] sm:$0xff]  ;;  %v695_v14 = vld [vmem:[%s299_s30 + $0x8] sm:$0xff] }
  0x38   : > { %v370_v15 = vld [vmem:[#allocation2 + $0x10] sm:$0xff]  ;;  %v371_v21 = vld [vmem:[#allocation2] sm:$0xff] }
  0x39   : > { %455 = vmatpush.bf16.msra.mxu0 %v702_v6  ;;  %705 = vmatpush.bf16.msra.mxu1 %v702_v6  ;;  %v372_v16 = vld [vmem:[#allocation2 + $0x18] sm:$0xff] }
  0x3a   : > { %v373_v22 = vld [vmem:[#allocation2 + $0x8] sm:$0xff] }
  0x3d   : > { %456 = vmatpush.bf16.msra.mxu0 %v701_v7  ;;  %706 = vmatpush.bf16.msra.mxu1 %v701_v7 }
  0x41   : > { %457 = vmatpush.bf16.msra.mxu0 %v700_v8  ;;  %707 = vmatpush.bf16.msra.mxu1 %v700_v8 }
  0x45   : > { %458 = vmatpush.bf16.msra.mxu0 %v699_v9  ;;  %708 = vmatpush.bf16.msra.mxu1 %v699_v9 }
  0x49   : > { %459 = vmatpush.bf16.msra.mxu0 %v698_v10  ;;  %709 = vmatpush.bf16.msra.mxu1 %v698_v10 }
  0x4d   : > { %460 = vmatpush.bf16.msra.mxu0 %v697_v11  ;;  %710 = vmatpush.bf16.msra.mxu1 %v697_v11 }
  0x51   : > { %461 = vmatpush.bf16.msra.mxu0 %v696_v12  ;;  %711 = vmatpush.bf16.msra.mxu1 %v696_v12 }
  0x54   : > { %462 = vmatmul.bf16.vlgmr.msra.gmra.mxu0 %v694_v13  ;;  %467 = vmatmul.bf16.vlgmr.msra.gmra.mxu1 %v695_v14 }
  0xd1   : > { %v463_v17 = vpop.f32.mrf.mxu0  ;;  %v468_v18 = vpop.f32.mrf.mxu1 }
  0xd2   : > { %v473_v19 = vadd.f32 %v463_v17, %v370_v15  ;;  %v475_v20 = vadd.f32 %v468_v18, %v372_v16 }
  0xd4   : > { %477 = vst [vmem:[#allocation2 + $0x10] sm:$0xff] %v473_v19 }
  0xd5   : > { %479 = vst [vmem:[#allocation2 + $0x18] sm:$0xff] %v475_v20 }
  0xd9   : > { %v465_v23 = vpop.f32.mrf.mxu0  ;;  %v470_v24 = vpop.f32.mrf.mxu1  ;;  %484 = sbr.rel (%p689_p0) target bundleno = 236 (0xec), region = 93 }
  0xda   : > { %v474_v25 = vadd.f32 %v465_v23, %v371_v21  ;;  %v476_v26 = vadd.f32 %v470_v24, %v373_v22 }
  0xdc   : > { %478 = vst [vmem:[#allocation2] sm:$0xff] %v474_v25 }
  0xdd   : > { %480 = vst [vmem:[#allocation2 + $0x8] sm:$0xff] %v476_v26 }
  0xde   : > { %v485_v27 = vld [vmem:[#allocation2 + $0x10] sm:$0xff]  ;;  %v774_v28 = vld [vmem:[#allocation4] ss:$0 sm:$0xff]  ;;  %v775_v29 = vld [vmem:[#allocation6] ss:$0 sm:$0xff] }
  0xdf   : > { %v493_v31 = vmul.f32 %v774_v28, %v485_v27  ;;  %v487_v33 = vld [vmem:[#allocation2 + $0x18] sm:$0xff] }
  0xe0   : > { %v495_v35 = vmul.f32 %v774_v28, %v487_v33 }
  0xe1   : > { %v501_v37 = vadd.f32 %v775_v29, %v493_v31 }
  0xe2   : > { %v503_v39 = vadd.f32 %v775_v29, %v495_v35 }
  0xe3   : > { %v486_v30 = vld [vmem:[#allocation2] sm:$0xff]  ;;  %v505_v41 = vmax.f32 %v501_v37, 0.0 }
  0xe4   : > { %v494_v32 = vmul.f32 %v774_v28, %v486_v30  ;;  %v488_v34 = vld [vmem:[#allocation2 + $0x8] sm:$0xff]  ;;  %v507_v43 = vmax.f32 %v503_v39, 0.0 }
  0xe5   : > { %v496_v36 = vmul.f32 %v774_v28, %v488_v34  ;;  %509 = vst [vmem:[%s1037_s4] sm:$0xff] %v505_v41 }
  0xe6   : > { %v502_v38 = vadd.f32 %v775_v29, %v494_v32  ;;  %511 = vst [vmem:[%s1037_s4 + $0x10] sm:$0xff] %v507_v43 }
  0xe7   : > { %v504_v40 = vadd.f32 %v775_v29, %v496_v36 }
  0xe8   : > { %v506_v42 = vmax.f32 %v502_v38, 0.0 }
  0xe9   : > { %v508_v44 = vmax.f32 %v504_v40, 0.0 }
  0xea   : > { %510 = vst [vmem:[%s1037_s4 + $0x8] sm:$0xff] %v506_v42 }
  0xeb   : > { %512 = vst [vmem:[%s1037_s4 + $0x18] sm:$0xff] %v508_v44 }
  0xec PF: > { %s16_s19 = sadd.s32 1, %s882_s19   ;;  %s1041_s15 = smov %s870_s16 }
  0xed   : > { %p13_p1 = scmp.ge.s32.totalorder %s16_s19, 11   ;;  %s1042_s16 = smov %s962_s27 }
  0xee   : > { %s1043_s17 = smov %s878_s18  ;;  %s1044_s18 = smov %s1046_s21 }
  0xef   :  { %15 = sbr.rel (!%p13_p1) target bundleno = 4 (0x4), region = 134 }
  0xf4   :  { %541 = vsyncpa [#allocation5], 1 }
  0xf5   :  { %543 = vsyncpa [#allocation5 + $0x1], 1 }
  0xf6   :  { %544 = vsyncpa [#allocation7], 1 }

// kernel: _lambda_.34
= control target key start
LH: loop header
LB: loop body
LE: loop exit
PB: predicated region body
PF: predicated region fallthrough
CT: control target
= control target key end

     0   :  { %9 = vsyncpa [#allocation4], 0  ;;  %s995_s0 = inlined_call_operand.vmem [shape: bf16[8,1152], index: 0, kind: input, shape index: {}]   ;;  %s996_s1 = inlined_call_operand.vmem [shape: bf16[1152,256], index: 1, kind: input, shape index: {}]   ;;  %s997_s2 = inlined_call_operand.hbm [shape: f32[1,256], index: 2, kind: input, shape index: {}]   ;;  %s998_s3 = inlined_call_operand.hbm [shape: f32[1,256], index: 3, kind: input, shape index: {}]   ;;  %s999_s4 = inlined_call_operand.vmem [shape: f32[8,256], index: 4, kind: output, shape index: {}]  }
   0x1   :  { %10 = vsyncpa [#allocation6], 0  ;;  %s883_s15 = smov 0   ;;  %s885_s16 = smov 0  }
   0x2   :  { %s887_s17 = smov 0  }
   0x3 LB: > { %s618_s18 = sadd.s32 4294967295, %s853_s17   ;;  %s28_s19 = sadd.s32 1, %s849_s16  ;;  %s853_s17 = sphi %s887_s17, %s16_s17   ;;  %s849_s16 = sphi %s885_s16, %s1003_s16   ;;  %s845_s15 = sphi %s883_s15, %s1002_s15  }
   0x4   : > { %p29_p0 = scmp.ge.s32.totalorder %s28_s19, 9  ;;  %p619_p1 = scmp.ge.s32.totalorder %s853_s17, 1 }
   0x5   : > { %p176_p2 = scmp.lt.s32.totalorder %s853_s17, 10  ;;  %p908_p4 = scmp.eq.s32.totalorder %s618_s18, 0 }
   0x6   : > { %s1005_s19 = smov (%p29_p0, %s28_s19), 0  ;;  %s190_s24 = sshll.u32 %s997_s2, 4  ;;  %s191_s24 = int_to_ptr.hbm [resolvable:$true] %s190_s24 }
   0x7   : > { %p904_p3 = pnand %p619_p1, %p176_p2  ;;  %s855_s25 = smov [#allocation3]  }
   0x8   : > { %s192_s26 = sshll.u32 %s855_s25, 4  ;;  %s204_s29 = sshll.u32 %s998_s3, 4  ;;  %s193_s26 = int_to_ptr.vmem [resolvable:$true] %s192_s26  ;;  %s205_s29 = int_to_ptr.hbm [resolvable:$true] %s204_s29 }
   0x9   : > { %p725_p5 = pneg %p904_p3  ;;  %s856_s30 = smov [#allocation5]  }
   0xa   : > { %s206_s5 = sshll.u32 %s856_s30, 4  ;;  %245 = sbr.rel (%p904_p3) target bundleno = 209 (0xd1), region = 36  ;;  %s207_s5 = int_to_ptr.vmem [resolvable:$true] %s206_s5 }
   0xb   : > { %p726_p6 = pnand %p908_p4, %p725_p5 }
   0xd   : > { %728 = dma.hbm_to_vmem [thread:$0]  (!%p726_p6), %s191_s24, 32, %s193_s26, [#allocation4]  }
   0xe   : > { %731 = dma.hbm_to_vmem [thread:$0]  (!%p726_p6), %s205_s29, 32, %s207_s5, [#allocation6]  }
   0xf   : > { %836 = dma.done.wait (%p908_p4), [#allocation4], 32  }
  0x10   : > { %838 = vsyncadd (%p908_p4), [#allocation4], 4294967264 }
  0x11   : > { %840 = dma.done.wait (%p908_p4), [#allocation6], 32  }
  0x12   : > { %842 = vsyncadd (%p908_p4), [#allocation6], 4294967264  ;;  %p296_p7 = scmp.lt.s32.totalorder %s845_s15, 8  ;;  %s627_s6 = sshll.u32 %s845_s15, 4 }
  0x13   : > { %p304_p8 = scmp.lt.s32.totalorder %s627_s6, 143  ;;  %p630_p9 = scmp.ne.s32.totalorder %s845_s15, 0 }
  0x14   : > { %s297_s7 = scalar_select %p296_p7, %s845_s15, 8 }
  0x15   : > { %s1007_s6 = smov (!%p304_p8, %s627_s6), 143  ;;  %329 = sbr.rel (%p630_p9) target bundleno = 29 (0x1d), region = 48 }
  0x16   : > { %s626_s8 = sshll.u32 %s297_s7, 2  ;;  %s700_s12 = sshll.u32 %s1007_s6, 3 }
  0x17   : > { %s938_s11 = scalar_lea.vmem %s995_s0, %s626_s8  ;;  %s943_s18 = scalar_lea.vmem %s996_s1, %s700_s12 }
  0x1a   : > { %v857_v0 = vmov 0.0  }
  0x1b   : > { %330 = vst [vmem:[#allocation2] sm:$0xff] %v857_v0 }
  0x1c   : > { %331 = vst [vmem:[#allocation2 + $0x8] sm:$0xff] %v857_v0 }
  0x1d PF: > { %v689_v1 = vld [vmem:[%s943_s18 + $0x70] sm:$0xf]  ;;  %v716_v2 = vld [vmem:[%s943_s18 + $0x74] sm:$0xf0]  ;;  %v715_v3 = vld [vmem:[%s943_s18 + $0x74] sm:$0xf] }
  0x1e   : > { %v690_v4 = vor.u32 %v716_v2, %v689_v1  ;;  %v691_v5 = vld [vmem:[%s943_s18 + $0x78] sm:$0xf0]  ;;  %v681_v6 = vld [vmem:[%s943_s18 + $0x60] sm:$0xf]  ;;  %v714_v7 = vld [vmem:[%s943_s18 + $0x64] sm:$0xf0] }
  0x1f   : > { %v694_v8 = vor.u32 %v715_v3, %v691_v5  ;;  %v713_v9 = vld [vmem:[%s943_s18 + $0x64] sm:$0xf]  ;;  %v683_v10 = vld [vmem:[%s943_s18 + $0x68] sm:$0xf0]  ;;  %v682_v11 = vor.u32 %v714_v7, %v681_v6  ;;  %v673_v13 = vld [vmem:[%s943_s18 + $0x50] sm:$0xf] }
  0x20   : > { %431 = vmatpush.bf16.msra.mxu0 %v690_v4  ;;  %v686_v12 = vor.u32 %v713_v9, %v683_v10  ;;  %v712_v14 = vld [vmem:[%s943_s18 + $0x54] sm:$0xf0]  ;;  %v711_v15 = vld [vmem:[%s943_s18 + $0x54] sm:$0xf]  ;;  %v675_v16 = vld [vmem:[%s943_s18 + $0x58] sm:$0xf0] }
  0x21   : > { %444 = vmatpush.bf16.msra.mxu1 %v694_v8  ;;  %v674_v17 = vor.u32 %v712_v14, %v673_v13  ;;  %v678_v18 = vor.u32 %v711_v15, %v675_v16  ;;  %v665_v19 = vld [vmem:[%s943_s18 + $0x40] sm:$0xf]  ;;  %v710_v20 = vld [vmem:[%s943_s18 + $0x44] sm:$0xf0]  ;;  %v709_v21 = vld [vmem:[%s943_s18 + $0x44] sm:$0xf] }
  0x22   : > { %v667_v22 = vld [vmem:[%s943_s18 + $0x48] sm:$0xf0]  ;;  %v666_v23 = vor.u32 %v710_v20, %v665_v19  ;;  %v657_v25 = vld [vmem:[%s943_s18 + $0x30] sm:$0xf]  ;;  %v708_v26 = vld [vmem:[%s943_s18 + $0x34] sm:$0xf0] }
  0x23   : > { %v670_v24 = vor.u32 %v709_v21, %v667_v22  ;;  %v707_v27 = vld [vmem:[%s943_s18 + $0x34] sm:$0xf]  ;;  %v659_v28 = vld [vmem:[%s943_s18 + $0x38] sm:$0xf0]  ;;  %v658_v29 = vor.u32 %v708_v26, %v657_v25  ;;  %v649_v31 = vld [vmem:[%s943_s18 + $0x20] sm:$0xf] }
  0x24   : > { %432 = vmatpush.bf16.msra.mxu0 %v682_v11  ;;  %v662_v30 = vor.u32 %v707_v27, %v659_v28  ;;  %v706_v32 = vld [vmem:[%s943_s18 + $0x24] sm:$0xf0]  ;;  %v705_v33 = vld [vmem:[%s943_s18 + $0x24] sm:$0xf]  ;;  %v651_v34 = vld [vmem:[%s943_s18 + $0x28] sm:$0xf0] }
  0x25   : > { %445 = vmatpush.bf16.msra.mxu1 %v686_v12  ;;  %v650_v35 = vor.u32 %v706_v32, %v649_v31  ;;  %v654_v36 = vor.u32 %v705_v33, %v651_v34  ;;  %v641_v37 = vld [vmem:[%s943_s18 + $0x10] sm:$0xf]  ;;  %v704_v38 = vld [vmem:[%s943_s18 + $0x14] sm:$0xf0]  ;;  %v703_v39 = vld [vmem:[%s943_s18 + $0x14] sm:$0xf] }
  0x26   : > { %v643_v40 = vld [vmem:[%s943_s18 + $0x18] sm:$0xf0]  ;;  %v642_v41 = vor.u32 %v704_v38, %v641_v37  ;;  %v633_v43 = vld [vmem:[%s943_s18] sm:$0xf]  ;;  %v702_v44 = vld [vmem:[%s943_s18 + $0x4] sm:$0xf0] }
  0x27   : > { %v646_v42 = vor.u32 %v703_v39, %v643_v40  ;;  %v701_v45 = vld [vmem:[%s943_s18 + $0x4] sm:$0xf]  ;;  %v635_v46 = vld [vmem:[%s943_s18 + $0x8] sm:$0xf0]  ;;  %v634_v47 = vor.u32 %v702_v44, %v633_v43  ;;  %v334_v49 = vld [vmem:[%s938_s11] sm:$0xf] }
  0x28   : > { %433 = vmatpush.bf16.msra.mxu0 %v674_v17  ;;  %v638_v48 = vor.u32 %v701_v45, %v635_v46  ;;  %v332_v50 = vld [vmem:[#allocation2] sm:$0xff]  ;;  %v333_v51 = vld [vmem:[#allocation2 + $0x8] sm:$0xff]  ;;  %p695_p10 = scmp.ne.s32.totalorder %s845_s15, 8 }
  0x29   : > { %446 = vmatpush.bf16.msra.mxu1 %v678_v18 }
  0x2c   : > { %434 = vmatpush.bf16.msra.mxu0 %v666_v23 }
  0x2d   : > { %447 = vmatpush.bf16.msra.mxu1 %v670_v24 }
  0x30   : > { %435 = vmatpush.bf16.msra.mxu0 %v658_v29 }
  0x31   : > { %448 = vmatpush.bf16.msra.mxu1 %v662_v30 }
  0x34   : > { %436 = vmatpush.bf16.msra.mxu0 %v650_v35 }
  0x35   : > { %449 = vmatpush.bf16.msra.mxu1 %v654_v36 }
  0x38   : > { %437 = vmatpush.bf16.msra.mxu0 %v642_v41 }
  0x39   : > { %450 = vmatpush.bf16.msra.mxu1 %v646_v42 }
  0x3c   : > { %438 = vmatpush.bf16.msra.mxu0 %v634_v47 }
  0x3d   : > { %451 = vmatpush.bf16.msra.mxu1 %v638_v48 }
  0x3f   : > { %439 = vmatmul.bf16.vlgmr.msra.gmra.mxu0 %v334_v49 }
  0x40   : > { %452 = vmatmul.bf16.vlgmr.msra.gmra.mxu1 %v334_v49 }
  0xbc   : > { %v440_v52 = vpop.f32.mrf.mxu0 }
  0xbd   : > { %v457_v53 = vadd.f32 %v440_v52, %v332_v50  ;;  %v453_v54 = vpop.f32.mrf.mxu1 }
  0xbe   : > { %v458_v55 = vadd.f32 %v453_v54, %v333_v51 }
  0xbf   : > { %459 = vst [vmem:[#allocation2] sm:$0xff] %v457_v53 }
  0xc0   : > { %460 = vst [vmem:[#allocation2 + $0x8] sm:$0xff] %v458_v55 }
  0xc1   : > { %464 = sbr.rel (%p695_p10) target bundleno = 209 (0xd1), region = 52 }
  0xc4   : > { %v442_v56 = vpop.f32.mrf.mxu0 }
  0xc5   : > { %v455_v57 = vpop.f32.mrf.mxu1 }
  0xc6   : > { %v465_v58 = vld [vmem:[#allocation2] sm:$0xff]  ;;  %v467_v59 = vld [vmem:[#allocation3] sm:$0x3]  ;;  %v475_v60 = vld [vmem:[#allocation5] sm:$0x3] }
  0xc7   : > { %v469_v61 = vperm.slane %v467_v59, 0  ;;  %v477_v62 = vperm.slane %v475_v60, 0  ;;  %v466_v63 = vld [vmem:[#allocation2 + $0x8] sm:$0xff]  ;;  %v470_v0 = vperm.slane %v467_v59, 1  ;;  %v478_v1 = vperm.slane %v475_v60, 1 }
  0xc9   : > { %v473_v2 = vmul.f32 %v469_v61, %v465_v58  ;;  %v474_v3 = vmul.f32 %v470_v0, %v466_v63 }
  0xcb   : > { %v481_v4 = vadd.f32 %v477_v62, %v473_v2  ;;  %v482_v5 = vadd.f32 %v478_v1, %v474_v3 }
  0xcd   : > { %v483_v6 = vmax.f32 %v481_v4, 0.0  ;;  %v484_v7 = vmax.f32 %v482_v5, 0.0 }
  0xcf   : > { %485 = vst [vmem:[%s999_s4] sm:$0xff] %v483_v6 }
  0xd0   : > { %486 = vst [vmem:[%s999_s4 + $0x8] sm:$0xff] %v484_v7 }
  0xd1 PF: > { %s16_s17 = sadd.s32 1, %s853_s17   ;;  %s1002_s15 = smov %s849_s16 }
  0xd2   : > { %p13_p11 = scmp.ge.s32.totalorder %s16_s17, 11   ;;  %s1003_s16 = smov %s1005_s19 }
  0xd4   :  { %15 = sbr.rel (!%p13_p11) target bundleno = 3 (0x3), region = 88 }
  0xd9   :  { %517 = vsyncpa [#allocation4], 1 }
  0xda   :  { %519 = vsyncpa [#allocation4 + $0x1], 1 }
  0xdb   :  { %520 = vsyncpa [#allocation6], 1 }

// kernel: _lambda_.35
= control target key start
LH: loop header
LB: loop body
LE: loop exit
PB: predicated region body
PF: predicated region fallthrough
CT: control target
= control target key end

     0   :  { %9 = vsyncpa [#allocation4], 0  ;;  %s481_s0 = inlined_call_operand.vmem [shape: bf16[8,128], index: 0, kind: input, shape index: {}]   ;;  %s482_s1 = inlined_call_operand.vmem [shape: bf16[128,256], index: 1, kind: input, shape index: {}]   ;;  %s483_s2 = inlined_call_operand.hbm [shape: f32[1,256], index: 2, kind: input, shape index: {}]   ;;  %s484_s3 = inlined_call_operand.hbm [shape: f32[1,256], index: 3, kind: input, shape index: {}]   ;;  %s485_s4 = inlined_call_operand.vmem [shape: f32[8,256], index: 4, kind: output, shape index: {}]  }
   0x1   :  { %s20_s17 = sshll.u32 %s483_s2, 4  ;;  %s21_s17 = int_to_ptr.hbm [resolvable:$true] %s20_s17 }
   0x2   :  { %10 = vsyncpa [#allocation6], 0  ;;  %s343_s18 = smov [#allocation3]   ;;  %s31_s22 = sshll.u32 %s484_s3, 4  ;;  %s32_s22 = int_to_ptr.hbm [resolvable:$true] %s31_s22 }
   0x3   :  { %s22_s19 = sshll.u32 %s343_s18, 4  ;;  %s344_s23 = smov [#allocation5]   ;;  %s23_s19 = int_to_ptr.vmem [resolvable:$true] %s22_s19 }
   0x4   :  { %25 = dma.hbm_to_vmem [thread:$0]  %s21_s17, 32, %s23_s19, [#allocation4]  }
   0x5   :  { %s33_s24 = sshll.u32 %s344_s23, 4  ;;  %s34_s24 = int_to_ptr.vmem [resolvable:$true] %s33_s24 }
   0x6   :  { %36 = dma.hbm_to_vmem [thread:$0]  %s32_s22, 32, %s34_s24, [#allocation6]  }
   0x7   :  { %339 = dma.done.wait [#allocation4], 32  }
   0x8   :  { %340 = vsyncadd [#allocation4], 4294967264 }
   0x9   :  { %341 = dma.done.wait [#allocation6], 32  }
   0xa   :  { %342 = vsyncadd [#allocation6], 4294967264  ;;  %v267_v0 = vld [vmem:[%s482_s1 + $0x70] sm:$0xf]  ;;  %v288_v1 = vld [vmem:[%s482_s1 + $0x74] sm:$0xf0] }
   0xb   :  { %v287_v2 = vld [vmem:[%s482_s1 + $0x74] sm:$0xf]  ;;  %v268_v3 = vor.u32 %v288_v1, %v267_v0  ;;  %v269_v4 = vld [vmem:[%s482_s1 + $0x78] sm:$0xf0]  ;;  %v259_v5 = vld [vmem:[%s482_s1 + $0x60] sm:$0xf] }
   0xc   :  { %v286_v6 = vld [vmem:[%s482_s1 + $0x64] sm:$0xf0]  ;;  %v272_v7 = vor.u32 %v287_v2, %v269_v4  ;;  %v285_v8 = vld [vmem:[%s482_s1 + $0x64] sm:$0xf]  ;;  %v261_v9 = vld [vmem:[%s482_s1 + $0x68] sm:$0xf0] }
   0xd   :  { %150 = vmatpush.bf16.msra.mxu0 %v268_v3  ;;  %v260_v10 = vor.u32 %v286_v6, %v259_v5  ;;  %v264_v11 = vor.u32 %v285_v8, %v261_v9  ;;  %v251_v12 = vld [vmem:[%s482_s1 + $0x50] sm:$0xf]  ;;  %v284_v13 = vld [vmem:[%s482_s1 + $0x54] sm:$0xf0]  ;;  %v283_v14 = vld [vmem:[%s482_s1 + $0x54] sm:$0xf] }
   0xe   :  { %163 = vmatpush.bf16.msra.mxu1 %v272_v7  ;;  %v253_v15 = vld [vmem:[%s482_s1 + $0x58] sm:$0xf0]  ;;  %v252_v16 = vor.u32 %v284_v13, %v251_v12  ;;  %v243_v18 = vld [vmem:[%s482_s1 + $0x40] sm:$0xf]  ;;  %v282_v19 = vld [vmem:[%s482_s1 + $0x44] sm:$0xf0] }
   0xf   :  { %v256_v17 = vor.u32 %v283_v14, %v253_v15  ;;  %v281_v20 = vld [vmem:[%s482_s1 + $0x44] sm:$0xf]  ;;  %v245_v21 = vld [vmem:[%s482_s1 + $0x48] sm:$0xf0]  ;;  %v244_v22 = vor.u32 %v282_v19, %v243_v18  ;;  %v235_v24 = vld [vmem:[%s482_s1 + $0x30] sm:$0xf] }
  0x10   :  { %v248_v23 = vor.u32 %v281_v20, %v245_v21  ;;  %v280_v25 = vld [vmem:[%s482_s1 + $0x34] sm:$0xf0]  ;;  %v279_v26 = vld [vmem:[%s482_s1 + $0x34] sm:$0xf]  ;;  %v237_v27 = vld [vmem:[%s482_s1 + $0x38] sm:$0xf0] }
  0x11   :  { %151 = vmatpush.bf16.msra.mxu0 %v260_v10  ;;  %v236_v28 = vor.u32 %v280_v25, %v235_v24  ;;  %v240_v29 = vor.u32 %v279_v26, %v237_v27  ;;  %v227_v30 = vld [vmem:[%s482_s1 + $0x20] sm:$0xf]  ;;  %v278_v31 = vld [vmem:[%s482_s1 + $0x24] sm:$0xf0]  ;;  %v277_v32 = vld [vmem:[%s482_s1 + $0x24] sm:$0xf] }
  0x12   :  { %164 = vmatpush.bf16.msra.mxu1 %v264_v11  ;;  %v229_v33 = vld [vmem:[%s482_s1 + $0x28] sm:$0xf0]  ;;  %v228_v34 = vor.u32 %v278_v31, %v227_v30  ;;  %v219_v36 = vld [vmem:[%s482_s1 + $0x10] sm:$0xf]  ;;  %v276_v37 = vld [vmem:[%s482_s1 + $0x14] sm:$0xf0] }
  0x13   :  { %v232_v35 = vor.u32 %v277_v32, %v229_v33  ;;  %v275_v38 = vld [vmem:[%s482_s1 + $0x14] sm:$0xf]  ;;  %v221_v39 = vld [vmem:[%s482_s1 + $0x18] sm:$0xf0]  ;;  %v220_v40 = vor.u32 %v276_v37, %v219_v36  ;;  %v211_v42 = vld [vmem:[%s482_s1] sm:$0xf] }
  0x14   :  { %v224_v41 = vor.u32 %v275_v38, %v221_v39  ;;  %v274_v43 = vld [vmem:[%s482_s1 + $0x4] sm:$0xf0]  ;;  %v273_v44 = vld [vmem:[%s482_s1 + $0x4] sm:$0xf]  ;;  %v213_v45 = vld [vmem:[%s482_s1 + $0x8] sm:$0xf0] }
  0x15   :  { %152 = vmatpush.bf16.msra.mxu0 %v252_v16  ;;  %v212_v46 = vor.u32 %v274_v43, %v211_v42  ;;  %v216_v47 = vor.u32 %v273_v44, %v213_v45  ;;  %v53_v48 = vld [vmem:[%s481_s0] sm:$0xf] }
  0x16   :  { %165 = vmatpush.bf16.msra.mxu1 %v256_v17  ;;  %v185_v49 = vld [vmem:[#allocation3] sm:$0x3]  ;;  %v193_v50 = vld [vmem:[#allocation5] sm:$0x3] }
  0x17   :  { %v187_v51 = vperm.slane %v185_v49, 0  ;;  %v188_v52 = vperm.slane %v185_v49, 1  ;;  %v195_v53 = vperm.slane %v193_v50, 0  ;;  %v196_v55 = vperm.slane %v193_v50, 1 }
  0x19   :  { %153 = vmatpush.bf16.msra.mxu0 %v244_v22 }
  0x1a   :  { %166 = vmatpush.bf16.msra.mxu1 %v248_v23 }
  0x1d   :  { %154 = vmatpush.bf16.msra.mxu0 %v236_v28 }
  0x1e   :  { %167 = vmatpush.bf16.msra.mxu1 %v240_v29 }
  0x21   :  { %155 = vmatpush.bf16.msra.mxu0 %v228_v34 }
  0x22   :  { %168 = vmatpush.bf16.msra.mxu1 %v232_v35 }
  0x25   :  { %156 = vmatpush.bf16.msra.mxu0 %v220_v40 }
  0x26   :  { %169 = vmatpush.bf16.msra.mxu1 %v224_v41 }
  0x29   :  { %157 = vmatpush.bf16.msra.mxu0 %v212_v46 }
  0x2a   :  { %170 = vmatpush.bf16.msra.mxu1 %v216_v47 }
  0x2c   :  { %158 = vmatmul.bf16.vlgmr.msra.gmra.mxu0 %v53_v48 }
  0x2d   :  { %171 = vmatmul.bf16.vlgmr.msra.gmra.mxu1 %v53_v48 }
  0xa9   :  { %v159_v54 = vpop.f32.mrf.mxu0 }
  0xaa   :  { %v191_v56 = vmul.f32 %v187_v51, %v159_v54  ;;  %v172_v57 = vpop.f32.mrf.mxu1 }
  0xab   :  { %v192_v58 = vmul.f32 %v188_v52, %v172_v57 }
  0xac   :  { %v199_v59 = vadd.f32 %v195_v53, %v191_v56 }
  0xad   :  { %v200_v60 = vadd.f32 %v196_v55, %v192_v58 }
  0xae   :  { %201 = vst [vmem:[%s485_s4] sm:$0xff] %v199_v59 }
  0xaf   :  { %202 = vst [vmem:[%s485_s4 + $0x8] sm:$0xff] %v200_v60 }
  0xb1   :  { %v161_v61 = vpop.f32.mrf.mxu0 }
  0xb2   :  { %v174_v62 = vpop.f32.mrf.mxu1 }
  0xb3   :  { %207 = vsyncpa [#allocation4], 1 }
  0xb4   :  { %208 = vsyncpa [#allocation6], 1 }

// kernel: _lambda_.37
= control target key start
LH: loop header
LB: loop body
LE: loop exit
PB: predicated region body
PF: predicated region fallthrough
CT: control target
= control target key end

     0   :  { %9 = vsyncpa [#allocation4], 0  ;;  %s1241_s0 = inlined_call_operand.vmem [shape: bf16[8,2304], index: 0, kind: input, shape index: {}]   ;;  %s1242_s1 = inlined_call_operand.vmem [shape: bf16[2304,256], index: 1, kind: input, shape index: {}]   ;;  %s1243_s2 = inlined_call_operand.hbm [shape: f32[1,256], index: 2, kind: input, shape index: {}]   ;;  %s1244_s3 = inlined_call_operand.hbm [shape: f32[1,256], index: 3, kind: input, shape index: {}]   ;;  %s1245_s4 = inlined_call_operand.vmem [shape: f32[8,256], index: 4, kind: output, shape index: {}]  }
   0x1   :  { %10 = vsyncpa [#allocation6], 0  ;;  %s1098_s15 = smov 0   ;;  %s1100_s16 = smov 0  }
   0x2   :  { %s1102_s17 = smov 0  }
   0x3 LB: > { %s752_s18 = sadd.s32 4294967295, %s1068_s17   ;;  %s28_s19 = sadd.s32 1, %s1064_s16  ;;  %s1068_s17 = sphi %s1102_s17, %s16_s17   ;;  %s1064_s16 = sphi %s1100_s16, %s1249_s16   ;;  %s1060_s15 = sphi %s1098_s15, %s1248_s15  }
   0x4   : > { %p29_p0 = scmp.ge.s32.totalorder %s28_s19, 9  ;;  %p753_p1 = scmp.ge.s32.totalorder %s1068_s17, 1 }
   0x5   : > { %p176_p2 = scmp.lt.s32.totalorder %s1068_s17, 10  ;;  %p1123_p4 = scmp.eq.s32.totalorder %s752_s18, 0 }
   0x6   : > { %s1251_s19 = smov (%p29_p0, %s28_s19), 0  ;;  %s190_s24 = sshll.u32 %s1243_s2, 4  ;;  %s191_s24 = int_to_ptr.hbm [resolvable:$true] %s190_s24 }
   0x7   : > { %p1119_p3 = pnand %p753_p1, %p176_p2  ;;  %s1070_s25 = smov [#allocation3]  }
   0x8   : > { %s192_s26 = sshll.u32 %s1070_s25, 4  ;;  %s204_s29 = sshll.u32 %s1244_s3, 4  ;;  %s193_s26 = int_to_ptr.vmem [resolvable:$true] %s192_s26  ;;  %s205_s29 = int_to_ptr.hbm [resolvable:$true] %s204_s29 }
   0x9   : > { %p940_p5 = pneg %p1119_p3  ;;  %s1071_s30 = smov [#allocation5]  }
   0xa   : > { %s206_s5 = sshll.u32 %s1071_s30, 4  ;;  %247 = sbr.rel (%p1119_p3) target bundleno = 219 (0xdb), region = 36  ;;  %s207_s5 = int_to_ptr.vmem [resolvable:$true] %s206_s5 }
   0xb   : > { %p941_p6 = pnand %p1123_p4, %p940_p5 }
   0xd   : > { %943 = dma.hbm_to_vmem [thread:$0]  (!%p941_p6), %s191_s24, 32, %s193_s26, [#allocation4]  }
   0xe   : > { %946 = dma.hbm_to_vmem [thread:$0]  (!%p941_p6), %s205_s29, 32, %s207_s5, [#allocation6]  }
   0xf   : > { %1051 = dma.done.wait (%p1123_p4), [#allocation4], 32  }
  0x10   : > { %1053 = vsyncadd (%p1123_p4), [#allocation4], 4294967264 }
  0x11   : > { %1055 = dma.done.wait (%p1123_p4), [#allocation6], 32  }
  0x12   : > { %1057 = vsyncadd (%p1123_p4), [#allocation6], 4294967264  ;;  %s760_s6 = sshll.u32 %s1060_s15, 1  ;;  %s762_s7 = sshll.u32 %s1060_s15, 5 }
  0x13   : > { %p300_p7 = scmp.lt.s32.totalorder %s760_s6, 17  ;;  %p309_p8 = scmp.lt.s32.totalorder %s762_s7, 287 }
  0x14   : > { %p765_p9 = scmp.ne.s32.totalorder %s1060_s15, 0 }
  0x15   : > { %s1253_s6 = smov (!%p300_p7, %s760_s6), 17  ;;  %s1255_s7 = smov (!%p309_p8, %s762_s7), 287 }
  0x16   : > { %s761_s8 = sshll.u32 %s1253_s6, 2  ;;  %s899_s12 = sshll.u32 %s1255_s7, 3 }
  0x17   : > { %s1152_s11 = scalar_lea.vmem %s1241_s0, %s761_s8  ;;  %s1157_s18 = scalar_lea.vmem %s1242_s1, %s899_s12 }
  0x18   : > { %334 = sbr.rel (%p765_p9) target bundleno = 32 (0x20), region = 48 }
  0x1d   : > { %v1072_v0 = vmov 0.0  }
  0x1e   : > { %335 = vst [vmem:[#allocation2] sm:$0xff] %v1072_v0 }
  0x1f   : > { %336 = vst [vmem:[#allocation2 + $0x8] sm:$0xff] %v1072_v0 }
  0x20 PF: > { %v824_v1 = vld [vmem:[%s1157_s18 + $0x70] sm:$0xf]  ;;  %v915_v2 = vld [vmem:[%s1157_s18 + $0x74] sm:$0xf0]  ;;  %v914_v6 = vld [vmem:[%s1157_s18 + $0x74] sm:$0xf] }
  0x21   : > { %v888_v3 = vld [vmem:[%s1157_s18 + $0xf0] sm:$0xf]  ;;  %v825_v4 = vor.u32 %v915_v2, %v824_v1  ;;  %v931_v5 = vld [vmem:[%s1157_s18 + $0xf4] sm:$0xf0]  ;;  %v826_v7 = vld [vmem:[%s1157_s18 + $0x78] sm:$0xf0] }
  0x22   : > { %v889_v8 = vor.u32 %v931_v5, %v888_v3  ;;  %v829_v9 = vor.u32 %v914_v6, %v826_v7  ;;  %v930_v10 = vld [vmem:[%s1157_s18 + $0xf4] sm:$0xf]  ;;  %v890_v11 = vld [vmem:[%s1157_s18 + $0xf8] sm:$0xf0]  ;;  %v816_v12 = vld [vmem:[%s1157_s18 + $0x60] sm:$0xf] }
  0x23   : > { %539 = vmatpush.bf16.msra.mxu0 %v825_v4  ;;  %v893_v13 = vor.u32 %v930_v10, %v890_v11  ;;  %v913_v14 = vld [vmem:[%s1157_s18 + $0x64] sm:$0xf0]  ;;  %v880_v15 = vld [vmem:[%s1157_s18 + $0xe0] sm:$0xf]  ;;  %v912_v19 = vld [vmem:[%s1157_s18 + $0x64] sm:$0xf] }
  0x24   : > { %v929_v16 = vld [vmem:[%s1157_s18 + $0xe4] sm:$0xf0]  ;;  %552 = vmatpush.bf16.msra.mxu1 %v889_v8  ;;  %565 = vmatpush.bf16.msra.mxu2 %v829_v9  ;;  %v817_v17 = vor.u32 %v913_v14, %v816_v12  ;;  %v818_v20 = vld [vmem:[%s1157_s18 + $0x68] sm:$0xf0]  ;;  %v928_v21 = vld [vmem:[%s1157_s18 + $0xe4] sm:$0xf] }
  0x25   : > { %v881_v18 = vor.u32 %v929_v16, %v880_v15  ;;  %578 = vmatpush.bf16.msra.mxu3 %v893_v13  ;;  %v821_v22 = vor.u32 %v912_v19, %v818_v20  ;;  %v882_v23 = vld [vmem:[%s1157_s18 + $0xe8] sm:$0xf0]  ;;  %v808_v24 = vld [vmem:[%s1157_s18 + $0x50] sm:$0xf]  ;;  %v911_v25 = vld [vmem:[%s1157_s18 + $0x54] sm:$0xf0] }
  0x26   : > { %v885_v26 = vor.u32 %v928_v21, %v882_v23  ;;  %v872_v27 = vld [vmem:[%s1157_s18 + $0xd0] sm:$0xf]  ;;  %v927_v28 = vld [vmem:[%s1157_s18 + $0xd4] sm:$0xf0]  ;;  %v910_v29 = vld [vmem:[%s1157_s18 + $0x54] sm:$0xf]  ;;  %v809_v30 = vor.u32 %v911_v25, %v808_v24 }
  0x27   : > { %540 = vmatpush.bf16.msra.mxu0 %v817_v17  ;;  %v810_v31 = vld [vmem:[%s1157_s18 + $0x58] sm:$0xf0]  ;;  %v926_v32 = vld [vmem:[%s1157_s18 + $0xd4] sm:$0xf]  ;;  %v873_v34 = vor.u32 %v927_v28, %v872_v27  ;;  %v800_v36 = vld [vmem:[%s1157_s18 + $0x40] sm:$0xf] }
  0x28   : > { %v874_v33 = vld [vmem:[%s1157_s18 + $0xd8] sm:$0xf0]  ;;  %553 = vmatpush.bf16.msra.mxu1 %v881_v18  ;;  %566 = vmatpush.bf16.msra.mxu2 %v821_v22  ;;  %v813_v35 = vor.u32 %v910_v29, %v810_v31  ;;  %v909_v37 = vld [vmem:[%s1157_s18 + $0x44] sm:$0xf0]  ;;  %v864_v38 = vld [vmem:[%s1157_s18 + $0xc0] sm:$0xf] }
  0x29   : > { %579 = vmatpush.bf16.msra.mxu3 %v885_v26  ;;  %v877_v39 = vor.u32 %v926_v32, %v874_v33  ;;  %v925_v40 = vld [vmem:[%s1157_s18 + $0xc4] sm:$0xf0]  ;;  %v908_v41 = vld [vmem:[%s1157_s18 + $0x44] sm:$0xf]  ;;  %v802_v42 = vld [vmem:[%s1157_s18 + $0x48] sm:$0xf0]  ;;  %v801_v45 = vor.u32 %v909_v37, %v800_v36 }
  0x2a   : > { %v924_v43 = vld [vmem:[%s1157_s18 + $0xc4] sm:$0xf]  ;;  %v866_v44 = vld [vmem:[%s1157_s18 + $0xc8] sm:$0xf0]  ;;  %v865_v46 = vor.u32 %v925_v40, %v864_v38  ;;  %v805_v47 = vor.u32 %v908_v41, %v802_v42  ;;  %v792_v48 = vld [vmem:[%s1157_s18 + $0x30] sm:$0xf] }
  0x2b   : > { %541 = vmatpush.bf16.msra.mxu0 %v809_v30  ;;  %v907_v49 = vld [vmem:[%s1157_s18 + $0x34] sm:$0xf0]  ;;  %v856_v50 = vld [vmem:[%s1157_s18 + $0xb0] sm:$0xf]  ;;  %v869_v51 = vor.u32 %v924_v43, %v866_v44  ;;  %v906_v53 = vld [vmem:[%s1157_s18 + $0x34] sm:$0xf] }
  0x2c   : > { %554 = vmatpush.bf16.msra.mxu1 %v873_v34  ;;  %567 = vmatpush.bf16.msra.mxu2 %v813_v35  ;;  %v923_v52 = vld [vmem:[%s1157_s18 + $0xb4] sm:$0xf0]  ;;  %v794_v54 = vld [vmem:[%s1157_s18 + $0x38] sm:$0xf0]  ;;  %v922_v55 = vld [vmem:[%s1157_s18 + $0xb4] sm:$0xf]  ;;  %v793_v57 = vor.u32 %v907_v49, %v792_v48 }
  0x2d   : > { %580 = vmatpush.bf16.msra.mxu3 %v877_v39  ;;  %v858_v56 = vld [vmem:[%s1157_s18 + $0xb8] sm:$0xf0]  ;;  %v857_v58 = vor.u32 %v923_v52, %v856_v50  ;;  %v797_v59 = vor.u32 %v906_v53, %v794_v54  ;;  %v784_v60 = vld [vmem:[%s1157_s18 + $0x20] sm:$0xf]  ;;  %v905_v61 = vld [vmem:[%s1157_s18 + $0x24] sm:$0xf0] }
  0x2e   : > { %v848_v62 = vld [vmem:[%s1157_s18 + $0xa0] sm:$0xf]  ;;  %v861_v63 = vor.u32 %v922_v55, %v858_v56  ;;  %v921_v0 = vld [vmem:[%s1157_s18 + $0xa4] sm:$0xf0]  ;;  %v904_v1 = vld [vmem:[%s1157_s18 + $0x24] sm:$0xf]  ;;  %v785_v5 = vor.u32 %v905_v61, %v784_v60 }
  0x2f   : > { %542 = vmatpush.bf16.msra.mxu0 %v801_v45  ;;  %v786_v2 = vld [vmem:[%s1157_s18 + $0x28] sm:$0xf0]  ;;  %v920_v3 = vld [vmem:[%s1157_s18 + $0xa4] sm:$0xf]  ;;  %v849_v6 = vor.u32 %v921_v0, %v848_v62  ;;  %v776_v8 = vld [vmem:[%s1157_s18 + $0x10] sm:$0xf] }
  0x30   : > { %555 = vmatpush.bf16.msra.mxu1 %v865_v46  ;;  %568 = vmatpush.bf16.msra.mxu2 %v805_v47  ;;  %v850_v4 = vld [vmem:[%s1157_s18 + $0xa8] sm:$0xf0]  ;;  %v789_v7 = vor.u32 %v904_v1, %v786_v2  ;;  %v903_v9 = vld [vmem:[%s1157_s18 + $0x14] sm:$0xf0]  ;;  %v840_v10 = vld [vmem:[%s1157_s18 + $0x90] sm:$0xf] }
  0x31   : > { %581 = vmatpush.bf16.msra.mxu3 %v869_v51  ;;  %v853_v11 = vor.u32 %v920_v3, %v850_v4  ;;  %v919_v12 = vld [vmem:[%s1157_s18 + $0x94] sm:$0xf0]  ;;  %v902_v13 = vld [vmem:[%s1157_s18 + $0x14] sm:$0xf]  ;;  %v778_v14 = vld [vmem:[%s1157_s18 + $0x18] sm:$0xf0]  ;;  %v777_v17 = vor.u32 %v903_v9, %v776_v8 }
  0x32   : > { %v918_v15 = vld [vmem:[%s1157_s18 + $0x94] sm:$0xf]  ;;  %v842_v16 = vld [vmem:[%s1157_s18 + $0x98] sm:$0xf0]  ;;  %v339_v18 = vld [vmem:[%s1152_s11] sm:$0xff]  ;;  %v841_v19 = vor.u32 %v919_v12, %v840_v10  ;;  %v781_v20 = vor.u32 %v902_v13, %v778_v14  ;;  %p894_p10 = scmp.ne.s32.totalorder %s1060_s15, 8 }
  0x33   : > { %543 = vmatpush.bf16.msra.mxu0 %v793_v57  ;;  %v768_v21 = vld [vmem:[%s1157_s18] sm:$0xf]  ;;  %v901_v22 = vld [vmem:[%s1157_s18 + $0x4] sm:$0xf0]  ;;  %v845_v24 = vor.u32 %v918_v15, %v842_v16  ;;  %v900_v26 = vld [vmem:[%s1157_s18 + $0x4] sm:$0xf]  ;;  %v373_v30 = vunpack.c.l.b16 %v339_v18  ;;  %v374_v32 = vunpack.c.h.b16 %v339_v18 }
  0x34   : > { %556 = vmatpush.bf16.msra.mxu1 %v857_v58  ;;  %569 = vmatpush.bf16.msra.mxu2 %v797_v59  ;;  %v832_v23 = vld [vmem:[%s1157_s18 + $0x80] sm:$0xf]  ;;  %v917_v25 = vld [vmem:[%s1157_s18 + $0x84] sm:$0xf0]  ;;  %v770_v27 = vld [vmem:[%s1157_s18 + $0x8] sm:$0xf0]  ;;  %v769_v31 = vor.u32 %v901_v22, %v768_v21 }
  0x35   : > { %582 = vmatpush.bf16.msra.mxu3 %v861_v63  ;;  %v916_v28 = vld [vmem:[%s1157_s18 + $0x84] sm:$0xf]  ;;  %v834_v29 = vld [vmem:[%s1157_s18 + $0x88] sm:$0xf0]  ;;  %v833_v33 = vor.u32 %v917_v25, %v832_v23  ;;  %v773_v34 = vor.u32 %v900_v26, %v770_v27  ;;  %v375_v36 = vpack.c.b16 %v373_v30, %v373_v30  ;;  %v376_v37 = vpack.c.b16 %v374_v32, %v374_v32 }
  0x36   : > { %v837_v35 = vor.u32 %v916_v28, %v834_v29  ;;  %v337_v39 = vld [vmem:[#allocation2] sm:$0xff]  ;;  %v338_v44 = vld [vmem:[#allocation2 + $0x8] sm:$0xff] }
  0x37   : > { %544 = vmatpush.bf16.msra.mxu0 %v785_v5 }
  0x38   : > { %557 = vmatpush.bf16.msra.mxu1 %v849_v6  ;;  %570 = vmatpush.bf16.msra.mxu2 %v789_v7 }
  0x39   : > { %583 = vmatpush.bf16.msra.mxu3 %v853_v11 }
  0x3b   : > { %545 = vmatpush.bf16.msra.mxu0 %v777_v17 }
  0x3c   : > { %558 = vmatpush.bf16.msra.mxu1 %v841_v19  ;;  %571 = vmatpush.bf16.msra.mxu2 %v781_v20 }
  0x3d   : > { %584 = vmatpush.bf16.msra.mxu3 %v845_v24 }
  0x3f   : > { %546 = vmatpush.bf16.msra.mxu0 %v769_v31 }
  0x40   : > { %559 = vmatpush.bf16.msra.mxu1 %v833_v33  ;;  %572 = vmatpush.bf16.msra.mxu2 %v773_v34 }
  0x41   : > { %585 = vmatpush.bf16.msra.mxu3 %v837_v35 }
  0x42   : > { %547 = vmatmul.bf16.vlgmr.msra.gmra.mxu0 %v375_v36 }
  0x43   : > { %560 = vmatmul.bf16.vlgmr.msra.gmra.mxu1 %v376_v37  ;;  %573 = vmatmul.bf16.vlgmr.msra.gmra.mxu2 %v375_v36 }
  0x44   : > { %586 = vmatmul.bf16.vlgmr.msra.gmra.mxu3 %v376_v37 }
  0xbf   : > { %v548_v38 = vpop.f32.mrf.mxu0 }
  0xc0   : > { %v561_v40 = vpop.f32.mrf.mxu1 }
  0xc1   : > { %v562_v41 = vadd.f32 %v561_v40, %v548_v38 }
  0xc3   : > { %v591_v42 = vadd.f32 %v562_v41, %v337_v39 }
  0xc5   : > { %593 = vst [vmem:[#allocation2] sm:$0xff] %v591_v42 }
  0xc6   : > { %v574_v43 = vpop.f32.mrf.mxu2 }
  0xc7   : > { %v587_v45 = vpop.f32.mrf.mxu3  ;;  %v550_v46 = vpop.f32.mrf.mxu0 }
  0xc8   : > { %v588_v47 = vadd.f32 %v587_v45, %v574_v43  ;;  %v563_v48 = vpop.f32.mrf.mxu1 }
  0xca   : > { %v592_v49 = vadd.f32 %v588_v47, %v338_v44 }
  0xcb   : > { %598 = sbr.rel (%p894_p10) target bundleno = 219 (0xdb), region = 52 }
  0xcc   : > { %594 = vst [vmem:[#allocation2 + $0x8] sm:$0xff] %v592_v49 }
  0xce   : > { %v576_v50 = vpop.f32.mrf.mxu2 }
  0xcf   : > { %v589_v51 = vpop.f32.mrf.mxu3 }
  0xd0   : > { %v599_v52 = vld [vmem:[#allocation2] sm:$0xff]  ;;  %v601_v53 = vld [vmem:[#allocation3] sm:$0x3]  ;;  %v609_v54 = vld [vmem:[#allocation5] sm:$0x3] }
  0xd1   : > { %v603_v55 = vperm.slane %v601_v53, 0  ;;  %v611_v56 = vperm.slane %v609_v54, 0  ;;  %v604_v58 = vperm.slane %v601_v53, 1  ;;  %v612_v59 = vperm.slane %v609_v54, 1 }
  0xd3   : > { %v600_v57 = vld [vmem:[#allocation2 + $0x8] sm:$0xff]  ;;  %v607_v60 = vmul.f32 %v603_v55, %v599_v52 }
  0xd4   : > { %v608_v61 = vmul.f32 %v604_v58, %v600_v57 }
  0xd5   : > { %v615_v62 = vadd.f32 %v611_v56, %v607_v60 }
  0xd6   : > { %v616_v63 = vadd.f32 %v612_v59, %v608_v61 }
  0xd7   : > { %v617_v0 = vmax.f32 %v615_v62, 0.0 }
  0xd8   : > { %v618_v1 = vmax.f32 %v616_v63, 0.0 }
  0xd9   : > { %619 = vst [vmem:[%s1245_s4] sm:$0xff] %v617_v0 }
  0xda   : > { %620 = vst [vmem:[%s1245_s4 + $0x8] sm:$0xff] %v618_v1 }
  0xdb PF: > { %s16_s17 = sadd.s32 1, %s1068_s17   ;;  %s1248_s15 = smov %s1064_s16 }
  0xdc   : > { %p13_p11 = scmp.ge.s32.totalorder %s16_s17, 11   ;;  %s1249_s16 = smov %s1251_s19 }
  0xde   :  { %15 = sbr.rel (!%p13_p11) target bundleno = 3 (0x3), region = 88 }
  0xe3   :  { %651 = vsyncpa [#allocation4], 1 }
  0xe4   :  { %653 = vsyncpa [#allocation4 + $0x1], 1 }
  0xe5   :  { %654 = vsyncpa [#allocation6], 1 }

// kernel: _lambda_.36
= control target key start
LH: loop header
LB: loop body
LE: loop exit
PB: predicated region body
PF: predicated region fallthrough
CT: control target
= control target key end

     0   :  { %10 = vsyncpa [#allocation4], 0  ;;  %s1341_s0 = inlined_call_operand.vmem [shape: bf16[8,2304], index: 0, kind: input, shape index: {}]   ;;  %s1342_s1 = inlined_call_operand.vmem [shape: bf16[2304,256], index: 1, kind: input, shape index: {}]   ;;  %s1343_s2 = inlined_call_operand.hbm [shape: f32[1,256], index: 2, kind: input, shape index: {}]   ;;  %s1344_s3 = inlined_call_operand.hbm [shape: f32[1,256], index: 3, kind: input, shape index: {}]   ;;  %s1345_s4 = inlined_call_operand.vmem [shape: f32[8,256], index: 4, kind: input, shape index: {}]   ;;  %s1346_s5 = inlined_call_operand.vmem [shape: f32[8,256], index: 5, kind: output, shape index: {}]  }
   0x1   :  { %11 = vsyncpa [#allocation6], 0  ;;  %s1192_s18 = smov 0   ;;  %s1194_s19 = smov 0  }
   0x2   :  { %s1196_s20 = smov 0  }
   0x3 LB: > { %s840_s21 = sadd.s32 4294967295, %s1157_s20   ;;  %s29_s22 = sadd.s32 1, %s1153_s19  ;;  %s1157_s20 = sphi %s1196_s20, %s17_s20   ;;  %s1153_s19 = sphi %s1194_s19, %s1350_s19   ;;  %s1149_s18 = sphi %s1192_s18, %s1349_s18  }
   0x4   : > { %p30_p0 = scmp.ge.s32.totalorder %s29_s22, 9  ;;  %p841_p1 = scmp.ge.s32.totalorder %s1157_s20, 1 }
   0x5   : > { %p205_p2 = scmp.lt.s32.totalorder %s1157_s20, 10  ;;  %p1217_p4 = scmp.eq.s32.totalorder %s840_s21, 0 }
   0x6   : > { %s1352_s22 = smov (%p30_p0, %s29_s22), 0  ;;  %s219_s27 = sshll.u32 %s1343_s2, 4  ;;  %s220_s27 = int_to_ptr.hbm [resolvable:$true] %s219_s27 }
   0x7   : > { %p1213_p3 = pnand %p841_p1, %p205_p2  ;;  %s1159_s28 = smov [#allocation3]  }
   0x8   : > { %s221_s29 = sshll.u32 %s1159_s28, 4  ;;  %s233_s7 = sshll.u32 %s1344_s3, 4  ;;  %s222_s29 = int_to_ptr.vmem [resolvable:$true] %s221_s29  ;;  %s234_s7 = int_to_ptr.hbm [resolvable:$true] %s233_s7 }
   0x9   : > { %p1029_p5 = pneg %p1213_p3  ;;  %s1160_s8 = smov [#allocation5]  }
   0xa   : > { %s235_s9 = sshll.u32 %s1160_s8, 4  ;;  %289 = sbr.rel (%p1213_p3) target bundleno = 221 (0xdd), region = 40  ;;  %s236_s9 = int_to_ptr.vmem [resolvable:$true] %s235_s9 }
   0xb   : > { %p1030_p6 = pnand %p1217_p4, %p1029_p5 }
   0xd   : > { %1032 = dma.hbm_to_vmem [thread:$0]  (!%p1030_p6), %s220_s27, 32, %s222_s29, [#allocation4]  }
   0xe   : > { %1035 = dma.hbm_to_vmem [thread:$0]  (!%p1030_p6), %s234_s7, 32, %s236_s9, [#allocation6]  }
   0xf   : > { %1140 = dma.done.wait (%p1217_p4), [#allocation4], 32  }
  0x10   : > { %1142 = vsyncadd (%p1217_p4), [#allocation4], 4294967264 }
  0x11   : > { %1144 = dma.done.wait (%p1217_p4), [#allocation6], 32  }
  0x12   : > { %1146 = vsyncadd (%p1217_p4), [#allocation6], 4294967264  ;;  %s849_s10 = sshll.u32 %s1149_s18, 1  ;;  %s851_s11 = sshll.u32 %s1149_s18, 5 }
  0x13   : > { %p353_p7 = scmp.lt.s32.totalorder %s849_s10, 17  ;;  %p362_p8 = scmp.lt.s32.totalorder %s851_s11, 287 }
  0x14   : > { %p854_p9 = scmp.ne.s32.totalorder %s1149_s18, 0 }
  0x15   : > { %s1354_s10 = smov (!%p353_p7, %s849_s10), 17  ;;  %s1356_s11 = smov (!%p362_p8, %s851_s11), 287 }
  0x16   : > { %s850_s12 = sshll.u32 %s1354_s10, 2  ;;  %s988_s16 = sshll.u32 %s1356_s11, 3 }
  0x17   : > { %s1246_s15 = scalar_lea.vmem %s1341_s0, %s850_s12  ;;  %s1251_s23 = scalar_lea.vmem %s1342_s1, %s988_s16 }
  0x18   : > { %397 = sbr.rel (%p854_p9) target bundleno = 32 (0x20), region = 52 }
  0x1d   : > { %v1161_v0 = vmov 0.0  }
  0x1e   : > { %398 = vst [vmem:[#allocation2] sm:$0xff] %v1161_v0 }
  0x1f   : > { %399 = vst [vmem:[#allocation2 + $0x8] sm:$0xff] %v1161_v0 }
  0x20 PF: > { %v913_v1 = vld [vmem:[%s1251_s23 + $0x70] sm:$0xf]  ;;  %v1004_v2 = vld [vmem:[%s1251_s23 + $0x74] sm:$0xf0]  ;;  %v1003_v6 = vld [vmem:[%s1251_s23 + $0x74] sm:$0xf] }
  0x21   : > { %v977_v3 = vld [vmem:[%s1251_s23 + $0xf0] sm:$0xf]  ;;  %v914_v4 = vor.u32 %v1004_v2, %v913_v1  ;;  %v1020_v5 = vld [vmem:[%s1251_s23 + $0xf4] sm:$0xf0]  ;;  %v915_v7 = vld [vmem:[%s1251_s23 + $0x78] sm:$0xf0] }
  0x22   : > { %v978_v8 = vor.u32 %v1020_v5, %v977_v3  ;;  %v918_v9 = vor.u32 %v1003_v6, %v915_v7  ;;  %v1019_v10 = vld [vmem:[%s1251_s23 + $0xf4] sm:$0xf]  ;;  %v979_v11 = vld [vmem:[%s1251_s23 + $0xf8] sm:$0xf0]  ;;  %v905_v12 = vld [vmem:[%s1251_s23 + $0x60] sm:$0xf] }
  0x23   : > { %602 = vmatpush.bf16.msra.mxu0 %v914_v4  ;;  %v982_v13 = vor.u32 %v1019_v10, %v979_v11  ;;  %v1002_v14 = vld [vmem:[%s1251_s23 + $0x64] sm:$0xf0]  ;;  %v969_v15 = vld [vmem:[%s1251_s23 + $0xe0] sm:$0xf]  ;;  %v1001_v19 = vld [vmem:[%s1251_s23 + $0x64] sm:$0xf] }
  0x24   : > { %v1018_v16 = vld [vmem:[%s1251_s23 + $0xe4] sm:$0xf0]  ;;  %615 = vmatpush.bf16.msra.mxu1 %v978_v8  ;;  %628 = vmatpush.bf16.msra.mxu2 %v918_v9  ;;  %v906_v17 = vor.u32 %v1002_v14, %v905_v12  ;;  %v907_v20 = vld [vmem:[%s1251_s23 + $0x68] sm:$0xf0]  ;;  %v1017_v21 = vld [vmem:[%s1251_s23 + $0xe4] sm:$0xf] }
  0x25   : > { %v970_v18 = vor.u32 %v1018_v16, %v969_v15  ;;  %641 = vmatpush.bf16.msra.mxu3 %v982_v13  ;;  %v910_v22 = vor.u32 %v1001_v19, %v907_v20  ;;  %v971_v23 = vld [vmem:[%s1251_s23 + $0xe8] sm:$0xf0]  ;;  %v897_v24 = vld [vmem:[%s1251_s23 + $0x50] sm:$0xf]  ;;  %v1000_v25 = vld [vmem:[%s1251_s23 + $0x54] sm:$0xf0] }
  0x26   : > { %v974_v26 = vor.u32 %v1017_v21, %v971_v23  ;;  %v961_v27 = vld [vmem:[%s1251_s23 + $0xd0] sm:$0xf]  ;;  %v1016_v28 = vld [vmem:[%s1251_s23 + $0xd4] sm:$0xf0]  ;;  %v999_v29 = vld [vmem:[%s1251_s23 + $0x54] sm:$0xf]  ;;  %v898_v30 = vor.u32 %v1000_v25, %v897_v24 }
  0x27   : > { %603 = vmatpush.bf16.msra.mxu0 %v906_v17  ;;  %v899_v31 = vld [vmem:[%s1251_s23 + $0x58] sm:$0xf0]  ;;  %v1015_v32 = vld [vmem:[%s1251_s23 + $0xd4] sm:$0xf]  ;;  %v962_v34 = vor.u32 %v1016_v28, %v961_v27  ;;  %v889_v36 = vld [vmem:[%s1251_s23 + $0x40] sm:$0xf] }
  0x28   : > { %v963_v33 = vld [vmem:[%s1251_s23 + $0xd8] sm:$0xf0]  ;;  %616 = vmatpush.bf16.msra.mxu1 %v970_v18  ;;  %629 = vmatpush.bf16.msra.mxu2 %v910_v22  ;;  %v902_v35 = vor.u32 %v999_v29, %v899_v31  ;;  %v998_v37 = vld [vmem:[%s1251_s23 + $0x44] sm:$0xf0]  ;;  %v953_v38 = vld [vmem:[%s1251_s23 + $0xc0] sm:$0xf] }
  0x29   : > { %642 = vmatpush.bf16.msra.mxu3 %v974_v26  ;;  %v966_v39 = vor.u32 %v1015_v32, %v963_v33  ;;  %v1014_v40 = vld [vmem:[%s1251_s23 + $0xc4] sm:$0xf0]  ;;  %v997_v41 = vld [vmem:[%s1251_s23 + $0x44] sm:$0xf]  ;;  %v891_v42 = vld [vmem:[%s1251_s23 + $0x48] sm:$0xf0]  ;;  %v890_v45 = vor.u32 %v998_v37, %v889_v36 }
  0x2a   : > { %v1013_v43 = vld [vmem:[%s1251_s23 + $0xc4] sm:$0xf]  ;;  %v955_v44 = vld [vmem:[%s1251_s23 + $0xc8] sm:$0xf0]  ;;  %v954_v46 = vor.u32 %v1014_v40, %v953_v38  ;;  %v894_v47 = vor.u32 %v997_v41, %v891_v42  ;;  %v881_v48 = vld [vmem:[%s1251_s23 + $0x30] sm:$0xf] }
  0x2b   : > { %604 = vmatpush.bf16.msra.mxu0 %v898_v30  ;;  %v996_v49 = vld [vmem:[%s1251_s23 + $0x34] sm:$0xf0]  ;;  %v945_v50 = vld [vmem:[%s1251_s23 + $0xb0] sm:$0xf]  ;;  %v958_v51 = vor.u32 %v1013_v43, %v955_v44  ;;  %v995_v53 = vld [vmem:[%s1251_s23 + $0x34] sm:$0xf] }
  0x2c   : > { %617 = vmatpush.bf16.msra.mxu1 %v962_v34  ;;  %630 = vmatpush.bf16.msra.mxu2 %v902_v35  ;;  %v1012_v52 = vld [vmem:[%s1251_s23 + $0xb4] sm:$0xf0]  ;;  %v883_v54 = vld [vmem:[%s1251_s23 + $0x38] sm:$0xf0]  ;;  %v1011_v55 = vld [vmem:[%s1251_s23 + $0xb4] sm:$0xf]  ;;  %v882_v57 = vor.u32 %v996_v49, %v881_v48 }
  0x2d   : > { %643 = vmatpush.bf16.msra.mxu3 %v966_v39  ;;  %v947_v56 = vld [vmem:[%s1251_s23 + $0xb8] sm:$0xf0]  ;;  %v946_v58 = vor.u32 %v1012_v52, %v945_v50  ;;  %v886_v59 = vor.u32 %v995_v53, %v883_v54  ;;  %v873_v60 = vld [vmem:[%s1251_s23 + $0x20] sm:$0xf]  ;;  %v994_v61 = vld [vmem:[%s1251_s23 + $0x24] sm:$0xf0] }
  0x2e   : > { %v937_v62 = vld [vmem:[%s1251_s23 + $0xa0] sm:$0xf]  ;;  %v950_v63 = vor.u32 %v1011_v55, %v947_v56  ;;  %v1010_v0 = vld [vmem:[%s1251_s23 + $0xa4] sm:$0xf0]  ;;  %v993_v1 = vld [vmem:[%s1251_s23 + $0x24] sm:$0xf]  ;;  %v874_v5 = vor.u32 %v994_v61, %v873_v60 }
  0x2f   : > { %605 = vmatpush.bf16.msra.mxu0 %v890_v45  ;;  %v875_v2 = vld [vmem:[%s1251_s23 + $0x28] sm:$0xf0]  ;;  %v1009_v3 = vld [vmem:[%s1251_s23 + $0xa4] sm:$0xf]  ;;  %v938_v6 = vor.u32 %v1010_v0, %v937_v62  ;;  %v865_v8 = vld [vmem:[%s1251_s23 + $0x10] sm:$0xf] }
  0x30   : > { %618 = vmatpush.bf16.msra.mxu1 %v954_v46  ;;  %631 = vmatpush.bf16.msra.mxu2 %v894_v47  ;;  %v939_v4 = vld [vmem:[%s1251_s23 + $0xa8] sm:$0xf0]  ;;  %v878_v7 = vor.u32 %v993_v1, %v875_v2  ;;  %v992_v9 = vld [vmem:[%s1251_s23 + $0x14] sm:$0xf0]  ;;  %v929_v10 = vld [vmem:[%s1251_s23 + $0x90] sm:$0xf] }
  0x31   : > { %644 = vmatpush.bf16.msra.mxu3 %v958_v51  ;;  %v942_v11 = vor.u32 %v1009_v3, %v939_v4  ;;  %v1008_v12 = vld [vmem:[%s1251_s23 + $0x94] sm:$0xf0]  ;;  %v991_v13 = vld [vmem:[%s1251_s23 + $0x14] sm:$0xf]  ;;  %v867_v14 = vld [vmem:[%s1251_s23 + $0x18] sm:$0xf0]  ;;  %v866_v17 = vor.u32 %v992_v9, %v865_v8 }
  0x32   : > { %v1007_v15 = vld [vmem:[%s1251_s23 + $0x94] sm:$0xf]  ;;  %v931_v16 = vld [vmem:[%s1251_s23 + $0x98] sm:$0xf0]  ;;  %v402_v18 = vld [vmem:[%s1246_s15] sm:$0xff]  ;;  %v930_v19 = vor.u32 %v1008_v12, %v929_v10  ;;  %v870_v20 = vor.u32 %v991_v13, %v867_v14  ;;  %p983_p10 = scmp.ne.s32.totalorder %s1149_s18, 8 }
  0x33   : > { %606 = vmatpush.bf16.msra.mxu0 %v882_v57  ;;  %v857_v21 = vld [vmem:[%s1251_s23] sm:$0xf]  ;;  %v990_v22 = vld [vmem:[%s1251_s23 + $0x4] sm:$0xf0]  ;;  %v934_v24 = vor.u32 %v1007_v15, %v931_v16  ;;  %v989_v26 = vld [vmem:[%s1251_s23 + $0x4] sm:$0xf]  ;;  %v436_v30 = vunpack.c.l.b16 %v402_v18  ;;  %v437_v32 = vunpack.c.h.b16 %v402_v18 }
  0x34   : > { %619 = vmatpush.bf16.msra.mxu1 %v946_v58  ;;  %632 = vmatpush.bf16.msra.mxu2 %v886_v59  ;;  %v921_v23 = vld [vmem:[%s1251_s23 + $0x80] sm:$0xf]  ;;  %v1006_v25 = vld [vmem:[%s1251_s23 + $0x84] sm:$0xf0]  ;;  %v859_v27 = vld [vmem:[%s1251_s23 + $0x8] sm:$0xf0]  ;;  %v858_v31 = vor.u32 %v990_v22, %v857_v21 }
  0x35   : > { %645 = vmatpush.bf16.msra.mxu3 %v950_v63  ;;  %v1005_v28 = vld [vmem:[%s1251_s23 + $0x84] sm:$0xf]  ;;  %v923_v29 = vld [vmem:[%s1251_s23 + $0x88] sm:$0xf0]  ;;  %v922_v33 = vor.u32 %v1006_v25, %v921_v23  ;;  %v862_v34 = vor.u32 %v989_v26, %v859_v27  ;;  %v438_v36 = vpack.c.b16 %v436_v30, %v436_v30  ;;  %v439_v37 = vpack.c.b16 %v437_v32, %v437_v32 }
  0x36   : > { %v926_v35 = vor.u32 %v1005_v28, %v923_v29  ;;  %v400_v39 = vld [vmem:[#allocation2] sm:$0xff]  ;;  %v401_v44 = vld [vmem:[#allocation2 + $0x8] sm:$0xff] }
  0x37   : > { %607 = vmatpush.bf16.msra.mxu0 %v874_v5 }
  0x38   : > { %620 = vmatpush.bf16.msra.mxu1 %v938_v6  ;;  %633 = vmatpush.bf16.msra.mxu2 %v878_v7 }
  0x39   : > { %646 = vmatpush.bf16.msra.mxu3 %v942_v11 }
  0x3b   : > { %608 = vmatpush.bf16.msra.mxu0 %v866_v17 }
  0x3c   : > { %621 = vmatpush.bf16.msra.mxu1 %v930_v19  ;;  %634 = vmatpush.bf16.msra.mxu2 %v870_v20 }
  0x3d   : > { %647 = vmatpush.bf16.msra.mxu3 %v934_v24 }
  0x3f   : > { %609 = vmatpush.bf16.msra.mxu0 %v858_v31 }
  0x40   : > { %622 = vmatpush.bf16.msra.mxu1 %v922_v33  ;;  %635 = vmatpush.bf16.msra.mxu2 %v862_v34 }
  0x41   : > { %648 = vmatpush.bf16.msra.mxu3 %v926_v35 }
  0x42   : > { %610 = vmatmul.bf16.vlgmr.msra.gmra.mxu0 %v438_v36 }
  0x43   : > { %623 = vmatmul.bf16.vlgmr.msra.gmra.mxu1 %v439_v37  ;;  %636 = vmatmul.bf16.vlgmr.msra.gmra.mxu2 %v438_v36 }
  0x44   : > { %649 = vmatmul.bf16.vlgmr.msra.gmra.mxu3 %v439_v37 }
  0xbf   : > { %v611_v38 = vpop.f32.mrf.mxu0 }
  0xc0   : > { %v624_v40 = vpop.f32.mrf.mxu1 }
  0xc1   : > { %v625_v41 = vadd.f32 %v624_v40, %v611_v38 }
  0xc3   : > { %v654_v42 = vadd.f32 %v625_v41, %v400_v39 }
  0xc5   : > { %656 = vst [vmem:[#allocation2] sm:$0xff] %v654_v42 }
  0xc6   : > { %v637_v43 = vpop.f32.mrf.mxu2 }
  0xc7   : > { %v650_v45 = vpop.f32.mrf.mxu3  ;;  %v613_v46 = vpop.f32.mrf.mxu0 }
  0xc8   : > { %v651_v47 = vadd.f32 %v650_v45, %v637_v43  ;;  %v626_v48 = vpop.f32.mrf.mxu1 }
  0xca   : > { %v655_v49 = vadd.f32 %v651_v47, %v401_v44 }
  0xcb   : > { %661 = sbr.rel (%p983_p10) target bundleno = 221 (0xdd), region = 56 }
  0xcc   : > { %657 = vst [vmem:[#allocation2 + $0x8] sm:$0xff] %v655_v49 }
  0xce   : > { %v639_v50 = vpop.f32.mrf.mxu2 }
  0xcf   : > { %v652_v51 = vpop.f32.mrf.mxu3 }
  0xd0   : > { %v662_v52 = vld [vmem:[#allocation2] sm:$0xff]  ;;  %v664_v53 = vld [vmem:[#allocation3] sm:$0x3]  ;;  %v672_v54 = vld [vmem:[#allocation5] sm:$0x3] }
  0xd1   : > { %v666_v55 = vperm.slane %v664_v53, 0  ;;  %v674_v56 = vperm.slane %v672_v54, 0  ;;  %v667_v58 = vperm.slane %v664_v53, 1  ;;  %v675_v59 = vperm.slane %v672_v54, 1  ;;  %v680_v62 = vld [vmem:[%s1345_s4] sm:$0xff]  ;;  %v681_v63 = vld [vmem:[%s1345_s4 + $0x8] sm:$0xff] }
  0xd3   : > { %v663_v57 = vld [vmem:[#allocation2 + $0x8] sm:$0xff]  ;;  %v670_v60 = vmul.f32 %v666_v55, %v662_v52 }
  0xd4   : > { %v671_v61 = vmul.f32 %v667_v58, %v663_v57 }
  0xd5   : > { %v678_v0 = vadd.f32 %v674_v56, %v670_v60 }
  0xd6   : > { %v679_v1 = vadd.f32 %v675_v59, %v671_v61 }
  0xd7   : > { %v682_v2 = vadd.f32 %v680_v62, %v678_v0 }
  0xd8   : > { %v683_v3 = vadd.f32 %v681_v63, %v679_v1 }
  0xd9   : > { %v684_v4 = vmax.f32 %v682_v2, 0.0 }
  0xda   : > { %v685_v5 = vmax.f32 %v683_v3, 0.0 }
  0xdb   : > { %686 = vst [vmem:[%s1346_s5] sm:$0xff] %v684_v4 }
  0xdc   : > { %687 = vst [vmem:[%s1346_s5 + $0x8] sm:$0xff] %v685_v5 }
  0xdd PF: > { %s17_s20 = sadd.s32 1, %s1157_s20   ;;  %s1349_s18 = smov %s1153_s19 }
  0xde   : > { %p14_p11 = scmp.ge.s32.totalorder %s17_s20, 11   ;;  %s1350_s19 = smov %s1352_s22 }
  0xe0   :  { %16 = sbr.rel (!%p14_p11) target bundleno = 3 (0x3), region = 95 }
  0xe5   :  { %718 = vsyncpa [#allocation4], 1 }
  0xe6   :  { %720 = vsyncpa [#allocation4 + $0x1], 1 }
  0xe7   :  { %721 = vsyncpa [#allocation6], 1 }

// kernel: _lambda_.39
= control target key start
LH: loop header
LB: loop body
LE: loop exit
PB: predicated region body
PF: predicated region fallthrough
CT: control target
= control target key end

     0   :  { %9 = vsyncpa [#allocation4], 0  ;;  %s1753_s0 = inlined_call_operand.vmem [shape: bf16[8,2304], index: 0, kind: input, shape index: {}]   ;;  %s1754_s1 = inlined_call_operand.vmem [shape: bf16[2304,512], index: 1, kind: input, shape index: {}]   ;;  %s1755_s2 = inlined_call_operand.hbm [shape: f32[1,512], index: 2, kind: input, shape index: {}]   ;;  %s1756_s3 = inlined_call_operand.hbm [shape: f32[1,512], index: 3, kind: input, shape index: {}]   ;;  %s1757_s4 = inlined_call_operand.vmem [shape: f32[8,512], index: 4, kind: output, shape index: {}]  }
   0x1   :  { %10 = vsyncpa [#allocation6], 0  ;;  %s1528_s15 = smov 0   ;;  %s1530_s16 = smov 0  }
   0x2   :  { %s1532_s17 = smov 0  }
   0x3 LB: > { %s1022_s18 = sadd.s32 4294967295, %s1498_s17   ;;  %s28_s19 = sadd.s32 1, %s1494_s16  ;;  %s1498_s17 = sphi %s1532_s17, %s16_s17   ;;  %s1494_s16 = sphi %s1530_s16, %s1761_s16   ;;  %s1490_s15 = sphi %s1528_s15, %s1760_s15  }
   0x4   : > { %p29_p0 = scmp.ge.s32.totalorder %s28_s19, 9  ;;  %p1023_p1 = scmp.ge.s32.totalorder %s1498_s17, 1 }
   0x5   : > { %p176_p2 = scmp.lt.s32.totalorder %s1498_s17, 10  ;;  %p1553_p4 = scmp.eq.s32.totalorder %s1022_s18, 0 }
   0x6   : > { %s1763_s19 = smov (%p29_p0, %s28_s19), 0  ;;  %s190_s24 = sshll.u32 %s1755_s2, 4  ;;  %s191_s24 = int_to_ptr.hbm [resolvable:$true] %s190_s24 }
   0x7   : > { %p1549_p3 = pnand %p1023_p1, %p176_p2  ;;  %s1500_s25 = smov [#allocation3]  }
   0x8   : > { %s192_s26 = sshll.u32 %s1500_s25, 4  ;;  %s204_s29 = sshll.u32 %s1756_s3, 4  ;;  %s193_s26 = int_to_ptr.vmem [resolvable:$true] %s192_s26  ;;  %s205_s29 = int_to_ptr.hbm [resolvable:$true] %s204_s29 }
   0x9   : > { %p1370_p5 = pneg %p1549_p3  ;;  %s1501_s30 = smov [#allocation5]  }
   0xa   : > { %s206_s5 = sshll.u32 %s1501_s30, 4  ;;  %247 = sbr.rel (%p1549_p3) target bundleno = 255 (0xff), region = 36  ;;  %s207_s5 = int_to_ptr.vmem [resolvable:$true] %s206_s5 }
   0xb   : > { %p1371_p6 = pnand %p1553_p4, %p1370_p5 }
   0xd   : > { %1373 = dma.hbm_to_vmem [thread:$0]  (!%p1371_p6), %s191_s24, 64, %s193_s26, [#allocation4]  }
   0xe   : > { %1376 = dma.hbm_to_vmem [thread:$0]  (!%p1371_p6), %s205_s29, 64, %s207_s5, [#allocation6]  }
   0xf   : > { %1481 = dma.done.wait (%p1553_p4), [#allocation4], 64  }
  0x10   : > { %1483 = vsyncadd (%p1553_p4), [#allocation4], 4294967232 }
  0x11   : > { %1485 = dma.done.wait (%p1553_p4), [#allocation6], 64  }
  0x12   : > { %1487 = vsyncadd (%p1553_p4), [#allocation6], 4294967232  ;;  %s1030_s6 = sshll.u32 %s1490_s15, 1  ;;  %s1032_s7 = sshll.u32 %s1490_s15, 5 }
  0x13   : > { %p300_p7 = scmp.lt.s32.totalorder %s1030_s6, 17  ;;  %p309_p8 = scmp.lt.s32.totalorder %s1032_s7, 287 }
  0x14   : > { %p1035_p9 = scmp.ne.s32.totalorder %s1490_s15, 0 }
  0x15   : > { %s1765_s6 = smov (!%p300_p7, %s1030_s6), 17  ;;  %s1767_s7 = smov (!%p309_p8, %s1032_s7), 287 }
  0x16   : > { %s1031_s8 = sshll.u32 %s1765_s6, 2  ;;  %s1297_s12 = sshll.u32 %s1767_s7, 4 }
  0x17   : > { %s1582_s11 = scalar_lea.vmem %s1753_s0, %s1031_s8  ;;  %s1587_s18 = scalar_lea.vmem %s1754_s1, %s1297_s12 }
  0x18   : > { %334 = sbr.rel (%p1035_p9) target bundleno = 34 (0x22), region = 48 }
  0x1d   : > { %v1502_v0 = vmov 0.0  }
  0x1e   : > { %335 = vst [vmem:[#allocation2 + $0x10] sm:$0xff] %v1502_v0 }
  0x1f   : > { %336 = vst [vmem:[#allocation2] sm:$0xff] %v1502_v0 }
  0x20   : > { %337 = vst [vmem:[#allocation2 + $0x18] sm:$0xff] %v1502_v0 }
  0x21   : > { %338 = vst [vmem:[#allocation2 + $0x8] sm:$0xff] %v1502_v0 }
  0x22 PF: > { %v1150_v1 = vld [vmem:[%s1587_s18 + $0xe0] sm:$0xf]  ;;  %v1328_v2 = vld [vmem:[%s1587_s18 + $0xec] sm:$0xf0]  ;;  %v1326_v6 = vld [vmem:[%s1587_s18 + $0xe4] sm:$0xf] }
  0x23   : > { %v1278_v3 = vld [vmem:[%s1587_s18 + $0x1e0] sm:$0xf]  ;;  %v1151_v4 = vor.u32 %v1328_v2, %v1150_v1  ;;  %v1360_v5 = vld [vmem:[%s1587_s18 + $0x1ec] sm:$0xf0]  ;;  %v1152_v7 = vld [vmem:[%s1587_s18 + $0xf0] sm:$0xf0] }
  0x24   : > { %v1279_v8 = vor.u32 %v1360_v5, %v1278_v3  ;;  %v1155_v9 = vor.u32 %v1326_v6, %v1152_v7  ;;  %v1358_v10 = vld [vmem:[%s1587_s18 + $0x1e4] sm:$0xf]  ;;  %v1280_v11 = vld [vmem:[%s1587_s18 + $0x1f0] sm:$0xf0]  ;;  %v1134_v12 = vld [vmem:[%s1587_s18 + $0xc0] sm:$0xf] }
  0x25   : > { %735 = vmatpush.bf16.msra.mxu0 %v1151_v4  ;;  %v1283_v13 = vor.u32 %v1358_v10, %v1280_v11  ;;  %v1324_v14 = vld [vmem:[%s1587_s18 + $0xcc] sm:$0xf0]  ;;  %v1262_v15 = vld [vmem:[%s1587_s18 + $0x1c0] sm:$0xf]  ;;  %v1322_v19 = vld [vmem:[%s1587_s18 + $0xc4] sm:$0xf] }
  0x26   : > { %v1356_v16 = vld [vmem:[%s1587_s18 + $0x1cc] sm:$0xf0]  ;;  %748 = vmatpush.bf16.msra.mxu1 %v1279_v8  ;;  %761 = vmatpush.bf16.msra.mxu2 %v1155_v9  ;;  %v1135_v17 = vor.u32 %v1324_v14, %v1134_v12  ;;  %v1136_v20 = vld [vmem:[%s1587_s18 + $0xd0] sm:$0xf0]  ;;  %v1354_v21 = vld [vmem:[%s1587_s18 + $0x1c4] sm:$0xf] }
  0x27   : > { %v1263_v18 = vor.u32 %v1356_v16, %v1262_v15  ;;  %774 = vmatpush.bf16.msra.mxu3 %v1283_v13  ;;  %v1139_v22 = vor.u32 %v1322_v19, %v1136_v20  ;;  %v1264_v23 = vld [vmem:[%s1587_s18 + $0x1d0] sm:$0xf0]  ;;  %v1118_v24 = vld [vmem:[%s1587_s18 + $0xa0] sm:$0xf]  ;;  %v1320_v25 = vld [vmem:[%s1587_s18 + $0xac] sm:$0xf0] }
  0x28   : > { %v1267_v26 = vor.u32 %v1354_v21, %v1264_v23  ;;  %v1246_v27 = vld [vmem:[%s1587_s18 + $0x1a0] sm:$0xf]  ;;  %v1352_v28 = vld [vmem:[%s1587_s18 + $0x1ac] sm:$0xf0]  ;;  %v1318_v29 = vld [vmem:[%s1587_s18 + $0xa4] sm:$0xf]  ;;  %v1119_v30 = vor.u32 %v1320_v25, %v1118_v24 }
  0x29   : > { %736 = vmatpush.bf16.msra.mxu0 %v1135_v17  ;;  %v1120_v31 = vld [vmem:[%s1587_s18 + $0xb0] sm:$0xf0]  ;;  %v1350_v32 = vld [vmem:[%s1587_s18 + $0x1a4] sm:$0xf]  ;;  %v1247_v34 = vor.u32 %v1352_v28, %v1246_v27  ;;  %v1102_v36 = vld [vmem:[%s1587_s18 + $0x80] sm:$0xf] }
  0x2a   : > { %v1248_v33 = vld [vmem:[%s1587_s18 + $0x1b0] sm:$0xf0]  ;;  %749 = vmatpush.bf16.msra.mxu1 %v1263_v18  ;;  %762 = vmatpush.bf16.msra.mxu2 %v1139_v22  ;;  %v1123_v35 = vor.u32 %v1318_v29, %v1120_v31  ;;  %v1316_v37 = vld [vmem:[%s1587_s18 + $0x8c] sm:$0xf0]  ;;  %v1230_v38 = vld [vmem:[%s1587_s18 + $0x180] sm:$0xf] }
  0x2b   : > { %775 = vmatpush.bf16.msra.mxu3 %v1267_v26  ;;  %v1251_v39 = vor.u32 %v1350_v32, %v1248_v33  ;;  %v1348_v40 = vld [vmem:[%s1587_s18 + $0x18c] sm:$0xf0]  ;;  %v1314_v41 = vld [vmem:[%s1587_s18 + $0x84] sm:$0xf]  ;;  %v1104_v42 = vld [vmem:[%s1587_s18 + $0x90] sm:$0xf0]  ;;  %v1103_v45 = vor.u32 %v1316_v37, %v1102_v36 }
  0x2c   : > { %v1346_v43 = vld [vmem:[%s1587_s18 + $0x184] sm:$0xf]  ;;  %v1232_v44 = vld [vmem:[%s1587_s18 + $0x190] sm:$0xf0]  ;;  %v1231_v46 = vor.u32 %v1348_v40, %v1230_v38  ;;  %v1107_v47 = vor.u32 %v1314_v41, %v1104_v42  ;;  %v1086_v48 = vld [vmem:[%s1587_s18 + $0x60] sm:$0xf] }
  0x2d   : > { %737 = vmatpush.bf16.msra.mxu0 %v1119_v30  ;;  %v1312_v49 = vld [vmem:[%s1587_s18 + $0x6c] sm:$0xf0]  ;;  %v1214_v50 = vld [vmem:[%s1587_s18 + $0x160] sm:$0xf]  ;;  %v1235_v51 = vor.u32 %v1346_v43, %v1232_v44  ;;  %v1310_v53 = vld [vmem:[%s1587_s18 + $0x64] sm:$0xf] }
  0x2e   : > { %750 = vmatpush.bf16.msra.mxu1 %v1247_v34  ;;  %763 = vmatpush.bf16.msra.mxu2 %v1123_v35  ;;  %v1344_v52 = vld [vmem:[%s1587_s18 + $0x16c] sm:$0xf0]  ;;  %v1088_v54 = vld [vmem:[%s1587_s18 + $0x70] sm:$0xf0]  ;;  %v1342_v55 = vld [vmem:[%s1587_s18 + $0x164] sm:$0xf]  ;;  %v1087_v57 = vor.u32 %v1312_v49, %v1086_v48 }
  0x2f   : > { %776 = vmatpush.bf16.msra.mxu3 %v1251_v39  ;;  %v1216_v56 = vld [vmem:[%s1587_s18 + $0x170] sm:$0xf0]  ;;  %v1215_v58 = vor.u32 %v1344_v52, %v1214_v50  ;;  %v1091_v59 = vor.u32 %v1310_v53, %v1088_v54  ;;  %v1070_v60 = vld [vmem:[%s1587_s18 + $0x40] sm:$0xf]  ;;  %v1308_v61 = vld [vmem:[%s1587_s18 + $0x4c] sm:$0xf0] }
  0x30   : > { %v1198_v62 = vld [vmem:[%s1587_s18 + $0x140] sm:$0xf]  ;;  %v1219_v63 = vor.u32 %v1342_v55, %v1216_v56  ;;  %v1340_v0 = vld [vmem:[%s1587_s18 + $0x14c] sm:$0xf0]  ;;  %v1306_v1 = vld [vmem:[%s1587_s18 + $0x44] sm:$0xf]  ;;  %v1071_v5 = vor.u32 %v1308_v61, %v1070_v60 }
  0x31   : > { %738 = vmatpush.bf16.msra.mxu0 %v1103_v45  ;;  %v1072_v2 = vld [vmem:[%s1587_s18 + $0x50] sm:$0xf0]  ;;  %v1338_v3 = vld [vmem:[%s1587_s18 + $0x144] sm:$0xf]  ;;  %v1199_v6 = vor.u32 %v1340_v0, %v1198_v62  ;;  %v1054_v8 = vld [vmem:[%s1587_s18 + $0x20] sm:$0xf] }
  0x32   : > { %751 = vmatpush.bf16.msra.mxu1 %v1231_v46  ;;  %764 = vmatpush.bf16.msra.mxu2 %v1107_v47  ;;  %v1200_v4 = vld [vmem:[%s1587_s18 + $0x150] sm:$0xf0]  ;;  %v1075_v7 = vor.u32 %v1306_v1, %v1072_v2  ;;  %v1304_v9 = vld [vmem:[%s1587_s18 + $0x2c] sm:$0xf0]  ;;  %v1182_v10 = vld [vmem:[%s1587_s18 + $0x120] sm:$0xf] }
  0x33   : > { %777 = vmatpush.bf16.msra.mxu3 %v1235_v51  ;;  %v1203_v11 = vor.u32 %v1338_v3, %v1200_v4  ;;  %v1336_v12 = vld [vmem:[%s1587_s18 + $0x12c] sm:$0xf0]  ;;  %v1302_v13 = vld [vmem:[%s1587_s18 + $0x24] sm:$0xf]  ;;  %v1056_v14 = vld [vmem:[%s1587_s18 + $0x30] sm:$0xf0]  ;;  %v1055_v17 = vor.u32 %v1304_v9, %v1054_v8 }
  0x34   : > { %v1334_v15 = vld [vmem:[%s1587_s18 + $0x124] sm:$0xf]  ;;  %v1184_v16 = vld [vmem:[%s1587_s18 + $0x130] sm:$0xf0]  ;;  %v1038_v18 = vld [vmem:[%s1587_s18] sm:$0xf]  ;;  %v1183_v21 = vor.u32 %v1336_v12, %v1182_v10  ;;  %v1059_v22 = vor.u32 %v1302_v13, %v1056_v14 }
  0x35   : > { %739 = vmatpush.bf16.msra.mxu0 %v1087_v57  ;;  %v1300_v19 = vld [vmem:[%s1587_s18 + $0xc] sm:$0xf0]  ;;  %v1166_v20 = vld [vmem:[%s1587_s18 + $0x100] sm:$0xf]  ;;  %v1298_v24 = vld [vmem:[%s1587_s18 + $0x4] sm:$0xf]  ;;  %v1187_v26 = vor.u32 %v1334_v15, %v1184_v16 }
  0x36   : > { %752 = vmatpush.bf16.msra.mxu1 %v1215_v58  ;;  %765 = vmatpush.bf16.msra.mxu2 %v1091_v59  ;;  %v1332_v23 = vld [vmem:[%s1587_s18 + $0x10c] sm:$0xf0]  ;;  %v1040_v25 = vld [vmem:[%s1587_s18 + $0x10] sm:$0xf0]  ;;  %v1330_v27 = vld [vmem:[%s1587_s18 + $0x104] sm:$0xf]  ;;  %v1039_v33 = vor.u32 %v1300_v19, %v1038_v18 }
  0x37   : > { %778 = vmatpush.bf16.msra.mxu3 %v1219_v63  ;;  %v1168_v28 = vld [vmem:[%s1587_s18 + $0x110] sm:$0xf0]  ;;  %v1158_v29 = vld [vmem:[%s1587_s18 + $0xe8] sm:$0xf]  ;;  %v1329_v30 = vld [vmem:[%s1587_s18 + $0xf4] sm:$0xf0]  ;;  %v1167_v38 = vor.u32 %v1332_v23, %v1166_v20  ;;  %v1043_v39 = vor.u32 %v1298_v24, %v1040_v25 }
  0x38   : > { %v1286_v31 = vld [vmem:[%s1587_s18 + $0x1e8] sm:$0xf]  ;;  %v343_v32 = vld [vmem:[%s1582_s11] sm:$0xff]  ;;  %v1361_v34 = vld [vmem:[%s1587_s18 + $0x1f4] sm:$0xf0]  ;;  %v1171_v43 = vor.u32 %v1330_v27, %v1168_v28  ;;  %v1159_v44 = vor.u32 %v1329_v30, %v1158_v29  ;;  %p1292_p10 = scmp.ne.s32.totalorder %s1490_s15, 8 }
  0x39   : > { %740 = vmatpush.bf16.msra.mxu0 %v1071_v5  ;;  %v1327_v35 = vld [vmem:[%s1587_s18 + $0xec] sm:$0xf]  ;;  %v1160_v36 = vld [vmem:[%s1587_s18 + $0xf8] sm:$0xf0]  ;;  %v409_v37 = vunpack.c.l.b16 %v343_v32  ;;  %v410_v42 = vunpack.c.h.b16 %v343_v32  ;;  %v1287_v45 = vor.u32 %v1361_v34, %v1286_v31  ;;  %v1142_v47 = vld [vmem:[%s1587_s18 + $0xc8] sm:$0xf] }
  0x3a   : > { %753 = vmatpush.bf16.msra.mxu1 %v1199_v6  ;;  %766 = vmatpush.bf16.msra.mxu2 %v1075_v7  ;;  %v1359_v40 = vld [vmem:[%s1587_s18 + $0x1ec] sm:$0xf]  ;;  %v1288_v41 = vld [vmem:[%s1587_s18 + $0x1f8] sm:$0xf0]  ;;  %v1163_v46 = vor.u32 %v1327_v35, %v1160_v36  ;;  %v1325_v48 = vld [vmem:[%s1587_s18 + $0xd4] sm:$0xf0] }
  0x3b   : > { %779 = vmatpush.bf16.msra.mxu3 %v1203_v11  ;;  %v1270_v49 = vld [vmem:[%s1587_s18 + $0x1c8] sm:$0xf]  ;;  %v1291_v50 = vor.u32 %v1359_v40, %v1288_v41  ;;  %v1357_v51 = vld [vmem:[%s1587_s18 + $0x1d4] sm:$0xf0]  ;;  %v1323_v52 = vld [vmem:[%s1587_s18 + $0xcc] sm:$0xf]  ;;  %v1669_v54 = vpack.c.b16 %v409_v37, %v409_v37  ;;  %v1673_v57 = vpack.c.b16 %v410_v42, %v410_v42  ;;  %v1143_v58 = vor.u32 %v1325_v48, %v1142_v47 }
  0x3c   : > { %v1144_v53 = vld [vmem:[%s1587_s18 + $0xd8] sm:$0xf0]  ;;  %v1355_v55 = vld [vmem:[%s1587_s18 + $0x1cc] sm:$0xf]  ;;  %v1271_v59 = vor.u32 %v1357_v51, %v1270_v49  ;;  %v1126_v61 = vld [vmem:[%s1587_s18 + $0xa8] sm:$0xf] }
  0x3d   : > { %741 = vmatpush.bf16.msra.mxu0 %v1055_v17  ;;  %v1272_v56 = vld [vmem:[%s1587_s18 + $0x1d8] sm:$0xf0]  ;;  %v1147_v60 = vor.u32 %v1323_v52, %v1144_v53  ;;  %v1321_v62 = vld [vmem:[%s1587_s18 + $0xb4] sm:$0xf0]  ;;  %v1254_v63 = vld [vmem:[%s1587_s18 + $0x1a8] sm:$0xf] }
  0x3e   : > { %754 = vmatpush.bf16.msra.mxu1 %v1183_v21  ;;  %767 = vmatpush.bf16.msra.mxu2 %v1059_v22  ;;  %v1275_v0 = vor.u32 %v1355_v55, %v1272_v56  ;;  %v1353_v1 = vld [vmem:[%s1587_s18 + $0x1b4] sm:$0xf0]  ;;  %v1319_v2 = vld [vmem:[%s1587_s18 + $0xac] sm:$0xf]  ;;  %v1128_v3 = vld [vmem:[%s1587_s18 + $0xb8] sm:$0xf0]  ;;  %v1127_v6 = vor.u32 %v1321_v62, %v1126_v61 }
  0x3f   : > { %780 = vmatpush.bf16.msra.mxu3 %v1187_v26  ;;  %v1351_v4 = vld [vmem:[%s1587_s18 + $0x1ac] sm:$0xf]  ;;  %v1256_v5 = vld [vmem:[%s1587_s18 + $0x1b8] sm:$0xf0]  ;;  %v1255_v7 = vor.u32 %v1353_v1, %v1254_v63  ;;  %v1131_v8 = vor.u32 %v1319_v2, %v1128_v3  ;;  %v1110_v9 = vld [vmem:[%s1587_s18 + $0x88] sm:$0xf] }
  0x40   : > { %v1317_v10 = vld [vmem:[%s1587_s18 + $0x94] sm:$0xf0]  ;;  %v1238_v11 = vld [vmem:[%s1587_s18 + $0x188] sm:$0xf]  ;;  %v1259_v12 = vor.u32 %v1351_v4, %v1256_v5  ;;  %v1315_v14 = vld [vmem:[%s1587_s18 + $0x8c] sm:$0xf] }
  0x41   : > { %742 = vmatpush.bf16.msra.mxu0 %v1039_v33  ;;  %v1349_v13 = vld [vmem:[%s1587_s18 + $0x194] sm:$0xf0]  ;;  %v1112_v15 = vld [vmem:[%s1587_s18 + $0x98] sm:$0xf0]  ;;  %v1347_v16 = vld [vmem:[%s1587_s18 + $0x18c] sm:$0xf]  ;;  %v1111_v18 = vor.u32 %v1317_v10, %v1110_v9 }
  0x42   : > { %755 = vmatpush.bf16.msra.mxu1 %v1167_v38  ;;  %768 = vmatpush.bf16.msra.mxu2 %v1043_v39  ;;  %v1240_v17 = vld [vmem:[%s1587_s18 + $0x198] sm:$0xf0]  ;;  %v1239_v19 = vor.u32 %v1349_v13, %v1238_v11  ;;  %v1115_v20 = vor.u32 %v1315_v14, %v1112_v15  ;;  %v1094_v21 = vld [vmem:[%s1587_s18 + $0x68] sm:$0xf]  ;;  %v1313_v22 = vld [vmem:[%s1587_s18 + $0x74] sm:$0xf0] }
  0x43   : > { %781 = vmatpush.bf16.msra.mxu3 %v1171_v43  ;;  %v1222_v23 = vld [vmem:[%s1587_s18 + $0x168] sm:$0xf]  ;;  %v1243_v24 = vor.u32 %v1347_v16, %v1240_v17  ;;  %v1345_v25 = vld [vmem:[%s1587_s18 + $0x174] sm:$0xf0]  ;;  %v1311_v26 = vld [vmem:[%s1587_s18 + $0x6c] sm:$0xf]  ;;  %v1095_v30 = vor.u32 %v1313_v22, %v1094_v21 }
  0x44   : > { %743 = vmatmul.bf16.vlgmr.msra.gmra.mxu0 %v1669_v54  ;;  %v1096_v27 = vld [vmem:[%s1587_s18 + $0x78] sm:$0xf0]  ;;  %v1343_v28 = vld [vmem:[%s1587_s18 + $0x16c] sm:$0xf]  ;;  %v1223_v31 = vor.u32 %v1345_v25, %v1222_v23  ;;  %v1078_v33 = vld [vmem:[%s1587_s18 + $0x48] sm:$0xf] }
  0x45   : > { %787 = vmatpush.bf16.msrb.mxu0 %v1159_v44  ;;  %769 = vmatmul.bf16.vlgmr.msra.gmra.mxu2 %v1669_v54  ;;  %v1224_v29 = vld [vmem:[%s1587_s18 + $0x178] sm:$0xf0]  ;;  %v1099_v32 = vor.u32 %v1311_v26, %v1096_v27  ;;  %v1309_v34 = vld [vmem:[%s1587_s18 + $0x54] sm:$0xf0]  ;;  %v1206_v35 = vld [vmem:[%s1587_s18 + $0x148] sm:$0xf] }
  0x46   : > { %800 = vmatpush.bf16.msrb.mxu1 %v1287_v45  ;;  %813 = vmatpush.bf16.msrb.mxu2 %v1163_v46  ;;  %v1227_v36 = vor.u32 %v1343_v28, %v1224_v29  ;;  %v1341_v37 = vld [vmem:[%s1587_s18 + $0x154] sm:$0xf0]  ;;  %v1307_v38 = vld [vmem:[%s1587_s18 + $0x4c] sm:$0xf]  ;;  %v1080_v39 = vld [vmem:[%s1587_s18 + $0x58] sm:$0xf0]  ;;  %v1079_v42 = vor.u32 %v1309_v34, %v1078_v33 }
  0x47   : > { %826 = vmatpush.bf16.msrb.mxu3 %v1291_v50  ;;  %756 = vmatmul.bf16.vlgmr.msra.gmra.mxu1 %v1673_v57  ;;  %v1339_v40 = vld [vmem:[%s1587_s18 + $0x14c] sm:$0xf]  ;;  %v1208_v41 = vld [vmem:[%s1587_s18 + $0x158] sm:$0xf0]  ;;  %v1207_v43 = vor.u32 %v1341_v37, %v1206_v35  ;;  %v1083_v44 = vor.u32 %v1307_v38, %v1080_v39  ;;  %v1062_v45 = vld [vmem:[%s1587_s18 + $0x28] sm:$0xf] }
  0x48   : > { %782 = vmatmul.bf16.vlgmr.msra.gmra.mxu3 %v1673_v57  ;;  %v1305_v46 = vld [vmem:[%s1587_s18 + $0x34] sm:$0xf0]  ;;  %v1190_v47 = vld [vmem:[%s1587_s18 + $0x128] sm:$0xf]  ;;  %v1211_v48 = vor.u32 %v1339_v40, %v1208_v41  ;;  %v1303_v50 = vld [vmem:[%s1587_s18 + $0x2c] sm:$0xf] }
  0x49   : > { %788 = vmatpush.bf16.msrb.mxu0 %v1143_v58  ;;  %v1337_v49 = vld [vmem:[%s1587_s18 + $0x134] sm:$0xf0]  ;;  %v1064_v51 = vld [vmem:[%s1587_s18 + $0x38] sm:$0xf0]  ;;  %v1335_v52 = vld [vmem:[%s1587_s18 + $0x12c] sm:$0xf]  ;;  %v1063_v55 = vor.u32 %v1305_v46, %v1062_v45 }
  0x4a   : > { %801 = vmatpush.bf16.msrb.mxu1 %v1271_v59  ;;  %814 = vmatpush.bf16.msrb.mxu2 %v1147_v60  ;;  %v1192_v53 = vld [vmem:[%s1587_s18 + $0x138] sm:$0xf0]  ;;  %v1191_v56 = vor.u32 %v1337_v49, %v1190_v47  ;;  %v1067_v58 = vor.u32 %v1303_v50, %v1064_v51  ;;  %v1046_v59 = vld [vmem:[%s1587_s18 + $0x8] sm:$0xf]  ;;  %v1301_v60 = vld [vmem:[%s1587_s18 + $0x14] sm:$0xf0] }
  0x4b   : > { %827 = vmatpush.bf16.msrb.mxu3 %v1275_v0  ;;  %v1174_v61 = vld [vmem:[%s1587_s18 + $0x108] sm:$0xf]  ;;  %v1195_v62 = vor.u32 %v1335_v52, %v1192_v53  ;;  %v1333_v63 = vld [vmem:[%s1587_s18 + $0x114] sm:$0xf0]  ;;  %v1299_v0 = vld [vmem:[%s1587_s18 + $0xc] sm:$0xf]  ;;  %v1047_v4 = vor.u32 %v1301_v60, %v1046_v59 }
  0x4c   : > { %v1048_v1 = vld [vmem:[%s1587_s18 + $0x18] sm:$0xf0]  ;;  %v1331_v2 = vld [vmem:[%s1587_s18 + $0x10c] sm:$0xf]  ;;  %v1175_v5 = vor.u32 %v1333_v63, %v1174_v61  ;;  %v339_v9 = vld [vmem:[#allocation2 + $0x10] sm:$0xff] }
  0x4d   : > { %789 = vmatpush.bf16.msrb.mxu0 %v1127_v6  ;;  %v1176_v3 = vld [vmem:[%s1587_s18 + $0x118] sm:$0xf0]  ;;  %v1051_v6 = vor.u32 %v1299_v0, %v1048_v1  ;;  %v340_v14 = vld [vmem:[#allocation2] sm:$0xff]  ;;  %v342_v26 = vld [vmem:[#allocation2 + $0x8] sm:$0xff] }
  0x4e   : > { %802 = vmatpush.bf16.msrb.mxu1 %v1255_v7  ;;  %815 = vmatpush.bf16.msrb.mxu2 %v1131_v8  ;;  %v1179_v7 = vor.u32 %v1331_v2, %v1176_v3 }
  0x4f   : > { %828 = vmatpush.bf16.msrb.mxu3 %v1259_v12 }
  0x51   : > { %790 = vmatpush.bf16.msrb.mxu0 %v1111_v18 }
  0x52   : > { %803 = vmatpush.bf16.msrb.mxu1 %v1239_v19  ;;  %816 = vmatpush.bf16.msrb.mxu2 %v1115_v20 }
  0x53   : > { %829 = vmatpush.bf16.msrb.mxu3 %v1243_v24 }
  0x55   : > { %791 = vmatpush.bf16.msrb.mxu0 %v1095_v30 }
  0x56   : > { %804 = vmatpush.bf16.msrb.mxu1 %v1223_v31  ;;  %817 = vmatpush.bf16.msrb.mxu2 %v1099_v32 }
  0x57   : > { %830 = vmatpush.bf16.msrb.mxu3 %v1227_v36 }
  0x59   : > { %792 = vmatpush.bf16.msrb.mxu0 %v1079_v42 }
  0x5a   : > { %805 = vmatpush.bf16.msrb.mxu1 %v1207_v43  ;;  %818 = vmatpush.bf16.msrb.mxu2 %v1083_v44 }
  0x5b   : > { %831 = vmatpush.bf16.msrb.mxu3 %v1211_v48 }
  0x5d   : > { %793 = vmatpush.bf16.msrb.mxu0 %v1063_v55 }
  0x5e   : > { %806 = vmatpush.bf16.msrb.mxu1 %v1191_v56  ;;  %819 = vmatpush.bf16.msrb.mxu2 %v1067_v58 }
  0x5f   : > { %832 = vmatpush.bf16.msrb.mxu3 %v1195_v62 }
  0x61   : > { %794 = vmatpush.bf16.msrb.mxu0 %v1047_v4 }
  0x62   : > { %807 = vmatpush.bf16.msrb.mxu1 %v1175_v5  ;;  %820 = vmatpush.bf16.msrb.mxu2 %v1051_v6 }
  0x63   : > { %833 = vmatpush.bf16.msrb.mxu3 %v1179_v7 }
  0x64   : > { %795 = vmatmul.bf16.vlgmr.msrb.gmra.mxu0 %v1669_v54 }
  0x65   : > { %808 = vmatmul.bf16.vlgmr.msrb.gmra.mxu1 %v1673_v57  ;;  %821 = vmatmul.bf16.vlgmr.msrb.gmra.mxu2 %v1669_v54  ;;  %v341_v54 = vld [vmem:[#allocation2 + $0x18] sm:$0xff] }
  0x66   : > { %834 = vmatmul.bf16.vlgmr.msrb.gmra.mxu3 %v1673_v57 }
  0xc1   : > { %v744_v8 = vpop.f32.mrf.mxu0 }
  0xc4   : > { %v757_v10 = vpop.f32.mrf.mxu1 }
  0xc5   : > { %v758_v11 = vadd.f32 %v757_v10, %v744_v8 }
  0xc7   : > { %v839_v12 = vadd.f32 %v758_v11, %v339_v9 }
  0xc8   : > { %v770_v13 = vpop.f32.mrf.mxu2 }
  0xc9   : > { %843 = vst [vmem:[#allocation2 + $0x10] sm:$0xff] %v839_v12  ;;  %v746_v17 = vpop.f32.mrf.mxu0 }
  0xcb   : > { %v783_v15 = vpop.f32.mrf.mxu3 }
  0xcc   : > { %v784_v16 = vadd.f32 %v783_v15, %v770_v13  ;;  %v759_v19 = vpop.f32.mrf.mxu1 }
  0xce   : > { %v840_v18 = vadd.f32 %v784_v16, %v340_v14 }
  0xd0   : > { %844 = vst [vmem:[#allocation2] sm:$0xff] %v840_v18  ;;  %v772_v20 = vpop.f32.mrf.mxu2 }
  0xd3   : > { %v785_v21 = vpop.f32.mrf.mxu3 }
  0xe1   : > { %v796_v22 = vpop.f32.mrf.mxu0 }
  0xe2   : > { %v809_v23 = vpop.f32.mrf.mxu1 }
  0xe3   : > { %v810_v57 = vadd.f32 %v809_v23, %v796_v22 }
  0xe5   : > { %v841_v24 = vadd.f32 %v810_v57, %v341_v54 }
  0xe7   : > { %845 = vst [vmem:[#allocation2 + $0x18] sm:$0xff] %v841_v24 }
  0xe8   : > { %v822_v25 = vpop.f32.mrf.mxu2 }
  0xe9   : > { %v835_v27 = vpop.f32.mrf.mxu3  ;;  %v798_v28 = vpop.f32.mrf.mxu0 }
  0xea   : > { %v836_v29 = vadd.f32 %v835_v27, %v822_v25  ;;  %v811_v30 = vpop.f32.mrf.mxu1 }
  0xec   : > { %v842_v31 = vadd.f32 %v836_v29, %v342_v26 }
  0xed   : > { %850 = sbr.rel (%p1292_p10) target bundleno = 255 (0xff), region = 52 }
  0xee   : > { %846 = vst [vmem:[#allocation2 + $0x8] sm:$0xff] %v842_v31 }
  0xf0   : > { %v824_v32 = vpop.f32.mrf.mxu2 }
  0xf1   : > { %v837_v33 = vpop.f32.mrf.mxu3 }
  0xf2   : > { %v851_v34 = vld [vmem:[#allocation2 + $0x10] sm:$0xff]  ;;  %v855_v35 = vld [vmem:[#allocation3] sm:$0xf]  ;;  %v869_v36 = vld [vmem:[#allocation5] sm:$0xf] }
  0xf3   : > { %v857_v37 = vperm.slane %v855_v35, 0  ;;  %v871_v38 = vperm.slane %v869_v36, 0  ;;  %v852_v39 = vld [vmem:[#allocation2] sm:$0xff]  ;;  %v858_v40 = vperm.slane %v855_v35, 1  ;;  %v872_v41 = vperm.slane %v869_v36, 1  ;;  %v853_v42 = vld [vmem:[#allocation2 + $0x18] sm:$0xff] }
  0xf4   : > { %v859_v43 = vperm.slane %v855_v35, 2  ;;  %v873_v44 = vperm.slane %v869_v36, 2  ;;  %v860_v46 = vperm.slane %v855_v35, 3  ;;  %v874_v47 = vperm.slane %v869_v36, 3 }
  0xf5   : > { %v854_v45 = vld [vmem:[#allocation2 + $0x8] sm:$0xff]  ;;  %v865_v48 = vmul.f32 %v857_v37, %v851_v34  ;;  %v866_v49 = vmul.f32 %v858_v40, %v852_v39 }
  0xf6   : > { %v867_v50 = vmul.f32 %v859_v43, %v853_v42  ;;  %v868_v51 = vmul.f32 %v860_v46, %v854_v45 }
  0xf7   : > { %v879_v52 = vadd.f32 %v871_v38, %v865_v48  ;;  %v880_v53 = vadd.f32 %v872_v41, %v866_v49 }
  0xf8   : > { %v881_v55 = vadd.f32 %v873_v44, %v867_v50  ;;  %v882_v56 = vadd.f32 %v874_v47, %v868_v51 }
  0xf9   : > { %v883_v58 = vmax.f32 %v879_v52, 0.0  ;;  %v884_v59 = vmax.f32 %v880_v53, 0.0 }
  0xfa   : > { %v885_v60 = vmax.f32 %v881_v55, 0.0  ;;  %v886_v61 = vmax.f32 %v882_v56, 0.0 }
  0xfb   : > { %887 = vst [vmem:[%s1757_s4] sm:$0xff] %v883_v58 }
  0xfc   : > { %888 = vst [vmem:[%s1757_s4 + $0x8] sm:$0xff] %v884_v59 }
  0xfd   : > { %889 = vst [vmem:[%s1757_s4 + $0x10] sm:$0xff] %v885_v60 }
  0xfe   : > { %890 = vst [vmem:[%s1757_s4 + $0x18] sm:$0xff] %v886_v61 }
  0xff PF: > { %s16_s17 = sadd.s32 1, %s1498_s17   ;;  %s1760_s15 = smov %s1494_s16 }
 0x100   : > { %p13_p11 = scmp.ge.s32.totalorder %s16_s17, 11   ;;  %s1761_s16 = smov %s1763_s19 }
 0x102   :  { %15 = sbr.rel (!%p13_p11) target bundleno = 3 (0x3), region = 88 }
 0x107   :  { %921 = vsyncpa [#allocation4], 1 }
 0x108   :  { %923 = vsyncpa [#allocation4 + $0x1], 1 }
 0x109   :  { %924 = vsyncpa [#allocation6], 1 }

// kernel: _lambda_.40
= control target key start
LH: loop header
LB: loop body
LE: loop exit
PB: predicated region body
PF: predicated region fallthrough
CT: control target
= control target key end

     0   :  { %9 = vsyncpa [#allocation4], 0  ;;  %s938_s18 = smov [#allocation3]   ;;  %s1381_s0 = inlined_call_operand.vmem [shape: bf16[8,256], index: 0, kind: input, shape index: {}]   ;;  %s1382_s1 = inlined_call_operand.vmem [shape: bf16[256,512], index: 1, kind: input, shape index: {}]   ;;  %s1383_s2 = inlined_call_operand.vmem [shape: f32[1,512], index: 2, kind: input, shape index: {}]   ;;  %s1384_s3 = inlined_call_operand.hbm [shape: f32[1,512], index: 3, kind: input, shape index: {}]   ;;  %s1385_s4 = inlined_call_operand.vmem [shape: f32[8,512], index: 4, kind: output, shape index: {}]  }
   0x1   :  { %s21_s17 = sshll.u32 %s1384_s3, 4  ;;  %s23_s19 = sshll.u32 %s938_s18, 4  ;;  %s22_s17 = int_to_ptr.hbm [resolvable:$true] %s21_s17  ;;  %s24_s19 = int_to_ptr.vmem [resolvable:$true] %s23_s19 }
   0x2   :  { %26 = dma.hbm_to_vmem [thread:$0]  %s22_s17, 64, %s24_s19, [#allocation4]  }
   0x3   :  { %936 = dma.done.wait [#allocation4], 64  }
   0x4   :  { %937 = vsyncadd [#allocation4], 4294967232  ;;  %v705_v0 = vld [vmem:[%s1382_s1 + $0xe0] sm:$0xf]  ;;  %v877_v1 = vld [vmem:[%s1382_s1 + $0xec] sm:$0xf0] }
   0x5   :  { %v833_v2 = vld [vmem:[%s1382_s1 + $0x1e0] sm:$0xf]  ;;  %v706_v3 = vor.u32 %v877_v1, %v705_v0  ;;  %v909_v4 = vld [vmem:[%s1382_s1 + $0x1ec] sm:$0xf0]  ;;  %v875_v5 = vld [vmem:[%s1382_s1 + $0xe4] sm:$0xf] }
   0x6   :  { %v707_v6 = vld [vmem:[%s1382_s1 + $0xf0] sm:$0xf0]  ;;  %v834_v7 = vor.u32 %v909_v4, %v833_v2  ;;  %v907_v9 = vld [vmem:[%s1382_s1 + $0x1e4] sm:$0xf]  ;;  %v689_v11 = vld [vmem:[%s1382_s1 + $0xc0] sm:$0xf] }
   0x7   :  { %v710_v8 = vor.u32 %v875_v5, %v707_v6  ;;  %v835_v10 = vld [vmem:[%s1382_s1 + $0x1f0] sm:$0xf0]  ;;  %435 = vmatpush.bf16.msra.mxu0 %v706_v3  ;;  %v873_v13 = vld [vmem:[%s1382_s1 + $0xcc] sm:$0xf0]  ;;  %v817_v14 = vld [vmem:[%s1382_s1 + $0x1c0] sm:$0xf] }
   0x8   :  { %v838_v12 = vor.u32 %v907_v9, %v835_v10  ;;  %v905_v15 = vld [vmem:[%s1382_s1 + $0x1cc] sm:$0xf0]  ;;  %448 = vmatpush.bf16.msra.mxu1 %v834_v7  ;;  %v690_v16 = vor.u32 %v873_v13, %v689_v11  ;;  %v871_v18 = vld [vmem:[%s1382_s1 + $0xc4] sm:$0xf]  ;;  %v691_v19 = vld [vmem:[%s1382_s1 + $0xd0] sm:$0xf0] }
   0x9   :  { %461 = vmatpush.bf16.msra.mxu2 %v710_v8  ;;  %v818_v17 = vor.u32 %v905_v15, %v817_v14  ;;  %v903_v20 = vld [vmem:[%s1382_s1 + $0x1c4] sm:$0xf]  ;;  %v694_v21 = vor.u32 %v871_v18, %v691_v19  ;;  %v819_v22 = vld [vmem:[%s1382_s1 + $0x1d0] sm:$0xf0]  ;;  %v673_v23 = vld [vmem:[%s1382_s1 + $0xa0] sm:$0xf] }
   0xa   :  { %474 = vmatpush.bf16.msra.mxu3 %v838_v12  ;;  %v869_v24 = vld [vmem:[%s1382_s1 + $0xac] sm:$0xf0]  ;;  %v822_v25 = vor.u32 %v903_v20, %v819_v22  ;;  %v801_v26 = vld [vmem:[%s1382_s1 + $0x1a0] sm:$0xf]  ;;  %v867_v28 = vld [vmem:[%s1382_s1 + $0xa4] sm:$0xf] }
   0xb   :  { %v901_v27 = vld [vmem:[%s1382_s1 + $0x1ac] sm:$0xf0]  ;;  %436 = vmatpush.bf16.msra.mxu0 %v690_v16  ;;  %v674_v29 = vor.u32 %v869_v24, %v673_v23  ;;  %v675_v30 = vld [vmem:[%s1382_s1 + $0xb0] sm:$0xf0]  ;;  %v899_v31 = vld [vmem:[%s1382_s1 + $0x1a4] sm:$0xf] }
   0xc   :  { %v803_v32 = vld [vmem:[%s1382_s1 + $0x1b0] sm:$0xf0]  ;;  %449 = vmatpush.bf16.msra.mxu1 %v818_v17  ;;  %v802_v33 = vor.u32 %v901_v27, %v801_v26  ;;  %v678_v34 = vor.u32 %v867_v28, %v675_v30  ;;  %v657_v35 = vld [vmem:[%s1382_s1 + $0x80] sm:$0xf]  ;;  %v865_v36 = vld [vmem:[%s1382_s1 + $0x8c] sm:$0xf0] }
   0xd   :  { %462 = vmatpush.bf16.msra.mxu2 %v694_v21  ;;  %v785_v37 = vld [vmem:[%s1382_s1 + $0x180] sm:$0xf]  ;;  %v806_v38 = vor.u32 %v899_v31, %v803_v32  ;;  %v897_v39 = vld [vmem:[%s1382_s1 + $0x18c] sm:$0xf0]  ;;  %v863_v40 = vld [vmem:[%s1382_s1 + $0x84] sm:$0xf]  ;;  %v658_v44 = vor.u32 %v865_v36, %v657_v35 }
   0xe   :  { %475 = vmatpush.bf16.msra.mxu3 %v822_v25  ;;  %v659_v41 = vld [vmem:[%s1382_s1 + $0x90] sm:$0xf0]  ;;  %v895_v42 = vld [vmem:[%s1382_s1 + $0x184] sm:$0xf]  ;;  %v786_v45 = vor.u32 %v897_v39, %v785_v37  ;;  %v641_v47 = vld [vmem:[%s1382_s1 + $0x60] sm:$0xf] }
   0xf   :  { %v787_v43 = vld [vmem:[%s1382_s1 + $0x190] sm:$0xf0]  ;;  %437 = vmatpush.bf16.msra.mxu0 %v674_v29  ;;  %v662_v46 = vor.u32 %v863_v40, %v659_v41  ;;  %v861_v48 = vld [vmem:[%s1382_s1 + $0x6c] sm:$0xf0]  ;;  %v769_v49 = vld [vmem:[%s1382_s1 + $0x160] sm:$0xf] }
  0x10   :  { %450 = vmatpush.bf16.msra.mxu1 %v802_v33  ;;  %v790_v50 = vor.u32 %v895_v42, %v787_v43  ;;  %v893_v51 = vld [vmem:[%s1382_s1 + $0x16c] sm:$0xf0]  ;;  %v859_v52 = vld [vmem:[%s1382_s1 + $0x64] sm:$0xf]  ;;  %v643_v53 = vld [vmem:[%s1382_s1 + $0x70] sm:$0xf0]  ;;  %v642_v56 = vor.u32 %v861_v48, %v641_v47 }
  0x11   :  { %463 = vmatpush.bf16.msra.mxu2 %v678_v34  ;;  %v891_v54 = vld [vmem:[%s1382_s1 + $0x164] sm:$0xf]  ;;  %v771_v55 = vld [vmem:[%s1382_s1 + $0x170] sm:$0xf0]  ;;  %v770_v57 = vor.u32 %v893_v51, %v769_v49  ;;  %v646_v58 = vor.u32 %v859_v52, %v643_v53  ;;  %v625_v59 = vld [vmem:[%s1382_s1 + $0x40] sm:$0xf] }
  0x12   :  { %476 = vmatpush.bf16.msra.mxu3 %v806_v38  ;;  %v857_v60 = vld [vmem:[%s1382_s1 + $0x4c] sm:$0xf0]  ;;  %v753_v61 = vld [vmem:[%s1382_s1 + $0x140] sm:$0xf]  ;;  %v774_v62 = vor.u32 %v891_v54, %v771_v55  ;;  %v855_v0 = vld [vmem:[%s1382_s1 + $0x44] sm:$0xf] }
  0x13   :  { %438 = vmatpush.bf16.msra.mxu0 %v658_v44  ;;  %v889_v63 = vld [vmem:[%s1382_s1 + $0x14c] sm:$0xf0]  ;;  %v627_v1 = vld [vmem:[%s1382_s1 + $0x50] sm:$0xf0]  ;;  %v887_v2 = vld [vmem:[%s1382_s1 + $0x144] sm:$0xf]  ;;  %v626_v4 = vor.u32 %v857_v60, %v625_v59 }
  0x14   :  { %451 = vmatpush.bf16.msra.mxu1 %v786_v45  ;;  %v755_v3 = vld [vmem:[%s1382_s1 + $0x150] sm:$0xf0]  ;;  %v754_v5 = vor.u32 %v889_v63, %v753_v61  ;;  %v630_v6 = vor.u32 %v855_v0, %v627_v1  ;;  %v609_v7 = vld [vmem:[%s1382_s1 + $0x20] sm:$0xf]  ;;  %v853_v8 = vld [vmem:[%s1382_s1 + $0x2c] sm:$0xf0] }
  0x15   :  { %464 = vmatpush.bf16.msra.mxu2 %v662_v46  ;;  %v737_v9 = vld [vmem:[%s1382_s1 + $0x120] sm:$0xf]  ;;  %v758_v10 = vor.u32 %v887_v2, %v755_v3  ;;  %v885_v11 = vld [vmem:[%s1382_s1 + $0x12c] sm:$0xf0]  ;;  %v851_v12 = vld [vmem:[%s1382_s1 + $0x24] sm:$0xf]  ;;  %v610_v16 = vor.u32 %v853_v8, %v609_v7 }
  0x16   :  { %477 = vmatpush.bf16.msra.mxu3 %v790_v50  ;;  %v611_v13 = vld [vmem:[%s1382_s1 + $0x30] sm:$0xf0]  ;;  %v883_v14 = vld [vmem:[%s1382_s1 + $0x124] sm:$0xf]  ;;  %v593_v17 = vld [vmem:[%s1382_s1] sm:$0xf]  ;;  %v738_v20 = vor.u32 %v885_v11, %v737_v9 }
  0x17   :  { %439 = vmatpush.bf16.msra.mxu0 %v642_v56  ;;  %v739_v15 = vld [vmem:[%s1382_s1 + $0x130] sm:$0xf0]  ;;  %v849_v18 = vld [vmem:[%s1382_s1 + $0xc] sm:$0xf0]  ;;  %v721_v19 = vld [vmem:[%s1382_s1 + $0x100] sm:$0xf]  ;;  %v614_v21 = vor.u32 %v851_v12, %v611_v13 }
  0x18   :  { %452 = vmatpush.bf16.msra.mxu1 %v770_v57  ;;  %v881_v22 = vld [vmem:[%s1382_s1 + $0x10c] sm:$0xf0]  ;;  %v847_v23 = vld [vmem:[%s1382_s1 + $0x4] sm:$0xf]  ;;  %v595_v24 = vld [vmem:[%s1382_s1 + $0x10] sm:$0xf0]  ;;  %v742_v25 = vor.u32 %v883_v14, %v739_v15  ;;  %v594_v32 = vor.u32 %v849_v18, %v593_v17 }
  0x19   :  { %465 = vmatpush.bf16.msra.mxu2 %v646_v58  ;;  %v879_v26 = vld [vmem:[%s1382_s1 + $0x104] sm:$0xf]  ;;  %v723_v27 = vld [vmem:[%s1382_s1 + $0x110] sm:$0xf0]  ;;  %v713_v28 = vld [vmem:[%s1382_s1 + $0xe8] sm:$0xf]  ;;  %v722_v37 = vor.u32 %v881_v22, %v721_v19  ;;  %v598_v38 = vor.u32 %v847_v23, %v595_v24 }
  0x1a   :  { %478 = vmatpush.bf16.msra.mxu3 %v774_v62  ;;  %v878_v29 = vld [vmem:[%s1382_s1 + $0xf4] sm:$0xf0]  ;;  %v841_v30 = vld [vmem:[%s1382_s1 + $0x1e8] sm:$0xf]  ;;  %v43_v31 = vld [vmem:[%s1381_s0] sm:$0xff]  ;;  %v726_v42 = vor.u32 %v879_v26, %v723_v27 }
  0x1b   :  { %440 = vmatpush.bf16.msra.mxu0 %v626_v4  ;;  %v910_v33 = vld [vmem:[%s1382_s1 + $0x1f4] sm:$0xf0]  ;;  %v876_v34 = vld [vmem:[%s1382_s1 + $0xec] sm:$0xf]  ;;  %v715_v35 = vld [vmem:[%s1382_s1 + $0xf8] sm:$0xf0]  ;;  %v109_v36 = vunpack.c.l.b16 %v43_v31  ;;  %v110_v41 = vunpack.c.h.b16 %v43_v31  ;;  %v714_v43 = vor.u32 %v878_v29, %v713_v28 }
  0x1c   :  { %453 = vmatpush.bf16.msra.mxu1 %v754_v5  ;;  %v908_v39 = vld [vmem:[%s1382_s1 + $0x1ec] sm:$0xf]  ;;  %v843_v40 = vld [vmem:[%s1382_s1 + $0x1f8] sm:$0xf0]  ;;  %v842_v44 = vor.u32 %v910_v33, %v841_v30  ;;  %v718_v45 = vor.u32 %v876_v34, %v715_v35  ;;  %v697_v46 = vld [vmem:[%s1382_s1 + $0xc8] sm:$0xf] }
  0x1d   :  { %466 = vmatpush.bf16.msra.mxu2 %v630_v6  ;;  %v874_v47 = vld [vmem:[%s1382_s1 + $0xd4] sm:$0xf0]  ;;  %v825_v48 = vld [vmem:[%s1382_s1 + $0x1c8] sm:$0xf]  ;;  %v846_v49 = vor.u32 %v908_v39, %v843_v40  ;;  %v872_v51 = vld [vmem:[%s1382_s1 + $0xcc] sm:$0xf]  ;;  %v1204_v53 = vpack.c.b16 %v109_v36, %v109_v36  ;;  %v1212_v56 = vpack.c.b16 %v110_v41, %v110_v41 }
  0x1e   :  { %479 = vmatpush.bf16.msra.mxu3 %v758_v10  ;;  %v906_v50 = vld [vmem:[%s1382_s1 + $0x1d4] sm:$0xf0]  ;;  %v699_v52 = vld [vmem:[%s1382_s1 + $0xd8] sm:$0xf0]  ;;  %v904_v54 = vld [vmem:[%s1382_s1 + $0x1cc] sm:$0xf]  ;;  %v698_v57 = vor.u32 %v874_v47, %v697_v46 }
  0x1f   :  { %441 = vmatpush.bf16.msra.mxu0 %v610_v16  ;;  %v827_v55 = vld [vmem:[%s1382_s1 + $0x1d8] sm:$0xf0]  ;;  %v826_v58 = vor.u32 %v906_v50, %v825_v48  ;;  %v702_v59 = vor.u32 %v872_v51, %v699_v52  ;;  %v681_v60 = vld [vmem:[%s1382_s1 + $0xa8] sm:$0xf]  ;;  %v870_v61 = vld [vmem:[%s1382_s1 + $0xb4] sm:$0xf0] }
  0x20   :  { %454 = vmatpush.bf16.msra.mxu1 %v738_v20  ;;  %v809_v62 = vld [vmem:[%s1382_s1 + $0x1a8] sm:$0xf]  ;;  %v830_v63 = vor.u32 %v904_v54, %v827_v55  ;;  %v902_v0 = vld [vmem:[%s1382_s1 + $0x1b4] sm:$0xf0]  ;;  %v868_v1 = vld [vmem:[%s1382_s1 + $0xac] sm:$0xf]  ;;  %v682_v5 = vor.u32 %v870_v61, %v681_v60 }
  0x21   :  { %467 = vmatpush.bf16.msra.mxu2 %v614_v21  ;;  %v683_v2 = vld [vmem:[%s1382_s1 + $0xb8] sm:$0xf0]  ;;  %v900_v3 = vld [vmem:[%s1382_s1 + $0x1ac] sm:$0xf]  ;;  %v810_v6 = vor.u32 %v902_v0, %v809_v62  ;;  %v665_v8 = vld [vmem:[%s1382_s1 + $0x88] sm:$0xf] }
  0x22   :  { %480 = vmatpush.bf16.msra.mxu3 %v742_v25  ;;  %v811_v4 = vld [vmem:[%s1382_s1 + $0x1b8] sm:$0xf0]  ;;  %v686_v7 = vor.u32 %v868_v1, %v683_v2  ;;  %v866_v9 = vld [vmem:[%s1382_s1 + $0x94] sm:$0xf0]  ;;  %v793_v10 = vld [vmem:[%s1382_s1 + $0x188] sm:$0xf] }
  0x23   :  { %442 = vmatpush.bf16.msra.mxu0 %v594_v32  ;;  %v814_v11 = vor.u32 %v900_v3, %v811_v4  ;;  %v898_v12 = vld [vmem:[%s1382_s1 + $0x194] sm:$0xf0]  ;;  %v864_v13 = vld [vmem:[%s1382_s1 + $0x8c] sm:$0xf]  ;;  %v667_v14 = vld [vmem:[%s1382_s1 + $0x98] sm:$0xf0]  ;;  %v666_v17 = vor.u32 %v866_v9, %v665_v8 }
  0x24   :  { %455 = vmatpush.bf16.msra.mxu1 %v722_v37  ;;  %v896_v15 = vld [vmem:[%s1382_s1 + $0x18c] sm:$0xf]  ;;  %v795_v16 = vld [vmem:[%s1382_s1 + $0x198] sm:$0xf0]  ;;  %v794_v18 = vor.u32 %v898_v12, %v793_v10  ;;  %v670_v19 = vor.u32 %v864_v13, %v667_v14  ;;  %v649_v20 = vld [vmem:[%s1382_s1 + $0x68] sm:$0xf] }
  0x25   :  { %468 = vmatpush.bf16.msra.mxu2 %v598_v38  ;;  %v862_v21 = vld [vmem:[%s1382_s1 + $0x74] sm:$0xf0]  ;;  %v777_v22 = vld [vmem:[%s1382_s1 + $0x168] sm:$0xf]  ;;  %v798_v23 = vor.u32 %v896_v15, %v795_v16  ;;  %v860_v25 = vld [vmem:[%s1382_s1 + $0x6c] sm:$0xf] }
  0x26   :  { %481 = vmatpush.bf16.msra.mxu3 %v726_v42  ;;  %443 = vmatmul.bf16.vlgmr.msra.gmra.mxu0 %v1204_v53  ;;  %v894_v24 = vld [vmem:[%s1382_s1 + $0x174] sm:$0xf0]  ;;  %v651_v26 = vld [vmem:[%s1382_s1 + $0x78] sm:$0xf0]  ;;  %v892_v27 = vld [vmem:[%s1382_s1 + $0x16c] sm:$0xf]  ;;  %v650_v29 = vor.u32 %v862_v21, %v649_v20 }
  0x27   :  { %487 = vmatpush.bf16.msrb.mxu0 %v714_v43  ;;  %456 = vmatmul.bf16.vlgmr.msra.gmra.mxu1 %v1212_v56  ;;  %v779_v28 = vld [vmem:[%s1382_s1 + $0x178] sm:$0xf0]  ;;  %v778_v30 = vor.u32 %v894_v24, %v777_v22  ;;  %v654_v31 = vor.u32 %v860_v25, %v651_v26  ;;  %v633_v32 = vld [vmem:[%s1382_s1 + $0x48] sm:$0xf]  ;;  %v858_v33 = vld [vmem:[%s1382_s1 + $0x54] sm:$0xf0] }
  0x28   :  { %500 = vmatpush.bf16.msrb.mxu1 %v842_v44  ;;  %469 = vmatmul.bf16.vlgmr.msra.gmra.mxu2 %v1204_v53  ;;  %v761_v34 = vld [vmem:[%s1382_s1 + $0x148] sm:$0xf]  ;;  %v782_v35 = vor.u32 %v892_v27, %v779_v28  ;;  %v890_v36 = vld [vmem:[%s1382_s1 + $0x154] sm:$0xf0]  ;;  %v856_v37 = vld [vmem:[%s1382_s1 + $0x4c] sm:$0xf]  ;;  %v634_v41 = vor.u32 %v858_v33, %v633_v32 }
  0x29   :  { %513 = vmatpush.bf16.msrb.mxu2 %v718_v45  ;;  %482 = vmatmul.bf16.vlgmr.msra.gmra.mxu3 %v1212_v56  ;;  %v635_v38 = vld [vmem:[%s1382_s1 + $0x58] sm:$0xf0]  ;;  %v888_v39 = vld [vmem:[%s1382_s1 + $0x14c] sm:$0xf]  ;;  %v762_v42 = vor.u32 %v890_v36, %v761_v34  ;;  %v617_v44 = vld [vmem:[%s1382_s1 + $0x28] sm:$0xf] }
  0x2a   :  { %526 = vmatpush.bf16.msrb.mxu3 %v846_v49  ;;  %v763_v40 = vld [vmem:[%s1382_s1 + $0x158] sm:$0xf0]  ;;  %v638_v43 = vor.u32 %v856_v37, %v635_v38  ;;  %v854_v45 = vld [vmem:[%s1382_s1 + $0x34] sm:$0xf0]  ;;  %v745_v46 = vld [vmem:[%s1382_s1 + $0x128] sm:$0xf] }
  0x2b   :  { %488 = vmatpush.bf16.msrb.mxu0 %v698_v57  ;;  %v766_v47 = vor.u32 %v888_v39, %v763_v40  ;;  %v886_v48 = vld [vmem:[%s1382_s1 + $0x134] sm:$0xf0]  ;;  %v852_v49 = vld [vmem:[%s1382_s1 + $0x2c] sm:$0xf]  ;;  %v619_v50 = vld [vmem:[%s1382_s1 + $0x38] sm:$0xf0]  ;;  %v618_v54 = vor.u32 %v854_v45, %v617_v44 }
  0x2c   :  { %501 = vmatpush.bf16.msrb.mxu1 %v826_v58  ;;  %v884_v51 = vld [vmem:[%s1382_s1 + $0x12c] sm:$0xf]  ;;  %v747_v52 = vld [vmem:[%s1382_s1 + $0x138] sm:$0xf0]  ;;  %v746_v55 = vor.u32 %v886_v48, %v745_v46  ;;  %v622_v57 = vor.u32 %v852_v49, %v619_v50  ;;  %v601_v58 = vld [vmem:[%s1382_s1 + $0x8] sm:$0xf] }
  0x2d   :  { %514 = vmatpush.bf16.msrb.mxu2 %v702_v59  ;;  %v850_v59 = vld [vmem:[%s1382_s1 + $0x14] sm:$0xf0]  ;;  %v729_v60 = vld [vmem:[%s1382_s1 + $0x108] sm:$0xf]  ;;  %v750_v61 = vor.u32 %v884_v51, %v747_v52  ;;  %v603_v0 = vld [vmem:[%s1382_s1 + $0x18] sm:$0xf0] }
  0x2e   :  { %527 = vmatpush.bf16.msrb.mxu3 %v830_v63  ;;  %v882_v62 = vld [vmem:[%s1382_s1 + $0x114] sm:$0xf0]  ;;  %v848_v63 = vld [vmem:[%s1382_s1 + $0xc] sm:$0xf]  ;;  %v731_v2 = vld [vmem:[%s1382_s1 + $0x118] sm:$0xf0]  ;;  %v602_v3 = vor.u32 %v850_v59, %v601_v58 }
  0x2f   :  { %489 = vmatpush.bf16.msrb.mxu0 %v682_v5  ;;  %v880_v1 = vld [vmem:[%s1382_s1 + $0x10c] sm:$0xf]  ;;  %v730_v4 = vor.u32 %v882_v62, %v729_v60  ;;  %v606_v5 = vor.u32 %v848_v63, %v603_v0  ;;  %v568_v8 = vld [vmem:[#allocation3] sm:$0xf] }
  0x30   :  { %502 = vmatpush.bf16.msrb.mxu1 %v810_v6  ;;  %v734_v6 = vor.u32 %v880_v1, %v731_v2  ;;  %v570_v13 = vperm.slane %v568_v8, 0  ;;  %v571_v20 = vperm.slane %v568_v8, 1  ;;  %v573_v37 = vperm.slane %v568_v8, 3 }
  0x31   :  { %515 = vmatpush.bf16.msrb.mxu2 %v686_v7  ;;  %v554_v7 = vld [vmem:[%s1383_s2] sm:$0xf] }
  0x32   :  { %528 = vmatpush.bf16.msrb.mxu3 %v814_v11  ;;  %v556_v10 = vperm.slane %v554_v7, 0  ;;  %v557_v16 = vperm.slane %v554_v7, 1  ;;  %v558_v26 = vperm.slane %v554_v7, 2  ;;  %v559_v33 = vperm.slane %v554_v7, 3 }
  0x33   :  { %490 = vmatpush.bf16.msrb.mxu0 %v666_v17 }
  0x34   :  { %503 = vmatpush.bf16.msrb.mxu1 %v794_v18 }
  0x35   :  { %516 = vmatpush.bf16.msrb.mxu2 %v670_v19 }
  0x36   :  { %529 = vmatpush.bf16.msrb.mxu3 %v798_v23 }
  0x37   :  { %491 = vmatpush.bf16.msrb.mxu0 %v650_v29  ;;  %v572_v29 = vperm.slane %v568_v8, 2 }
  0x38   :  { %504 = vmatpush.bf16.msrb.mxu1 %v778_v30 }
  0x39   :  { %517 = vmatpush.bf16.msrb.mxu2 %v654_v31 }
  0x3a   :  { %530 = vmatpush.bf16.msrb.mxu3 %v782_v35 }
  0x3b   :  { %492 = vmatpush.bf16.msrb.mxu0 %v634_v41 }
  0x3c   :  { %505 = vmatpush.bf16.msrb.mxu1 %v762_v42 }
  0x3d   :  { %518 = vmatpush.bf16.msrb.mxu2 %v638_v43 }
  0x3e   :  { %531 = vmatpush.bf16.msrb.mxu3 %v766_v47 }
  0x3f   :  { %493 = vmatpush.bf16.msrb.mxu0 %v618_v54 }
  0x40   :  { %506 = vmatpush.bf16.msrb.mxu1 %v746_v55 }
  0x41   :  { %519 = vmatpush.bf16.msrb.mxu2 %v622_v57 }
  0x42   :  { %532 = vmatpush.bf16.msrb.mxu3 %v750_v61 }
  0x43   :  { %494 = vmatpush.bf16.msrb.mxu0 %v602_v3 }
  0x44   :  { %507 = vmatpush.bf16.msrb.mxu1 %v730_v4 }
  0x45   :  { %520 = vmatpush.bf16.msrb.mxu2 %v606_v5 }
  0x46   :  { %533 = vmatpush.bf16.msrb.mxu3 %v734_v6  ;;  %495 = vmatmul.bf16.vlgmr.msrb.gmra.mxu0 %v1204_v53 }
  0x47   :  { %508 = vmatmul.bf16.vlgmr.msrb.gmra.mxu1 %v1212_v56 }
  0x48   :  { %521 = vmatmul.bf16.vlgmr.msrb.gmra.mxu2 %v1204_v53 }
  0x49   :  { %534 = vmatmul.bf16.vlgmr.msrb.gmra.mxu3 %v1212_v56 }
  0xa3   :  { %v444_v9 = vpop.f32.mrf.mxu0 }
  0xa4   :  { %v457_v11 = vpop.f32.mrf.mxu1 }
  0xa5   :  { %v458_v12 = vadd.f32 %v457_v11, %v444_v9 }
  0xa7   :  { %v564_v14 = vmul.f32 %v556_v10, %v458_v12 }
  0xa9   :  { %v578_v17 = vadd.f32 %v570_v13, %v564_v14 }
  0xab   :  { %v470_v15 = vpop.f32.mrf.mxu2  ;;  %582 = vst [vmem:[%s1385_s4] sm:$0xff] %v578_v17  ;;  %v446_v53 = vpop.f32.mrf.mxu0 }
  0xac   :  { %v483_v18 = vpop.f32.mrf.mxu3  ;;  %v459_v21 = vpop.f32.mrf.mxu1 }
  0xad   :  { %v484_v19 = vadd.f32 %v483_v18, %v470_v15 }
  0xaf   :  { %v565_v56 = vmul.f32 %v557_v16, %v484_v19 }
  0xb1   :  { %v579_v22 = vadd.f32 %v571_v20, %v565_v56 }
  0xb3   :  { %583 = vst [vmem:[%s1385_s4 + $0x8] sm:$0xff] %v579_v22  ;;  %v472_v23 = vpop.f32.mrf.mxu2 }
  0xb4   :  { %v485_v24 = vpop.f32.mrf.mxu3 }
  0xc3   :  { %v496_v25 = vpop.f32.mrf.mxu0 }
  0xc4   :  { %v509_v27 = vpop.f32.mrf.mxu1 }
  0xc5   :  { %v510_v28 = vadd.f32 %v509_v27, %v496_v25 }
  0xc7   :  { %v566_v30 = vmul.f32 %v558_v26, %v510_v28 }
  0xc9   :  { %v580_v31 = vadd.f32 %v572_v29, %v566_v30 }
  0xcb   :  { %v522_v32 = vpop.f32.mrf.mxu2  ;;  %584 = vst [vmem:[%s1385_s4 + $0x10] sm:$0xff] %v580_v31  ;;  %v498_v35 = vpop.f32.mrf.mxu0 }
  0xcc   :  { %v535_v34 = vpop.f32.mrf.mxu3  ;;  %v511_v38 = vpop.f32.mrf.mxu1 }
  0xcd   :  { %v536_v36 = vadd.f32 %v535_v34, %v522_v32 }
  0xcf   :  { %v567_v39 = vmul.f32 %v559_v33, %v536_v36 }
  0xd1   :  { %v581_v40 = vadd.f32 %v573_v37, %v567_v39 }
  0xd3   :  { %585 = vst [vmem:[%s1385_s4 + $0x18] sm:$0xff] %v581_v40  ;;  %v524_v41 = vpop.f32.mrf.mxu2 }
  0xd4   :  { %v537_v42 = vpop.f32.mrf.mxu3 }
  0xd5   :  { %590 = vsyncpa [#allocation4], 1 }

// kernel: _lambda_.41
= control target key start
LH: loop header
LB: loop body
LE: loop exit
PB: predicated region body
PF: predicated region fallthrough
CT: control target
= control target key end

     0   :  { %s2339_s18 = smov 0   ;;  %s2341_s19 = smov 0   ;;  %s2694_s0 = inlined_call_operand.vmem [shape: bf16[8,4608], index: 0, kind: input, shape index: {}]   ;;  %s2695_s1 = inlined_call_operand.vmem [shape: bf16[4608,512], index: 1, kind: input, shape index: {}]   ;;  %s2696_s2 = inlined_call_operand.vmem [shape: f32[1,512], index: 2, kind: input, shape index: {}]   ;;  %s2697_s3 = inlined_call_operand.vmem [shape: f32[1,512], index: 3, kind: input, shape index: {}]   ;;  %s2698_s4 = inlined_call_operand.vmem [shape: f32[8,512], index: 4, kind: input, shape index: {}]   ;;  %s2699_s5 = inlined_call_operand.vmem [shape: f32[8,512], index: 5, kind: output, shape index: {}]  }
   0x1   :  { %s2343_s20 = smov 0  }
   0x2 LB: > { %s27_s21 = sadd.s32 1, %s2302_s19  ;;  %p1606_p0 = scmp.ge.s32.totalorder %s2306_s20, 1  ;;  %s2306_s20 = sphi %s2343_s20, %s15_s20   ;;  %s2302_s19 = sphi %s2341_s19, %s2701_s19   ;;  %s2298_s18 = sphi %s2339_s18, %s2700_s18  }
   0x3   : > { %p28_p1 = scmp.ge.s32.totalorder %s27_s21, 9  ;;  %p271_p2 = scmp.lt.s32.totalorder %s2306_s20, 10 }
   0x5   : > { %s2703_s21 = smov (%p28_p1, %s27_s21), 0  ;;  %p272_p3 = pnand %p1606_p0, %p271_p2 }
   0x6   : > { %s1607_s22 = sshll.u32 (!%p272_p3), %s2298_s18, 2  ;;  %s1609_s23 = sshll.u32 (!%p272_p3), %s2298_s18, 6 }
   0x7   : > { %275 = sbr.rel (%p272_p3) target bundleno = 313 (0x139), region = 40  ;;  %p337_p4 = scmp.lt.s32.totalorder (!%p272_p3), %s1607_s22, 35 }
   0x8   : > { %p346_p5 = scmp.lt.s32.totalorder (!%p272_p3), %s1609_s23, 575  ;;  %p1612_p6 = scmp.ne.s32.totalorder (!%p272_p3), %s2298_s18, 0 }
   0xc   : > { %s2705_s22 = smov (!%p337_p4, %s1607_s22), 35  ;;  %s2707_s23 = smov (!%p346_p5, %s1609_s23), 575 }
   0xd   : > { %s1608_s24 = sshll.u32 %s2705_s22, 2  ;;  %s2130_s28 = sshll.u32 %s2707_s23, 4 }
   0xe   : > { %s2364_s27 = scalar_lea.vmem %s2694_s0, %s1608_s24  ;;  %s2369_s6 = scalar_lea.vmem %s2695_s1, %s2130_s28 }
   0xf   : > { %389 = sbr.rel (%p1612_p6) target bundleno = 25 (0x19), region = 44 }
  0x14   : > { %v2308_v0 = vmov 0.0  }
  0x15   : > { %390 = vst [vmem:[#allocation2 + $0x10] sm:$0xff] %v2308_v0 }
  0x16   : > { %391 = vst [vmem:[#allocation2] sm:$0xff] %v2308_v0 }
  0x17   : > { %392 = vst [vmem:[#allocation2 + $0x18] sm:$0xff] %v2308_v0 }
  0x18   : > { %393 = vst [vmem:[#allocation2 + $0x8] sm:$0xff] %v2308_v0 }
  0x19 PF: > { %v1727_v1 = vld [vmem:[%s2369_s6 + $0xe0] sm:$0xf]  ;;  %v2161_v2 = vld [vmem:[%s2369_s6 + $0xec] sm:$0xf0]  ;;  %p2125_p7 = scmp.ne.s32.totalorder %s2298_s18, 8 }
  0x1a   : > { %v1855_v3 = vld [vmem:[%s2369_s6 + $0x1e0] sm:$0xf]  ;;  %v1728_v4 = vor.u32 %v2161_v2, %v1727_v1  ;;  %v2193_v5 = vld [vmem:[%s2369_s6 + $0x1ec] sm:$0xf0] }
  0x1b   : > { %v1983_v6 = vld [vmem:[%s2369_s6 + $0x2e0] sm:$0xf]  ;;  %v2225_v7 = vld [vmem:[%s2369_s6 + $0x2ec] sm:$0xf0]  ;;  %v1856_v8 = vor.u32 %v2193_v5, %v1855_v3 }
  0x1c   : > { %v1984_v9 = vor.u32 %v2225_v7, %v1983_v6  ;;  %v2111_v10 = vld [vmem:[%s2369_s6 + $0x3e0] sm:$0xf]  ;;  %v2257_v11 = vld [vmem:[%s2369_s6 + $0x3ec] sm:$0xf0]  ;;  %1182 = vmatpush.bf16.msra.mxu0 %v1728_v4 }
  0x1d   : > { %v1711_v12 = vld [vmem:[%s2369_s6 + $0xc0] sm:$0xf]  ;;  %v2112_v13 = vor.u32 %v2257_v11, %v2111_v10  ;;  %v2157_v14 = vld [vmem:[%s2369_s6 + $0xcc] sm:$0xf0]  ;;  %1195 = vmatpush.bf16.msra.mxu1 %v1856_v8 }
  0x1e   : > { %v1839_v15 = vld [vmem:[%s2369_s6 + $0x1c0] sm:$0xf]  ;;  %v2189_v16 = vld [vmem:[%s2369_s6 + $0x1cc] sm:$0xf0]  ;;  %1208 = vmatpush.bf16.msra.mxu2 %v1984_v9  ;;  %v1712_v17 = vor.u32 %v2157_v14, %v1711_v12 }
  0x1f   : > { %v1840_v18 = vor.u32 %v2189_v16, %v1839_v15  ;;  %v1967_v19 = vld [vmem:[%s2369_s6 + $0x2c0] sm:$0xf]  ;;  %v2221_v20 = vld [vmem:[%s2369_s6 + $0x2cc] sm:$0xf0]  ;;  %1221 = vmatpush.bf16.msra.mxu3 %v2112_v13 }
  0x20   : > { %v2095_v21 = vld [vmem:[%s2369_s6 + $0x3c0] sm:$0xf]  ;;  %v1968_v22 = vor.u32 %v2221_v20, %v1967_v19  ;;  %v2253_v23 = vld [vmem:[%s2369_s6 + $0x3cc] sm:$0xf0]  ;;  %1183 = vmatpush.bf16.msra.mxu0 %v1712_v17 }
  0x21   : > { %v1695_v24 = vld [vmem:[%s2369_s6 + $0xa0] sm:$0xf]  ;;  %v2153_v25 = vld [vmem:[%s2369_s6 + $0xac] sm:$0xf0]  ;;  %v2096_v26 = vor.u32 %v2253_v23, %v2095_v21  ;;  %1196 = vmatpush.bf16.msra.mxu1 %v1840_v18 }
  0x22   : > { %v1823_v27 = vld [vmem:[%s2369_s6 + $0x1a0] sm:$0xf]  ;;  %v2185_v28 = vld [vmem:[%s2369_s6 + $0x1ac] sm:$0xf0]  ;;  %v1696_v30 = vor.u32 %v2153_v25, %v1695_v24  ;;  %1209 = vmatpush.bf16.msra.mxu2 %v1968_v22 }
  0x23   : > { %v1951_v29 = vld [vmem:[%s2369_s6 + $0x2a0] sm:$0xf]  ;;  %v2217_v31 = vld [vmem:[%s2369_s6 + $0x2ac] sm:$0xf0]  ;;  %v1824_v34 = vor.u32 %v2185_v28, %v1823_v27  ;;  %1222 = vmatpush.bf16.msra.mxu3 %v2096_v26 }
  0x24   : > { %v2079_v32 = vld [vmem:[%s2369_s6 + $0x3a0] sm:$0xf]  ;;  %v2249_v33 = vld [vmem:[%s2369_s6 + $0x3ac] sm:$0xf0]  ;;  %v1952_v35 = vor.u32 %v2217_v31, %v1951_v29  ;;  %1184 = vmatpush.bf16.msra.mxu0 %v1696_v30  ;;  %v2159_v29 = vld [vmem:[%s2369_s6 + $0xe4] sm:$0xf] }
  0x25   : > { %v1679_v36 = vld [vmem:[%s2369_s6 + $0x80] sm:$0xf]  ;;  %v2149_v37 = vld [vmem:[%s2369_s6 + $0x8c] sm:$0xf0]  ;;  %v2080_v39 = vor.u32 %v2249_v33, %v2079_v32  ;;  %1197 = vmatpush.bf16.msra.mxu1 %v1824_v34  ;;  %v1729_v30 = vld [vmem:[%s2369_s6 + $0xf0] sm:$0xf0] }
  0x26   : > { %v1807_v38 = vld [vmem:[%s2369_s6 + $0x180] sm:$0xf]  ;;  %v2181_v40 = vld [vmem:[%s2369_s6 + $0x18c] sm:$0xf0]  ;;  %v1680_v45 = vor.u32 %v2149_v37, %v1679_v36  ;;  %1210 = vmatpush.bf16.msra.mxu2 %v1952_v35  ;;  %v2191_v31 = vld [vmem:[%s2369_s6 + $0x1e4] sm:$0xf] }
  0x27   : > { %v1935_v41 = vld [vmem:[%s2369_s6 + $0x280] sm:$0xf]  ;;  %v2213_v42 = vld [vmem:[%s2369_s6 + $0x28c] sm:$0xf0]  ;;  %v1808_v46 = vor.u32 %v2181_v40, %v1807_v38  ;;  %1223 = vmatpush.bf16.msra.mxu3 %v2080_v39  ;;  %v1857_v33 = vld [vmem:[%s2369_s6 + $0x1f0] sm:$0xf0] }
  0x28   : > { %v2063_v43 = vld [vmem:[%s2369_s6 + $0x380] sm:$0xf]  ;;  %v2245_v44 = vld [vmem:[%s2369_s6 + $0x38c] sm:$0xf0]  ;;  %v1936_v47 = vor.u32 %v2213_v42, %v1935_v41  ;;  %1185 = vmatpush.bf16.msra.mxu0 %v1680_v45  ;;  %v2223_v34 = vld [vmem:[%s2369_s6 + $0x2e4] sm:$0xf]  ;;  %v1732_v41 = vor.u32 %v2159_v29, %v1729_v30  ;;  %v1860_v42 = vor.u32 %v2191_v31, %v1857_v33 }
  0x29   : > { %v1663_v48 = vld [vmem:[%s2369_s6 + $0x60] sm:$0xf]  ;;  %v2145_v49 = vld [vmem:[%s2369_s6 + $0x6c] sm:$0xf0]  ;;  %v2064_v51 = vor.u32 %v2245_v44, %v2063_v43  ;;  %1198 = vmatpush.bf16.msra.mxu1 %v1808_v46  ;;  %v1985_v35 = vld [vmem:[%s2369_s6 + $0x2f0] sm:$0xf0] }
  0x2a   : > { %v1791_v50 = vld [vmem:[%s2369_s6 + $0x160] sm:$0xf]  ;;  %v2177_v52 = vld [vmem:[%s2369_s6 + $0x16c] sm:$0xf0]  ;;  %v1664_v57 = vor.u32 %v2145_v49, %v1663_v48  ;;  %1211 = vmatpush.bf16.msra.mxu2 %v1936_v47  ;;  %v2255_v38 = vld [vmem:[%s2369_s6 + $0x3e4] sm:$0xf]  ;;  %v1988_v43 = vor.u32 %v2223_v34, %v1985_v35 }
  0x2b   : > { %v1919_v53 = vld [vmem:[%s2369_s6 + $0x260] sm:$0xf]  ;;  %v2209_v54 = vld [vmem:[%s2369_s6 + $0x26c] sm:$0xf0]  ;;  %v1792_v58 = vor.u32 %v2177_v52, %v1791_v50  ;;  %1224 = vmatpush.bf16.msra.mxu3 %v2064_v51  ;;  %v2113_v39 = vld [vmem:[%s2369_s6 + $0x3f0] sm:$0xf0] }
  0x2c   : > { %v2047_v55 = vld [vmem:[%s2369_s6 + $0x360] sm:$0xf]  ;;  %v2241_v56 = vld [vmem:[%s2369_s6 + $0x36c] sm:$0xf0]  ;;  %v1920_v59 = vor.u32 %v2209_v54, %v1919_v53  ;;  %1186 = vmatpush.bf16.msra.mxu0 %v1664_v57  ;;  %v2155_v44 = vld [vmem:[%s2369_s6 + $0xc4] sm:$0xf]  ;;  %v2116_v47 = vor.u32 %v2255_v38, %v2113_v39 }
  0x2d   : > { %v1647_v60 = vld [vmem:[%s2369_s6 + $0x40] sm:$0xf]  ;;  %v2141_v61 = vld [vmem:[%s2369_s6 + $0x4c] sm:$0xf0]  ;;  %v2048_v63 = vor.u32 %v2241_v56, %v2047_v55  ;;  %1199 = vmatpush.bf16.msra.mxu1 %v1792_v58  ;;  %v1713_v45 = vld [vmem:[%s2369_s6 + $0xd0] sm:$0xf0] }
  0x2e   : > { %v1775_v62 = vld [vmem:[%s2369_s6 + $0x140] sm:$0xf]  ;;  %v2173_v0 = vld [vmem:[%s2369_s6 + $0x14c] sm:$0xf0]  ;;  %v1648_v5 = vor.u32 %v2141_v61, %v1647_v60  ;;  %1212 = vmatpush.bf16.msra.mxu2 %v1920_v59  ;;  %v2187_v46 = vld [vmem:[%s2369_s6 + $0x1c4] sm:$0xf]  ;;  %v1716_v53 = vor.u32 %v2155_v44, %v1713_v45 }
  0x2f   : > { %v1903_v1 = vld [vmem:[%s2369_s6 + $0x240] sm:$0xf]  ;;  %v2205_v2 = vld [vmem:[%s2369_s6 + $0x24c] sm:$0xf0]  ;;  %v1776_v6 = vor.u32 %v2173_v0, %v1775_v62  ;;  %1225 = vmatpush.bf16.msra.mxu3 %v2048_v63  ;;  %v1841_v48 = vld [vmem:[%s2369_s6 + $0x1d0] sm:$0xf0] }
  0x30   : > { %v2031_v3 = vld [vmem:[%s2369_s6 + $0x340] sm:$0xf]  ;;  %v2237_v4 = vld [vmem:[%s2369_s6 + $0x34c] sm:$0xf0]  ;;  %v1904_v7 = vor.u32 %v2205_v2, %v1903_v1  ;;  %1187 = vmatpush.bf16.msra.mxu0 %v1648_v5  ;;  %v2219_v49 = vld [vmem:[%s2369_s6 + $0x2c4] sm:$0xf]  ;;  %v1844_v54 = vor.u32 %v2187_v46, %v1841_v48 }
  0x31   : > { %v1631_v8 = vld [vmem:[%s2369_s6 + $0x20] sm:$0xf]  ;;  %v2137_v9 = vld [vmem:[%s2369_s6 + $0x2c] sm:$0xf0]  ;;  %v2032_v11 = vor.u32 %v2237_v4, %v2031_v3  ;;  %1200 = vmatpush.bf16.msra.mxu1 %v1776_v6  ;;  %v1969_v50 = vld [vmem:[%s2369_s6 + $0x2d0] sm:$0xf0] }
  0x32   : > { %v1759_v10 = vld [vmem:[%s2369_s6 + $0x120] sm:$0xf]  ;;  %v2169_v12 = vld [vmem:[%s2369_s6 + $0x12c] sm:$0xf0]  ;;  %v1632_v17 = vor.u32 %v2137_v9, %v1631_v8  ;;  %1213 = vmatpush.bf16.msra.mxu2 %v1904_v7  ;;  %v2251_v51 = vld [vmem:[%s2369_s6 + $0x3c4] sm:$0xf]  ;;  %v1972_v55 = vor.u32 %v2219_v49, %v1969_v50 }
  0x33   : > { %v1887_v13 = vld [vmem:[%s2369_s6 + $0x220] sm:$0xf]  ;;  %v2201_v14 = vld [vmem:[%s2369_s6 + $0x22c] sm:$0xf0]  ;;  %v1760_v20 = vor.u32 %v2169_v12, %v1759_v10  ;;  %1226 = vmatpush.bf16.msra.mxu3 %v2032_v11  ;;  %v2097_v52 = vld [vmem:[%s2369_s6 + $0x3d0] sm:$0xf0] }
  0x34   : > { %v2015_v15 = vld [vmem:[%s2369_s6 + $0x320] sm:$0xf]  ;;  %v2233_v16 = vld [vmem:[%s2369_s6 + $0x32c] sm:$0xf0]  ;;  %v1888_v21 = vor.u32 %v2201_v14, %v1887_v13  ;;  %1188 = vmatpush.bf16.msra.mxu0 %v1632_v17  ;;  %v2151_v56 = vld [vmem:[%s2369_s6 + $0xa4] sm:$0xf]  ;;  %v2100_v59 = vor.u32 %v2251_v51, %v2097_v52 }
  0x35   : > { %v1615_v18 = vld [vmem:[%s2369_s6] sm:$0xf]  ;;  %v2133_v19 = vld [vmem:[%s2369_s6 + $0xc] sm:$0xf0]  ;;  %v2016_v25 = vor.u32 %v2233_v16, %v2015_v15  ;;  %1201 = vmatpush.bf16.msra.mxu1 %v1760_v20  ;;  %v1697_v57 = vld [vmem:[%s2369_s6 + $0xb0] sm:$0xf0] }
  0x36   : > { %v1743_v22 = vld [vmem:[%s2369_s6 + $0x100] sm:$0xf]  ;;  %v2165_v23 = vld [vmem:[%s2369_s6 + $0x10c] sm:$0xf0]  ;;  %v1616_v32 = vor.u32 %v2133_v19, %v1615_v18  ;;  %1214 = vmatpush.bf16.msra.mxu2 %v1888_v21  ;;  %v2183_v58 = vld [vmem:[%s2369_s6 + $0x1a4] sm:$0xf]  ;;  %v1700_v1 = vor.u32 %v2151_v56, %v1697_v57 }
  0x37   : > { %v1871_v24 = vld [vmem:[%s2369_s6 + $0x200] sm:$0xf]  ;;  %v2197_v26 = vld [vmem:[%s2369_s6 + $0x20c] sm:$0xf0]  ;;  %v1744_v36 = vor.u32 %v2165_v23, %v1743_v22  ;;  %1227 = vmatpush.bf16.msra.mxu3 %v2016_v25  ;;  %v1825_v60 = vld [vmem:[%s2369_s6 + $0x1b0] sm:$0xf0] }
  0x38   : > { %v1999_v27 = vld [vmem:[%s2369_s6 + $0x300] sm:$0xf]  ;;  %v2229_v28 = vld [vmem:[%s2369_s6 + $0x30c] sm:$0xf0]  ;;  %v1872_v37 = vor.u32 %v2197_v26, %v1871_v24  ;;  %1189 = vmatpush.bf16.msra.mxu0 %v1616_v32  ;;  %v2215_v61 = vld [vmem:[%s2369_s6 + $0x2a4] sm:$0xf]  ;;  %v1828_v3 = vor.u32 %v2183_v58, %v1825_v60 }
  0x39   : > { %v2000_v40 = vor.u32 %v2229_v28, %v1999_v27  ;;  %1202 = vmatpush.bf16.msra.mxu1 %v1744_v36  ;;  %v1953_v62 = vld [vmem:[%s2369_s6 + $0x2b0] sm:$0xf0]  ;;  %v2247_v63 = vld [vmem:[%s2369_s6 + $0x3a4] sm:$0xf]  ;;  %v399_v2 = vld [vmem:[%s2364_s27 + $0x8] sm:$0xff] }
  0x3a   : > { %1215 = vmatpush.bf16.msra.mxu2 %v1872_v37  ;;  %v2081_v0 = vld [vmem:[%s2369_s6 + $0x3b0] sm:$0xf0]  ;;  %v1956_v4 = vor.u32 %v2215_v61, %v1953_v62  ;;  %v2147_v5 = vld [vmem:[%s2369_s6 + $0x84] sm:$0xf]  ;;  %v532_v8 = vunpack.c.l.b16 %v399_v2  ;;  %v533_v9 = vunpack.c.h.b16 %v399_v2 }
  0x3b   : > { %1228 = vmatpush.bf16.msra.mxu3 %v2000_v40  ;;  %v1681_v6 = vld [vmem:[%s2369_s6 + $0x90] sm:$0xf0]  ;;  %v2179_v7 = vld [vmem:[%s2369_s6 + $0x184] sm:$0xf]  ;;  %v2084_v10 = vor.u32 %v2247_v63, %v2081_v0 }
  0x3c   : > { %1234 = vmatpush.bf16.msrb.mxu0 %v1732_v41  ;;  %v1809_v11 = vld [vmem:[%s2369_s6 + $0x190] sm:$0xf0]  ;;  %v2211_v12 = vld [vmem:[%s2369_s6 + $0x284] sm:$0xf]  ;;  %v2469_v16 = vpack.c.b16 %v532_v8, %v532_v8  ;;  %v2471_v17 = vpack.c.b16 %v533_v9, %v533_v9  ;;  %v1684_v19 = vor.u32 %v2147_v5, %v1681_v6  ;;  %v2162_v8 = vld [vmem:[%s2369_s6 + $0xf4] sm:$0xf0] }
  0x3d   : > { %1247 = vmatpush.bf16.msrb.mxu1 %v1860_v42  ;;  %v1937_v13 = vld [vmem:[%s2369_s6 + $0x290] sm:$0xf0]  ;;  %v2243_v14 = vld [vmem:[%s2369_s6 + $0x384] sm:$0xf]  ;;  %v1812_v22 = vor.u32 %v2179_v7, %v1809_v11  ;;  %v1735_v7 = vld [vmem:[%s2369_s6 + $0xe8] sm:$0xf] }
  0x3e   : > { %1260 = vmatpush.bf16.msrb.mxu2 %v1988_v43  ;;  %v2065_v15 = vld [vmem:[%s2369_s6 + $0x390] sm:$0xf0]  ;;  %v398_v18 = vld [vmem:[%s2364_s27] sm:$0xff]  ;;  %v1940_v23 = vor.u32 %v2211_v12, %v1937_v13  ;;  %1229 = vmatmul.bf16.vlgmr.msra.gmra.mxu3 %v2471_v17  ;;  %v1863_v9 = vld [vmem:[%s2369_s6 + $0x1e8] sm:$0xf] }
  0x3f   : > { %1273 = vmatpush.bf16.msrb.mxu3 %v2116_v47  ;;  %v530_v20 = vunpack.c.l.b16 %v398_v18  ;;  %v531_v21 = vunpack.c.h.b16 %v398_v18  ;;  %v2143_v24 = vld [vmem:[%s2369_s6 + $0x64] sm:$0xf]  ;;  %v1665_v25 = vld [vmem:[%s2369_s6 + $0x70] sm:$0xf0]  ;;  %v2068_v27 = vor.u32 %v2243_v14, %v2065_v15  ;;  %1216 = vmatmul.bf16.vlgmr.msra.gmra.mxu2 %v2469_v16  ;;  %v2194_v11 = vld [vmem:[%s2369_s6 + $0x1f4] sm:$0xf0] }
  0x40   : > { %1235 = vmatpush.bf16.msrb.mxu0 %v1716_v53  ;;  %v2175_v26 = vld [vmem:[%s2369_s6 + $0x164] sm:$0xf]  ;;  %v1793_v28 = vld [vmem:[%s2369_s6 + $0x170] sm:$0xf0]  ;;  %v1668_v35 = vor.u32 %v2143_v24, %v1665_v25  ;;  %v1991_v12 = vld [vmem:[%s2369_s6 + $0x2e8] sm:$0xf] }
  0x41   : > { %1248 = vmatpush.bf16.msrb.mxu1 %v1844_v54  ;;  %v2207_v29 = vld [vmem:[%s2369_s6 + $0x264] sm:$0xf]  ;;  %v1921_v30 = vld [vmem:[%s2369_s6 + $0x270] sm:$0xf0]  ;;  %v2481_v31 = vpack.c.b16 %v530_v20, %v530_v20  ;;  %v2483_v32 = vpack.c.b16 %v531_v21, %v531_v21  ;;  %v1796_v36 = vor.u32 %v2175_v26, %v1793_v28  ;;  %v2226_v13 = vld [vmem:[%s2369_s6 + $0x2f4] sm:$0xf0]  ;;  %v1736_v21 = vor.u32 %v2162_v8, %v1735_v7 }
  0x42   : > { %1261 = vmatpush.bf16.msrb.mxu2 %v1972_v55  ;;  %v2239_v33 = vld [vmem:[%s2369_s6 + $0x364] sm:$0xf]  ;;  %v2049_v34 = vld [vmem:[%s2369_s6 + $0x370] sm:$0xf0]  ;;  %v1924_v37 = vor.u32 %v2207_v29, %v1921_v30  ;;  %v2119_v18 = vld [vmem:[%s2369_s6 + $0x3e8] sm:$0xf] }
  0x43   : > { %1274 = vmatpush.bf16.msrb.mxu3 %v2100_v59  ;;  %1203 = vmatmul.bf16.vlgmr.msra.gmra.mxu1 %v2483_v32  ;;  %v2139_v38 = vld [vmem:[%s2369_s6 + $0x44] sm:$0xf]  ;;  %v1649_v39 = vld [vmem:[%s2369_s6 + $0x50] sm:$0xf0]  ;;  %v2052_v41 = vor.u32 %v2239_v33, %v2049_v34  ;;  %v1719_v24 = vld [vmem:[%s2369_s6 + $0xc8] sm:$0xf] }
  0x44   : > { %1236 = vmatpush.bf16.msrb.mxu0 %v1700_v1  ;;  %v2171_v40 = vld [vmem:[%s2369_s6 + $0x144] sm:$0xf]  ;;  %v1777_v42 = vld [vmem:[%s2369_s6 + $0x150] sm:$0xf0]  ;;  %v1652_v47 = vor.u32 %v2139_v38, %v1649_v39  ;;  %v2158_v25 = vld [vmem:[%s2369_s6 + $0xd4] sm:$0xf0] }
  0x45   : > { %1249 = vmatpush.bf16.msrb.mxu1 %v1828_v3  ;;  %v2203_v43 = vld [vmem:[%s2369_s6 + $0x244] sm:$0xf]  ;;  %v1905_v44 = vld [vmem:[%s2369_s6 + $0x250] sm:$0xf0]  ;;  %1190 = vmatmul.bf16.vlgmr.msra.gmra.mxu0 %v2481_v31  ;;  %v1780_v48 = vor.u32 %v2171_v40, %v1777_v42  ;;  %v1847_v26 = vld [vmem:[%s2369_s6 + $0x1c8] sm:$0xf] }
  0x46   : > { %1262 = vmatpush.bf16.msrb.mxu2 %v1956_v4  ;;  %v2235_v45 = vld [vmem:[%s2369_s6 + $0x344] sm:$0xf]  ;;  %v2033_v46 = vld [vmem:[%s2369_s6 + $0x350] sm:$0xf0]  ;;  %v1908_v49 = vor.u32 %v2203_v43, %v1905_v44  ;;  %v2190_v28 = vld [vmem:[%s2369_s6 + $0x1d4] sm:$0xf0] }
  0x47   : > { %1275 = vmatpush.bf16.msrb.mxu3 %v2084_v10  ;;  %v2135_v50 = vld [vmem:[%s2369_s6 + $0x24] sm:$0xf]  ;;  %v1633_v51 = vld [vmem:[%s2369_s6 + $0x30] sm:$0xf0]  ;;  %v2036_v53 = vor.u32 %v2235_v45, %v2033_v46  ;;  %v1975_v29 = vld [vmem:[%s2369_s6 + $0x2c8] sm:$0xf] }
  0x48   : > { %1237 = vmatpush.bf16.msrb.mxu0 %v1684_v19  ;;  %v2167_v52 = vld [vmem:[%s2369_s6 + $0x124] sm:$0xf]  ;;  %v1761_v54 = vld [vmem:[%s2369_s6 + $0x130] sm:$0xf0]  ;;  %v1636_v59 = vor.u32 %v2135_v50, %v1633_v51  ;;  %v2258_v19 = vld [vmem:[%s2369_s6 + $0x3f4] sm:$0xf0] }
  0x49   : > { %1250 = vmatpush.bf16.msrb.mxu1 %v1812_v22  ;;  %v2199_v55 = vld [vmem:[%s2369_s6 + $0x224] sm:$0xf]  ;;  %v1889_v56 = vld [vmem:[%s2369_s6 + $0x230] sm:$0xf0]  ;;  %v1764_v62 = vor.u32 %v2167_v52, %v1761_v54  ;;  %v1864_v22 = vor.u32 %v2194_v11, %v1863_v9  ;;  %v2222_v30 = vld [vmem:[%s2369_s6 + $0x2d4] sm:$0xf0] }
  0x4a   : > { %1263 = vmatpush.bf16.msrb.mxu2 %v1940_v23  ;;  %v2231_v57 = vld [vmem:[%s2369_s6 + $0x324] sm:$0xf]  ;;  %v2017_v58 = vld [vmem:[%s2369_s6 + $0x330] sm:$0xf0]  ;;  %v1892_v63 = vor.u32 %v2199_v55, %v1889_v56  ;;  %v1992_v23 = vor.u32 %v2226_v13, %v1991_v12  ;;  %v2103_v33 = vld [vmem:[%s2369_s6 + $0x3c8] sm:$0xf] }
  0x4b   : > { %1276 = vmatpush.bf16.msrb.mxu3 %v2068_v27  ;;  %v2131_v60 = vld [vmem:[%s2369_s6 + $0x4] sm:$0xf]  ;;  %v1617_v61 = vld [vmem:[%s2369_s6 + $0x10] sm:$0xf0]  ;;  %v2020_v3 = vor.u32 %v2231_v57, %v2017_v58  ;;  %v2120_v27 = vor.u32 %v2258_v19, %v2119_v18  ;;  %v2254_v34 = vld [vmem:[%s2369_s6 + $0x3d4] sm:$0xf0] }
  0x4c   : > { %1238 = vmatpush.bf16.msrb.mxu0 %v1668_v35  ;;  %v2163_v0 = vld [vmem:[%s2369_s6 + $0x104] sm:$0xf]  ;;  %v1745_v1 = vld [vmem:[%s2369_s6 + $0x110] sm:$0xf0]  ;;  %v1620_v10 = vor.u32 %v2131_v60, %v1617_v61  ;;  %v1720_v35 = vor.u32 %v2158_v25, %v1719_v24  ;;  %v1703_v38 = vld [vmem:[%s2369_s6 + $0xa8] sm:$0xf] }
  0x4d   : > { %1251 = vmatpush.bf16.msrb.mxu1 %v1796_v36  ;;  %v2195_v2 = vld [vmem:[%s2369_s6 + $0x204] sm:$0xf]  ;;  %v1873_v4 = vld [vmem:[%s2369_s6 + $0x210] sm:$0xf0]  ;;  %v1748_v14 = vor.u32 %v2163_v0, %v1745_v1  ;;  %v1848_v36 = vor.u32 %v2190_v28, %v1847_v26  ;;  %v2154_v39 = vld [vmem:[%s2369_s6 + $0xb4] sm:$0xf0] }
  0x4e   : > { %1264 = vmatpush.bf16.msrb.mxu2 %v1924_v37  ;;  %v2227_v5 = vld [vmem:[%s2369_s6 + $0x304] sm:$0xf]  ;;  %v2001_v6 = vld [vmem:[%s2369_s6 + $0x310] sm:$0xf0]  ;;  %v1876_v15 = vor.u32 %v2195_v2, %v1873_v4  ;;  %v1976_v37 = vor.u32 %v2222_v30, %v1975_v29  ;;  %v1831_v40 = vld [vmem:[%s2369_s6 + $0x1a8] sm:$0xf] }
  0x4f   : > { %1277 = vmatpush.bf16.msrb.mxu3 %v2052_v41  ;;  %v2004_v20 = vor.u32 %v2227_v5, %v2001_v6  ;;  %v2104_v41 = vor.u32 %v2254_v34, %v2103_v33  ;;  %v2186_v42 = vld [vmem:[%s2369_s6 + $0x1b4] sm:$0xf0]  ;;  %v1959_v43 = vld [vmem:[%s2369_s6 + $0x2a8] sm:$0xf] }
  0x50   : > { %1239 = vmatpush.bf16.msrb.mxu0 %v1652_v47  ;;  %v2218_v44 = vld [vmem:[%s2369_s6 + $0x2b4] sm:$0xf0]  ;;  %v2087_v45 = vld [vmem:[%s2369_s6 + $0x3a8] sm:$0xf]  ;;  %v1704_v47 = vor.u32 %v2154_v39, %v1703_v38 }
  0x51   : > { %1252 = vmatpush.bf16.msrb.mxu1 %v1780_v48  ;;  %v2250_v46 = vld [vmem:[%s2369_s6 + $0x3b4] sm:$0xf0]  ;;  %v1832_v48 = vor.u32 %v2186_v42, %v1831_v40  ;;  %v1687_v50 = vld [vmem:[%s2369_s6 + $0x88] sm:$0xf] }
  0x52   : > { %1265 = vmatpush.bf16.msrb.mxu2 %v1908_v49  ;;  %v1960_v49 = vor.u32 %v2218_v44, %v1959_v43  ;;  %v2150_v51 = vld [vmem:[%s2369_s6 + $0x94] sm:$0xf0]  ;;  %v1815_v52 = vld [vmem:[%s2369_s6 + $0x188] sm:$0xf] }
  0x53   : > { %1278 = vmatpush.bf16.msrb.mxu3 %v2036_v53  ;;  %v2088_v53 = vor.u32 %v2250_v46, %v2087_v45  ;;  %v2182_v54 = vld [vmem:[%s2369_s6 + $0x194] sm:$0xf0]  ;;  %v1943_v55 = vld [vmem:[%s2369_s6 + $0x288] sm:$0xf] }
  0x54   : > { %1240 = vmatpush.bf16.msrb.mxu0 %v1636_v59  ;;  %v2214_v56 = vld [vmem:[%s2369_s6 + $0x294] sm:$0xf0]  ;;  %v2071_v57 = vld [vmem:[%s2369_s6 + $0x388] sm:$0xf]  ;;  %v1688_v59 = vor.u32 %v2150_v51, %v1687_v50  ;;  %v1816_v60 = vor.u32 %v2182_v54, %v1815_v52  ;;  %v1865_v51 = vld [vmem:[%s2369_s6 + $0x1f8] sm:$0xf0] }
  0x55   : > { %1253 = vmatpush.bf16.msrb.mxu1 %v1764_v62  ;;  %v2246_v58 = vld [vmem:[%s2369_s6 + $0x394] sm:$0xf0]  ;;  %v1944_v61 = vor.u32 %v2214_v56, %v1943_v55  ;;  %v1671_v62 = vld [vmem:[%s2369_s6 + $0x68] sm:$0xf]  ;;  %v2224_v52 = vld [vmem:[%s2369_s6 + $0x2ec] sm:$0xf] }
  0x56   : > { %1266 = vmatpush.bf16.msrb.mxu2 %v1892_v63  ;;  %v2146_v63 = vld [vmem:[%s2369_s6 + $0x74] sm:$0xf0]  ;;  %v1799_v0 = vld [vmem:[%s2369_s6 + $0x168] sm:$0xf]  ;;  %v2072_v1 = vor.u32 %v2246_v58, %v2071_v57  ;;  %v2256_v56 = vld [vmem:[%s2369_s6 + $0x3ec] sm:$0xf] }
  0x57   : > { %1279 = vmatpush.bf16.msrb.mxu3 %v2020_v3  ;;  %v2178_v2 = vld [vmem:[%s2369_s6 + $0x174] sm:$0xf0]  ;;  %v1927_v3 = vld [vmem:[%s2369_s6 + $0x268] sm:$0xf]  ;;  %v1672_v7 = vor.u32 %v2146_v63, %v1671_v62  ;;  %v2121_v57 = vld [vmem:[%s2369_s6 + $0x3f8] sm:$0xf0] }
  0x58   : > { %1241 = vmatpush.bf16.msrb.mxu0 %v1620_v10  ;;  %v2210_v4 = vld [vmem:[%s2369_s6 + $0x274] sm:$0xf0]  ;;  %v2055_v5 = vld [vmem:[%s2369_s6 + $0x368] sm:$0xf]  ;;  %v1800_v8 = vor.u32 %v2178_v2, %v1799_v0  ;;  %v2156_v62 = vld [vmem:[%s2369_s6 + $0xcc] sm:$0xf] }
  0x59   : > { %1254 = vmatpush.bf16.msrb.mxu1 %v1748_v14  ;;  %v2242_v6 = vld [vmem:[%s2369_s6 + $0x374] sm:$0xf0]  ;;  %v1928_v9 = vor.u32 %v2210_v4, %v1927_v3  ;;  %v1655_v10 = vld [vmem:[%s2369_s6 + $0x48] sm:$0xf]  ;;  %v1721_v63 = vld [vmem:[%s2369_s6 + $0xd8] sm:$0xf0] }
  0x5a   : > { %1267 = vmatpush.bf16.msrb.mxu2 %v1876_v15  ;;  %v2142_v11 = vld [vmem:[%s2369_s6 + $0x54] sm:$0xf0]  ;;  %v1783_v12 = vld [vmem:[%s2369_s6 + $0x148] sm:$0xf]  ;;  %v2056_v13 = vor.u32 %v2242_v6, %v2055_v5  ;;  %v2188_v0 = vld [vmem:[%s2369_s6 + $0x1cc] sm:$0xf] }
  0x5b   : > { %1280 = vmatpush.bf16.msrb.mxu3 %v2004_v20  ;;  %1242 = vmatmul.bf16.vlgmr.msrb.gmra.mxu0 %v2481_v31  ;;  %v2174_v14 = vld [vmem:[%s2369_s6 + $0x154] sm:$0xf0]  ;;  %v1911_v15 = vld [vmem:[%s2369_s6 + $0x248] sm:$0xf]  ;;  %v1849_v2 = vld [vmem:[%s2369_s6 + $0x1d8] sm:$0xf0] }
  0x5c   : > { %1286 = vmatpush.bf16.msra.mxu0 %v1736_v21  ;;  %1255 = vmatmul.bf16.vlgmr.msrb.gmra.mxu1 %v2483_v32  ;;  %v2206_v18 = vld [vmem:[%s2369_s6 + $0x254] sm:$0xf0]  ;;  %v2039_v19 = vld [vmem:[%s2369_s6 + $0x348] sm:$0xf]  ;;  %v1656_v21 = vor.u32 %v2142_v11, %v1655_v10  ;;  %v2220_v3 = vld [vmem:[%s2369_s6 + $0x2cc] sm:$0xf] }
  0x5d   : > { %1299 = vmatpush.bf16.msra.mxu1 %v1864_v22  ;;  %1268 = vmatmul.bf16.vlgmr.msrb.gmra.mxu2 %v2469_v16  ;;  %v2238_v20 = vld [vmem:[%s2369_s6 + $0x354] sm:$0xf0]  ;;  %v1784_v22 = vor.u32 %v2174_v14, %v1783_v12  ;;  %v1639_v24 = vld [vmem:[%s2369_s6 + $0x28] sm:$0xf]  ;;  %v1977_v4 = vld [vmem:[%s2369_s6 + $0x2d8] sm:$0xf0] }
  0x5e   : > { %1312 = vmatpush.bf16.msra.mxu2 %v1992_v23  ;;  %1281 = vmatmul.bf16.vlgmr.msrb.gmra.mxu3 %v2471_v17  ;;  %v1912_v23 = vor.u32 %v2206_v18, %v1911_v15  ;;  %v2138_v25 = vld [vmem:[%s2369_s6 + $0x34] sm:$0xf0]  ;;  %v1767_v26 = vld [vmem:[%s2369_s6 + $0x128] sm:$0xf]  ;;  %v2252_v5 = vld [vmem:[%s2369_s6 + $0x3cc] sm:$0xf] }
  0x5f   : > { %1325 = vmatpush.bf16.msra.mxu3 %v2120_v27  ;;  %v2040_v27 = vor.u32 %v2238_v20, %v2039_v19  ;;  %v2170_v28 = vld [vmem:[%s2369_s6 + $0x134] sm:$0xf0]  ;;  %v1895_v29 = vld [vmem:[%s2369_s6 + $0x228] sm:$0xf]  ;;  %v2105_v6 = vld [vmem:[%s2369_s6 + $0x3d8] sm:$0xf0] }
  0x60   : > { %1287 = vmatpush.bf16.msra.mxu0 %v1720_v35  ;;  %v2202_v30 = vld [vmem:[%s2369_s6 + $0x234] sm:$0xf0]  ;;  %v2023_v33 = vld [vmem:[%s2369_s6 + $0x328] sm:$0xf]  ;;  %v1640_v35 = vor.u32 %v2138_v25, %v1639_v24  ;;  %v1768_v38 = vor.u32 %v2170_v28, %v1767_v26  ;;  %v2152_v10 = vld [vmem:[%s2369_s6 + $0xac] sm:$0xf] }
  0x61   : > { %1300 = vmatpush.bf16.msra.mxu1 %v1848_v36  ;;  %v2234_v34 = vld [vmem:[%s2369_s6 + $0x334] sm:$0xf0]  ;;  %v1623_v36 = vld [vmem:[%s2369_s6 + $0x8] sm:$0xf]  ;;  %v1896_v39 = vor.u32 %v2202_v30, %v1895_v29  ;;  %v1705_v11 = vld [vmem:[%s2369_s6 + $0xb8] sm:$0xf0] }
  0x62   : > { %1313 = vmatpush.bf16.msra.mxu2 %v1976_v37  ;;  %v2134_v37 = vld [vmem:[%s2369_s6 + $0x14] sm:$0xf0]  ;;  %v1751_v40 = vld [vmem:[%s2369_s6 + $0x108] sm:$0xf]  ;;  %v2024_v43 = vor.u32 %v2234_v34, %v2023_v33  ;;  %v2184_v12 = vld [vmem:[%s2369_s6 + $0x1ac] sm:$0xf] }
  0x63   : > { %1326 = vmatpush.bf16.msra.mxu3 %v2104_v41  ;;  %v2166_v41 = vld [vmem:[%s2369_s6 + $0x114] sm:$0xf0]  ;;  %v1879_v42 = vld [vmem:[%s2369_s6 + $0x208] sm:$0xf]  ;;  %v1624_v50 = vor.u32 %v2134_v37, %v1623_v36  ;;  %v1833_v14 = vld [vmem:[%s2369_s6 + $0x1b8] sm:$0xf0] }
  0x64   : > { %1288 = vmatpush.bf16.msra.mxu0 %v1704_v47  ;;  %v2198_v44 = vld [vmem:[%s2369_s6 + $0x214] sm:$0xf0]  ;;  %v2007_v45 = vld [vmem:[%s2369_s6 + $0x308] sm:$0xf]  ;;  %v2160_v47 = vld [vmem:[%s2369_s6 + $0xec] sm:$0xf]  ;;  %v1752_v54 = vor.u32 %v2166_v41, %v1751_v40 }
  0x65   : > { %1301 = vmatpush.bf16.msra.mxu1 %v1832_v48  ;;  %v2230_v46 = vld [vmem:[%s2369_s6 + $0x314] sm:$0xf0]  ;;  %v1737_v48 = vld [vmem:[%s2369_s6 + $0xf8] sm:$0xf0]  ;;  %v1880_v55 = vor.u32 %v2198_v44, %v1879_v42  ;;  %v2216_v15 = vld [vmem:[%s2369_s6 + $0x2ac] sm:$0xf] }
  0x66   : > { %1314 = vmatpush.bf16.msra.mxu2 %v1960_v49  ;;  %v2192_v49 = vld [vmem:[%s2369_s6 + $0x1ec] sm:$0xf]  ;;  %v2008_v58 = vor.u32 %v2230_v46, %v2007_v45  ;;  %v1961_v18 = vld [vmem:[%s2369_s6 + $0x2b8] sm:$0xf0] }
  0x67   : > { %1327 = vmatpush.bf16.msra.mxu3 %v2088_v53  ;;  %v1993_v53 = vld [vmem:[%s2369_s6 + $0x2f8] sm:$0xf0]  ;;  %v2248_v19 = vld [vmem:[%s2369_s6 + $0x3ac] sm:$0xf] }
  0x68   : > { %1289 = vmatpush.bf16.msra.mxu0 %v1688_v59  ;;  %v1740_v59 = vor.u32 %v2160_v47, %v1737_v48  ;;  %v2089_v20 = vld [vmem:[%s2369_s6 + $0x3b8] sm:$0xf0]  ;;  %v2148_v24 = vld [vmem:[%s2369_s6 + $0x8c] sm:$0xf] }
  0x69   : > { %1302 = vmatpush.bf16.msra.mxu1 %v1816_v60  ;;  %v1868_v60 = vor.u32 %v2192_v49, %v1865_v51  ;;  %v1689_v25 = vld [vmem:[%s2369_s6 + $0x98] sm:$0xf0]  ;;  %v2180_v26 = vld [vmem:[%s2369_s6 + $0x18c] sm:$0xf] }
  0x6a   : > { %1315 = vmatpush.bf16.msra.mxu2 %v1944_v61  ;;  %v1996_v61 = vor.u32 %v2224_v52, %v1993_v53  ;;  %v1817_v28 = vld [vmem:[%s2369_s6 + $0x198] sm:$0xf0]  ;;  %v2212_v29 = vld [vmem:[%s2369_s6 + $0x28c] sm:$0xf] }
  0x6b   : > { %1328 = vmatpush.bf16.msra.mxu3 %v2072_v1  ;;  %v2124_v1 = vor.u32 %v2256_v56, %v2121_v57  ;;  %v1945_v30 = vld [vmem:[%s2369_s6 + $0x298] sm:$0xf0]  ;;  %v2244_v33 = vld [vmem:[%s2369_s6 + $0x38c] sm:$0xf]  ;;  %v1820_v36 = vor.u32 %v2180_v26, %v1817_v28 }
  0x6c   : > { %1290 = vmatpush.bf16.msra.mxu0 %v1672_v7  ;;  %v1724_v7 = vor.u32 %v2156_v62, %v1721_v63  ;;  %v2073_v34 = vld [vmem:[%s2369_s6 + $0x398] sm:$0xf0]  ;;  %v1948_v37 = vor.u32 %v2212_v29, %v1945_v30  ;;  %v2176_v40 = vld [vmem:[%s2369_s6 + $0x16c] sm:$0xf] }
  0x6d   : > { %1303 = vmatpush.bf16.msra.mxu1 %v1800_v8  ;;  %v1852_v8 = vor.u32 %v2188_v0, %v1849_v2  ;;  %v2076_v41 = vor.u32 %v2244_v33, %v2073_v34  ;;  %v1801_v42 = vld [vmem:[%s2369_s6 + $0x178] sm:$0xf0]  ;;  %v2240_v45 = vld [vmem:[%s2369_s6 + $0x36c] sm:$0xf]  ;;  %v394_v33 = vld [vmem:[#allocation2 + $0x10] sm:$0xff] }
  0x6e   : > { %1316 = vmatpush.bf16.msra.mxu2 %v1928_v9  ;;  %v1980_v9 = vor.u32 %v2220_v3, %v1977_v4  ;;  %v1929_v44 = vld [vmem:[%s2369_s6 + $0x278] sm:$0xf0]  ;;  %v1804_v48 = vor.u32 %v2176_v40, %v1801_v42  ;;  %v2172_v52 = vld [vmem:[%s2369_s6 + $0x14c] sm:$0xf]  ;;  %v395_v42 = vld [vmem:[#allocation2] sm:$0xff] }
  0x6f   : > { %1329 = vmatpush.bf16.msra.mxu3 %v2056_v13  ;;  %v2108_v13 = vor.u32 %v2252_v5, %v2105_v6  ;;  %v2057_v46 = vld [vmem:[%s2369_s6 + $0x378] sm:$0xf0]  ;;  %v2236_v57 = vld [vmem:[%s2369_s6 + $0x34c] sm:$0xf] }
  0x70   : > { %1291 = vmatpush.bf16.msra.mxu0 %v1656_v21  ;;  %v1708_v21 = vor.u32 %v2152_v10, %v1705_v11  ;;  %v1657_v51 = vld [vmem:[%s2369_s6 + $0x58] sm:$0xf0]  ;;  %v2060_v53 = vor.u32 %v2240_v45, %v2057_v46  ;;  %v2136_v62 = vld [vmem:[%s2369_s6 + $0x2c] sm:$0xf] }
  0x71   : > { %1304 = vmatpush.bf16.msra.mxu1 %v1784_v22  ;;  %v1836_v22 = vor.u32 %v2184_v12, %v1833_v14  ;;  %v1913_v56 = vld [vmem:[%s2369_s6 + $0x258] sm:$0xf0]  ;;  %v2168_v0 = vld [vmem:[%s2369_s6 + $0x12c] sm:$0xf] }
  0x72   : > { %1317 = vmatpush.bf16.msra.mxu2 %v1912_v23  ;;  %v1964_v23 = vor.u32 %v2216_v15, %v1961_v18  ;;  %v1641_v63 = vld [vmem:[%s2369_s6 + $0x38] sm:$0xf0]  ;;  %v2200_v3 = vld [vmem:[%s2369_s6 + $0x22c] sm:$0xf] }
  0x73   : > { %1330 = vmatpush.bf16.msra.mxu3 %v2040_v27  ;;  %v2092_v27 = vor.u32 %v2248_v19, %v2089_v20  ;;  %v1769_v2 = vld [vmem:[%s2369_s6 + $0x138] sm:$0xf0]  ;;  %v2232_v5 = vld [vmem:[%s2369_s6 + $0x32c] sm:$0xf] }
  0x74   : > { %1292 = vmatpush.bf16.msra.mxu0 %v1640_v35  ;;  %v1692_v35 = vor.u32 %v2148_v24, %v1689_v25  ;;  %v1897_v4 = vld [vmem:[%s2369_s6 + $0x238] sm:$0xf0]  ;;  %v2132_v10 = vld [vmem:[%s2369_s6 + $0xc] sm:$0xf] }
  0x75   : > { %1305 = vmatpush.bf16.msra.mxu1 %v1768_v38  ;;  %v2144_v38 = vld [vmem:[%s2369_s6 + $0x6c] sm:$0xf]  ;;  %v2025_v6 = vld [vmem:[%s2369_s6 + $0x338] sm:$0xf0] }
  0x76   : > { %1318 = vmatpush.bf16.msra.mxu2 %v1896_v39  ;;  %v1673_v39 = vld [vmem:[%s2369_s6 + $0x78] sm:$0xf0]  ;;  %v2164_v12 = vld [vmem:[%s2369_s6 + $0x10c] sm:$0xf] }
  0x77   : > { %1331 = vmatpush.bf16.msra.mxu3 %v2024_v43  ;;  %v2208_v43 = vld [vmem:[%s2369_s6 + $0x26c] sm:$0xf]  ;;  %v1676_v47 = vor.u32 %v2144_v38, %v1673_v39  ;;  %v1625_v11 = vld [vmem:[%s2369_s6 + $0x18] sm:$0xf0] }
  0x78   : > { %1293 = vmatpush.bf16.msra.mxu0 %v1624_v50  ;;  %v1932_v49 = vor.u32 %v2208_v43, %v1929_v44  ;;  %v2140_v50 = vld [vmem:[%s2369_s6 + $0x4c] sm:$0xf]  ;;  %v1753_v14 = vld [vmem:[%s2369_s6 + $0x118] sm:$0xf0] }
  0x79   : > { %1306 = vmatpush.bf16.msra.mxu1 %v1752_v54  ;;  %v1785_v54 = vld [vmem:[%s2369_s6 + $0x158] sm:$0xf0]  ;;  %v2196_v15 = vld [vmem:[%s2369_s6 + $0x20c] sm:$0xf] }
  0x7a   : > { %1319 = vmatpush.bf16.msra.mxu2 %v1880_v55  ;;  %v2204_v55 = vld [vmem:[%s2369_s6 + $0x24c] sm:$0xf]  ;;  %v1881_v18 = vld [vmem:[%s2369_s6 + $0x218] sm:$0xf0] }
  0x7b   : > { %1332 = vmatpush.bf16.msra.mxu3 %v2008_v58  ;;  %1294 = vmatmul.bf16.vlgmr.msra.gmra.mxu0 %v2481_v31  ;;  %v2041_v58 = vld [vmem:[%s2369_s6 + $0x358] sm:$0xf0]  ;;  %v2228_v19 = vld [vmem:[%s2369_s6 + $0x30c] sm:$0xf] }
  0x7c   : > { %1338 = vmatpush.bf16.msrb.mxu0 %v1740_v59  ;;  %1307 = vmatmul.bf16.vlgmr.msra.gmra.mxu1 %v2483_v32  ;;  %v1660_v59 = vor.u32 %v2140_v50, %v1657_v51  ;;  %v2009_v20 = vld [vmem:[%s2369_s6 + $0x318] sm:$0xf0] }
  0x7d   : > { %1351 = vmatpush.bf16.msrb.mxu1 %v1868_v60  ;;  %1320 = vmatmul.bf16.vlgmr.msra.gmra.mxu2 %v2469_v16  ;;  %v1788_v60 = vor.u32 %v2172_v52, %v1785_v54  ;;  %v2012_v24 = vor.u32 %v2228_v19, %v2009_v20 }
  0x7e   : > { %1364 = vmatpush.bf16.msrb.mxu2 %v1996_v61  ;;  %1333 = vmatmul.bf16.vlgmr.msra.gmra.mxu3 %v2471_v17  ;;  %v1916_v61 = vor.u32 %v2204_v55, %v1913_v56  ;;  %v396_v55 = vld [vmem:[#allocation2 + $0x18] sm:$0xff] }
  0x7f   : > { %1377 = vmatpush.bf16.msrb.mxu3 %v2124_v1  ;;  %v2044_v1 = vor.u32 %v2236_v57, %v2041_v58 }
  0x80   : > { %1339 = vmatpush.bf16.msrb.mxu0 %v1724_v7  ;;  %v1644_v7 = vor.u32 %v2136_v62, %v1641_v63 }
  0x81   : > { %1352 = vmatpush.bf16.msrb.mxu1 %v1852_v8  ;;  %v1772_v8 = vor.u32 %v2168_v0, %v1769_v2 }
  0x82   : > { %1365 = vmatpush.bf16.msrb.mxu2 %v1980_v9  ;;  %v1900_v9 = vor.u32 %v2200_v3, %v1897_v4 }
  0x83   : > { %1378 = vmatpush.bf16.msrb.mxu3 %v2108_v13  ;;  %v2028_v13 = vor.u32 %v2232_v5, %v2025_v6  ;;  %v397_v5 = vld [vmem:[#allocation2 + $0x8] sm:$0xff] }
  0x84   : > { %1340 = vmatpush.bf16.msrb.mxu0 %v1708_v21  ;;  %v1628_v21 = vor.u32 %v2132_v10, %v1625_v11 }
  0x85   : > { %1353 = vmatpush.bf16.msrb.mxu1 %v1836_v22  ;;  %v1756_v22 = vor.u32 %v2164_v12, %v1753_v14 }
  0x86   : > { %1366 = vmatpush.bf16.msrb.mxu2 %v1964_v23  ;;  %v1884_v23 = vor.u32 %v2196_v15, %v1881_v18 }
  0x87   : > { %1379 = vmatpush.bf16.msrb.mxu3 %v2092_v27 }
  0x88   : > { %1341 = vmatpush.bf16.msrb.mxu0 %v1692_v35 }
  0x89   : > { %1354 = vmatpush.bf16.msrb.mxu1 %v1820_v36 }
  0x8a   : > { %1367 = vmatpush.bf16.msrb.mxu2 %v1948_v37 }
  0x8b   : > { %1380 = vmatpush.bf16.msrb.mxu3 %v2076_v41 }
  0x8c   : > { %1342 = vmatpush.bf16.msrb.mxu0 %v1676_v47 }
  0x8d   : > { %1355 = vmatpush.bf16.msrb.mxu1 %v1804_v48 }
  0x8e   : > { %1368 = vmatpush.bf16.msrb.mxu2 %v1932_v49 }
  0x8f   : > { %1381 = vmatpush.bf16.msrb.mxu3 %v2060_v53 }
  0x90   : > { %1343 = vmatpush.bf16.msrb.mxu0 %v1660_v59 }
  0x91   : > { %1356 = vmatpush.bf16.msrb.mxu1 %v1788_v60 }
  0x92   : > { %1369 = vmatpush.bf16.msrb.mxu2 %v1916_v61 }
  0x93   : > { %1382 = vmatpush.bf16.msrb.mxu3 %v2044_v1 }
  0x94   : > { %1344 = vmatpush.bf16.msrb.mxu0 %v1644_v7 }
  0x95   : > { %1357 = vmatpush.bf16.msrb.mxu1 %v1772_v8 }
  0x96   : > { %1370 = vmatpush.bf16.msrb.mxu2 %v1900_v9 }
  0x97   : > { %1383 = vmatpush.bf16.msrb.mxu3 %v2028_v13 }
  0x98   : > { %1345 = vmatpush.bf16.msrb.mxu0 %v1628_v21 }
  0x99   : > { %1358 = vmatpush.bf16.msrb.mxu1 %v1756_v22 }
  0x9a   : > { %1371 = vmatpush.bf16.msrb.mxu2 %v1884_v23 }
  0x9b   : > { %1384 = vmatpush.bf16.msrb.mxu3 %v2012_v24  ;;  %1346 = vmatmul.bf16.vlgmr.msrb.gmra.mxu0 %v2481_v31 }
  0x9c   : > { %1359 = vmatmul.bf16.vlgmr.msrb.gmra.mxu1 %v2483_v32 }
  0x9d   : > { %1372 = vmatmul.bf16.vlgmr.msrb.gmra.mxu2 %v2469_v16 }
  0x9e   : > { %1385 = vmatmul.bf16.vlgmr.msrb.gmra.mxu3 %v2471_v17 }
  0xc0   : > { %v1204_v25 = vpop.f32.mrf.mxu1 }
  0xc1   : > { %v1230_v30 = vpop.f32.mrf.mxu3 }
  0xc2   : > { %v1191_v26 = vpop.f32.mrf.mxu0  ;;  %v1217_v28 = vpop.f32.mrf.mxu2 }
  0xc3   : > { %v1205_v27 = vadd.f32 %v1204_v25, %v1191_v26 }
  0xc5   : > { %v1218_v29 = vadd.f32 %v1217_v28, %v1205_v27 }
  0xc7   : > { %v1231_v34 = vadd.f32 %v1230_v30, %v1218_v29 }
  0xc8   : > { %v1206_v35 = vpop.f32.mrf.mxu1 }
  0xc9   : > { %v1390_v36 = vadd.f32 %v1231_v34, %v394_v33  ;;  %v1232_v31 = vpop.f32.mrf.mxu3 }
  0xca   : > { %v1193_v37 = vpop.f32.mrf.mxu0  ;;  %v1219_v38 = vpop.f32.mrf.mxu2 }
  0xcb   : > { %1394 = vst [vmem:[#allocation2 + $0x10] sm:$0xff] %v1390_v36 }
  0xd8   : > { %v1243_v39 = vpop.f32.mrf.mxu0 }
  0xd9   : > { %v1256_v32 = vpop.f32.mrf.mxu1 }
  0xda   : > { %v1257_v40 = vadd.f32 %v1256_v32, %v1243_v39 }
  0xe0   : > { %v1269_v16 = vpop.f32.mrf.mxu2  ;;  %v1245_v44 = vpop.f32.mrf.mxu0 }
  0xe1   : > { %v1270_v41 = vadd.f32 %v1269_v16, %v1257_v40  ;;  %v1282_v17 = vpop.f32.mrf.mxu3  ;;  %v1258_v45 = vpop.f32.mrf.mxu1 }
  0xe3   : > { %v1283_v43 = vadd.f32 %v1282_v17, %v1270_v41 }
  0xe5   : > { %v1391_v46 = vadd.f32 %v1283_v43, %v395_v42 }
  0xe7   : > { %1395 = vst [vmem:[#allocation2] sm:$0xff] %v1391_v46 }
  0xe8   : > { %v1271_v47 = vpop.f32.mrf.mxu2 }
  0xe9   : > { %v1284_v48 = vpop.f32.mrf.mxu3 }
  0xf8   : > { %v1295_v49 = vpop.f32.mrf.mxu0 }
  0xf9   : > { %v1308_v50 = vpop.f32.mrf.mxu1 }
  0xfa   : > { %v1309_v51 = vadd.f32 %v1308_v50, %v1295_v49 }
 0x100   : > { %v1321_v52 = vpop.f32.mrf.mxu2  ;;  %v1297_v57 = vpop.f32.mrf.mxu0 }
 0x101   : > { %v1322_v53 = vadd.f32 %v1321_v52, %v1309_v51  ;;  %v1334_v54 = vpop.f32.mrf.mxu3  ;;  %v1310_v58 = vpop.f32.mrf.mxu1 }
 0x103   : > { %v1335_v56 = vadd.f32 %v1334_v54, %v1322_v53 }
 0x105   : > { %v1392_v59 = vadd.f32 %v1335_v56, %v396_v55 }
 0x107   : > { %1396 = vst [vmem:[#allocation2 + $0x18] sm:$0xff] %v1392_v59 }
 0x108   : > { %v1323_v60 = vpop.f32.mrf.mxu2 }
 0x109   : > { %v1336_v61 = vpop.f32.mrf.mxu3 }
 0x118   : > { %v1347_v62 = vpop.f32.mrf.mxu0 }
 0x119   : > { %v1360_v63 = vpop.f32.mrf.mxu1 }
 0x11a   : > { %v1361_v0 = vadd.f32 %v1360_v63, %v1347_v62 }
 0x120   : > { %v1373_v1 = vpop.f32.mrf.mxu2  ;;  %v1349_v4 = vpop.f32.mrf.mxu0 }
 0x121   : > { %v1374_v2 = vadd.f32 %v1373_v1, %v1361_v0  ;;  %v1386_v3 = vpop.f32.mrf.mxu3  ;;  %v1362_v6 = vpop.f32.mrf.mxu1 }
 0x123   : > { %v1387_v7 = vadd.f32 %v1386_v3, %v1374_v2 }
 0x125   : > { %v1393_v8 = vadd.f32 %v1387_v7, %v397_v5  ;;  %1401 = sbr.rel (%p2125_p7) target bundleno = 313 (0x139), region = 48 }
 0x127   : > { %1397 = vst [vmem:[#allocation2 + $0x8] sm:$0xff] %v1393_v8 }
 0x128   : > { %v1375_v9 = vpop.f32.mrf.mxu2 }
 0x129   : > { %v1388_v10 = vpop.f32.mrf.mxu3 }
 0x12a   : > { %v1402_v11 = vld [vmem:[#allocation2 + $0x10] sm:$0xff]  ;;  %v1406_v12 = vld [vmem:[%s2696_s2] sm:$0xf]  ;;  %v1404_v21 = vld [vmem:[#allocation2 + $0x18] sm:$0xff] }
 0x12b   : > { %v1420_v13 = vld [vmem:[%s2697_s3] sm:$0xf]  ;;  %v1408_v14 = vperm.slane %v1406_v12, 0  ;;  %v1409_v19 = vperm.slane %v1406_v12, 1  ;;  %v1410_v22 = vperm.slane %v1406_v12, 2  ;;  %v1411_v24 = vperm.slane %v1406_v12, 3 }
 0x12c   : > { %v1422_v15 = vperm.slane %v1420_v13, 0  ;;  %v1403_v18 = vld [vmem:[#allocation2] sm:$0xff]  ;;  %v1423_v20 = vperm.slane %v1420_v13, 1  ;;  %v1424_v23 = vperm.slane %v1420_v13, 2  ;;  %v1425_v28 = vperm.slane %v1420_v13, 3  ;;  %v1435_v30 = vld [vmem:[%s2698_s4 + $0x8] sm:$0xff] }
 0x12d   : > { %v1416_v25 = vmul.f32 %v1408_v14, %v1402_v11  ;;  %v1417_v26 = vmul.f32 %v1409_v19, %v1403_v18  ;;  %v1434_v29 = vld [vmem:[%s2698_s4] sm:$0xff]  ;;  %v1418_v33 = vmul.f32 %v1410_v22, %v1404_v21  ;;  %v1436_v37 = vld [vmem:[%s2698_s4 + $0x10] sm:$0xff]  ;;  %v1437_v38 = vld [vmem:[%s2698_s4 + $0x18] sm:$0xff] }
 0x12e   : > { %v1405_v27 = vld [vmem:[#allocation2 + $0x8] sm:$0xff] }
 0x12f   : > { %v1419_v34 = vmul.f32 %v1411_v24, %v1405_v27  ;;  %v1430_v35 = vadd.f32 %v1422_v15, %v1416_v25  ;;  %v1431_v36 = vadd.f32 %v1423_v20, %v1417_v26  ;;  %v1432_v31 = vadd.f32 %v1424_v23, %v1418_v33 }
 0x131   : > { %v1433_v39 = vadd.f32 %v1425_v28, %v1419_v34  ;;  %v1438_v32 = vadd.f32 %v1434_v29, %v1430_v35  ;;  %v1439_v40 = vadd.f32 %v1435_v30, %v1431_v36  ;;  %v1440_v16 = vadd.f32 %v1436_v37, %v1432_v31 }
 0x133   : > { %v1441_v41 = vadd.f32 %v1437_v38, %v1433_v39  ;;  %v1442_v17 = vmax.f32 %v1438_v32, 0.0  ;;  %v1443_v42 = vmax.f32 %v1439_v40, 0.0  ;;  %v1444_v43 = vmax.f32 %v1440_v16, 0.0 }
 0x135   : > { %v1445_v44 = vmax.f32 %v1441_v41, 0.0  ;;  %1446 = vst [vmem:[%s2699_s5] sm:$0xff] %v1442_v17 }
 0x136   : > { %1447 = vst [vmem:[%s2699_s5 + $0x8] sm:$0xff] %v1443_v42 }
 0x137   : > { %1448 = vst [vmem:[%s2699_s5 + $0x10] sm:$0xff] %v1444_v43 }
 0x138   : > { %1449 = vst [vmem:[%s2699_s5 + $0x18] sm:$0xff] %v1445_v44 }
 0x139 PF: > { %s15_s20 = sadd.s32 1, %s2306_s20   ;;  %s2700_s18 = smov %s2302_s19 }
 0x13a   : > { %p12_p8 = scmp.ge.s32.totalorder %s15_s20, 11   ;;  %s2701_s19 = smov %s2703_s21 }
 0x13c   :  { %14 = sbr.rel (!%p12_p8) target bundleno = 2 (0x2), region = 90 }

// kernel: _lambda_.44
= control target key start
LH: loop header
LB: loop body
LE: loop exit
PB: predicated region body
PF: predicated region fallthrough
CT: control target
= control target key end

     0   :  { %s43_s0 = inlined_call_operand.vmem [shape: f32[2,1,512], index: 0, kind: input, shape index: {}]   ;;  %s44_s1 = inlined_call_operand.vmem [shape: f32[2,512], index: 1, kind: output, shape index: {}]  }
   0x1   :  { %v8_v0 = vld [vmem:[%s43_s0] sm:$0xf]  ;;  %v9_v1 = vld [vmem:[%s43_s0 + $0x4] sm:$0xf] }
   0x2   :  { %14 = vst [vmem:[#allocation1] ss:$2 sm:$0xff] %v8_v0 }
   0x3   :  { %16 = vst [vmem:[#allocation1 + $0x1] ss:$2 sm:$0xff] %v9_v1 }
   0xa   :  { %v17_v2 = vld [vmem:[#allocation1] sm:$0xff] }
   0xb   :  { %19 = vst [vmem:[%s44_s1] sm:$0xff] %v17_v2 }

// kernel: _lambda_.42
= control target key start
LH: loop header
LB: loop body
LE: loop exit
PB: predicated region body
PF: predicated region fallthrough
CT: control target
= control target key end

     0   :  { %s2241_s15 = smov 0   ;;  %s2243_s16 = smov 0   ;;  %s2584_s0 = inlined_call_operand.vmem [shape: bf16[8,4608], index: 0, kind: input, shape index: {}]   ;;  %s2585_s1 = inlined_call_operand.vmem [shape: bf16[4608,512], index: 1, kind: input, shape index: {}]   ;;  %s2586_s2 = inlined_call_operand.vmem [shape: f32[1,512], index: 2, kind: input, shape index: {}]   ;;  %s2587_s3 = inlined_call_operand.vmem [shape: f32[1,512], index: 3, kind: input, shape index: {}]   ;;  %s2588_s4 = inlined_call_operand.vmem [shape: f32[8,512], index: 4, kind: output, shape index: {}]  }
   0x1   :  { %s2245_s17 = smov 0  }
   0x2 LB: > { %s26_s18 = sadd.s32 1, %s2209_s16  ;;  %p1513_p0 = scmp.ge.s32.totalorder %s2213_s17, 1  ;;  %s2213_s17 = sphi %s2245_s17, %s14_s17   ;;  %s2209_s16 = sphi %s2243_s16, %s2590_s16   ;;  %s2205_s15 = sphi %s2241_s15, %s2589_s15  }
   0x3   : > { %p27_p1 = scmp.ge.s32.totalorder %s26_s18, 9  ;;  %p229_p2 = scmp.lt.s32.totalorder %s2213_s17, 10 }
   0x5   : > { %s2592_s18 = smov (%p27_p1, %s26_s18), 0  ;;  %p230_p3 = pnand %p1513_p0, %p229_p2 }
   0x6   : > { %s1514_s19 = sshll.u32 (!%p230_p3), %s2205_s15, 2  ;;  %s1516_s20 = sshll.u32 (!%p230_p3), %s2205_s15, 6 }
   0x7   : > { %233 = sbr.rel (%p230_p3) target bundleno = 311 (0x137), region = 36  ;;  %p284_p4 = scmp.lt.s32.totalorder (!%p230_p3), %s1514_s19, 35 }
   0x8   : > { %p293_p5 = scmp.lt.s32.totalorder (!%p230_p3), %s1516_s20, 575  ;;  %p1519_p6 = scmp.ne.s32.totalorder (!%p230_p3), %s2205_s15, 0 }
   0xc   : > { %s2594_s19 = smov (!%p284_p4, %s1514_s19), 35  ;;  %s2596_s20 = smov (!%p293_p5, %s1516_s20), 575 }
   0xd   : > { %s1515_s21 = sshll.u32 %s2594_s19, 2  ;;  %s2037_s25 = sshll.u32 %s2596_s20, 4 }
   0xe   : > { %s2266_s24 = scalar_lea.vmem %s2584_s0, %s1515_s21  ;;  %s2271_s28 = scalar_lea.vmem %s2585_s1, %s2037_s25 }
   0xf   : > { %326 = sbr.rel (%p1519_p6) target bundleno = 25 (0x19), region = 40 }
  0x14   : > { %v2215_v0 = vmov 0.0  }
  0x15   : > { %327 = vst [vmem:[#allocation2 + $0x10] sm:$0xff] %v2215_v0 }
  0x16   : > { %328 = vst [vmem:[#allocation2] sm:$0xff] %v2215_v0 }
  0x17   : > { %329 = vst [vmem:[#allocation2 + $0x18] sm:$0xff] %v2215_v0 }
  0x18   : > { %330 = vst [vmem:[#allocation2 + $0x8] sm:$0xff] %v2215_v0 }
  0x19 PF: > { %v1634_v1 = vld [vmem:[%s2271_s28 + $0xe0] sm:$0xf]  ;;  %v2068_v2 = vld [vmem:[%s2271_s28 + $0xec] sm:$0xf0]  ;;  %p2032_p7 = scmp.ne.s32.totalorder %s2205_s15, 8 }
  0x1a   : > { %v1762_v3 = vld [vmem:[%s2271_s28 + $0x1e0] sm:$0xf]  ;;  %v1635_v4 = vor.u32 %v2068_v2, %v1634_v1  ;;  %v2100_v5 = vld [vmem:[%s2271_s28 + $0x1ec] sm:$0xf0] }
  0x1b   : > { %v1890_v6 = vld [vmem:[%s2271_s28 + $0x2e0] sm:$0xf]  ;;  %v2132_v7 = vld [vmem:[%s2271_s28 + $0x2ec] sm:$0xf0]  ;;  %v1763_v8 = vor.u32 %v2100_v5, %v1762_v3 }
  0x1c   : > { %v1891_v9 = vor.u32 %v2132_v7, %v1890_v6  ;;  %v2018_v10 = vld [vmem:[%s2271_s28 + $0x3e0] sm:$0xf]  ;;  %v2164_v11 = vld [vmem:[%s2271_s28 + $0x3ec] sm:$0xf0]  ;;  %1119 = vmatpush.bf16.msra.mxu0 %v1635_v4 }
  0x1d   : > { %v1618_v12 = vld [vmem:[%s2271_s28 + $0xc0] sm:$0xf]  ;;  %v2019_v13 = vor.u32 %v2164_v11, %v2018_v10  ;;  %v2064_v14 = vld [vmem:[%s2271_s28 + $0xcc] sm:$0xf0]  ;;  %1132 = vmatpush.bf16.msra.mxu1 %v1763_v8 }
  0x1e   : > { %v1746_v15 = vld [vmem:[%s2271_s28 + $0x1c0] sm:$0xf]  ;;  %v2096_v16 = vld [vmem:[%s2271_s28 + $0x1cc] sm:$0xf0]  ;;  %1145 = vmatpush.bf16.msra.mxu2 %v1891_v9  ;;  %v1619_v17 = vor.u32 %v2064_v14, %v1618_v12 }
  0x1f   : > { %v1747_v18 = vor.u32 %v2096_v16, %v1746_v15  ;;  %v1874_v19 = vld [vmem:[%s2271_s28 + $0x2c0] sm:$0xf]  ;;  %v2128_v20 = vld [vmem:[%s2271_s28 + $0x2cc] sm:$0xf0]  ;;  %1158 = vmatpush.bf16.msra.mxu3 %v2019_v13 }
  0x20   : > { %v2002_v21 = vld [vmem:[%s2271_s28 + $0x3c0] sm:$0xf]  ;;  %v1875_v22 = vor.u32 %v2128_v20, %v1874_v19  ;;  %v2160_v23 = vld [vmem:[%s2271_s28 + $0x3cc] sm:$0xf0]  ;;  %1120 = vmatpush.bf16.msra.mxu0 %v1619_v17 }
  0x21   : > { %v1602_v24 = vld [vmem:[%s2271_s28 + $0xa0] sm:$0xf]  ;;  %v2060_v25 = vld [vmem:[%s2271_s28 + $0xac] sm:$0xf0]  ;;  %v2003_v26 = vor.u32 %v2160_v23, %v2002_v21  ;;  %1133 = vmatpush.bf16.msra.mxu1 %v1747_v18 }
  0x22   : > { %v1730_v27 = vld [vmem:[%s2271_s28 + $0x1a0] sm:$0xf]  ;;  %v2092_v28 = vld [vmem:[%s2271_s28 + $0x1ac] sm:$0xf0]  ;;  %v1603_v30 = vor.u32 %v2060_v25, %v1602_v24  ;;  %1146 = vmatpush.bf16.msra.mxu2 %v1875_v22 }
  0x23   : > { %v1858_v29 = vld [vmem:[%s2271_s28 + $0x2a0] sm:$0xf]  ;;  %v2124_v31 = vld [vmem:[%s2271_s28 + $0x2ac] sm:$0xf0]  ;;  %v1731_v34 = vor.u32 %v2092_v28, %v1730_v27  ;;  %1159 = vmatpush.bf16.msra.mxu3 %v2003_v26 }
  0x24   : > { %v1986_v32 = vld [vmem:[%s2271_s28 + $0x3a0] sm:$0xf]  ;;  %v2156_v33 = vld [vmem:[%s2271_s28 + $0x3ac] sm:$0xf0]  ;;  %v1859_v35 = vor.u32 %v2124_v31, %v1858_v29  ;;  %1121 = vmatpush.bf16.msra.mxu0 %v1603_v30  ;;  %v2066_v29 = vld [vmem:[%s2271_s28 + $0xe4] sm:$0xf] }
  0x25   : > { %v1586_v36 = vld [vmem:[%s2271_s28 + $0x80] sm:$0xf]  ;;  %v2056_v37 = vld [vmem:[%s2271_s28 + $0x8c] sm:$0xf0]  ;;  %v1987_v39 = vor.u32 %v2156_v33, %v1986_v32  ;;  %1134 = vmatpush.bf16.msra.mxu1 %v1731_v34  ;;  %v1636_v30 = vld [vmem:[%s2271_s28 + $0xf0] sm:$0xf0] }
  0x26   : > { %v1714_v38 = vld [vmem:[%s2271_s28 + $0x180] sm:$0xf]  ;;  %v2088_v40 = vld [vmem:[%s2271_s28 + $0x18c] sm:$0xf0]  ;;  %v1587_v45 = vor.u32 %v2056_v37, %v1586_v36  ;;  %1147 = vmatpush.bf16.msra.mxu2 %v1859_v35  ;;  %v2098_v31 = vld [vmem:[%s2271_s28 + $0x1e4] sm:$0xf] }
  0x27   : > { %v1842_v41 = vld [vmem:[%s2271_s28 + $0x280] sm:$0xf]  ;;  %v2120_v42 = vld [vmem:[%s2271_s28 + $0x28c] sm:$0xf0]  ;;  %v1715_v46 = vor.u32 %v2088_v40, %v1714_v38  ;;  %1160 = vmatpush.bf16.msra.mxu3 %v1987_v39  ;;  %v1764_v33 = vld [vmem:[%s2271_s28 + $0x1f0] sm:$0xf0] }
  0x28   : > { %v1970_v43 = vld [vmem:[%s2271_s28 + $0x380] sm:$0xf]  ;;  %v2152_v44 = vld [vmem:[%s2271_s28 + $0x38c] sm:$0xf0]  ;;  %v1843_v47 = vor.u32 %v2120_v42, %v1842_v41  ;;  %1122 = vmatpush.bf16.msra.mxu0 %v1587_v45  ;;  %v2130_v34 = vld [vmem:[%s2271_s28 + $0x2e4] sm:$0xf]  ;;  %v1639_v41 = vor.u32 %v2066_v29, %v1636_v30  ;;  %v1767_v42 = vor.u32 %v2098_v31, %v1764_v33 }
  0x29   : > { %v1570_v48 = vld [vmem:[%s2271_s28 + $0x60] sm:$0xf]  ;;  %v2052_v49 = vld [vmem:[%s2271_s28 + $0x6c] sm:$0xf0]  ;;  %v1971_v51 = vor.u32 %v2152_v44, %v1970_v43  ;;  %1135 = vmatpush.bf16.msra.mxu1 %v1715_v46  ;;  %v1892_v35 = vld [vmem:[%s2271_s28 + $0x2f0] sm:$0xf0] }
  0x2a   : > { %v1698_v50 = vld [vmem:[%s2271_s28 + $0x160] sm:$0xf]  ;;  %v2084_v52 = vld [vmem:[%s2271_s28 + $0x16c] sm:$0xf0]  ;;  %v1571_v57 = vor.u32 %v2052_v49, %v1570_v48  ;;  %1148 = vmatpush.bf16.msra.mxu2 %v1843_v47  ;;  %v2162_v38 = vld [vmem:[%s2271_s28 + $0x3e4] sm:$0xf]  ;;  %v1895_v43 = vor.u32 %v2130_v34, %v1892_v35 }
  0x2b   : > { %v1826_v53 = vld [vmem:[%s2271_s28 + $0x260] sm:$0xf]  ;;  %v2116_v54 = vld [vmem:[%s2271_s28 + $0x26c] sm:$0xf0]  ;;  %v1699_v58 = vor.u32 %v2084_v52, %v1698_v50  ;;  %1161 = vmatpush.bf16.msra.mxu3 %v1971_v51  ;;  %v2020_v39 = vld [vmem:[%s2271_s28 + $0x3f0] sm:$0xf0] }
  0x2c   : > { %v1954_v55 = vld [vmem:[%s2271_s28 + $0x360] sm:$0xf]  ;;  %v2148_v56 = vld [vmem:[%s2271_s28 + $0x36c] sm:$0xf0]  ;;  %v1827_v59 = vor.u32 %v2116_v54, %v1826_v53  ;;  %1123 = vmatpush.bf16.msra.mxu0 %v1571_v57  ;;  %v2062_v44 = vld [vmem:[%s2271_s28 + $0xc4] sm:$0xf]  ;;  %v2023_v47 = vor.u32 %v2162_v38, %v2020_v39 }
  0x2d   : > { %v1554_v60 = vld [vmem:[%s2271_s28 + $0x40] sm:$0xf]  ;;  %v2048_v61 = vld [vmem:[%s2271_s28 + $0x4c] sm:$0xf0]  ;;  %v1955_v63 = vor.u32 %v2148_v56, %v1954_v55  ;;  %1136 = vmatpush.bf16.msra.mxu1 %v1699_v58  ;;  %v1620_v45 = vld [vmem:[%s2271_s28 + $0xd0] sm:$0xf0] }
  0x2e   : > { %v1682_v62 = vld [vmem:[%s2271_s28 + $0x140] sm:$0xf]  ;;  %v2080_v0 = vld [vmem:[%s2271_s28 + $0x14c] sm:$0xf0]  ;;  %v1555_v5 = vor.u32 %v2048_v61, %v1554_v60  ;;  %1149 = vmatpush.bf16.msra.mxu2 %v1827_v59  ;;  %v2094_v46 = vld [vmem:[%s2271_s28 + $0x1c4] sm:$0xf]  ;;  %v1623_v53 = vor.u32 %v2062_v44, %v1620_v45 }
  0x2f   : > { %v1810_v1 = vld [vmem:[%s2271_s28 + $0x240] sm:$0xf]  ;;  %v2112_v2 = vld [vmem:[%s2271_s28 + $0x24c] sm:$0xf0]  ;;  %v1683_v6 = vor.u32 %v2080_v0, %v1682_v62  ;;  %1162 = vmatpush.bf16.msra.mxu3 %v1955_v63  ;;  %v1748_v48 = vld [vmem:[%s2271_s28 + $0x1d0] sm:$0xf0] }
  0x30   : > { %v1938_v3 = vld [vmem:[%s2271_s28 + $0x340] sm:$0xf]  ;;  %v2144_v4 = vld [vmem:[%s2271_s28 + $0x34c] sm:$0xf0]  ;;  %v1811_v7 = vor.u32 %v2112_v2, %v1810_v1  ;;  %1124 = vmatpush.bf16.msra.mxu0 %v1555_v5  ;;  %v2126_v49 = vld [vmem:[%s2271_s28 + $0x2c4] sm:$0xf]  ;;  %v1751_v54 = vor.u32 %v2094_v46, %v1748_v48 }
  0x31   : > { %v1538_v8 = vld [vmem:[%s2271_s28 + $0x20] sm:$0xf]  ;;  %v2044_v9 = vld [vmem:[%s2271_s28 + $0x2c] sm:$0xf0]  ;;  %v1939_v11 = vor.u32 %v2144_v4, %v1938_v3  ;;  %1137 = vmatpush.bf16.msra.mxu1 %v1683_v6  ;;  %v1876_v50 = vld [vmem:[%s2271_s28 + $0x2d0] sm:$0xf0] }
  0x32   : > { %v1666_v10 = vld [vmem:[%s2271_s28 + $0x120] sm:$0xf]  ;;  %v2076_v12 = vld [vmem:[%s2271_s28 + $0x12c] sm:$0xf0]  ;;  %v1539_v17 = vor.u32 %v2044_v9, %v1538_v8  ;;  %1150 = vmatpush.bf16.msra.mxu2 %v1811_v7  ;;  %v2158_v51 = vld [vmem:[%s2271_s28 + $0x3c4] sm:$0xf]  ;;  %v1879_v55 = vor.u32 %v2126_v49, %v1876_v50 }
  0x33   : > { %v1794_v13 = vld [vmem:[%s2271_s28 + $0x220] sm:$0xf]  ;;  %v2108_v14 = vld [vmem:[%s2271_s28 + $0x22c] sm:$0xf0]  ;;  %v1667_v20 = vor.u32 %v2076_v12, %v1666_v10  ;;  %1163 = vmatpush.bf16.msra.mxu3 %v1939_v11  ;;  %v2004_v52 = vld [vmem:[%s2271_s28 + $0x3d0] sm:$0xf0] }
  0x34   : > { %v1922_v15 = vld [vmem:[%s2271_s28 + $0x320] sm:$0xf]  ;;  %v2140_v16 = vld [vmem:[%s2271_s28 + $0x32c] sm:$0xf0]  ;;  %v1795_v21 = vor.u32 %v2108_v14, %v1794_v13  ;;  %1125 = vmatpush.bf16.msra.mxu0 %v1539_v17  ;;  %v2058_v56 = vld [vmem:[%s2271_s28 + $0xa4] sm:$0xf]  ;;  %v2007_v59 = vor.u32 %v2158_v51, %v2004_v52 }
  0x35   : > { %v1522_v18 = vld [vmem:[%s2271_s28] sm:$0xf]  ;;  %v2040_v19 = vld [vmem:[%s2271_s28 + $0xc] sm:$0xf0]  ;;  %v1923_v25 = vor.u32 %v2140_v16, %v1922_v15  ;;  %1138 = vmatpush.bf16.msra.mxu1 %v1667_v20  ;;  %v1604_v57 = vld [vmem:[%s2271_s28 + $0xb0] sm:$0xf0] }
  0x36   : > { %v1650_v22 = vld [vmem:[%s2271_s28 + $0x100] sm:$0xf]  ;;  %v2072_v23 = vld [vmem:[%s2271_s28 + $0x10c] sm:$0xf0]  ;;  %v1523_v32 = vor.u32 %v2040_v19, %v1522_v18  ;;  %1151 = vmatpush.bf16.msra.mxu2 %v1795_v21  ;;  %v2090_v58 = vld [vmem:[%s2271_s28 + $0x1a4] sm:$0xf]  ;;  %v1607_v1 = vor.u32 %v2058_v56, %v1604_v57 }
  0x37   : > { %v1778_v24 = vld [vmem:[%s2271_s28 + $0x200] sm:$0xf]  ;;  %v2104_v26 = vld [vmem:[%s2271_s28 + $0x20c] sm:$0xf0]  ;;  %v1651_v36 = vor.u32 %v2072_v23, %v1650_v22  ;;  %1164 = vmatpush.bf16.msra.mxu3 %v1923_v25  ;;  %v1732_v60 = vld [vmem:[%s2271_s28 + $0x1b0] sm:$0xf0] }
  0x38   : > { %v1906_v27 = vld [vmem:[%s2271_s28 + $0x300] sm:$0xf]  ;;  %v2136_v28 = vld [vmem:[%s2271_s28 + $0x30c] sm:$0xf0]  ;;  %v1779_v37 = vor.u32 %v2104_v26, %v1778_v24  ;;  %1126 = vmatpush.bf16.msra.mxu0 %v1523_v32  ;;  %v2122_v61 = vld [vmem:[%s2271_s28 + $0x2a4] sm:$0xf]  ;;  %v1735_v3 = vor.u32 %v2090_v58, %v1732_v60 }
  0x39   : > { %v1907_v40 = vor.u32 %v2136_v28, %v1906_v27  ;;  %1139 = vmatpush.bf16.msra.mxu1 %v1651_v36  ;;  %v1860_v62 = vld [vmem:[%s2271_s28 + $0x2b0] sm:$0xf0]  ;;  %v2154_v63 = vld [vmem:[%s2271_s28 + $0x3a4] sm:$0xf]  ;;  %v336_v2 = vld [vmem:[%s2266_s24 + $0x8] sm:$0xff] }
  0x3a   : > { %1152 = vmatpush.bf16.msra.mxu2 %v1779_v37  ;;  %v1988_v0 = vld [vmem:[%s2271_s28 + $0x3b0] sm:$0xf0]  ;;  %v1863_v4 = vor.u32 %v2122_v61, %v1860_v62  ;;  %v2054_v5 = vld [vmem:[%s2271_s28 + $0x84] sm:$0xf]  ;;  %v469_v8 = vunpack.c.l.b16 %v336_v2  ;;  %v470_v9 = vunpack.c.h.b16 %v336_v2 }
  0x3b   : > { %1165 = vmatpush.bf16.msra.mxu3 %v1907_v40  ;;  %v1588_v6 = vld [vmem:[%s2271_s28 + $0x90] sm:$0xf0]  ;;  %v2086_v7 = vld [vmem:[%s2271_s28 + $0x184] sm:$0xf]  ;;  %v1991_v10 = vor.u32 %v2154_v63, %v1988_v0 }
  0x3c   : > { %1171 = vmatpush.bf16.msrb.mxu0 %v1639_v41  ;;  %v1716_v11 = vld [vmem:[%s2271_s28 + $0x190] sm:$0xf0]  ;;  %v2118_v12 = vld [vmem:[%s2271_s28 + $0x284] sm:$0xf]  ;;  %v2371_v16 = vpack.c.b16 %v469_v8, %v469_v8  ;;  %v2373_v17 = vpack.c.b16 %v470_v9, %v470_v9  ;;  %v1591_v19 = vor.u32 %v2054_v5, %v1588_v6  ;;  %v2069_v8 = vld [vmem:[%s2271_s28 + $0xf4] sm:$0xf0] }
  0x3d   : > { %1184 = vmatpush.bf16.msrb.mxu1 %v1767_v42  ;;  %v1844_v13 = vld [vmem:[%s2271_s28 + $0x290] sm:$0xf0]  ;;  %v2150_v14 = vld [vmem:[%s2271_s28 + $0x384] sm:$0xf]  ;;  %v1719_v22 = vor.u32 %v2086_v7, %v1716_v11  ;;  %v1642_v7 = vld [vmem:[%s2271_s28 + $0xe8] sm:$0xf] }
  0x3e   : > { %1197 = vmatpush.bf16.msrb.mxu2 %v1895_v43  ;;  %v1972_v15 = vld [vmem:[%s2271_s28 + $0x390] sm:$0xf0]  ;;  %v335_v18 = vld [vmem:[%s2266_s24] sm:$0xff]  ;;  %v1847_v23 = vor.u32 %v2118_v12, %v1844_v13  ;;  %1166 = vmatmul.bf16.vlgmr.msra.gmra.mxu3 %v2373_v17  ;;  %v1770_v9 = vld [vmem:[%s2271_s28 + $0x1e8] sm:$0xf] }
  0x3f   : > { %1210 = vmatpush.bf16.msrb.mxu3 %v2023_v47  ;;  %v467_v20 = vunpack.c.l.b16 %v335_v18  ;;  %v468_v21 = vunpack.c.h.b16 %v335_v18  ;;  %v2050_v24 = vld [vmem:[%s2271_s28 + $0x64] sm:$0xf]  ;;  %v1572_v25 = vld [vmem:[%s2271_s28 + $0x70] sm:$0xf0]  ;;  %v1975_v27 = vor.u32 %v2150_v14, %v1972_v15  ;;  %1153 = vmatmul.bf16.vlgmr.msra.gmra.mxu2 %v2371_v16  ;;  %v2101_v11 = vld [vmem:[%s2271_s28 + $0x1f4] sm:$0xf0] }
  0x40   : > { %1172 = vmatpush.bf16.msrb.mxu0 %v1623_v53  ;;  %v2082_v26 = vld [vmem:[%s2271_s28 + $0x164] sm:$0xf]  ;;  %v1700_v28 = vld [vmem:[%s2271_s28 + $0x170] sm:$0xf0]  ;;  %v1575_v35 = vor.u32 %v2050_v24, %v1572_v25  ;;  %v1898_v12 = vld [vmem:[%s2271_s28 + $0x2e8] sm:$0xf] }
  0x41   : > { %1185 = vmatpush.bf16.msrb.mxu1 %v1751_v54  ;;  %v2114_v29 = vld [vmem:[%s2271_s28 + $0x264] sm:$0xf]  ;;  %v1828_v30 = vld [vmem:[%s2271_s28 + $0x270] sm:$0xf0]  ;;  %v2383_v31 = vpack.c.b16 %v467_v20, %v467_v20  ;;  %v2385_v32 = vpack.c.b16 %v468_v21, %v468_v21  ;;  %v1703_v36 = vor.u32 %v2082_v26, %v1700_v28  ;;  %v2133_v13 = vld [vmem:[%s2271_s28 + $0x2f4] sm:$0xf0]  ;;  %v1643_v21 = vor.u32 %v2069_v8, %v1642_v7 }
  0x42   : > { %1198 = vmatpush.bf16.msrb.mxu2 %v1879_v55  ;;  %v2146_v33 = vld [vmem:[%s2271_s28 + $0x364] sm:$0xf]  ;;  %v1956_v34 = vld [vmem:[%s2271_s28 + $0x370] sm:$0xf0]  ;;  %v1831_v37 = vor.u32 %v2114_v29, %v1828_v30  ;;  %v2026_v18 = vld [vmem:[%s2271_s28 + $0x3e8] sm:$0xf] }
  0x43   : > { %1211 = vmatpush.bf16.msrb.mxu3 %v2007_v59  ;;  %1140 = vmatmul.bf16.vlgmr.msra.gmra.mxu1 %v2385_v32  ;;  %v2046_v38 = vld [vmem:[%s2271_s28 + $0x44] sm:$0xf]  ;;  %v1556_v39 = vld [vmem:[%s2271_s28 + $0x50] sm:$0xf0]  ;;  %v1959_v41 = vor.u32 %v2146_v33, %v1956_v34  ;;  %v1626_v24 = vld [vmem:[%s2271_s28 + $0xc8] sm:$0xf] }
  0x44   : > { %1173 = vmatpush.bf16.msrb.mxu0 %v1607_v1  ;;  %v2078_v40 = vld [vmem:[%s2271_s28 + $0x144] sm:$0xf]  ;;  %v1684_v42 = vld [vmem:[%s2271_s28 + $0x150] sm:$0xf0]  ;;  %v1559_v47 = vor.u32 %v2046_v38, %v1556_v39  ;;  %v2065_v25 = vld [vmem:[%s2271_s28 + $0xd4] sm:$0xf0] }
  0x45   : > { %1186 = vmatpush.bf16.msrb.mxu1 %v1735_v3  ;;  %v2110_v43 = vld [vmem:[%s2271_s28 + $0x244] sm:$0xf]  ;;  %v1812_v44 = vld [vmem:[%s2271_s28 + $0x250] sm:$0xf0]  ;;  %1127 = vmatmul.bf16.vlgmr.msra.gmra.mxu0 %v2383_v31  ;;  %v1687_v48 = vor.u32 %v2078_v40, %v1684_v42  ;;  %v1754_v26 = vld [vmem:[%s2271_s28 + $0x1c8] sm:$0xf] }
  0x46   : > { %1199 = vmatpush.bf16.msrb.mxu2 %v1863_v4  ;;  %v2142_v45 = vld [vmem:[%s2271_s28 + $0x344] sm:$0xf]  ;;  %v1940_v46 = vld [vmem:[%s2271_s28 + $0x350] sm:$0xf0]  ;;  %v1815_v49 = vor.u32 %v2110_v43, %v1812_v44  ;;  %v2097_v28 = vld [vmem:[%s2271_s28 + $0x1d4] sm:$0xf0] }
  0x47   : > { %1212 = vmatpush.bf16.msrb.mxu3 %v1991_v10  ;;  %v2042_v50 = vld [vmem:[%s2271_s28 + $0x24] sm:$0xf]  ;;  %v1540_v51 = vld [vmem:[%s2271_s28 + $0x30] sm:$0xf0]  ;;  %v1943_v53 = vor.u32 %v2142_v45, %v1940_v46  ;;  %v1882_v29 = vld [vmem:[%s2271_s28 + $0x2c8] sm:$0xf] }
  0x48   : > { %1174 = vmatpush.bf16.msrb.mxu0 %v1591_v19  ;;  %v2074_v52 = vld [vmem:[%s2271_s28 + $0x124] sm:$0xf]  ;;  %v1668_v54 = vld [vmem:[%s2271_s28 + $0x130] sm:$0xf0]  ;;  %v1543_v59 = vor.u32 %v2042_v50, %v1540_v51  ;;  %v2165_v19 = vld [vmem:[%s2271_s28 + $0x3f4] sm:$0xf0] }
  0x49   : > { %1187 = vmatpush.bf16.msrb.mxu1 %v1719_v22  ;;  %v2106_v55 = vld [vmem:[%s2271_s28 + $0x224] sm:$0xf]  ;;  %v1796_v56 = vld [vmem:[%s2271_s28 + $0x230] sm:$0xf0]  ;;  %v1671_v62 = vor.u32 %v2074_v52, %v1668_v54  ;;  %v1771_v22 = vor.u32 %v2101_v11, %v1770_v9  ;;  %v2129_v30 = vld [vmem:[%s2271_s28 + $0x2d4] sm:$0xf0] }
  0x4a   : > { %1200 = vmatpush.bf16.msrb.mxu2 %v1847_v23  ;;  %v2138_v57 = vld [vmem:[%s2271_s28 + $0x324] sm:$0xf]  ;;  %v1924_v58 = vld [vmem:[%s2271_s28 + $0x330] sm:$0xf0]  ;;  %v1799_v63 = vor.u32 %v2106_v55, %v1796_v56  ;;  %v1899_v23 = vor.u32 %v2133_v13, %v1898_v12  ;;  %v2010_v33 = vld [vmem:[%s2271_s28 + $0x3c8] sm:$0xf] }
  0x4b   : > { %1213 = vmatpush.bf16.msrb.mxu3 %v1975_v27  ;;  %v2038_v60 = vld [vmem:[%s2271_s28 + $0x4] sm:$0xf]  ;;  %v1524_v61 = vld [vmem:[%s2271_s28 + $0x10] sm:$0xf0]  ;;  %v1927_v3 = vor.u32 %v2138_v57, %v1924_v58  ;;  %v2027_v27 = vor.u32 %v2165_v19, %v2026_v18  ;;  %v2161_v34 = vld [vmem:[%s2271_s28 + $0x3d4] sm:$0xf0] }
  0x4c   : > { %1175 = vmatpush.bf16.msrb.mxu0 %v1575_v35  ;;  %v2070_v0 = vld [vmem:[%s2271_s28 + $0x104] sm:$0xf]  ;;  %v1652_v1 = vld [vmem:[%s2271_s28 + $0x110] sm:$0xf0]  ;;  %v1527_v10 = vor.u32 %v2038_v60, %v1524_v61  ;;  %v1627_v35 = vor.u32 %v2065_v25, %v1626_v24  ;;  %v1610_v38 = vld [vmem:[%s2271_s28 + $0xa8] sm:$0xf] }
  0x4d   : > { %1188 = vmatpush.bf16.msrb.mxu1 %v1703_v36  ;;  %v2102_v2 = vld [vmem:[%s2271_s28 + $0x204] sm:$0xf]  ;;  %v1780_v4 = vld [vmem:[%s2271_s28 + $0x210] sm:$0xf0]  ;;  %v1655_v14 = vor.u32 %v2070_v0, %v1652_v1  ;;  %v1755_v36 = vor.u32 %v2097_v28, %v1754_v26  ;;  %v2061_v39 = vld [vmem:[%s2271_s28 + $0xb4] sm:$0xf0] }
  0x4e   : > { %1201 = vmatpush.bf16.msrb.mxu2 %v1831_v37  ;;  %v2134_v5 = vld [vmem:[%s2271_s28 + $0x304] sm:$0xf]  ;;  %v1908_v6 = vld [vmem:[%s2271_s28 + $0x310] sm:$0xf0]  ;;  %v1783_v15 = vor.u32 %v2102_v2, %v1780_v4  ;;  %v1883_v37 = vor.u32 %v2129_v30, %v1882_v29  ;;  %v1738_v40 = vld [vmem:[%s2271_s28 + $0x1a8] sm:$0xf] }
  0x4f   : > { %1214 = vmatpush.bf16.msrb.mxu3 %v1959_v41  ;;  %v1911_v20 = vor.u32 %v2134_v5, %v1908_v6  ;;  %v2011_v41 = vor.u32 %v2161_v34, %v2010_v33  ;;  %v2093_v42 = vld [vmem:[%s2271_s28 + $0x1b4] sm:$0xf0]  ;;  %v1866_v43 = vld [vmem:[%s2271_s28 + $0x2a8] sm:$0xf] }
  0x50   : > { %1176 = vmatpush.bf16.msrb.mxu0 %v1559_v47  ;;  %v2125_v44 = vld [vmem:[%s2271_s28 + $0x2b4] sm:$0xf0]  ;;  %v1994_v45 = vld [vmem:[%s2271_s28 + $0x3a8] sm:$0xf]  ;;  %v1611_v47 = vor.u32 %v2061_v39, %v1610_v38 }
  0x51   : > { %1189 = vmatpush.bf16.msrb.mxu1 %v1687_v48  ;;  %v2157_v46 = vld [vmem:[%s2271_s28 + $0x3b4] sm:$0xf0]  ;;  %v1739_v48 = vor.u32 %v2093_v42, %v1738_v40  ;;  %v1594_v50 = vld [vmem:[%s2271_s28 + $0x88] sm:$0xf] }
  0x52   : > { %1202 = vmatpush.bf16.msrb.mxu2 %v1815_v49  ;;  %v1867_v49 = vor.u32 %v2125_v44, %v1866_v43  ;;  %v2057_v51 = vld [vmem:[%s2271_s28 + $0x94] sm:$0xf0]  ;;  %v1722_v52 = vld [vmem:[%s2271_s28 + $0x188] sm:$0xf] }
  0x53   : > { %1215 = vmatpush.bf16.msrb.mxu3 %v1943_v53  ;;  %v1995_v53 = vor.u32 %v2157_v46, %v1994_v45  ;;  %v2089_v54 = vld [vmem:[%s2271_s28 + $0x194] sm:$0xf0]  ;;  %v1850_v55 = vld [vmem:[%s2271_s28 + $0x288] sm:$0xf] }
  0x54   : > { %1177 = vmatpush.bf16.msrb.mxu0 %v1543_v59  ;;  %v2121_v56 = vld [vmem:[%s2271_s28 + $0x294] sm:$0xf0]  ;;  %v1978_v57 = vld [vmem:[%s2271_s28 + $0x388] sm:$0xf]  ;;  %v1595_v59 = vor.u32 %v2057_v51, %v1594_v50  ;;  %v1723_v60 = vor.u32 %v2089_v54, %v1722_v52  ;;  %v1772_v51 = vld [vmem:[%s2271_s28 + $0x1f8] sm:$0xf0] }
  0x55   : > { %1190 = vmatpush.bf16.msrb.mxu1 %v1671_v62  ;;  %v2153_v58 = vld [vmem:[%s2271_s28 + $0x394] sm:$0xf0]  ;;  %v1851_v61 = vor.u32 %v2121_v56, %v1850_v55  ;;  %v1578_v62 = vld [vmem:[%s2271_s28 + $0x68] sm:$0xf]  ;;  %v2131_v52 = vld [vmem:[%s2271_s28 + $0x2ec] sm:$0xf] }
  0x56   : > { %1203 = vmatpush.bf16.msrb.mxu2 %v1799_v63  ;;  %v2053_v63 = vld [vmem:[%s2271_s28 + $0x74] sm:$0xf0]  ;;  %v1706_v0 = vld [vmem:[%s2271_s28 + $0x168] sm:$0xf]  ;;  %v1979_v1 = vor.u32 %v2153_v58, %v1978_v57  ;;  %v2163_v56 = vld [vmem:[%s2271_s28 + $0x3ec] sm:$0xf] }
  0x57   : > { %1216 = vmatpush.bf16.msrb.mxu3 %v1927_v3  ;;  %v2085_v2 = vld [vmem:[%s2271_s28 + $0x174] sm:$0xf0]  ;;  %v1834_v3 = vld [vmem:[%s2271_s28 + $0x268] sm:$0xf]  ;;  %v1579_v7 = vor.u32 %v2053_v63, %v1578_v62  ;;  %v2028_v57 = vld [vmem:[%s2271_s28 + $0x3f8] sm:$0xf0] }
  0x58   : > { %1178 = vmatpush.bf16.msrb.mxu0 %v1527_v10  ;;  %v2117_v4 = vld [vmem:[%s2271_s28 + $0x274] sm:$0xf0]  ;;  %v1962_v5 = vld [vmem:[%s2271_s28 + $0x368] sm:$0xf]  ;;  %v1707_v8 = vor.u32 %v2085_v2, %v1706_v0  ;;  %v2063_v62 = vld [vmem:[%s2271_s28 + $0xcc] sm:$0xf] }
  0x59   : > { %1191 = vmatpush.bf16.msrb.mxu1 %v1655_v14  ;;  %v2149_v6 = vld [vmem:[%s2271_s28 + $0x374] sm:$0xf0]  ;;  %v1835_v9 = vor.u32 %v2117_v4, %v1834_v3  ;;  %v1562_v10 = vld [vmem:[%s2271_s28 + $0x48] sm:$0xf]  ;;  %v1628_v63 = vld [vmem:[%s2271_s28 + $0xd8] sm:$0xf0] }
  0x5a   : > { %1204 = vmatpush.bf16.msrb.mxu2 %v1783_v15  ;;  %v2049_v11 = vld [vmem:[%s2271_s28 + $0x54] sm:$0xf0]  ;;  %v1690_v12 = vld [vmem:[%s2271_s28 + $0x148] sm:$0xf]  ;;  %v1963_v13 = vor.u32 %v2149_v6, %v1962_v5  ;;  %v2095_v0 = vld [vmem:[%s2271_s28 + $0x1cc] sm:$0xf] }
  0x5b   : > { %1217 = vmatpush.bf16.msrb.mxu3 %v1911_v20  ;;  %1179 = vmatmul.bf16.vlgmr.msrb.gmra.mxu0 %v2383_v31  ;;  %v2081_v14 = vld [vmem:[%s2271_s28 + $0x154] sm:$0xf0]  ;;  %v1818_v15 = vld [vmem:[%s2271_s28 + $0x248] sm:$0xf]  ;;  %v1756_v2 = vld [vmem:[%s2271_s28 + $0x1d8] sm:$0xf0] }
  0x5c   : > { %1223 = vmatpush.bf16.msra.mxu0 %v1643_v21  ;;  %1192 = vmatmul.bf16.vlgmr.msrb.gmra.mxu1 %v2385_v32  ;;  %v2113_v18 = vld [vmem:[%s2271_s28 + $0x254] sm:$0xf0]  ;;  %v1946_v19 = vld [vmem:[%s2271_s28 + $0x348] sm:$0xf]  ;;  %v1563_v21 = vor.u32 %v2049_v11, %v1562_v10  ;;  %v2127_v3 = vld [vmem:[%s2271_s28 + $0x2cc] sm:$0xf] }
  0x5d   : > { %1236 = vmatpush.bf16.msra.mxu1 %v1771_v22  ;;  %1205 = vmatmul.bf16.vlgmr.msrb.gmra.mxu2 %v2371_v16  ;;  %v2145_v20 = vld [vmem:[%s2271_s28 + $0x354] sm:$0xf0]  ;;  %v1691_v22 = vor.u32 %v2081_v14, %v1690_v12  ;;  %v1546_v24 = vld [vmem:[%s2271_s28 + $0x28] sm:$0xf]  ;;  %v1884_v4 = vld [vmem:[%s2271_s28 + $0x2d8] sm:$0xf0] }
  0x5e   : > { %1249 = vmatpush.bf16.msra.mxu2 %v1899_v23  ;;  %1218 = vmatmul.bf16.vlgmr.msrb.gmra.mxu3 %v2373_v17  ;;  %v1819_v23 = vor.u32 %v2113_v18, %v1818_v15  ;;  %v2045_v25 = vld [vmem:[%s2271_s28 + $0x34] sm:$0xf0]  ;;  %v1674_v26 = vld [vmem:[%s2271_s28 + $0x128] sm:$0xf]  ;;  %v2159_v5 = vld [vmem:[%s2271_s28 + $0x3cc] sm:$0xf] }
  0x5f   : > { %1262 = vmatpush.bf16.msra.mxu3 %v2027_v27  ;;  %v1947_v27 = vor.u32 %v2145_v20, %v1946_v19  ;;  %v2077_v28 = vld [vmem:[%s2271_s28 + $0x134] sm:$0xf0]  ;;  %v1802_v29 = vld [vmem:[%s2271_s28 + $0x228] sm:$0xf]  ;;  %v2012_v6 = vld [vmem:[%s2271_s28 + $0x3d8] sm:$0xf0] }
  0x60   : > { %1224 = vmatpush.bf16.msra.mxu0 %v1627_v35  ;;  %v2109_v30 = vld [vmem:[%s2271_s28 + $0x234] sm:$0xf0]  ;;  %v1930_v33 = vld [vmem:[%s2271_s28 + $0x328] sm:$0xf]  ;;  %v1547_v35 = vor.u32 %v2045_v25, %v1546_v24  ;;  %v1675_v38 = vor.u32 %v2077_v28, %v1674_v26  ;;  %v2059_v10 = vld [vmem:[%s2271_s28 + $0xac] sm:$0xf] }
  0x61   : > { %1237 = vmatpush.bf16.msra.mxu1 %v1755_v36  ;;  %v2141_v34 = vld [vmem:[%s2271_s28 + $0x334] sm:$0xf0]  ;;  %v1530_v36 = vld [vmem:[%s2271_s28 + $0x8] sm:$0xf]  ;;  %v1803_v39 = vor.u32 %v2109_v30, %v1802_v29  ;;  %v1612_v11 = vld [vmem:[%s2271_s28 + $0xb8] sm:$0xf0] }
  0x62   : > { %1250 = vmatpush.bf16.msra.mxu2 %v1883_v37  ;;  %v2041_v37 = vld [vmem:[%s2271_s28 + $0x14] sm:$0xf0]  ;;  %v1658_v40 = vld [vmem:[%s2271_s28 + $0x108] sm:$0xf]  ;;  %v1931_v43 = vor.u32 %v2141_v34, %v1930_v33  ;;  %v2091_v12 = vld [vmem:[%s2271_s28 + $0x1ac] sm:$0xf] }
  0x63   : > { %1263 = vmatpush.bf16.msra.mxu3 %v2011_v41  ;;  %v2073_v41 = vld [vmem:[%s2271_s28 + $0x114] sm:$0xf0]  ;;  %v1786_v42 = vld [vmem:[%s2271_s28 + $0x208] sm:$0xf]  ;;  %v1531_v50 = vor.u32 %v2041_v37, %v1530_v36  ;;  %v1740_v14 = vld [vmem:[%s2271_s28 + $0x1b8] sm:$0xf0] }
  0x64   : > { %1225 = vmatpush.bf16.msra.mxu0 %v1611_v47  ;;  %v2105_v44 = vld [vmem:[%s2271_s28 + $0x214] sm:$0xf0]  ;;  %v1914_v45 = vld [vmem:[%s2271_s28 + $0x308] sm:$0xf]  ;;  %v2067_v47 = vld [vmem:[%s2271_s28 + $0xec] sm:$0xf]  ;;  %v1659_v54 = vor.u32 %v2073_v41, %v1658_v40 }
  0x65   : > { %1238 = vmatpush.bf16.msra.mxu1 %v1739_v48  ;;  %v2137_v46 = vld [vmem:[%s2271_s28 + $0x314] sm:$0xf0]  ;;  %v1644_v48 = vld [vmem:[%s2271_s28 + $0xf8] sm:$0xf0]  ;;  %v1787_v55 = vor.u32 %v2105_v44, %v1786_v42  ;;  %v2123_v15 = vld [vmem:[%s2271_s28 + $0x2ac] sm:$0xf] }
  0x66   : > { %1251 = vmatpush.bf16.msra.mxu2 %v1867_v49  ;;  %v2099_v49 = vld [vmem:[%s2271_s28 + $0x1ec] sm:$0xf]  ;;  %v1915_v58 = vor.u32 %v2137_v46, %v1914_v45  ;;  %v1868_v18 = vld [vmem:[%s2271_s28 + $0x2b8] sm:$0xf0] }
  0x67   : > { %1264 = vmatpush.bf16.msra.mxu3 %v1995_v53  ;;  %v1900_v53 = vld [vmem:[%s2271_s28 + $0x2f8] sm:$0xf0]  ;;  %v2155_v19 = vld [vmem:[%s2271_s28 + $0x3ac] sm:$0xf] }
  0x68   : > { %1226 = vmatpush.bf16.msra.mxu0 %v1595_v59  ;;  %v1647_v59 = vor.u32 %v2067_v47, %v1644_v48  ;;  %v1996_v20 = vld [vmem:[%s2271_s28 + $0x3b8] sm:$0xf0]  ;;  %v2055_v24 = vld [vmem:[%s2271_s28 + $0x8c] sm:$0xf] }
  0x69   : > { %1239 = vmatpush.bf16.msra.mxu1 %v1723_v60  ;;  %v1775_v60 = vor.u32 %v2099_v49, %v1772_v51  ;;  %v1596_v25 = vld [vmem:[%s2271_s28 + $0x98] sm:$0xf0]  ;;  %v2087_v26 = vld [vmem:[%s2271_s28 + $0x18c] sm:$0xf] }
  0x6a   : > { %1252 = vmatpush.bf16.msra.mxu2 %v1851_v61  ;;  %v1903_v61 = vor.u32 %v2131_v52, %v1900_v53  ;;  %v1724_v28 = vld [vmem:[%s2271_s28 + $0x198] sm:$0xf0]  ;;  %v2119_v29 = vld [vmem:[%s2271_s28 + $0x28c] sm:$0xf] }
  0x6b   : > { %1265 = vmatpush.bf16.msra.mxu3 %v1979_v1  ;;  %v2031_v1 = vor.u32 %v2163_v56, %v2028_v57  ;;  %v1852_v30 = vld [vmem:[%s2271_s28 + $0x298] sm:$0xf0]  ;;  %v2151_v33 = vld [vmem:[%s2271_s28 + $0x38c] sm:$0xf]  ;;  %v1727_v36 = vor.u32 %v2087_v26, %v1724_v28 }
  0x6c   : > { %1227 = vmatpush.bf16.msra.mxu0 %v1579_v7  ;;  %v1631_v7 = vor.u32 %v2063_v62, %v1628_v63  ;;  %v1980_v34 = vld [vmem:[%s2271_s28 + $0x398] sm:$0xf0]  ;;  %v1855_v37 = vor.u32 %v2119_v29, %v1852_v30  ;;  %v2083_v40 = vld [vmem:[%s2271_s28 + $0x16c] sm:$0xf] }
  0x6d   : > { %1240 = vmatpush.bf16.msra.mxu1 %v1707_v8  ;;  %v1759_v8 = vor.u32 %v2095_v0, %v1756_v2  ;;  %v1983_v41 = vor.u32 %v2151_v33, %v1980_v34  ;;  %v1708_v42 = vld [vmem:[%s2271_s28 + $0x178] sm:$0xf0]  ;;  %v2147_v45 = vld [vmem:[%s2271_s28 + $0x36c] sm:$0xf]  ;;  %v331_v33 = vld [vmem:[#allocation2 + $0x10] sm:$0xff] }
  0x6e   : > { %1253 = vmatpush.bf16.msra.mxu2 %v1835_v9  ;;  %v1887_v9 = vor.u32 %v2127_v3, %v1884_v4  ;;  %v1836_v44 = vld [vmem:[%s2271_s28 + $0x278] sm:$0xf0]  ;;  %v1711_v48 = vor.u32 %v2083_v40, %v1708_v42  ;;  %v2079_v52 = vld [vmem:[%s2271_s28 + $0x14c] sm:$0xf]  ;;  %v332_v42 = vld [vmem:[#allocation2] sm:$0xff] }
  0x6f   : > { %1266 = vmatpush.bf16.msra.mxu3 %v1963_v13  ;;  %v2015_v13 = vor.u32 %v2159_v5, %v2012_v6  ;;  %v1964_v46 = vld [vmem:[%s2271_s28 + $0x378] sm:$0xf0]  ;;  %v2143_v57 = vld [vmem:[%s2271_s28 + $0x34c] sm:$0xf] }
  0x70   : > { %1228 = vmatpush.bf16.msra.mxu0 %v1563_v21  ;;  %v1615_v21 = vor.u32 %v2059_v10, %v1612_v11  ;;  %v1564_v51 = vld [vmem:[%s2271_s28 + $0x58] sm:$0xf0]  ;;  %v1967_v53 = vor.u32 %v2147_v45, %v1964_v46  ;;  %v2043_v62 = vld [vmem:[%s2271_s28 + $0x2c] sm:$0xf] }
  0x71   : > { %1241 = vmatpush.bf16.msra.mxu1 %v1691_v22  ;;  %v1743_v22 = vor.u32 %v2091_v12, %v1740_v14  ;;  %v1820_v56 = vld [vmem:[%s2271_s28 + $0x258] sm:$0xf0]  ;;  %v2075_v0 = vld [vmem:[%s2271_s28 + $0x12c] sm:$0xf] }
  0x72   : > { %1254 = vmatpush.bf16.msra.mxu2 %v1819_v23  ;;  %v1871_v23 = vor.u32 %v2123_v15, %v1868_v18  ;;  %v1548_v63 = vld [vmem:[%s2271_s28 + $0x38] sm:$0xf0]  ;;  %v2107_v3 = vld [vmem:[%s2271_s28 + $0x22c] sm:$0xf] }
  0x73   : > { %1267 = vmatpush.bf16.msra.mxu3 %v1947_v27  ;;  %v1999_v27 = vor.u32 %v2155_v19, %v1996_v20  ;;  %v1676_v2 = vld [vmem:[%s2271_s28 + $0x138] sm:$0xf0]  ;;  %v2139_v5 = vld [vmem:[%s2271_s28 + $0x32c] sm:$0xf] }
  0x74   : > { %1229 = vmatpush.bf16.msra.mxu0 %v1547_v35  ;;  %v1599_v35 = vor.u32 %v2055_v24, %v1596_v25  ;;  %v1804_v4 = vld [vmem:[%s2271_s28 + $0x238] sm:$0xf0]  ;;  %v2039_v10 = vld [vmem:[%s2271_s28 + $0xc] sm:$0xf] }
  0x75   : > { %1242 = vmatpush.bf16.msra.mxu1 %v1675_v38  ;;  %v2051_v38 = vld [vmem:[%s2271_s28 + $0x6c] sm:$0xf]  ;;  %v1932_v6 = vld [vmem:[%s2271_s28 + $0x338] sm:$0xf0] }
  0x76   : > { %1255 = vmatpush.bf16.msra.mxu2 %v1803_v39  ;;  %v1580_v39 = vld [vmem:[%s2271_s28 + $0x78] sm:$0xf0]  ;;  %v2071_v12 = vld [vmem:[%s2271_s28 + $0x10c] sm:$0xf] }
  0x77   : > { %1268 = vmatpush.bf16.msra.mxu3 %v1931_v43  ;;  %v2115_v43 = vld [vmem:[%s2271_s28 + $0x26c] sm:$0xf]  ;;  %v1583_v47 = vor.u32 %v2051_v38, %v1580_v39  ;;  %v1532_v11 = vld [vmem:[%s2271_s28 + $0x18] sm:$0xf0] }
  0x78   : > { %1230 = vmatpush.bf16.msra.mxu0 %v1531_v50  ;;  %v1839_v49 = vor.u32 %v2115_v43, %v1836_v44  ;;  %v2047_v50 = vld [vmem:[%s2271_s28 + $0x4c] sm:$0xf]  ;;  %v1660_v14 = vld [vmem:[%s2271_s28 + $0x118] sm:$0xf0] }
  0x79   : > { %1243 = vmatpush.bf16.msra.mxu1 %v1659_v54  ;;  %v1692_v54 = vld [vmem:[%s2271_s28 + $0x158] sm:$0xf0]  ;;  %v2103_v15 = vld [vmem:[%s2271_s28 + $0x20c] sm:$0xf] }
  0x7a   : > { %1256 = vmatpush.bf16.msra.mxu2 %v1787_v55  ;;  %v2111_v55 = vld [vmem:[%s2271_s28 + $0x24c] sm:$0xf]  ;;  %v1788_v18 = vld [vmem:[%s2271_s28 + $0x218] sm:$0xf0] }
  0x7b   : > { %1269 = vmatpush.bf16.msra.mxu3 %v1915_v58  ;;  %1231 = vmatmul.bf16.vlgmr.msra.gmra.mxu0 %v2383_v31  ;;  %v1948_v58 = vld [vmem:[%s2271_s28 + $0x358] sm:$0xf0]  ;;  %v2135_v19 = vld [vmem:[%s2271_s28 + $0x30c] sm:$0xf] }
  0x7c   : > { %1275 = vmatpush.bf16.msrb.mxu0 %v1647_v59  ;;  %1244 = vmatmul.bf16.vlgmr.msra.gmra.mxu1 %v2385_v32  ;;  %v1567_v59 = vor.u32 %v2047_v50, %v1564_v51  ;;  %v1916_v20 = vld [vmem:[%s2271_s28 + $0x318] sm:$0xf0] }
  0x7d   : > { %1288 = vmatpush.bf16.msrb.mxu1 %v1775_v60  ;;  %1257 = vmatmul.bf16.vlgmr.msra.gmra.mxu2 %v2371_v16  ;;  %v1695_v60 = vor.u32 %v2079_v52, %v1692_v54  ;;  %v1919_v24 = vor.u32 %v2135_v19, %v1916_v20 }
  0x7e   : > { %1301 = vmatpush.bf16.msrb.mxu2 %v1903_v61  ;;  %1270 = vmatmul.bf16.vlgmr.msra.gmra.mxu3 %v2373_v17  ;;  %v1823_v61 = vor.u32 %v2111_v55, %v1820_v56  ;;  %v333_v55 = vld [vmem:[#allocation2 + $0x18] sm:$0xff] }
  0x7f   : > { %1314 = vmatpush.bf16.msrb.mxu3 %v2031_v1  ;;  %v1951_v1 = vor.u32 %v2143_v57, %v1948_v58 }
  0x80   : > { %1276 = vmatpush.bf16.msrb.mxu0 %v1631_v7  ;;  %v1551_v7 = vor.u32 %v2043_v62, %v1548_v63 }
  0x81   : > { %1289 = vmatpush.bf16.msrb.mxu1 %v1759_v8  ;;  %v1679_v8 = vor.u32 %v2075_v0, %v1676_v2 }
  0x82   : > { %1302 = vmatpush.bf16.msrb.mxu2 %v1887_v9  ;;  %v1807_v9 = vor.u32 %v2107_v3, %v1804_v4 }
  0x83   : > { %1315 = vmatpush.bf16.msrb.mxu3 %v2015_v13  ;;  %v1935_v13 = vor.u32 %v2139_v5, %v1932_v6  ;;  %v334_v5 = vld [vmem:[#allocation2 + $0x8] sm:$0xff] }
  0x84   : > { %1277 = vmatpush.bf16.msrb.mxu0 %v1615_v21  ;;  %v1535_v21 = vor.u32 %v2039_v10, %v1532_v11 }
  0x85   : > { %1290 = vmatpush.bf16.msrb.mxu1 %v1743_v22  ;;  %v1663_v22 = vor.u32 %v2071_v12, %v1660_v14 }
  0x86   : > { %1303 = vmatpush.bf16.msrb.mxu2 %v1871_v23  ;;  %v1791_v23 = vor.u32 %v2103_v15, %v1788_v18 }
  0x87   : > { %1316 = vmatpush.bf16.msrb.mxu3 %v1999_v27 }
  0x88   : > { %1278 = vmatpush.bf16.msrb.mxu0 %v1599_v35 }
  0x89   : > { %1291 = vmatpush.bf16.msrb.mxu1 %v1727_v36 }
  0x8a   : > { %1304 = vmatpush.bf16.msrb.mxu2 %v1855_v37 }
  0x8b   : > { %1317 = vmatpush.bf16.msrb.mxu3 %v1983_v41 }
  0x8c   : > { %1279 = vmatpush.bf16.msrb.mxu0 %v1583_v47 }
  0x8d   : > { %1292 = vmatpush.bf16.msrb.mxu1 %v1711_v48 }
  0x8e   : > { %1305 = vmatpush.bf16.msrb.mxu2 %v1839_v49 }
  0x8f   : > { %1318 = vmatpush.bf16.msrb.mxu3 %v1967_v53 }
  0x90   : > { %1280 = vmatpush.bf16.msrb.mxu0 %v1567_v59 }
  0x91   : > { %1293 = vmatpush.bf16.msrb.mxu1 %v1695_v60 }
  0x92   : > { %1306 = vmatpush.bf16.msrb.mxu2 %v1823_v61 }
  0x93   : > { %1319 = vmatpush.bf16.msrb.mxu3 %v1951_v1 }
  0x94   : > { %1281 = vmatpush.bf16.msrb.mxu0 %v1551_v7 }
  0x95   : > { %1294 = vmatpush.bf16.msrb.mxu1 %v1679_v8 }
  0x96   : > { %1307 = vmatpush.bf16.msrb.mxu2 %v1807_v9 }
  0x97   : > { %1320 = vmatpush.bf16.msrb.mxu3 %v1935_v13 }
  0x98   : > { %1282 = vmatpush.bf16.msrb.mxu0 %v1535_v21 }
  0x99   : > { %1295 = vmatpush.bf16.msrb.mxu1 %v1663_v22 }
  0x9a   : > { %1308 = vmatpush.bf16.msrb.mxu2 %v1791_v23 }
  0x9b   : > { %1321 = vmatpush.bf16.msrb.mxu3 %v1919_v24  ;;  %1283 = vmatmul.bf16.vlgmr.msrb.gmra.mxu0 %v2383_v31 }
  0x9c   : > { %1296 = vmatmul.bf16.vlgmr.msrb.gmra.mxu1 %v2385_v32 }
  0x9d   : > { %1309 = vmatmul.bf16.vlgmr.msrb.gmra.mxu2 %v2371_v16 }
  0x9e   : > { %1322 = vmatmul.bf16.vlgmr.msrb.gmra.mxu3 %v2373_v17 }
  0xc0   : > { %v1141_v25 = vpop.f32.mrf.mxu1 }
  0xc1   : > { %v1167_v30 = vpop.f32.mrf.mxu3 }
  0xc2   : > { %v1128_v26 = vpop.f32.mrf.mxu0  ;;  %v1154_v28 = vpop.f32.mrf.mxu2 }
  0xc3   : > { %v1142_v27 = vadd.f32 %v1141_v25, %v1128_v26 }
  0xc5   : > { %v1155_v29 = vadd.f32 %v1154_v28, %v1142_v27 }
  0xc7   : > { %v1168_v34 = vadd.f32 %v1167_v30, %v1155_v29 }
  0xc8   : > { %v1143_v35 = vpop.f32.mrf.mxu1 }
  0xc9   : > { %v1327_v36 = vadd.f32 %v1168_v34, %v331_v33  ;;  %v1169_v31 = vpop.f32.mrf.mxu3 }
  0xca   : > { %v1130_v37 = vpop.f32.mrf.mxu0  ;;  %v1156_v38 = vpop.f32.mrf.mxu2 }
  0xcb   : > { %1331 = vst [vmem:[#allocation2 + $0x10] sm:$0xff] %v1327_v36 }
  0xd8   : > { %v1180_v39 = vpop.f32.mrf.mxu0 }
  0xd9   : > { %v1193_v32 = vpop.f32.mrf.mxu1 }
  0xda   : > { %v1194_v40 = vadd.f32 %v1193_v32, %v1180_v39 }
  0xe0   : > { %v1206_v16 = vpop.f32.mrf.mxu2  ;;  %v1182_v44 = vpop.f32.mrf.mxu0 }
  0xe1   : > { %v1207_v41 = vadd.f32 %v1206_v16, %v1194_v40  ;;  %v1219_v17 = vpop.f32.mrf.mxu3  ;;  %v1195_v45 = vpop.f32.mrf.mxu1 }
  0xe3   : > { %v1220_v43 = vadd.f32 %v1219_v17, %v1207_v41 }
  0xe5   : > { %v1328_v46 = vadd.f32 %v1220_v43, %v332_v42 }
  0xe7   : > { %1332 = vst [vmem:[#allocation2] sm:$0xff] %v1328_v46 }
  0xe8   : > { %v1208_v47 = vpop.f32.mrf.mxu2 }
  0xe9   : > { %v1221_v48 = vpop.f32.mrf.mxu3 }
  0xf8   : > { %v1232_v49 = vpop.f32.mrf.mxu0 }
  0xf9   : > { %v1245_v50 = vpop.f32.mrf.mxu1 }
  0xfa   : > { %v1246_v51 = vadd.f32 %v1245_v50, %v1232_v49 }
 0x100   : > { %v1258_v52 = vpop.f32.mrf.mxu2  ;;  %v1234_v57 = vpop.f32.mrf.mxu0 }
 0x101   : > { %v1259_v53 = vadd.f32 %v1258_v52, %v1246_v51  ;;  %v1271_v54 = vpop.f32.mrf.mxu3  ;;  %v1247_v58 = vpop.f32.mrf.mxu1 }
 0x103   : > { %v1272_v56 = vadd.f32 %v1271_v54, %v1259_v53 }
 0x105   : > { %v1329_v59 = vadd.f32 %v1272_v56, %v333_v55 }
 0x107   : > { %1333 = vst [vmem:[#allocation2 + $0x18] sm:$0xff] %v1329_v59 }
 0x108   : > { %v1260_v60 = vpop.f32.mrf.mxu2 }
 0x109   : > { %v1273_v61 = vpop.f32.mrf.mxu3 }
 0x118   : > { %v1284_v62 = vpop.f32.mrf.mxu0 }
 0x119   : > { %v1297_v63 = vpop.f32.mrf.mxu1 }
 0x11a   : > { %v1298_v0 = vadd.f32 %v1297_v63, %v1284_v62 }
 0x120   : > { %v1310_v1 = vpop.f32.mrf.mxu2  ;;  %v1286_v4 = vpop.f32.mrf.mxu0 }
 0x121   : > { %v1311_v2 = vadd.f32 %v1310_v1, %v1298_v0  ;;  %v1323_v3 = vpop.f32.mrf.mxu3  ;;  %v1299_v6 = vpop.f32.mrf.mxu1 }
 0x123   : > { %v1324_v7 = vadd.f32 %v1323_v3, %v1311_v2 }
 0x125   : > { %v1330_v8 = vadd.f32 %v1324_v7, %v334_v5  ;;  %1338 = sbr.rel (%p2032_p7) target bundleno = 311 (0x137), region = 44 }
 0x127   : > { %1334 = vst [vmem:[#allocation2 + $0x8] sm:$0xff] %v1330_v8 }
 0x128   : > { %v1312_v9 = vpop.f32.mrf.mxu2 }
 0x129   : > { %v1325_v10 = vpop.f32.mrf.mxu3 }
 0x12a   : > { %v1339_v11 = vld [vmem:[#allocation2 + $0x10] sm:$0xff]  ;;  %v1343_v12 = vld [vmem:[%s2586_s2] sm:$0xf]  ;;  %v1341_v21 = vld [vmem:[#allocation2 + $0x18] sm:$0xff] }
 0x12b   : > { %v1357_v13 = vld [vmem:[%s2587_s3] sm:$0xf]  ;;  %v1345_v14 = vperm.slane %v1343_v12, 0  ;;  %v1346_v19 = vperm.slane %v1343_v12, 1  ;;  %v1347_v22 = vperm.slane %v1343_v12, 2  ;;  %v1348_v25 = vperm.slane %v1343_v12, 3 }
 0x12c   : > { %v1359_v15 = vperm.slane %v1357_v13, 0  ;;  %v1340_v18 = vld [vmem:[#allocation2] sm:$0xff]  ;;  %v1360_v20 = vperm.slane %v1357_v13, 1  ;;  %v1361_v23 = vperm.slane %v1357_v13, 2  ;;  %v1362_v26 = vperm.slane %v1357_v13, 3 }
 0x12d   : > { %v1353_v27 = vmul.f32 %v1345_v14, %v1339_v11  ;;  %v1354_v28 = vmul.f32 %v1346_v19, %v1340_v18  ;;  %v1355_v29 = vmul.f32 %v1347_v22, %v1341_v21 }
 0x12e   : > { %v1342_v24 = vld [vmem:[#allocation2 + $0x8] sm:$0xff] }
 0x12f   : > { %v1356_v30 = vmul.f32 %v1348_v25, %v1342_v24  ;;  %v1367_v33 = vadd.f32 %v1359_v15, %v1353_v27  ;;  %v1368_v34 = vadd.f32 %v1360_v20, %v1354_v28  ;;  %v1369_v35 = vadd.f32 %v1361_v23, %v1355_v29 }
 0x131   : > { %v1370_v36 = vadd.f32 %v1362_v26, %v1356_v30  ;;  %v1371_v37 = vmax.f32 %v1367_v33, 0.0  ;;  %v1372_v38 = vmax.f32 %v1368_v34, 0.0  ;;  %v1373_v31 = vmax.f32 %v1369_v35, 0.0 }
 0x133   : > { %v1374_v39 = vmax.f32 %v1370_v36, 0.0  ;;  %1375 = vst [vmem:[%s2588_s4] sm:$0xff] %v1371_v37 }
 0x134   : > { %1376 = vst [vmem:[%s2588_s4 + $0x8] sm:$0xff] %v1372_v38 }
 0x135   : > { %1377 = vst [vmem:[%s2588_s4 + $0x10] sm:$0xff] %v1373_v31 }
 0x136   : > { %1378 = vst [vmem:[%s2588_s4 + $0x18] sm:$0xff] %v1374_v39 }
 0x137 PF: > { %s14_s17 = sadd.s32 1, %s2213_s17   ;;  %s2589_s15 = smov %s2209_s16 }
 0x138   : > { %p11_p8 = scmp.ge.s32.totalorder %s14_s17, 11   ;;  %s2590_s16 = smov %s2592_s18 }
 0x13a   :  { %13 = sbr.rel (!%p11_p8) target bundleno = 2 (0x2), region = 83 }

// kernel: _lambda_.45
= control target key start
LH: loop header
LB: loop body
LE: loop exit
PB: predicated region body
PF: predicated region fallthrough
CT: control target
= control target key end

     0   :  { %9 = vsyncpa [#allocation4], 0  ;;  %s572_s18 = smov [#allocation3]   ;;  %s709_s0 = inlined_call_operand.vmem [shape: bf16[8,512], index: 0, kind: input, shape index: {}]   ;;  %s710_s1 = inlined_call_operand.vmem [shape: bf16[512,128], index: 1, kind: input, shape index: {}]   ;;  %s711_s2 = inlined_call_operand.vmem [shape: f32[1,128], index: 2, kind: input, shape index: {}]   ;;  %s712_s3 = inlined_call_operand.hbm [shape: f32[1,128], index: 3, kind: input, shape index: {}]   ;;  %s713_s4 = inlined_call_operand.vmem [shape: f32[8,128], index: 4, kind: output, shape index: {}]  }
   0x1   :  { %s21_s17 = sshll.u32 %s712_s3, 4  ;;  %s23_s19 = sshll.u32 %s572_s18, 4  ;;  %s22_s17 = int_to_ptr.hbm [resolvable:$true] %s21_s17  ;;  %s24_s19 = int_to_ptr.vmem [resolvable:$true] %s23_s19 }
   0x2   :  { %26 = dma.hbm_to_vmem [thread:$0]  %s22_s17, 16, %s24_s19, [#allocation4]  }
   0x3   :  { %570 = dma.done.wait [#allocation4], 16  }
   0x4   :  { %571 = vsyncadd [#allocation4], 4294967280  ;;  %v518_v0 = vld [vmem:[%s710_s1 + $0x38] sm:$0xff]  ;;  %v517_v4 = vld [vmem:[%s710_s1 + $0x30] sm:$0xff] }
   0x5   :  { %v526_v1 = vld [vmem:[%s710_s1 + $0x78] sm:$0xff]  ;;  %309 = vmatpush.bf16.msra.mxu0 %v518_v0  ;;  %v525_v5 = vld [vmem:[%s710_s1 + $0x70] sm:$0xff]  ;;  %v516_v8 = vld [vmem:[%s710_s1 + $0x28] sm:$0xff] }
   0x6   :  { %v534_v2 = vld [vmem:[%s710_s1 + $0xb8] sm:$0xff]  ;;  %322 = vmatpush.bf16.msra.mxu1 %v526_v1  ;;  %v533_v6 = vld [vmem:[%s710_s1 + $0xb0] sm:$0xff]  ;;  %v524_v9 = vld [vmem:[%s710_s1 + $0x68] sm:$0xff] }
   0x7   :  { %v542_v3 = vld [vmem:[%s710_s1 + $0xf8] sm:$0xff]  ;;  %335 = vmatpush.bf16.msra.mxu2 %v534_v2  ;;  %v541_v7 = vld [vmem:[%s710_s1 + $0xf0] sm:$0xff]  ;;  %v532_v10 = vld [vmem:[%s710_s1 + $0xa8] sm:$0xff] }
   0x8   :  { %348 = vmatpush.bf16.msra.mxu3 %v542_v3  ;;  %v540_v11 = vld [vmem:[%s710_s1 + $0xe8] sm:$0xff]  ;;  %v515_v12 = vld [vmem:[%s710_s1 + $0x20] sm:$0xff]  ;;  %v514_v16 = vld [vmem:[%s710_s1 + $0x18] sm:$0xff] }
   0x9   :  { %310 = vmatpush.bf16.msra.mxu0 %v517_v4  ;;  %v523_v13 = vld [vmem:[%s710_s1 + $0x60] sm:$0xff]  ;;  %v522_v17 = vld [vmem:[%s710_s1 + $0x58] sm:$0xff]  ;;  %v513_v20 = vld [vmem:[%s710_s1 + $0x10] sm:$0xff] }
   0xa   :  { %323 = vmatpush.bf16.msra.mxu1 %v525_v5  ;;  %v531_v14 = vld [vmem:[%s710_s1 + $0xa0] sm:$0xff]  ;;  %v530_v18 = vld [vmem:[%s710_s1 + $0x98] sm:$0xff]  ;;  %v521_v21 = vld [vmem:[%s710_s1 + $0x50] sm:$0xff] }
   0xb   :  { %336 = vmatpush.bf16.msra.mxu2 %v533_v6  ;;  %v539_v15 = vld [vmem:[%s710_s1 + $0xe0] sm:$0xff]  ;;  %v538_v19 = vld [vmem:[%s710_s1 + $0xd8] sm:$0xff]  ;;  %v529_v22 = vld [vmem:[%s710_s1 + $0x90] sm:$0xff] }
   0xc   :  { %349 = vmatpush.bf16.msra.mxu3 %v541_v7  ;;  %v537_v23 = vld [vmem:[%s710_s1 + $0xd0] sm:$0xff]  ;;  %v512_v24 = vld [vmem:[%s710_s1 + $0x8] sm:$0xff]  ;;  %v37_v26 = vld [vmem:[%s709_s0] sm:$0xff] }
   0xd   :  { %311 = vmatpush.bf16.msra.mxu0 %v516_v8  ;;  %v520_v25 = vld [vmem:[%s710_s1 + $0x48] sm:$0xff]  ;;  %v105_v30 = vunpack.c.l.b16 %v37_v26  ;;  %v106_v31 = vunpack.c.h.b16 %v37_v26  ;;  %v511_v32 = vld [vmem:[%s710_s1] sm:$0xff] }
   0xe   :  { %324 = vmatpush.bf16.msra.mxu1 %v524_v9  ;;  %v528_v27 = vld [vmem:[%s710_s1 + $0x88] sm:$0xff]  ;;  %v519_v33 = vld [vmem:[%s710_s1 + $0x40] sm:$0xff] }
   0xf   :  { %337 = vmatpush.bf16.msra.mxu2 %v532_v10  ;;  %v536_v28 = vld [vmem:[%s710_s1 + $0xc8] sm:$0xff]  ;;  %v527_v36 = vld [vmem:[%s710_s1 + $0x80] sm:$0xff]  ;;  %v109_v38 = vpack.c.b16 %v105_v30, %v105_v30  ;;  %v110_v39 = vpack.c.b16 %v106_v31, %v106_v31 }
  0x10   :  { %350 = vmatpush.bf16.msra.mxu3 %v540_v11  ;;  %v38_v29 = vld [vmem:[%s709_s0 + $0x8] sm:$0xff]  ;;  %v535_v37 = vld [vmem:[%s710_s1 + $0xc0] sm:$0xff] }
  0x11   :  { %312 = vmatpush.bf16.msra.mxu0 %v515_v12  ;;  %v107_v34 = vunpack.c.l.b16 %v38_v29  ;;  %v108_v35 = vunpack.c.h.b16 %v38_v29  ;;  %v544_v48 = vld [vmem:[%s711_s2] ss:$0 sm:$0xff] }
  0x12   :  { %325 = vmatpush.bf16.msra.mxu1 %v523_v13  ;;  %v545_v52 = vld [vmem:[#allocation3] ss:$0 sm:$0xff] }
  0x13   :  { %338 = vmatpush.bf16.msra.mxu2 %v531_v14  ;;  %v111_v40 = vpack.c.b16 %v107_v34, %v107_v34  ;;  %v112_v41 = vpack.c.b16 %v108_v35, %v108_v35 }
  0x14   :  { %351 = vmatpush.bf16.msra.mxu3 %v539_v15 }
  0x15   :  { %313 = vmatpush.bf16.msra.mxu0 %v514_v16 }
  0x16   :  { %326 = vmatpush.bf16.msra.mxu1 %v522_v17 }
  0x17   :  { %339 = vmatpush.bf16.msra.mxu2 %v530_v18 }
  0x18   :  { %352 = vmatpush.bf16.msra.mxu3 %v538_v19 }
  0x19   :  { %314 = vmatpush.bf16.msra.mxu0 %v513_v20 }
  0x1a   :  { %327 = vmatpush.bf16.msra.mxu1 %v521_v21 }
  0x1b   :  { %340 = vmatpush.bf16.msra.mxu2 %v529_v22 }
  0x1c   :  { %353 = vmatpush.bf16.msra.mxu3 %v537_v23 }
  0x1d   :  { %315 = vmatpush.bf16.msra.mxu0 %v512_v24 }
  0x1e   :  { %328 = vmatpush.bf16.msra.mxu1 %v520_v25 }
  0x1f   :  { %341 = vmatpush.bf16.msra.mxu2 %v528_v27 }
  0x20   :  { %354 = vmatpush.bf16.msra.mxu3 %v536_v28 }
  0x21   :  { %316 = vmatpush.bf16.msra.mxu0 %v511_v32 }
  0x22   :  { %329 = vmatpush.bf16.msra.mxu1 %v519_v33 }
  0x23   :  { %342 = vmatpush.bf16.msra.mxu2 %v527_v36 }
  0x24   :  { %355 = vmatpush.bf16.msra.mxu3 %v535_v37  ;;  %317 = vmatmul.bf16.vlgmr.msra.gmra.mxu0 %v109_v38 }
  0x25   :  { %330 = vmatmul.bf16.vlgmr.msra.gmra.mxu1 %v110_v39 }
  0x26   :  { %343 = vmatmul.bf16.vlgmr.msra.gmra.mxu2 %v111_v40 }
  0x27   :  { %356 = vmatmul.bf16.vlgmr.msra.gmra.mxu3 %v112_v41 }
  0xa1   :  { %v318_v42 = vpop.f32.mrf.mxu0 }
  0xa2   :  { %v331_v43 = vpop.f32.mrf.mxu1 }
  0xa3   :  { %v332_v44 = vadd.f32 %v331_v43, %v318_v42 }
  0xa9   :  { %v344_v45 = vpop.f32.mrf.mxu2  ;;  %v320_v49 = vpop.f32.mrf.mxu0 }
  0xaa   :  { %v357_v46 = vpop.f32.mrf.mxu3  ;;  %v345_v47 = vadd.f32 %v344_v45, %v332_v44  ;;  %v333_v50 = vpop.f32.mrf.mxu1 }
  0xac   :  { %v358_v51 = vadd.f32 %v357_v46, %v345_v47 }
  0xae   :  { %v371_v53 = vmul.f32 %v544_v48, %v358_v51 }
  0xb0   :  { %v376_v54 = vadd.f32 %v545_v52, %v371_v53 }
  0xb1   :  { %v346_v55 = vpop.f32.mrf.mxu2 }
  0xb2   :  { %v359_v56 = vpop.f32.mrf.mxu3  ;;  %377 = vst [vmem:[%s713_s4] sm:$0xff] %v376_v54 }
  0xb3   :  { %382 = vsyncpa [#allocation4], 1 }

</bundles_post_ra>
